<compile_context>
chip_gen: v6e
topology: v6e:2x2x1
jax: 0.10.0
libtpu: 0.0.40
codegen_flags: <defaults>
</compile_context>

<pallas_src>
import math

import jax
import jax.numpy as jnp
from jax.experimental import pallas as pl
from jax.experimental.pallas import tpu as pltpu


# ----------------------------- fused Pallas kernel ---------------------------

def _make_fused_kernel(num_blocks: int, d_out_final: int):
    """Build the fused kernel for one batch tile.

    Ref order (positional):
      x_ref                              (bm, H)
      [w1, b1, w2, b2] * num_blocks      (H,H) (1,H) (H,H) (1,H)
      wf, bf                             (1,H),(1,1)  if d_out_final == 1
                                         (H,F),(1,F)  otherwise
      o_ref                              (bm, d_out_final)
    """

    def kernel(x_ref, *refs):
        o_ref = refs[-1]
        wf_ref = refs[4 * num_blocks]
        bf_ref = refs[4 * num_blocks + 1]

        x = x_ref[...]
        for b in range(num_blocks):
            w1 = refs[4 * b][...]
            b1 = refs[4 * b + 1][...]
            w2 = refs[4 * b + 2][...]
            b2 = refs[4 * b + 3][...]
            h = jnp.sin(jnp.dot(x, w1, preferred_element_type=jnp.float32) + b1)
            h = jnp.sin(jnp.dot(h, w2, preferred_element_type=jnp.float32) + b2)
            # Residual.  Because x and the weights were zero-padded to the
            # common hidden width H, this equals h + concat(x, zeros) with no
            # in-kernel concatenate / zero broadcast.
            x = h + x

        if d_out_final == 1:
            # N=1 matmul wastes an MXU issue and forces a lane-1 store path;
            # do a VPU multiply + cross-lane reduce instead.
            out = jnp.sum(x * wf_ref[...], axis=-1, keepdims=True) + bf_ref[...]
        else:
            out = jnp.dot(x, wf_ref[...],
                          preferred_element_type=jnp.float32) + bf_ref[...]
        o_ref[...] = out.astype(o_ref.dtype)

    return kernel


# --------------------------- parameter setup --------------------------------

def init_net_params(key, layers):
    """Torch-nn.Linear-style init (uniform +-1/sqrt(fan_in)).

    Weights are stored transposed: (in_features, out_features).
    Returns (blocks, final) where blocks = [(w1, b1, w2, b2), ...].
    """
    hid = len(layers) - 2
    blocks = []
    for i in range(hid):
        d_in, d_out = layers[i], layers[i + 1]
        key, k1, k2, k3, k4 = jax.random.split(key, 5)
        bnd1 = 1.0 / math.sqrt(d_in)
        bnd2 = 1.0 / math.sqrt(d_out)
        w1 = jax.random.uniform(k1, (d_in, d_out), jnp.float32, -bnd1, bnd1)
        b1 = jax.random.uniform(k2, (1, d_out), jnp.float32, -bnd1, bnd1)
        w2 = jax.random.uniform(k3, (d_out, d_out), jnp.float32, -bnd2, bnd2)
        b2 = jax.random.uniform(k4, (1, d_out), jnp.float32, -bnd2, bnd2)
        blocks.append((w1, b1, w2, b2))
    d_in, d_out = layers[-2], layers[-1]
    key, k1, k2 = jax.random.split(key, 3)
    bnd = 1.0 / math.sqrt(d_in)
    wf = jax.random.uniform(k1, (d_in, d_out), jnp.float32, -bnd, bnd)
    bf = jax.random.uniform(k2, (1, d_out), jnp.float32, -bnd, bnd)
    return blocks, (wf, bf)


def prepare_fused_params(params, layers):
    """Zero-pad all weights/biases to the common hidden width H.

    Padded lanes stay exactly zero through the whole network (sin(0)=0, zero
    residual), so results on the real lanes are unchanged while the kernel
    body becomes fully uniform (no concat, no per-block shape logic).
    """
    # Original torch code requires non-decreasing hidden widths (it builds
    # torch.zeros(n, layers[i+1]-layers[i])).
    assert all(layers[i] <= layers[i + 1] for i in range(len(layers) - 2))

    blocks, (wf, bf) = params
    H = max(layers[1:-1])
    num_blocks = len(layers) - 2
    d_out_final = layers[-1]

    flat = []
    for i, (w1, b1, w2, b2) in enumerate(blocks):
        d_in, d_out = layers[i], layers[i + 1]
        w1p = jnp.zeros((H, H), jnp.float32).at[:d_in, :d_out].set(w1)
        b1p = jnp.zeros((1, H), jnp.float32).at[:, :d_out].set(b1)
        w2p = jnp.zeros((H, H), jnp.float32).at[:d_out, :d_out].set(w2)
        b2p = jnp.zeros((1, H), jnp.float32).at[:, :d_out].set(b2)
        flat += [w1p, b1p, w2p, b2p]

    d_last = layers[-2]
    if d_out_final == 1:
        wfp = jnp.zeros((1, H), jnp.float32).at[0, :d_last].set(wf[:, 0])
        bfp = bf.reshape(1, 1).astype(jnp.float32)
    else:
        wfp = jnp.zeros((H, d_out_final), jnp.float32).at[:d_last, :].set(wf)
        bfp = bf.astype(jnp.float32)
    flat += [wfp, bfp]

    return tuple(flat), (H, num_blocks, d_out_final)


# ------------------------------ wrapper --------------------------------------

def _pick_bm(n, max_bm=512):
    """Largest convenient batch tile; keep >=2 grid steps when possible so
    both v7x TensorCores get work."""
    if n <= max_bm:
        if n >= 16 and n % 16 == 0:
            return n // 2
        return n
    for bm in range(max_bm, 7, -8):
        if n % bm == 0:
            return bm
    return n  # fallback: single full-batch tile


def fused_net_forward(fused, x, bm=None):
    tensors, (H, num_blocks, d_out_final) = fused
    n, d0 = x.shape
    if d0 < H:  # pad input features to hidden width (layout plumbing in XLA)
        x = jnp.zeros((n, H), x.dtype).at[:, :d0].set(x)
    if bm is None:
        bm = _pick_bm(n)
    assert n % bm == 0
    grid = (n // bm,)

    in_specs = [pl.BlockSpec((bm, H), lambda i: (i, 0))]
    for t in tensors:  # weights/biases: VMEM-resident, same block every step
        in_specs.append(pl.BlockSpec(t.shape, lambda i: (0, 0)))
    out_specs = pl.BlockSpec((bm, d_out_final), lambda i: (i, 0))

    flops = int(n * (num_blocks * 4 * H * H + 2 * H * d_out_final))
    transcendentals = int(n * num_blocks * 2 * H)
    bytes_accessed = int(4 * (n * H + n * d_out_final
                              + sum(int(t.size) for t in tensors)))
    cost = pl.CostEstimate(flops=flops,
                           transcendentals=transcendentals,
                           bytes_accessed=bytes_accessed)

    kernel = _make_fused_kernel(num_blocks, d_out_final)
    return pl.pallas_call(
        kernel,
        out_shape=jax.ShapeDtypeStruct((n, d_out_final), x.dtype),
        grid_spec=pltpu.PrefetchScalarGridSpec(
            num_scalar_prefetch=0,
            grid=grid,
            in_specs=in_specs,
            out_specs=out_specs,
        ),
        compiler_params=pltpu.CompilerParams(
            dimension_semantics=("parallel",)),
        cost_estimate=cost,
    )(x, *tensors)


# ------------------------------ reference -----------------------------------

def net_forward_ref(params, x):
    blocks, (wf, bf) = params
    for (w1, b1, w2, b2) in blocks:
        h = jnp.sin(x @ w1 + b1)
        h = jnp.sin(h @ w2 + b2)
        pad_cols = w1.shape[1] - x.shape[1]
        if pad_cols > 0:
            x = jnp.concatenate(
                [x, jnp.zeros((x.shape[0], pad_cols), x.dtype)], axis=1)
        x = h + x
    return x @ wf + bf


# -------------------------------- main ---------------------------------------

if __name__ == "__main__":
    # Small PINN-style net: input dim 2, two hidden blocks of width 32, output 1.
    layers = [2, 32, 32, 1]
    batch = 256  # bm = 128 -> grid of 2 "parallel" steps (both v7x cores busy)

    key = jax.random.PRNGKey(0)
    key, kx = jax.random.split(key)
    x = jax.random.normal(kx, (batch, layers[0]), dtype=jnp.float32)

    params = init_net_params(jax.random.PRNGKey(0), layers)
    fused = prepare_fused_params(params, layers)

    fwd = jax.jit(lambda xb: fused_net_forward(fused, xb))
    out = jax.block_until_ready(fwd(x))

    ref = net_forward_ref(params, x)
    assert out.shape == (batch, layers[-1])
    assert jnp.allclose(out, ref, atol=2e-5, rtol=2e-5), float(
        jnp.max(jnp.abs(out - ref)))

    print("KERNEL_OK")
</pallas_src>

<mosaic_0001>
module attributes {stable_mosaic.version = 11 : i64} {
  func.func @kernel(%arg0: i32, %arg1: memref<128x32xf32, #tpu.memory_space<vmem>>, %arg2: memref<32x32xf32, #tpu.memory_space<vmem>>, %arg3: memref<1x32xf32, #tpu.memory_space<vmem>>, %arg4: memref<32x32xf32, #tpu.memory_space<vmem>>, %arg5: memref<1x32xf32, #tpu.memory_space<vmem>>, %arg6: memref<32x32xf32, #tpu.memory_space<vmem>>, %arg7: memref<1x32xf32, #tpu.memory_space<vmem>>, %arg8: memref<32x32xf32, #tpu.memory_space<vmem>>, %arg9: memref<1x32xf32, #tpu.memory_space<vmem>>, %arg10: memref<1x32xf32, #tpu.memory_space<vmem>>, %arg11: memref<1x1xf32, #tpu.memory_space<vmem>>, %arg12: memref<128x1xf32, #tpu.memory_space<vmem>>) attributes {dimension_semantics = [#tpu.dimension_semantics<parallel>], iteration_bounds = array<i64: 2>, scalar_prefetch = 0 : i64, scratch_operands = 0 : i64, tpu.core_type = #tpu.core_type<tc>, window_params = [{transform_indices = @transform_0, window_bounds = array<i64: 128, 32>}, {pipeline_mode = #tpu.pipeline_mode<synchronous>, transform_indices = @transform_1, window_bounds = array<i64: 32, 32>}, {pipeline_mode = #tpu.pipeline_mode<synchronous>, transform_indices = @transform_2, window_bounds = array<i64: 1, 32>}, {pipeline_mode = #tpu.pipeline_mode<synchronous>, transform_indices = @transform_3, window_bounds = array<i64: 32, 32>}, {pipeline_mode = #tpu.pipeline_mode<synchronous>, transform_indices = @transform_4, window_bounds = array<i64: 1, 32>}, {pipeline_mode = #tpu.pipeline_mode<synchronous>, transform_indices = @transform_5, window_bounds = array<i64: 32, 32>}, {pipeline_mode = #tpu.pipeline_mode<synchronous>, transform_indices = @transform_6, window_bounds = array<i64: 1, 32>}, {pipeline_mode = #tpu.pipeline_mode<synchronous>, transform_indices = @transform_7, window_bounds = array<i64: 32, 32>}, {pipeline_mode = #tpu.pipeline_mode<synchronous>, transform_indices = @transform_8, window_bounds = array<i64: 1, 32>}, {pipeline_mode = #tpu.pipeline_mode<synchronous>, transform_indices = @transform_9, window_bounds = array<i64: 1, 32>}, {pipeline_mode = #tpu.pipeline_mode<synchronous>, transform_indices = @transform_10, window_bounds = array<i64: 1, 1>}, {transform_indices = @transform_11, window_bounds = array<i64: 128, 1>}]} {
    %c0 = arith.constant 0 : index
    %c0_0 = arith.constant 0 : index
    %0 = vector.load %arg1[%c0, %c0_0] : memref<128x32xf32, #tpu.memory_space<vmem>>, vector<128x32xf32>
    %c0_1 = arith.constant 0 : index
    %c0_2 = arith.constant 0 : index
    %1 = vector.load %arg2[%c0_1, %c0_2] : memref<32x32xf32, #tpu.memory_space<vmem>>, vector<32x32xf32>
    %c0_3 = arith.constant 0 : index
    %c0_4 = arith.constant 0 : index
    %2 = vector.load %arg3[%c0_3, %c0_4] : memref<1x32xf32, #tpu.memory_space<vmem>>, vector<1x32xf32>
    %c0_5 = arith.constant 0 : index
    %c0_6 = arith.constant 0 : index
    %3 = vector.load %arg4[%c0_5, %c0_6] : memref<32x32xf32, #tpu.memory_space<vmem>>, vector<32x32xf32>
    %c0_7 = arith.constant 0 : index
    %c0_8 = arith.constant 0 : index
    %4 = vector.load %arg5[%c0_7, %c0_8] : memref<1x32xf32, #tpu.memory_space<vmem>>, vector<1x32xf32>
    %cst = arith.constant dense<0.000000e+00> : vector<128x32xf32>
    %5 = tpu.matmul %0, %1, %cst {dimension_numbers = #tpu.dot_dimension_numbers<[1], [0], [0], [1], [0, 0, 1, 1], [], []>} : vector<128x32xf32>, vector<32x32xf32>, vector<128x32xf32> -> vector<128x32xf32>
    %6 = vector.broadcast %2 : vector<1x32xf32> to vector<128x32xf32>
    %7 = arith.addf %5, %6 : vector<128x32xf32>
    %8 = math.sin %7 : vector<128x32xf32>
    %cst_9 = arith.constant dense<0.000000e+00> : vector<128x32xf32>
    %9 = tpu.matmul %8, %3, %cst_9 {dimension_numbers = #tpu.dot_dimension_numbers<[1], [0], [0], [1], [0, 0, 1, 1], [], []>} : vector<128x32xf32>, vector<32x32xf32>, vector<128x32xf32> -> vector<128x32xf32>
    %10 = vector.broadcast %4 : vector<1x32xf32> to vector<128x32xf32>
    %11 = arith.addf %9, %10 : vector<128x32xf32>
    %12 = math.sin %11 : vector<128x32xf32>
    %13 = arith.addf %12, %0 : vector<128x32xf32>
    %c0_10 = arith.constant 0 : index
    %c0_11 = arith.constant 0 : index
    %14 = vector.load %arg6[%c0_10, %c0_11] : memref<32x32xf32, #tpu.memory_space<vmem>>, vector<32x32xf32>
    %c0_12 = arith.constant 0 : index
    %c0_13 = arith.constant 0 : index
    %15 = vector.load %arg7[%c0_12, %c0_13] : memref<1x32xf32, #tpu.memory_space<vmem>>, vector<1x32xf32>
    %c0_14 = arith.constant 0 : index
    %c0_15 = arith.constant 0 : index
    %16 = vector.load %arg8[%c0_14, %c0_15] : memref<32x32xf32, #tpu.memory_space<vmem>>, vector<32x32xf32>
    %c0_16 = arith.constant 0 : index
    %c0_17 = arith.constant 0 : index
    %17 = vector.load %arg9[%c0_16, %c0_17] : memref<1x32xf32, #tpu.memory_space<vmem>>, vector<1x32xf32>
    %cst_18 = arith.constant dense<0.000000e+00> : vector<128x32xf32>
    %18 = tpu.matmul %13, %14, %cst_18 {dimension_numbers = #tpu.dot_dimension_numbers<[1], [0], [0], [1], [0, 0, 1, 1], [], []>} : vector<128x32xf32>, vector<32x32xf32>, vector<128x32xf32> -> vector<128x32xf32>
    %19 = vector.broadcast %15 : vector<1x32xf32> to vector<128x32xf32>
    %20 = arith.addf %18, %19 : vector<128x32xf32>
    %21 = math.sin %20 : vector<128x32xf32>
    %cst_19 = arith.constant dense<0.000000e+00> : vector<128x32xf32>
    %22 = tpu.matmul %21, %16, %cst_19 {dimension_numbers = #tpu.dot_dimension_numbers<[1], [0], [0], [1], [0, 0, 1, 1], [], []>} : vector<128x32xf32>, vector<32x32xf32>, vector<128x32xf32> -> vector<128x32xf32>
    %23 = vector.broadcast %17 : vector<1x32xf32> to vector<128x32xf32>
    %24 = arith.addf %22, %23 : vector<128x32xf32>
    %25 = math.sin %24 : vector<128x32xf32>
    %26 = arith.addf %25, %13 : vector<128x32xf32>
    %c0_20 = arith.constant 0 : index
    %c0_21 = arith.constant 0 : index
    %27 = vector.load %arg10[%c0_20, %c0_21] : memref<1x32xf32, #tpu.memory_space<vmem>>, vector<1x32xf32>
    %28 = vector.broadcast %27 : vector<1x32xf32> to vector<128x32xf32>
    %29 = arith.mulf %26, %28 : vector<128x32xf32>
    %cst_22 = arith.constant dense<0.000000e+00> : vector<128xf32>
    %30 = vector.multi_reduction <add>, %29, %cst_22 [1] : vector<128x32xf32> to vector<128xf32>
    %31 = vector.shape_cast %30 : vector<128xf32> to vector<128x1xf32>
    %c0_23 = arith.constant 0 : index
    %c0_24 = arith.constant 0 : index
    %32 = vector.load %arg11[%c0_23, %c0_24] : memref<1x1xf32, #tpu.memory_space<vmem>>, vector<1x1xf32>
    %33 = vector.broadcast %32 : vector<1x1xf32> to vector<128x1xf32>
    %34 = arith.addf %31, %33 : vector<128x1xf32>
    %c0_25 = arith.constant 0 : index
    %c0_26 = arith.constant 0 : index
    %35 = vector.load %arg12[%c0_25, %c0_26] : memref<128x1xf32, #tpu.memory_space<vmem>>, vector<128x1xf32>
    tpu.vector_store %arg12[%c0_25, %c0_26], %34 {strides = array<i32>} : memref<128x1xf32, #tpu.memory_space<vmem>>, vector<128x1xf32>,
    return
  }
  func.func @transform_0(%arg0: i32) -> (i32, i32) {
    %c0_i32 = arith.constant 0 : i32
    %c0_i32_0 = arith.constant 0 : i32
    return %arg0, %c0_i32 : i32, i32
  }
  func.func @transform_1(%arg0: i32) -> (i32, i32) {
    %c0_i32 = arith.constant 0 : i32
    %c0_i32_0 = arith.constant 0 : i32
    %c0_i32_1 = arith.constant 0 : i32
    return %c0_i32, %c0_i32_0 : i32, i32
  }
  func.func @transform_2(%arg0: i32) -> (i32, i32) {
    %c0_i32 = arith.constant 0 : i32
    %c0_i32_0 = arith.constant 0 : i32
    %c0_i32_1 = arith.constant 0 : i32
    return %c0_i32, %c0_i32_0 : i32, i32
  }
  func.func @transform_3(%arg0: i32) -> (i32, i32) {
    %c0_i32 = arith.constant 0 : i32
    %c0_i32_0 = arith.constant 0 : i32
    %c0_i32_1 = arith.constant 0 : i32
    return %c0_i32, %c0_i32_0 : i32, i32
  }
  func.func @transform_4(%arg0: i32) -> (i32, i32) {
    %c0_i32 = arith.constant 0 : i32
    %c0_i32_0 = arith.constant 0 : i32
    %c0_i32_1 = arith.constant 0 : i32
    return %c0_i32, %c0_i32_0 : i32, i32
  }
  func.func @transform_5(%arg0: i32) -> (i32, i32) {
    %c0_i32 = arith.constant 0 : i32
    %c0_i32_0 = arith.constant 0 : i32
    %c0_i32_1 = arith.constant 0 : i32
    return %c0_i32, %c0_i32_0 : i32, i32
  }
  func.func @transform_6(%arg0: i32) -> (i32, i32) {
    %c0_i32 = arith.constant 0 : i32
    %c0_i32_0 = arith.constant 0 : i32
    %c0_i32_1 = arith.constant 0 : i32
    return %c0_i32, %c0_i32_0 : i32, i32
  }
  func.func @transform_7(%arg0: i32) -> (i32, i32) {
    %c0_i32 = arith.constant 0 : i32
    %c0_i32_0 = arith.constant 0 : i32
    %c0_i32_1 = arith.constant 0 : i32
    return %c0_i32, %c0_i32_0 : i32, i32
  }
  func.func @transform_8(%arg0: i32) -> (i32, i32) {
    %c0_i32 = arith.constant 0 : i32
    %c0_i32_0 = arith.constant 0 : i32
    %c0_i32_1 = arith.constant 0 : i32
    return %c0_i32, %c0_i32_0 : i32, i32
  }
  func.func @transform_9(%arg0: i32) -> (i32, i32) {
    %c0_i32 = arith.constant 0 : i32
    %c0_i32_0 = arith.constant 0 : i32
    %c0_i32_1 = arith.constant 0 : i32
    return %c0_i32, %c0_i32_0 : i32, i32
  }
  func.func @transform_10(%arg0: i32) -> (i32, i32) {
    %c0_i32 = arith.constant 0 : i32
    %c0_i32_0 = arith.constant 0 : i32
    %c0_i32_1 = arith.constant 0 : i32
    return %c0_i32, %c0_i32_0 : i32, i32
  }
  func.func @transform_11(%arg0: i32) -> (i32, i32) {
    %c0_i32 = arith.constant 0 : i32
    %c0_i32_0 = arith.constant 0 : i32
    return %arg0, %c0_i32 : i32, i32
  }
}

</mosaic_0001>

<bundles_post_ra>
// kernel: _lambda_.1
= control target key start
LH: loop header
LB: loop body
LE: loop exit
PB: predicated region body
PF: predicated region fallthrough
CT: control target
= control target key end

     0   :  { %s9251_s19 = smov 0   ;;  %s15557_s0 = inlined_call_operand.vmem [shape: f32[256,32], index: 0, kind: input, shape index: {}]   ;;  %s15558_s1 = inlined_call_operand.vmem [shape: f32[32,32], index: 1, kind: input, shape index: {}]   ;;  %s15559_s2 = inlined_call_operand.vmem [shape: f32[1,32], index: 2, kind: input, shape index: {}]   ;;  %s15560_s3 = inlined_call_operand.vmem [shape: f32[32,32], index: 3, kind: input, shape index: {}]   ;;  %s15561_s4 = inlined_call_operand.vmem [shape: f32[1,32], index: 4, kind: input, shape index: {}]   ;;  %s15562_s5 = inlined_call_operand.vmem [shape: f32[32,32], index: 5, kind: input, shape index: {}]   ;;  %s15563_s6 = inlined_call_operand.vmem [shape: f32[1,32], index: 6, kind: input, shape index: {}]   ;;  %s15564_s7 = inlined_call_operand.vmem [shape: f32[32,32], index: 7, kind: input, shape index: {}]   ;;  %s15565_s8 = inlined_call_operand.vmem [shape: f32[1,32], index: 8, kind: input, shape index: {}]   ;;  %s15566_s9 = inlined_call_operand.vmem [shape: f32[1,32], index: 9, kind: input, shape index: {}]   ;;  %s15567_s10 = inlined_call_operand.<no memory space> [shape: f32[1,1], index: 10, kind: input, shape index: {}]   ;;  %s15568_s11 = inlined_call_operand.vmem [shape: f32[256,1], index: 11, kind: output, shape index: {}]  }
   0x1   :  { %v16_v0 = vstv %s15567_s10 }
   0x2   :  { %17 = vst [vmem:[#allocation2] sm:$0x1] %v16_v0 }
   0x3 LB: > { %s8080_s20 = sadd.s32 4294967295, %s9180_s19   ;;  %p8084_p0 = scmp.ge.s32.totalorder %s9180_s19, 1  ;;  %s9180_s19 = sphi %s9251_s19, %s23_s19  }
   0x4   : > { %p340_p1 = scmp.lt.s32.totalorder %s9180_s19, 3 }
   0x6   : > { %p341_p2 = pnand %p8084_p0, %p340_p1 }
   0x8   : > { %344 = sbr.rel (%p341_p2) target bundleno = 2476 (0x9ac), region = 64 }
   0xd   : > { %v411_v1 = vld [vmem:[%s15558_s1 + $0x18] sm:$0xff]  ;;  %v410_v2 = vld [vmem:[%s15558_s1 + $0x10] sm:$0xff]  ;;  %s8085_s24 = sshll.u32 %s8080_s20, 4  ;;  %v409_v3 = vld [vmem:[%s15558_s1 + $0x8] sm:$0xff]  ;;  %vm15635_vm0 = vcmask 261120  }
   0xe   : > { %8497 = vmatprep.subr.mxu0 %v411_v1  ;;  %p381_p3 = scmp.lt.s32.totalorder %s8085_s24, 31  ;;  %v408_v4 = vld [vmem:[%s15558_s1] sm:$0xff]  ;;  %v15584_v47 = vmov 683565275   ;;  %v15574_v49 = vmov 2475754826  }
   0xf   : > { %8498 = vmatpush3.msra.mxu0 %v411_v1  ;;  %v9316_v21 = vld [vmem:[%s15559_s2] ss:$0 sm:$0xff]  ;;  %v15576_v53 = vmov 2131351028   ;;  %v15579_v56 = vmov 2102212464  }
  0x10   : > { %8499 = vmatprep.subr.mxu0 %v410_v2  ;;  %s16558_s24 = smov (!%p381_p3, %s8085_s24), 31  ;;  %v15597_v59 = vmov 920167782   ;;  %v15581_v62 = vmov 1326507024  }
  0x11   : > { %8500 = vmatpush3.msra.mxu0 %v410_v2  ;;  %s8086_s29 = sshll.u32 %s16558_s24, 3 }
  0x12   : > { %8501 = vmatprep.subr.mxu0 %v409_v3  ;;  %s9279_s13 = scalar_lea.vmem %s15557_s0, %s8086_s29  ;;  %s15520_s14 = scalar_lea.vmem %s15568_s11, %s8086_s29 }
  0x13   : > { %8502 = vmatpush3.msra.mxu0 %v409_v3  ;;  %v392_v5 = vld [vmem:[%s9279_s13] sm:$0xff]  ;;  %v393_v6 = vld [vmem:[%s9279_s13 + $0x8] sm:$0xff]  ;;  %v394_v7 = vld [vmem:[%s9279_s13 + $0x10] sm:$0xff] }
  0x14   : > { %8503 = vmatprep.subr.mxu0 %v408_v4  ;;  %8505 = vmatprep.mubr.msk.f32.mxu0 %vm15635_vm0, %v392_v5  ;;  %v395_v8 = vld [vmem:[%s9279_s13 + $0x18] sm:$0xff]  ;;  %v396_v9 = vld [vmem:[%s9279_s13 + $0x20] sm:$0xff]  ;;  %v397_v10 = vld [vmem:[%s9279_s13 + $0x28] sm:$0xff] }
  0x15   : > { %8504 = vmatpush3.msra.mxu0 %v408_v4  ;;  %v398_v11 = vld [vmem:[%s9279_s13 + $0x30] sm:$0xff]  ;;  %v399_v12 = vld [vmem:[%s9279_s13 + $0x38] sm:$0xff]  ;;  %v400_v13 = vld [vmem:[%s9279_s13 + $0x40] sm:$0xff] }
  0x16   : > { %8506 = vmatmul.mubr.msk.f32.vlgmr.msra.gmra.mxu0 %vm15635_vm0, %v393_v6  ;;  %v401_v14 = vld [vmem:[%s9279_s13 + $0x48] sm:$0xff]  ;;  %v402_v15 = vld [vmem:[%s9279_s13 + $0x50] sm:$0xff]  ;;  %v403_v16 = vld [vmem:[%s9279_s13 + $0x58] sm:$0xff] }
  0x17   : > { %8508 = vmatprep.mubr.msk.f32.mxu0 %vm15635_vm0, %v394_v7  ;;  %v404_v17 = vld [vmem:[%s9279_s13 + $0x60] sm:$0xff]  ;;  %v405_v18 = vld [vmem:[%s9279_s13 + $0x68] sm:$0xff]  ;;  %v406_v19 = vld [vmem:[%s9279_s13 + $0x70] sm:$0xff] }
  0x18   : > { %v407_v20 = vld [vmem:[%s9279_s13 + $0x78] sm:$0xff] }
  0x1a   : > { %8509 = vmatmul.mubr.msk.f32.gmra.mxu0 %vm15635_vm0, %v395_v8 }
  0x1b   : > { %8511 = vmatprep.mubr.msk.f32.mxu0 %vm15635_vm0, %v396_v9 }
  0x1e   : > { %8512 = vmatmul.mubr.msk.f32.gmra.mxu0 %vm15635_vm0, %v397_v10 }
  0x1f   : > { %8514 = vmatprep.mubr.msk.f32.mxu0 %vm15635_vm0, %v398_v11 }
  0x22   : > { %8515 = vmatmul.mubr.msk.f32.gmra.mxu0 %vm15635_vm0, %v399_v12 }
  0x23   : > { %8517 = vmatprep.mubr.msk.f32.mxu0 %vm15635_vm0, %v400_v13 }
  0x26   : > { %8518 = vmatmul.mubr.msk.f32.gmra.mxu0 %vm15635_vm0, %v401_v14 }
  0x27   : > { %8520 = vmatprep.mubr.msk.f32.mxu0 %vm15635_vm0, %v402_v15 }
  0x2a   : > { %8521 = vmatmul.mubr.msk.f32.gmra.mxu0 %vm15635_vm0, %v403_v16 }
  0x2b   : > { %8523 = vmatprep.mubr.msk.f32.mxu0 %vm15635_vm0, %v404_v17 }
  0x2e   : > { %8524 = vmatmul.mubr.msk.f32.gmra.mxu0 %vm15635_vm0, %v405_v18 }
  0x2f   : > { %8526 = vmatprep.mubr.msk.f32.mxu0 %vm15635_vm0, %v406_v19 }
  0x32   : > { %8527 = vmatmul.mubr.msk.f32.gmra.mxu0 %vm15635_vm0, %v407_v20 }
  0xd6   : > { %v8507_v22 = vpop.f32.mrf.mxu0 }
  0xd7   : > { %v9319_v23 = vadd.f32 %v8507_v22, %v9316_v21 }
  0xd8   : > { %v9321_v24 = vpop.f32.mrf.mxu0 }
  0xd9   : > { %15882 = vst [vmem:[#allocation3_spill] sm:$0xff] %v9319_v23  ;;  %v15578_v25 = vand.u32 2147483647, %v9319_v23  ;;  %v725_v26 = vand.u32 2139095040, %v9319_v23 }
  0xda   : > { %v8510_v27 = vpop.f32.mrf.mxu0 }
  0xdb   : > { %v726_v28 = vshrl.u32 %v725_v26, 23  ;;  %v9326_v29 = vadd.f32 %v8510_v27, %v9316_v21  ;;  %v729_v31 = vand.u32 8388607, %v15578_v25 }
  0xdc   : > { %v549_v34 = vpop.f32.mrf.mxu0 }
  0xdd   : > { %15883 = vst [vmem:[#allocation4_spill] sm:$0xff] %v9326_v29  ;;  %v8110_v30 = vadd.s32 4294967169, %v726_v28  ;;  %v15572_v32 = vand.u32 2147483647, %v9326_v29  ;;  %v933_v33 = vand.u32 2139095040, %v9326_v29  ;;  %v730_v36 = vor.u32 8388608, %v729_v31 }
  0xde   : > { %v9333_v38 = vadd.f32 %v9316_v21, %v549_v34 }
  0xdf   : > { %v732_v35 = vadd.s32 1, %v8110_v30  ;;  %v934_v37 = vshrl.u32 %v933_v33, 23  ;;  %v937_v40 = vand.u32 8388607, %v15572_v32  ;;  %v9337_v43 = vshll.u32 %v730_v36, 8 }
  0xe0   : > { %15884 = vst [vmem:[#allocation5_spill] sm:$0xff] %v9333_v38  ;;  %v829_v45 = vand.u32 2139095040, %v9333_v38 }
  0xe1   : > { %vm733_vm1 = vcmp.gt.s32.totalorder %v732_v35, 0  ;;  %v8118_v44 = vadd.s32 4294967169, %v934_v37  ;;  %v938_v51 = vor.u32 8388608, %v937_v40 }
  0xe2   : > { %v734_v39 = vsel %vm733_vm1, %v732_v35, 0  ;;  %v830_v9 = vshrl.u32 %v829_v45, 23  ;;  %v15571_v35 = vand.u32 2147483647, %v9333_v38 }
  0xe3   : > { %v736_v41 = vand.u32 31, %v734_v39  ;;  %v735_v46 = vshrl.u32 %v734_v39, 5  ;;  %v940_v3 = vadd.s32 1, %v8118_v44  ;;  %v9363_v34 = vshll.u32 %v938_v51, 8 }
  0xe4   : > { %v8114_v30 = vadd.s32 4294967169, %v830_v9 }
  0xe5   : > { %v737_v42 = vsub.s32 32, %v736_v41  ;;  %v739_v48 = vshll.u32 %v15584_v47, %v736_v41  ;;  %v742_v50 = vshll.u32 %v15574_v49, %v736_v41  ;;  %v745_v55 = vshll.u32 %v15576_v53, %v736_v41 }
  0xe6   : > { %v748_v58 = vshll.u32 %v15579_v56, %v736_v41  ;;  %v751_v61 = vshll.u32 %v15597_v59, %v736_v41  ;;  %vm754_vm2 = vcmp.lt.s32.totalorder %v735_v46, 1  ;;  %vm757_vm3 = vcmp.lt.s32.totalorder %v735_v46, 4 }
  0xe7   : > { %v740_v52 = vshrl.u32 %v15574_v49, %v737_v42  ;;  %v743_v54 = vshrl.u32 %v15576_v53, %v737_v42  ;;  %v746_v57 = vshrl.u32 %v15579_v56, %v737_v42  ;;  %v749_v60 = vshrl.u32 %v15597_v59, %v737_v42 }
  0xe8   : > { %v752_v63 = vshrl.u32 %v15581_v62, %v737_v42  ;;  %v738_v10 = vshrl.u32 %v15584_v47, %v737_v42  ;;  %vm756_vm4 = vcmp.lt.s32.totalorder %v735_v46, 3  ;;  %vm755_vm5 = vcmp.lt.s32.totalorder %v735_v46, 2 }
  0xe9   : > { %v741_v0 = vor.u32 %v740_v52, %v739_v48  ;;  %v744_v1 = vor.u32 %v743_v54, %v742_v50  ;;  %v747_v2 = vor.u32 %v746_v57, %v745_v55  ;;  %v750_v4 = vor.u32 %v749_v60, %v748_v58 }
  0xea   : > { %v753_v5 = vor.u32 %v752_v63, %v751_v61  ;;  %vm941_vm6 = vcmp.gt.s32.totalorder %v940_v3, 0  ;;  %v836_v40 = vadd.s32 1, %v8114_v30 }
  0xeb   : > { %v759_v6 = vsel %vm757_vm3, %v747_v2, 2102212464  ;;  %v762_v7 = vsel %vm754_vm2, %v741_v0, %v744_v1  ;;  %v766_v8 = vsel %vm754_vm2, %v744_v1, %v747_v2  ;;  %v763_v11 = vsel %vm757_vm3, %v750_v4, 920167782 }
  0xec   : > { %v767_v12 = vsel %vm757_vm3, %v753_v5, 1326507024  ;;  %v764_v13 = vsel %vm756_vm4, %v747_v2, %v763_v11  ;;  %v758_v15 = vsel %vm754_vm2, %v738_v10, %v741_v0  ;;  %v760_v16 = vsel %vm756_vm4, %v744_v1, %v759_v6 }
  0xed   : > { %v768_v14 = vsel %vm756_vm4, %v750_v4, %v767_v12  ;;  %v765_v17 = vsel %vm755_vm5, %v762_v7, %v764_v13  ;;  %v761_v27 = vsel %vm755_vm5, %v758_v15, %v760_v16  ;;  %v942_v28 = vsel %vm941_vm6, %v940_v3, 0 }
  0xee   : > { %v769_v18 = vsel %vm755_vm5, %v766_v8, %v768_v14  ;;  %v9356_v22 = vmul.u32.u64.low %v9337_v43, %v765_v17  ;;  %v9357_v26 = vmul.u32.u64.high %v9337_v43, %v765_v17, %v9356_v22  ;;  %v944_v31 = vand.u32 31, %v942_v28 }
  0xef   : > { %v9352_v19 = vmul.u32.u64.low %v9337_v43, %v769_v18  ;;  %v9353_v20 = vmul.u32.u64.high %v9337_v43, %v769_v18, %v9352_v19  ;;  %v777_v36 = vmul.u32 %v9337_v43, %v761_v27  ;;  %v943_v37 = vshrl.u32 %v942_v28, 5 }
  0xf0   : > { %v780_v33 = vadd.s32 1, %v9357_v26  ;;  %v945_v39 = vsub.s32 32, %v944_v31  ;;  %v947_v42 = vshll.u32 %v15584_v47, %v944_v31  ;;  %v950_v44 = vshll.u32 %v15574_v49, %v944_v31 }
  0xf1   : > { %vm779_vm7 = vc.u32 %v9353_v20, %v9356_v22  ;;  %v953_v45 = vshll.u32 %v15576_v53, %v944_v31  ;;  %v956_v51 = vshll.u32 %v15579_v56, %v944_v31  ;;  %v959_v54 = vshll.u32 %v15597_v59, %v944_v31 }
  0xf2   : > { %v781_v41 = vsel %vm779_vm7, %v780_v33, %v9357_v26  ;;  %v948_v48 = vshrl.u32 %v15574_v49, %v945_v39  ;;  %v951_v50 = vshrl.u32 %v15576_v53, %v945_v39  ;;  %v954_v43 = vshrl.u32 %v15579_v56, %v945_v39 }
  0xf3   : > { %v782_v46 = vadd.s32 %v781_v41, %v777_v36  ;;  %v957_v52 = vshrl.u32 %v15597_v59, %v945_v39  ;;  %v960_v55 = vshrl.u32 %v15581_v62, %v945_v39  ;;  %v946_v58 = vshrl.u32 %v15584_v47, %v945_v39 }
  0xf4   : > { %v949_v60 = vor.u32 %v948_v48, %v947_v42  ;;  %v952_v61 = vor.u32 %v951_v50, %v950_v44  ;;  %v955_v63 = vor.u32 %v954_v43, %v953_v45  ;;  %vm962_vm8 = vcmp.lt.s32.totalorder %v943_v37, 1 }
  0xf5   : > { %v783_v57 = vadd.s32 536870912, %v782_v46  ;;  %v958_v0 = vor.u32 %v957_v52, %v956_v51  ;;  %v961_v1 = vor.u32 %v960_v55, %v959_v54  ;;  %vm964_vm9 = vcmp.lt.s32.totalorder %v943_v37, 3 }
  0xf6   : > { %vm965_vm10 = vcmp.lt.s32.totalorder %v943_v37, 4  ;;  %v970_v3 = vsel %vm962_vm8, %v949_v60, %v952_v61  ;;  %v974_v6 = vsel %vm962_vm8, %v952_v61, %v955_v63  ;;  %vm963_vm11 = vcmp.lt.s32.totalorder %v943_v37, 2 }
  0xf7   : > { %v9379_v2 = vshrl.u32 %v783_v57, 30  ;;  %v967_v4 = vsel %vm965_vm10, %v955_v63, 2102212464  ;;  %v971_v5 = vsel %vm965_vm10, %v958_v0, 920167782  ;;  %v966_v8 = vsel %vm962_vm8, %v946_v58, %v949_v60 }
  0xf8   : > { %v975_v7 = vsel %vm965_vm10, %v961_v1, 1326507024  ;;  %v972_v9 = vsel %vm964_vm9, %v955_v63, %v971_v5  ;;  %v968_v11 = vsel %vm964_vm9, %v952_v61, %v967_v4  ;;  %vm837_vm12 = vcmp.gt.s32.totalorder %v836_v40, 0 }
  0xf9   : > { %15885 = vst [vmem:[#allocation6_spill] sm:$0xff] %v9379_v2  ;;  %v976_v10 = vsel %vm964_vm9, %v958_v0, %v975_v7  ;;  %v973_v12 = vsel %vm963_vm11, %v970_v3, %v972_v9  ;;  %v9383_v14 = vadd.f32 %v9316_v21, %v9321_v24  ;;  %v833_v17 = vand.u32 8388607, %v15571_v35 }
  0xfa   : > { %v977_v13 = vsel %vm963_vm11, %v974_v6, %v976_v10  ;;  %v785_v18 = vshll.u32 %v9379_v2, 30  ;;  %v9393_v19 = vmul.u32.u64.low %v9363_v34, %v973_v12  ;;  %v9394_v26 = vmul.u32.u64.high %v9363_v34, %v973_v12, %v9393_v19 }
  0xfb   : > { %v9386_v15 = vmul.u32.u64.low %v9363_v34, %v977_v13  ;;  %v9387_v16 = vmul.u32.u64.high %v9363_v34, %v977_v13, %v9386_v15  ;;  %v838_v27 = vsel %vm837_vm12, %v836_v40, 0  ;;  %v969_v28 = vsel %vm963_vm11, %v966_v8, %v968_v11 }
  0xfc   : > { %v840_v30 = vand.u32 31, %v838_v27  ;;  %v621_v24 = vand.u32 2139095040, %v9383_v14  ;;  %v9400_v33 = vsub.s32 %v782_v46, %v785_v18  ;;  %v985_v36 = vmul.u32 %v9363_v34, %v969_v28  ;;  %v8513_v34 = vpop.f32.mrf.mxu0 }
  0xfd   : > { %vm987_vm13 = vc.u32 %v9387_v16, %v9393_v19  ;;  %v988_v37 = vadd.s32 1, %v9394_v26  ;;  %v834_v39 = vor.u32 8388608, %v833_v17  ;;  %v839_v43 = vshrl.u32 %v838_v27, 5 }
  0xfe   : > { %v841_v31 = vsub.s32 32, %v840_v30  ;;  %v843_v41 = vshll.u32 %v15584_v47, %v840_v30  ;;  %v846_v40 = vshll.u32 %v15574_v49, %v840_v30  ;;  %v852_v46 = vshll.u32 %v15579_v56, %v840_v30 }
  0xff   : > { %v989_v45 = vsel %vm987_vm13, %v988_v37, %v9394_v26  ;;  %v849_v54 = vshll.u32 %v15576_v53, %v840_v30  ;;  %v855_v58 = vshll.u32 %v15597_v59, %v840_v30  ;;  %v788_v61 = vsub.s32 0, %v9400_v33 }
 0x100   : > { %v844_v42 = vshrl.u32 %v15574_v49, %v841_v31  ;;  %v847_v44 = vshrl.u32 %v15576_v53, %v841_v31  ;;  %v850_v48 = vshrl.u32 %v15579_v56, %v841_v31  ;;  %v853_v50 = vshrl.u32 %v15597_v59, %v841_v31 }
 0x101   : > { %v990_v51 = vadd.s32 %v989_v45, %v985_v36  ;;  %v856_v60 = vshrl.u32 %v15581_v62, %v841_v31  ;;  %v9417_v63 = vadd.f32 %v8513_v34, %v9316_v21  ;;  %v622_v3 = vshrl.u32 %v621_v24, 23 }
 0x102   : > { %v845_v52 = vor.u32 %v844_v42, %v843_v41  ;;  %v848_v55 = vor.u32 %v847_v44, %v846_v40  ;;  %v854_v57 = vor.u32 %v853_v50, %v852_v46  ;;  %v851_v0 = vor.u32 %v850_v48, %v849_v54  ;;  %v559_v54 = vpop.f32.mrf.mxu0 }
 0x103   : > { %15886 = vst [vmem:[#allocation7_spill] sm:$0xff] %v9417_v63  ;;  %v857_v1 = vor.u32 %v856_v60, %v855_v58  ;;  %vm858_vm14 = vcmp.lt.s32.totalorder %v839_v43, 1  ;;  %vm861_vm15 = vcmp.lt.s32.totalorder %v839_v43, 4  ;;  %v991_v4 = vadd.s32 536870912, %v990_v51 }
 0x104   : > { %v866_v5 = vsel %vm858_vm14, %v845_v52, %v848_v55  ;;  %v867_v6 = vsel %vm861_vm15, %v854_v57, 920167782  ;;  %v874_v7 = vshll.u32 %v834_v39, 8  ;;  %v8111_v8 = vmin.u32 %v788_v61, %v9400_v33 }
 0x105   : > { %vm859_vm1 = vcmp.lt.s32.totalorder %v839_v43, 2  ;;  %vm860_vm2 = vcmp.lt.s32.totalorder %v839_v43, 3  ;;  %v1141_v9 = vand.u32 2139095040, %v9417_v63  ;;  %v863_v10 = vsel %vm861_vm15, %v851_v0, 2102212464 }
 0x106   : > { %v868_v11 = vsel %vm860_vm2, %v851_v0, %v867_v6  ;;  %v870_v12 = vsel %vm858_vm14, %v848_v55, %v851_v0  ;;  %v871_v13 = vsel %vm861_vm15, %v857_v1, 1326507024  ;;  %v8106_v15 = vadd.s32 4294967169, %v622_v3 }
 0x107   : > { %v842_v17 = vshrl.u32 %v15584_v47, %v841_v31  ;;  %v869_v18 = vsel %vm859_vm1, %v866_v5, %v868_v11  ;;  %v9425_v26 = vshrl.u32 %v991_v4, 30  ;;  %v872_v27 = vsel %vm860_vm2, %v854_v57, %v871_v13 }
 0x108   : > { %v9427_v28 = vmul.u32.u64.low %v874_v7, %v869_v18  ;;  %v9428_v30 = vmul.u32.u64.high %v874_v7, %v869_v18, %v9427_v28  ;;  %v790_v24 = vclz %v8111_v8  ;;  %v864_v37 = vsel %vm860_vm2, %v848_v55, %v863_v10 }
 0x109   : > { %15887 = vst [vmem:[#allocation8_spill] sm:$0xff] %v9425_v26  ;;  %v862_v36 = vsel %vm858_vm14, %v842_v17, %v845_v52  ;;  %v873_v39 = vsel %vm859_vm1, %v870_v12, %v872_v27  ;;  %v1142_v40 = vshrl.u32 %v1141_v9, 23  ;;  %v628_v31 = vadd.s32 1, %v8106_v15 }
 0x10a   : > { %v9433_v41 = vmul.u32.u64.low %v874_v7, %v873_v39  ;;  %v9434_v42 = vmul.u32.u64.high %v874_v7, %v873_v39, %v9433_v41  ;;  %v993_v44 = vshll.u32 %v9425_v26, 30  ;;  %v865_v45 = vsel %vm859_vm1, %v862_v36, %v864_v37 }
 0x10b   : > { %v884_v48 = vadd.s32 1, %v9428_v30  ;;  %v8126_v46 = vadd.s32 4294967169, %v1142_v40  ;;  %v8112_v50 = vadd.s32 4294967294, %v790_v24  ;;  %v15570_v34 = vand.u32 2147483647, %v9417_v63 }
 0x10c   : > { %vm883_vm3 = vc.u32 %v9434_v42, %v9427_v28  ;;  %v881_v55 = vmul.u32 %v874_v7, %v865_v45  ;;  %vm629_vm4 = vcmp.gt.s32.totalorder %v628_v31, 0  ;;  %v9443_v58 = vsub.s32 %v990_v51, %v993_v44 }
 0x10d   : > { %v1148_v52 = vadd.s32 1, %v8126_v46  ;;  %v885_v57 = vsel %vm883_vm3, %v884_v48, %v9428_v30  ;;  %v9446_v43 = vadd.f32 %v9316_v21, %v559_v54  ;;  %vm8113_vm6 = vcmp.lt.s32.totalorder %v8112_v50, 0 }
 0x10e   : > { %v886_v60 = vadd.s32 %v885_v57, %v881_v55  ;;  %v1145_v61 = vand.u32 8388607, %v15570_v34  ;;  %v9450_v1 = vsel %vm629_vm4, %v628_v31, 0  ;;  %v9452_v3 = vsel %vm8113_vm6, 0, %v8112_v50 }
 0x10f   : > { %vm1149_vm5 = vcmp.gt.s32.totalorder %v1148_v52, 0  ;;  %15888 = vst [vmem:[#allocation9_spill] sm:$0xff] %v9446_v43  ;;  %v996_v4 = vsub.s32 0, %v9443_v58  ;;  %v1037_v51 = vand.u32 2139095040, %v9446_v43  ;;  %v798_v12 = vsub.s32 4294967266, %v9452_v3 }
 0x110   : > { %v1150_v0 = vsel %vm1149_vm5, %v1148_v52, 0  ;;  %v887_v6 = vadd.s32 536870912, %v886_v60  ;;  %v1146_v7 = vor.u32 8388608, %v1145_v61  ;;  %v9460_v13 = vand.u32 31, %v9450_v1 }
 0x111   : > { %v1152_v5 = vand.u32 31, %v1150_v0  ;;  %v1151_v8 = vshrl.u32 %v1150_v0, 5  ;;  %v8119_v18 = vmin.u32 %v996_v4, %v9443_v58  ;;  %v1038_v24 = vshrl.u32 %v1037_v51, 23 }
 0x112   : > { %v9467_v36 = vshrl.u32 %v887_v6, 30  ;;  %v1186_v41 = vshll.u32 %v1146_v7, 8  ;;  %v799_v6 = vadd.s32 127, %v798_v12  ;;  %v9490_v12 = vsub.s32 32, %v9460_v13 }
 0x113   : > { %v1153_v9 = vsub.s32 32, %v1152_v5  ;;  %v1155_v10 = vshll.u32 %v15584_v47, %v1152_v5  ;;  %v1158_v11 = vshll.u32 %v15574_v49, %v1152_v5  ;;  %v1161_v15 = vshll.u32 %v15576_v53, %v1152_v5 }
 0x114   : > { %v1164_v17 = vshll.u32 %v15579_v56, %v1152_v5  ;;  %15889 = vst [vmem:[#allocation10_spill] sm:$0xff] %v9467_v36  ;;  %v1167_v44 = vshll.u32 %v15597_v59, %v1152_v5  ;;  %vm1170_vm7 = vcmp.lt.s32.totalorder %v1151_v8, 1  ;;  %v998_v54 = vclz %v8119_v18 }
 0x115   : > { %v1156_v27 = vshrl.u32 %v15574_v49, %v1153_v9  ;;  %v1159_v30 = vshrl.u32 %v15576_v53, %v1153_v9  ;;  %v1162_v37 = vshrl.u32 %v15579_v56, %v1153_v9  ;;  %v1165_v39 = vshrl.u32 %v15597_v59, %v1153_v9 }
 0x116   : > { %v1154_v45 = vshrl.u32 %v15584_v47, %v1153_v9  ;;  %v1168_v50 = vshrl.u32 %v15581_v62, %v1153_v9  ;;  %vm1173_vm8 = vcmp.lt.s32.totalorder %v1151_v8, 4  ;;  %v8122_v55 = vadd.s32 4294967169, %v1038_v24 }
 0x117   : > { %v1157_v40 = vor.u32 %v1156_v27, %v1155_v10  ;;  %v1160_v31 = vor.u32 %v1159_v30, %v1158_v11  ;;  %v1163_v48 = vor.u32 %v1162_v37, %v1161_v15  ;;  %v1166_v46 = vor.u32 %v1165_v39, %v1164_v17 }
 0x118   : > { %v1169_v57 = vor.u32 %v1168_v50, %v1167_v44  ;;  %vm1172_vm9 = vcmp.lt.s32.totalorder %v1151_v8, 3  ;;  %v889_v4 = vshll.u32 %v9467_v36, 30  ;;  %vm1171_vm10 = vcmp.lt.s32.totalorder %v1151_v8, 2  ;;  %v8516_v8 = vpop.f32.mrf.mxu0 }
 0x119   : > { %v1178_v52 = vsel %vm1170_vm7, %v1157_v40, %v1160_v31  ;;  %v1175_v61 = vsel %vm1173_vm8, %v1163_v48, 2102212464  ;;  %v1179_v0 = vsel %vm1173_vm8, %v1166_v46, 920167782  ;;  %v1182_v51 = vsel %vm1170_vm7, %v1160_v31, %v1163_v48 }
 0x11a   : > { %v1180_v5 = vsel %vm1172_vm9, %v1163_v48, %v1179_v0  ;;  %v1174_v7 = vsel %vm1170_vm7, %v1154_v45, %v1157_v40  ;;  %v1183_v10 = vsel %vm1173_vm8, %v1169_v57, 1326507024  ;;  %v1176_v11 = vsel %vm1172_vm9, %v1160_v31, %v1175_v61 }
 0x11b   : > { %v1181_v9 = vsel %vm1171_vm10, %v1178_v52, %v1180_v5  ;;  %v1184_v15 = vsel %vm1172_vm9, %v1166_v46, %v1183_v10  ;;  %v1044_v30 = vadd.s32 1, %v8122_v55  ;;  %v8120_v24 = vadd.s32 4294967294, %v998_v54 }
 0x11c   : > { %v9479_v17 = vmul.u32.u64.low %v1186_v41, %v1181_v9  ;;  %v9480_v18 = vmul.u32.u64.high %v1186_v41, %v1181_v9, %v9479_v17  ;;  %v1185_v27 = vsel %vm1171_vm10, %v1182_v51, %v1184_v15  ;;  %v9484_v37 = vsub.s32 %v886_v60, %v889_v4 }
 0x11d   : > { %v9486_v39 = vmul.u32.u64.low %v1186_v41, %v1185_v27  ;;  %v9487_v44 = vmul.u32.u64.high %v1186_v41, %v1185_v27, %v9486_v39  ;;  %v1177_v40 = vsel %vm1171_vm10, %v1174_v7, %v1176_v11  ;;  %vm1045_vm11 = vcmp.gt.s32.totalorder %v1044_v30, 0 }
 0x11e   : > { %v794_v31 = vsub.s32 32, %v9452_v3  ;;  %v800_v45 = vshll.u32 %v799_v6, 23  ;;  %v778_v48 = vadd.s32 %v9356_v22, %v9353_v20  ;;  %v1196_v46 = vadd.s32 1, %v9480_v18 }
 0x11f   : > { %v15569_v60 = vand.u32 2147483647, %v9446_v43  ;;  %v1046_v50 = vsel %vm1045_vm11, %v1044_v30, 0  ;;  %vm8121_vm12 = vcmp.lt.s32.totalorder %v8120_v24, 0  ;;  %v892_v54 = vsub.s32 0, %v9484_v37 }
 0x120   : > { %v1193_v52 = vmul.u32 %v1186_v41, %v1177_v40  ;;  %vm1195_vm13 = vc.u32 %v9487_v44, %v9479_v17  ;;  %v9503_v55 = vshrl.u32 %v15597_v59, %v9490_v12  ;;  %v1048_v20 = vand.u32 31, %v1046_v50 }
 0x121   : > { %v1197_v57 = vsel %vm1195_vm13, %v1196_v46, %v9480_v18  ;;  %v795_v22 = vshll.u32 %v9400_v33, %v9452_v3  ;;  %v796_v61 = vshrl.u32 %v778_v48, %v794_v31  ;;  %v9508_v0 = vor.u32 4788187, %v800_v45 }
 0x122   : > { %v1198_v4 = vadd.s32 %v1197_v57, %v1193_v52  ;;  %v9510_v5 = vsel %vm8121_vm12, 0, %v8120_v24  ;;  %v1041_v41 = vand.u32 8388607, %v15569_v60  ;;  %v1049_v51 = vsub.s32 32, %v1048_v20 }
 0x123   : > { %v9515_v6 = vadd.f32 %v8516_v8, %v9316_v21  ;;  %v8115_v7 = vmin.u32 %v892_v54, %v9484_v37  ;;  %v1047_v10 = vshrl.u32 %v1046_v50, 5  ;;  %v1051_v11 = vshll.u32 %v15584_v47, %v1048_v20 }
 0x124   : > { %v1199_v9 = vadd.s32 536870912, %v1198_v4  ;;  %v1052_v33 = vshrl.u32 %v15574_v49, %v1049_v51  ;;  %v1054_v3 = vshll.u32 %v15574_v49, %v1048_v20  ;;  %v1055_v15 = vshrl.u32 %v15576_v53, %v1049_v51 }
 0x125   : > { %15890 = vst [vmem:[#allocation11_spill] sm:$0xff] %v9515_v6  ;;  %v1058_v18 = vshrl.u32 %v15579_v56, %v1049_v51  ;;  %v1057_v30 = vshll.u32 %v15576_v53, %v1048_v20  ;;  %v1060_v24 = vshll.u32 %v15579_v56, %v1048_v20  ;;  %v1061_v39 = vshrl.u32 %v15597_v59, %v1049_v51 }
 0x126   : > { %v9523_v27 = vshrl.u32 %v1199_v9, 30  ;;  %v1053_v40 = vor.u32 %v1052_v33, %v1051_v11  ;;  %v1056_v31 = vor.u32 %v1055_v15, %v1054_v3  ;;  %v1063_v45 = vshll.u32 %v15597_v59, %v1048_v20 }
 0x127   : > { %v1064_v48 = vshrl.u32 %v15581_v62, %v1049_v51  ;;  %v797_v46 = vor.u32 %v796_v61, %v795_v22  ;;  %v802_v50 = vand.u32 2147483647, %v9508_v0  ;;  %v1059_v54 = vor.u32 %v1058_v18, %v1057_v30 }
 0x128   : > { %15891 = vst [vmem:[#allocation12_spill] sm:$0xff] %v9523_v27  ;;  %v1062_v52 = vor.u32 %v1061_v39, %v1060_v24  ;;  %v1006_v8 = vsub.s32 4294967266, %v9510_v5  ;;  %v894_v57 = vclz %v8115_v7  ;;  %v1042_v9 = vor.u32 8388608, %v1041_v41 }
 0x129   : > { %v1065_v60 = vor.u32 %v1064_v48, %v1063_v45  ;;  %v1201_v34 = vshll.u32 %v9523_v27, 30  ;;  %vm1066_vm14 = vcmp.lt.s32.totalorder %v1047_v10, 1  ;;  %vm1069_vm15 = vcmp.lt.s32.totalorder %v1047_v10, 4 }
 0x12a   : > { %v1349_v11 = vand.u32 2139095040, %v9515_v6  ;;  %v1050_v20 = vshrl.u32 %v15584_v47, %v1049_v51  ;;  %vm1068_vm1 = vcmp.lt.s32.totalorder %v1047_v10, 3  ;;  %v1074_v22 = vsel %vm1066_vm14, %v1053_v40, %v1056_v31 }
 0x12b   : > { %v1075_v61 = vsel %vm1069_vm15, %v1062_v52, 920167782  ;;  %vm1067_vm2 = vcmp.lt.s32.totalorder %v1047_v10, 2  ;;  %v1071_v0 = vsel %vm1069_vm15, %v1059_v54, 2102212464  ;;  %v1078_v3 = vsel %vm1066_vm14, %v1056_v31, %v1059_v54 }
 0x12c   : > { %v1076_v33 = vsel %vm1068_vm1, %v1059_v54, %v1075_v61  ;;  %v8116_v7 = vadd.s32 4294967294, %v894_v57  ;;  %v1079_v15 = vsel %vm1069_vm15, %v1065_v60, 1326507024  ;;  %v1082_v18 = vshll.u32 %v1042_v9, 8 }
 0x12d   : > { %v1077_v41 = vsel %vm1067_vm2, %v1074_v22, %v1076_v33  ;;  %v9538_v30 = vsub.s32 %v1198_v4, %v1201_v34  ;;  %v1070_v24 = vsel %vm1066_vm14, %v1050_v20, %v1053_v40  ;;  %v1080_v39 = vsel %vm1068_vm1, %v1062_v52, %v1079_v15 }
 0x12e   : > { %v1350_v51 = vshrl.u32 %v1349_v11, 23  ;;  %v1072_v45 = vsel %vm1068_vm1, %v1056_v31, %v1071_v0  ;;  %v1081_v48 = vsel %vm1067_vm2, %v1078_v3, %v1080_v39  ;;  %v1007_v61 = vadd.s32 127, %v1006_v8  ;;  %v569_v39 = vpop.f32.mrf.mxu0 }
 0x12f   : > { %v9542_v35 = vmul.u32.u64.low %v1082_v18, %v1077_v41  ;;  %v9543_v32 = vmul.u32.u64.high %v1082_v18, %v1077_v41, %v9542_v35  ;;  %v9546_v54 = vmul.u32.u64.low %v1082_v18, %v1081_v48  ;;  %v9547_v57 = vmul.u32.u64.high %v1082_v18, %v1081_v48, %v9546_v54 }
 0x130   : > { %v8134_v22 = vadd.s32 4294967169, %v1350_v51  ;;  %v804_v60 = vcvt.s32.f32 %v797_v46  ;;  %v644_v34 = vshll.u32 %v15579_v56, %v9460_v13  ;;  %vm8117_vm3 = vcmp.lt.s32.totalorder %v8116_v7, 0 }
 0x131   : > { %v9552_v4 = vshrl.u32 %v9450_v1, 5  ;;  %v1204_v40 = vsub.s32 0, %v9538_v30  ;;  %v1073_v31 = vsel %vm1067_vm2, %v1070_v24, %v1072_v45  ;;  %v1002_v11 = vsub.s32 32, %v9510_v5 }
 0x132   : > { %v1356_v52 = vadd.s32 1, %v8134_v22  ;;  %v9556_v9 = vmul.f32 %v804_v60, %v802_v50  ;;  %v9559_v8 = vor.u32 %v9503_v55, %v644_v34  ;;  %v1092_v46 = vadd.s32 1, %v9543_v32 }
 0x133   : > { %v1008_v20 = vshll.u32 %v1007_v61, 23  ;;  %v9563_v0 = vsel %vm8117_vm3, 0, %v8116_v7  ;;  %vm1091_vm4 = vc.u32 %v9547_v57, %v9542_v35  ;;  %v1089_v1 = vmul.u32 %v1082_v18, %v1073_v31 }
 0x134   : > { %15892 = vst [vmem:[#allocation13_spill] sm:$0xff] %v9559_v8  ;;  %vm1357_vm5 = vcmp.gt.s32.totalorder %v1356_v52, 0  ;;  %v1093_v10 = vsel %vm1091_vm4, %v1092_v46, %v9543_v32  ;;  %v15573_v50 = vand.u32 2147483647, %v9515_v6  ;;  %v9571_v55 = vshll.u32 %v15597_v59, %v9460_v13 }
 0x135   : > { %v1358_v33 = vsel %vm1357_vm5, %v1356_v52, 0  ;;  %v9575_v3 = vshrl.u32 %v15581_v62, %v9490_v12  ;;  %v986_v7 = vadd.s32 %v9393_v19, %v9387_v16  ;;  %v8127_v41 = vmin.u32 %v1204_v40, %v9538_v30 }
 0x136   : > { %v882_v32 = vadd.s32 %v9427_v28, %v9434_v42  ;;  %v9583_v18 = vadd.s32 %v1093_v10, %v1089_v1  ;;  %v1360_v24 = vand.u32 31, %v1358_v33  ;;  %v1003_v51 = vshll.u32 %v9443_v58, %v9510_v5 }
 0x137   : > { %v1004_v45 = vshrl.u32 %v986_v7, %v1002_v11  ;;  %v9587_v48 = vor.u32 4788187, %v1008_v20  ;;  %v902_v61 = vsub.s32 4294967266, %v9563_v0  ;;  %v1353_v16 = vand.u32 8388607, %v15573_v50 }
 0x138   : > { %v1361_v19 = vsub.s32 32, %v1360_v24  ;;  %v1363_v54 = vshll.u32 %v15584_v47, %v1360_v24  ;;  %v1366_v28 = vshll.u32 %v15574_v49, %v1360_v24  ;;  %v1206_v42 = vclz %v8127_v41 }
 0x139   : > { %v1369_v22 = vshll.u32 %v15576_v53, %v1360_v24  ;;  %v1372_v60 = vshll.u32 %v15579_v56, %v1360_v24  ;;  %v9597_v58 = vadd.f32 %v9316_v21, %v569_v39  ;;  %v1095_v5 = vadd.s32 536870912, %v9583_v18 }
 0x13a   : > { %v1364_v34 = vshrl.u32 %v15574_v49, %v1361_v19  ;;  %v1367_v40 = vshrl.u32 %v15576_v53, %v1361_v19  ;;  %v1370_v31 = vshrl.u32 %v15579_v56, %v1361_v19  ;;  %v1005_v52 = vor.u32 %v1004_v45, %v1003_v51 }
 0x13b   : > { %15893 = vst [vmem:[#allocation14_spill] sm:$0xff] %v9597_v58  ;;  %v1010_v11 = vand.u32 2147483647, %v9587_v48  ;;  %v1359_v46 = vshrl.u32 %v1358_v33, 5  ;;  %v1373_v20 = vshrl.u32 %v15597_v59, %v1361_v19  ;;  %v1354_v1 = vor.u32 8388608, %v1353_v16 }
 0x13c   : > { %v1365_v10 = vor.u32 %v1364_v34, %v1363_v54  ;;  %v1368_v7 = vor.u32 %v1367_v40, %v1366_v28  ;;  %v1375_v41 = vshll.u32 %v15597_v59, %v1360_v24  ;;  %v898_v39 = vsub.s32 32, %v9563_v0 }
 0x13d   : > { %v1371_v50 = vor.u32 %v1370_v31, %v1369_v22  ;;  %v1374_v15 = vor.u32 %v1373_v20, %v1372_v60  ;;  %v1376_v49 = vshrl.u32 %v15581_v62, %v1361_v19  ;;  %v903_v53 = vadd.s32 127, %v902_v61 }
 0x13e   : > { %v8128_v25 = vadd.s32 4294967294, %v1206_v42  ;;  %v9608_v56 = vshrl.u32 %v1095_v5, 30  ;;  %v1245_v51 = vand.u32 2139095040, %v9597_v58  ;;  %vm724_vm6 = vcmp.lt.s32.totalorder %v9319_v23, 0 }
 0x13f   : > { %v1362_v33 = vshrl.u32 %v15584_v47, %v1361_v19  ;;  %v1377_v45 = vor.u32 %v1376_v49, %v1375_v41  ;;  %vm1378_vm7 = vcmp.lt.s32.totalorder %v1359_v46, 1  ;;  %vm1381_vm8 = vcmp.lt.s32.totalorder %v1359_v46, 4 }
 0x140   : > { %15894 = vst [vmem:[#allocation15_spill] sm:$0xff] %v9608_v56  ;;  %vm1380_vm9 = vcmp.lt.s32.totalorder %v1359_v46, 3  ;;  %v1386_v24 = vsel %vm1378_vm7, %v1365_v10, %v1368_v7  ;;  %v1387_v48 = vsel %vm1381_vm8, %v1374_v15, 920167782  ;;  %v1394_v16 = vshll.u32 %v1354_v1, 8 }
 0x141   : > { %vm1379_vm10 = vcmp.lt.s32.totalorder %v1359_v46, 2  ;;  %v1383_v54 = vsel %vm1381_vm8, %v1371_v50, 2102212464  ;;  %v1388_v61 = vsel %vm1380_vm9, %v1371_v50, %v1387_v48  ;;  %v1390_v28 = vsel %vm1378_vm7, %v1368_v7, %v1371_v50  ;;  %v8519_v48 = vpop.f32.mrf.mxu0 }
 0x142   : > { %v15895_v42 = vand.u32 2147483647, %v9319_v23  ;;  %v15896_v22 = vmov 0  ;;  %v1097_v49 = vshll.u32 %v9608_v56, 30  ;;  %v1389_v19 = vsel %vm1379_vm10, %v1386_v24, %v1388_v61 }
 0x143   : > { %v1391_v60 = vsel %vm1381_vm8, %v1377_v45, 1326507024  ;;  %v1246_v5 = vshrl.u32 %v1245_v51, 23  ;;  %v900_v34 = vshrl.u32 %v882_v32, %v898_v39  ;;  %vm8129_vm12 = vcmp.lt.s32.totalorder %v8128_v25, 0 }
 0x144   : > { %vm9618_vm11 = vcmp.le.f32.partialorder %v15895_v42, 0.7853982  ;;  %v1382_v40 = vsel %vm1378_vm7, %v1362_v33, %v1365_v10  ;;  %v1392_v31 = vsel %vm1380_vm9, %v1374_v15, %v1391_v60  ;;  %v1384_v50 = vsel %vm1380_vm9, %v1368_v7, %v1383_v54 }
 0x145   : > { %v15897_v22 = vsel %vm9618_vm11, 4294967295, %v15896_v22  ;;  %v1393_v20 = vsel %vm1379_vm10, %v1390_v28, %v1392_v31  ;;  %v9628_v1 = vmul.u32.u64.low %v1394_v16, %v1389_v19  ;;  %v9629_v41 = vmul.u32.u64.high %v1394_v16, %v1389_v19, %v9628_v1 }
 0x146   : > { %15898 = vst [vmem:[#allocation16_spill] sm:$0xff] %v15897_v22  ;;  %v904_v42 = vshll.u32 %v903_v53, 23  ;;  %v9632_v62 = vmul.u32.u64.low %v1394_v16, %v1393_v20  ;;  %v9633_v24 = vmul.u32.u64.high %v1394_v16, %v1393_v20, %v9632_v62  ;;  %v15583_v32 = vand.u32 2147483647, %v9597_v58 }
 0x147   : > { %v1012_v39 = vcvt.s32.f32 %v1005_v52  ;;  %v9636_v51 = vsel %vm8129_vm12, 0, %v8128_v25  ;;  %v9639_v15 = vsub.s32 %v9583_v18, %v1097_v49  ;;  %v8130_v10 = vadd.s32 4294967169, %v1246_v5 }
 0x148   : > { %v899_v33 = vshll.u32 %v9484_v37, %v9563_v0  ;;  %v1385_v53 = vsel %vm1379_vm10, %v1382_v40, %v1384_v50  ;;  %v9647_v45 = vadd.f32 %v8519_v48, %v9316_v21  ;;  %v15899_v62 = vxor.u32 2147483648, %v9556_v9 }
 0x149   : > { %v9654_v18 = vmul.f32 %v1012_v39, %v1010_v11  ;;  %v1404_v52 = vadd.s32 1, %v9629_v41  ;;  %v1252_v54 = vadd.s32 1, %v8130_v10  ;;  %v9659_v28 = vor.u32 4788187, %v904_v42 }
 0x14a   : > { %v807_v25 = vsel %vm724_vm6, %v15899_v62, %v9556_v9  ;;  %v9657_v61 = vor.u32 %v900_v34, %v899_v33  ;;  %v1214_v37 = vsub.s32 4294967266, %v9636_v51  ;;  %v1249_v21 = vand.u32 8388607, %v15583_v32 }
 0x14b   : > { %v1100_v0 = vsub.s32 0, %v9639_v15  ;;  %v1401_v46 = vmul.u32 %v1394_v16, %v1385_v53  ;;  %vm1403_vm13 = vc.u32 %v9633_v24, %v9628_v1  ;;  %vm1253_vm14 = vcmp.gt.s32.totalorder %v1252_v54, 0 }
 0x14c   : > { %v9670_v9 = vsel %vm9618_vm11, %v9319_v23, %v807_v25  ;;  %v1405_v11 = vsel %vm1403_vm13, %v1404_v52, %v9629_v41  ;;  %v1254_v49 = vsel %vm1253_vm14, %v1252_v54, 0  ;;  %v1557_v19 = vand.u32 2139095040, %v9647_v45 }
 0x14d   : > { %v1194_v5 = vadd.s32 %v9479_v17, %v9487_v44  ;;  %v1406_v16 = vadd.s32 %v1405_v11, %v1401_v46  ;;  %v1256_v34 = vand.u32 31, %v1254_v49  ;;  %v1210_v50 = vsub.s32 32, %v9636_v51 }
 0x14e   : > { %v1215_v20 = vadd.s32 127, %v1214_v37  ;;  %v8123_v48 = vmin.u32 %v1100_v0, %v9639_v15  ;;  %v1250_v42 = vor.u32 8388608, %v1249_v21  ;;  %v1255_v10 = vshrl.u32 %v1254_v49, 5 }
 0x14f   : > { %v1407_v41 = vadd.s32 536870912, %v1406_v16  ;;  %v1257_v39 = vsub.s32 32, %v1256_v34  ;;  %v1259_v33 = vshll.u32 %v15584_v47, %v1256_v34  ;;  %v15900_v53 = vmov 2475754826  }
 0x150   : > { %v1262_v62 = vshll.u32 %v15900_v53, %v1256_v34  ;;  %v1558_v17 = vshrl.u32 %v1557_v19, 23  ;;  %v15902_v52 = vmov 2131351028   ;;  %v15903_v37 = vmov 2102212464  }
 0x151   : > { %v9683_v44 = vshrl.u32 %v1407_v41, 30  ;;  %v1260_v25 = vshrl.u32 %v15900_v53, %v1257_v39  ;;  %v1263_v54 = vshrl.u32 %v15902_v52, %v1257_v39  ;;  %v1265_v46 = vshll.u32 %v15902_v52, %v1256_v34 }
 0x152   : > { %v1266_v11 = vshrl.u32 %v15903_v37, %v1257_v39  ;;  %v1268_v0 = vshll.u32 %v15903_v37, %v1256_v34  ;;  %v1269_v21 = vshrl.u32 %v15597_v59, %v1257_v39  ;;  %v1271_v49 = vshll.u32 %v15597_v59, %v1256_v34 }
 0x153   : > { %15901 = vst [vmem:[#allocation17_spill] sm:$0xff] %v9683_v44  ;;  %v1409_v32 = vshll.u32 %v9683_v44, 30  ;;  %v1261_v7 = vor.u32 %v1260_v25, %v1259_v33  ;;  %v1264_v19 = vor.u32 %v1263_v54, %v1262_v62  ;;  %v15904_v41 = vmov 1326507024  }
 0x154   : > { %v1272_v31 = vshrl.u32 %v15904_v41, %v1257_v39  ;;  %vm15644_vm15 = vcmp.lt.s32.totalorder %v9326_v29, 0  ;;  %v1216_v40 = vshll.u32 %v1215_v20, 23  ;;  %v1102_v60 = vclz %v8123_v48 }
 0x155   : > { %v1267_v47 = vor.u32 %v1266_v11, %v1265_v46  ;;  %v1270_v27 = vor.u32 %v1269_v21, %v1268_v0  ;;  %v9695_v56 = vsub.s32 %v1406_v16, %v1409_v32  ;;  %vm1274_vm1 = vcmp.lt.s32.totalorder %v1255_v10, 1 }
 0x156   : > { %v1273_v26 = vor.u32 %v1272_v31, %v1271_v49  ;;  %v1290_v22 = vshll.u32 %v1250_v42, 8  ;;  %v15905_v36 = vmov 683565275   ;;  %vm1277_vm2 = vcmp.lt.s32.totalorder %v1255_v10, 4 }
 0x157   : > { %v1258_v23 = vshrl.u32 %v15905_v36, %v1257_v39  ;;  %v1282_v34 = vsel %vm1274_vm1, %v1261_v7, %v1264_v19  ;;  %v8142_v33 = vadd.s32 4294967169, %v1558_v17  ;;  %vm653_vm3 = vcmp.lt.s32.totalorder %v9552_v4, 4 }
 0x158   : > { %v1412_v62 = vsub.s32 0, %v9695_v56  ;;  %vm1276_vm4 = vcmp.lt.s32.totalorder %v1255_v10, 3  ;;  %v1279_v20 = vsel %vm1277_vm2, %v1267_v47, 2102212464  ;;  %v1283_v48 = vsel %vm1277_vm2, %v1270_v27, 920167782 }
 0x159   : > { %v15906_v25 = vand.u32 2147483647, %v9326_v29  ;;  %v15907_v32 = vmov 0  ;;  %vm1275_vm7 = vcmp.lt.s32.totalorder %v1255_v10, 2  ;;  %v1284_v16 = vsel %vm1276_vm4, %v1267_v47, %v1283_v48 }
 0x15a   : > { %v1286_v31 = vsel %vm1274_vm1, %v1264_v19, %v1267_v47  ;;  %v1287_v42 = vsel %vm1277_vm2, %v1273_v26, 1326507024  ;;  %v1211_v39 = vshll.u32 %v9538_v30, %v9636_v51  ;;  %v1212_v17 = vshrl.u32 %v1194_v5, %v1210_v50  ;;  %v579_v26 = vpop.f32.mrf.mxu0 }
 0x15b   : > { %vm9703_vm5 = vcmp.le.f32.partialorder %v15906_v25, 0.7853982  ;;  %v1278_v54 = vsel %vm1274_vm1, %v1258_v23, %v1261_v7  ;;  %v1285_v46 = vsel %vm1275_vm7, %v1282_v34, %v1284_v16  ;;  %v1280_v11 = vsel %vm1276_vm4, %v1264_v19, %v1279_v20 }
 0x15c   : > { %v15908_v32 = vsel %vm9703_vm5, 4294967295, %v15907_v32  ;;  %v1288_v0 = vsel %vm1276_vm4, %v1270_v27, %v1287_v42  ;;  %v9712_v21 = vmul.u32.u64.low %v1290_v22, %v1285_v46  ;;  %v9713_v49 = vmul.u32.u64.high %v1290_v22, %v1285_v46, %v9712_v21 }
 0x15d   : > { %15909 = vst [vmem:[#allocation18_spill] sm:$0xff] %v15908_v32  ;;  %v1217_v25 = vor.u32 4788187, %v1216_v40  ;;  %v8124_v59 = vadd.s32 4294967294, %v1102_v60  ;;  %v8135_v48 = vmin.u32 %v1412_v62, %v9695_v56  ;;  %v1289_v47 = vsel %vm1275_vm7, %v1286_v31, %v1288_v0 }
 0x15e   : > { %8895 = vcosq.f32 %v9670_v9  ;;  %v9719_v30 = vmul.u32.u64.low %v1290_v22, %v1289_v47  ;;  %v9720_v51 = vmul.u32.u64.high %v1290_v22, %v1289_v47, %v9719_v30  ;;  %v1564_v23 = vadd.s32 1, %v8142_v33  ;;  %v9739_v33 = vld [vmem:[%s15559_s2] ss:$0 sm:$0xff] }
 0x15f   : > { %v15910_v27 = vxor.u32 2147483648, %v9654_v18  ;;  %v15911_v5 = vand.u32 2147483647, %v9659_v28  ;;  %v15912_v60 = vcvt.s32.f32 %v9657_v61  ;;  %v1213_v50 = vor.u32 %v1212_v17, %v1211_v39 }
 0x160   : > { %v1281_v19 = vsel %vm1275_vm7, %v1278_v54, %v1280_v11  ;;  %v1300_v34 = vadd.s32 1, %v9713_v49  ;;  %v15599_v62 = vand.u32 2147483647, %v9647_v45  ;;  %vm1565_vm8 = vcmp.gt.s32.totalorder %v1564_v23, 0 }
 0x161   : > { %v1015_v7 = vsel %vm15644_vm15, %v15910_v27, %v9654_v18  ;;  %v9731_v40 = vmul.f32 %v15912_v60, %v15911_v5  ;;  %v9742_v18 = vadd.f32 %v9739_v33, %v579_v26  ;;  %v1218_v28 = vand.u32 2147483647, %v1217_v25 }
 0x162   : > { %vm8125_vm9 = vcmp.lt.s32.totalorder %v8124_v59, 0  ;;  %v1414_v61 = vclz %v8135_v48  ;;  %v1566_v20 = vsel %vm1565_vm8, %v1564_v23, 0  ;;  %8897 = vsinq.f32 %v9670_v9 }
 0x163   : > { %v9748_v10 = vsel %vm653_vm3, %v9559_v8, 920167782  ;;  %v1297_v16 = vmul.u32 %v1290_v22, %v1281_v19  ;;  %vm1299_vm10 = vc.u32 %v9720_v51, %v9712_v21  ;;  %v9755_v31 = vsel %vm9703_vm5, %v9326_v29, %v1015_v7 }
 0x164   : > { %v1220_v39 = vcvt.s32.f32 %v1213_v50  ;;  %v1301_v17 = vsel %vm1299_vm10, %v1300_v34, %v9713_v49  ;;  %v9759_v9 = vsel %vm8125_vm9, 0, %v8124_v59  ;;  %v1561_v22 = vand.u32 8388607, %v15599_v62 }
 0x165   : > { %v9761_v54 = vadd.s32 %v1301_v17, %v1297_v16  ;;  %v1568_v46 = vand.u32 31, %v1566_v20  ;;  %v1090_v0 = vadd.s32 %v9542_v35, %v9547_v57  ;;  %v8136_v25 = vadd.s32 4294967294, %v1414_v61 }
 0x166   : > { %v9765_v11 = vmul.f32 %v1220_v39, %v1218_v28  ;;  %v1453_v48 = vand.u32 2139095040, %v9742_v18  ;;  %v9770_v47 = vshrl.u32 %v1566_v20, 5  ;;  %v1106_v30 = vsub.s32 32, %v9759_v9 }
 0x167   : > { %v1569_v26 = vsub.s32 32, %v1568_v46  ;;  %v1571_v59 = vshll.u32 %v15905_v36, %v1568_v46  ;;  %v1574_v49 = vshll.u32 %v15900_v53, %v1568_v46  ;;  %v1303_v23 = vadd.s32 536870912, %v9761_v54 }
 0x168   : > { %v1577_v27 = vshll.u32 %v15902_v52, %v1568_v46  ;;  %v1580_v7 = vshll.u32 %v15903_v37, %v1568_v46  ;;  %v1110_v35 = vsub.s32 4294967266, %v9759_v9  ;;  %v1562_v57 = vor.u32 8388608, %v1561_v22 }
 0x169   : > { %v1572_v5 = vshrl.u32 %v15900_v53, %v1569_v26  ;;  %v1575_v60 = vshrl.u32 %v15902_v52, %v1569_v26  ;;  %vm8137_vm12 = vcmp.lt.s32.totalorder %v8136_v25, 0  ;;  %v1578_v50 = vshrl.u32 %v15903_v37, %v1569_v26 }
 0x16a   : > { %v15913_v19 = vmov 920167782   ;;  %v1454_v28 = vshrl.u32 %v1453_v48, 23  ;;  %vm15664_vm13 = vcmp.lt.s32.totalorder %v9333_v38, 0  ;;  %vm1586_vm14 = vcmp.lt.s32.totalorder %v9770_v47, 1 }
 0x16b   : > { %v1581_v34 = vshrl.u32 %v15913_v19, %v1569_v26  ;;  %v1573_v61 = vor.u32 %v1572_v5, %v1571_v59  ;;  %v1576_v20 = vor.u32 %v1575_v60, %v1574_v49  ;;  %v1583_v16 = vshll.u32 %v15913_v19, %v1568_v46  ;;  %v9786_v39 = vpop.eup %8895 }
 0x16c   : > { %15914 = vst [vmem:[#allocation19_spill] sm:$0xff] %v9786_v39  ;;  %v9788_v17 = vshrl.u32 %v1303_v23, 30  ;;  %v1579_v22 = vor.u32 %v1578_v50, %v1577_v27  ;;  %v1584_v42 = vshrl.u32 %v15904_v41, %v1569_v26  ;;  %v9791_v44 = vsel %vm8137_vm12, 0, %v8136_v25 }
 0x16d   : > { %v1582_v62 = vor.u32 %v1581_v34, %v1580_v7  ;;  %vm1589_vm1 = vcmp.lt.s32.totalorder %v9770_v47, 4  ;;  %v1594_v48 = vsel %vm1586_vm14, %v1573_v61, %v1576_v20  ;;  %v1602_v59 = vshll.u32 %v1562_v57, 8 }
 0x16e   : > { %15915 = vst [vmem:[#allocation20_spill] sm:$0xff] %v9788_v17  ;;  %v15916_v46 = vand.u32 2147483647, %v9333_v38  ;;  %v15917_v49 = vmov 0  ;;  %v1585_v23 = vor.u32 %v1584_v42, %v1583_v16  ;;  %vm1588_vm4 = vcmp.lt.s32.totalorder %v9770_v47, 3 }
 0x16f   : > { %v1595_v27 = vsel %vm1589_vm1, %v1582_v62, 920167782  ;;  %v8138_v25 = vadd.s32 4294967169, %v1454_v28  ;;  %v1570_v7 = vshrl.u32 %v15905_v36, %v1569_v26  ;;  %vm1587_vm7 = vcmp.lt.s32.totalorder %v9770_v47, 2  ;;  %v9811_v60 = vpop.eup %8897 }
 0x170   : > { %vm9798_vm2 = vcmp.le.f32.partialorder %v15916_v46, 0.7853982  ;;  %v1596_v57 = vsel %vm1588_vm4, %v1579_v22, %v1595_v27  ;;  %v1598_v5 = vsel %vm1586_vm14, %v1576_v20, %v1579_v22  ;;  %15920 = vst [vmem:[#allocation22_spill] sm:$0xff] %v9811_v60  ;;  %vm15637_vm8 = vcmp.lt.s32.totalorder %v9417_v63, 0 }
 0x171   : > { %v15918_v49 = vsel %vm9798_vm2, 4294967295, %v15917_v49  ;;  %v1305_v42 = vshll.u32 %v9788_v17, 30  ;;  %v1591_v50 = vsel %vm1589_vm1, %v1579_v22, 2102212464  ;;  %v1597_v26 = vsel %vm1587_vm7, %v1594_v48, %v1596_v57 }
 0x172   : > { %15919 = vst [vmem:[#allocation21_spill] sm:$0xff] %v15918_v49  ;;  %v1599_v34 = vsel %vm1589_vm1, %v1585_v23, 1326507024  ;;  %v1111_v28 = vadd.s32 127, %v1110_v35  ;;  %v9823_v46 = vmul.u32.u64.low %v1602_v59, %v1597_v26  ;;  %v9824_v27 = vmul.u32.u64.high %v1602_v59, %v1597_v26, %v9823_v46 }
 0x173   : > { %v1600_v16 = vsel %vm1588_vm4, %v1582_v62, %v1599_v34  ;;  %v1108_v32 = vshrl.u32 %v1090_v0, %v1106_v30  ;;  %v1422_v17 = vsub.s32 4294967266, %v9791_v44  ;;  %v1460_v29 = vadd.s32 1, %v8138_v25 }
 0x174   : > { %v1601_v22 = vsel %vm1587_vm7, %v1598_v5, %v1600_v16  ;;  %v1590_v48 = vsel %vm1586_vm14, %v1570_v7, %v1573_v61  ;;  %v1592_v35 = vsel %vm1588_vm4, %v1576_v20, %v1591_v50  ;;  %v15921_v62 = vxor.u32 2147483648, %v9731_v40  ;;  %v8522_v50 = vpop.f32.mrf.mxu0 }
 0x175   : > { %v9834_v23 = vmul.u32.u64.low %v1602_v59, %v1601_v22  ;;  %v9835_v57 = vmul.u32.u64.high %v1602_v59, %v1601_v22, %v9834_v23  ;;  %v1107_v30 = vshll.u32 %v9639_v15, %v9759_v9  ;;  %v9845_v25 = vsub.s32 %v9761_v54, %v1305_v42 }
 0x176   : > { %v911_v0 = vsel %vm15664_vm13, %v15921_v62, %v9731_v40  ;;  %vm1461_vm9 = vcmp.gt.s32.totalorder %v1460_v29, 0  ;;  %v1222_v61 = vxor.u32 2147483648, %v9765_v11  ;;  %v1112_v7 = vshll.u32 %v1111_v28, 23 }
 0x177   : > { %v1612_v20 = vadd.s32 1, %v9824_v27  ;;  %v1462_v5 = vsel %vm1461_vm9, %v1460_v29, 0  ;;  %v9849_v26 = vor.u32 %v1108_v32, %v1107_v30  ;;  %v1593_v34 = vsel %vm1587_vm7, %v1590_v48, %v1592_v35 }
 0x178   : > { %v15607_v40 = vand.u32 2147483647, %v9742_v18  ;;  %v1464_v16 = vand.u32 31, %v1462_v5  ;;  %8899 = vcosq.f32 %v9755_v31  ;;  %v9858_v15 = vsel %vm9798_vm2, %v9333_v38, %v911_v0 }
 0x179   : > { %v1423_v9 = vadd.s32 127, %v1422_v17  ;;  %vm1611_vm10 = vc.u32 %v9835_v57, %v9823_v46  ;;  %v1308_v29 = vsub.s32 0, %v9845_v25  ;;  %v9865_v47 = vadd.f32 %v9739_v33, %v8522_v50 }
 0x17a   : > { %v1613_v32 = vsel %vm1611_vm10, %v1612_v20, %v9824_v27  ;;  %v1465_v54 = vsub.s32 32, %v1464_v16  ;;  %v9870_v42 = vsel %vm15637_vm8, %v1222_v61, %v9765_v11  ;;  %v1113_v28 = vor.u32 4788187, %v1112_v7 }
 0x17b   : > { %v1402_v17 = vadd.s32 %v9628_v1, %v9633_v24  ;;  %v1609_v22 = vmul.u32 %v1602_v59, %v1593_v34  ;;  %v1116_v48 = vcvt.s32.f32 %v9849_v26  ;;  %v1457_v35 = vand.u32 8388607, %v15607_v40 }
 0x17c   : > { %v1468_v27 = vshrl.u32 %v15900_v53, %v1465_v54  ;;  %v1471_v23 = vshrl.u32 %v15902_v52, %v1465_v54  ;;  %v1418_v62 = vsub.s32 32, %v9791_v44  ;;  %v1424_v0 = vshll.u32 %v1423_v9, 23 }
 0x17d   : > { %v9880_v30 = vadd.s32 %v1613_v32, %v1609_v22  ;;  %v1467_v11 = vshll.u32 %v15905_v36, %v1464_v16  ;;  %v8131_v61 = vmin.u32 %v1308_v29, %v9845_v25  ;;  %v1470_v1 = vshll.u32 %v15900_v53, %v1464_v16 }
 0x17e   : > { %v1473_v24 = vshll.u32 %v15902_v52, %v1464_v16  ;;  %v1474_v59 = vshrl.u32 %v15903_v37, %v1465_v54  ;;  %v1463_v7 = vshrl.u32 %v1462_v5, 5  ;;  %v1476_v50 = vshll.u32 %v15903_v37, %v1464_v16 }
 0x17f   : > { %v1469_v20 = vor.u32 %v1468_v27, %v1467_v11  ;;  %v1477_v26 = vshrl.u32 %v15913_v19, %v1465_v54  ;;  %v1472_v34 = vor.u32 %v1471_v23, %v1470_v1  ;;  %v1479_v32 = vshll.u32 %v15913_v19, %v1464_v16 }
 0x180   : > { %v1475_v9 = vor.u32 %v1474_v59, %v1473_v24  ;;  %v1480_v22 = vshrl.u32 %v15904_v41, %v1465_v54  ;;  %v1114_v40 = vand.u32 2147483647, %v1113_v28  ;;  %v1615_v29 = vadd.s32 536870912, %v9880_v30 }
 0x181   : > { %v1458_v39 = vor.u32 8388608, %v1457_v35  ;;  %v1478_v60 = vor.u32 %v1477_v26, %v1476_v50  ;;  %v15922_v49 = vand.u32 2147483647, %v9417_v63  ;;  %v15923_v5 = vmov 0 }
 0x182   : > { %v1420_v27 = vshrl.u32 %v1402_v17, %v1418_v62  ;;  %v1425_v11 = vor.u32 4788187, %v1424_v0  ;;  %v1481_v38 = vor.u32 %v1480_v22, %v1479_v32  ;;  %v1765_v23 = vand.u32 2139095040, %v9865_v47 }
 0x183   : > { %vm9894_vm12 = vcmp.le.f32.partialorder %v15922_v49, 0.7853982  ;;  %v1310_v1 = vclz %v8131_v61  ;;  %v1466_v16 = vshrl.u32 %v15905_v36, %v1465_v54  ;;  %vm1482_vm14 = vcmp.lt.s32.totalorder %v1463_v7, 1 }
 0x184   : > { %v15924_v5 = vsel %vm9894_vm12, 4294967295, %v15923_v5  ;;  %vm1485_vm1 = vcmp.lt.s32.totalorder %v1463_v7, 4  ;;  %vm1484_vm4 = vcmp.lt.s32.totalorder %v1463_v7, 3  ;;  %v1490_v35 = vsel %vm1482_vm14, %v1469_v20, %v1472_v34 }
 0x185   : > { %15925 = vst [vmem:[#allocation23_spill] sm:$0xff] %v15924_v5  ;;  %v1487_v28 = vsel %vm1485_vm1, %v1475_v9, 2102212464  ;;  %v1491_v24 = vsel %vm1485_vm1, %v1478_v60, 920167782  ;;  %v9901_v59 = vshrl.u32 %v1615_v29, 30  ;;  %v1494_v17 = vsel %vm1482_vm14, %v1472_v34, %v1475_v9  ;;  %v9905_v62 = vpop.eup %8899 }
 0x186   : > { %vm1483_vm7 = vcmp.lt.s32.totalorder %v1463_v7, 2  ;;  %v1492_v49 = vsel %vm1484_vm4, %v1475_v9, %v1491_v24  ;;  %15927 = vst [vmem:[#allocation25_spill] sm:$0xff] %v9905_v62  ;;  %v1495_v61 = vsel %vm1485_vm1, %v1481_v38, 1326507024  ;;  %v1498_v54 = vshll.u32 %v1458_v39, 8  ;;  %v589_v62 = vpop.f32.mrf.mxu0 }
 0x187   : > { %15926 = vst [vmem:[#allocation24_spill] sm:$0xff] %v9901_v59  ;;  %v1493_v0 = vsel %vm1483_vm7, %v1490_v35, %v1492_v49  ;;  %v1766_v50 = vshrl.u32 %v1765_v23, 23  ;;  %v8132_v26 = vadd.s32 4294967294, %v1310_v1  ;;  %v1486_v32 = vsel %vm1482_vm14, %v1466_v16, %v1469_v20 }
 0x188   : > { %v1488_v22 = vsel %vm1484_vm4, %v1472_v34, %v1487_v28  ;;  %v1496_v29 = vsel %vm1484_vm4, %v1478_v60, %v1495_v61  ;;  %v9912_v8 = vmul.u32.u64.low %v1498_v54, %v1493_v0  ;;  %v9913_v24 = vmul.u32.u64.high %v1498_v54, %v1493_v0, %v9912_v8 }
 0x189   : > { %v1497_v2 = vsel %vm1483_vm7, %v1494_v17, %v1496_v29  ;;  %v8150_v9 = vadd.s32 4294967169, %v1766_v50  ;;  %v1419_v38 = vshll.u32 %v9695_v56, %v9791_v44  ;;  %v1617_v39 = vshll.u32 %v9901_v59, 30 }
 0x18a   : > { %v9919_v23 = vmul.u32.u64.low %v1498_v54, %v1497_v2  ;;  %v9920_v1 = vmul.u32.u64.high %v1498_v54, %v1497_v2, %v9919_v23  ;;  %8901 = vsinq.f32 %v9755_v31  ;;  %v9923_v20 = vmul.f32 %v1116_v48, %v1114_v40 }
 0x18b   : > { %v1489_v60 = vsel %vm1483_vm7, %v1486_v32, %v1488_v22  ;;  %v1772_v34 = vadd.s32 1, %v8150_v9  ;;  %8903 = vcosq.f32 %v9858_v15  ;;  %v9931_v16 = vsel %vm9894_vm12, %v9417_v63, %v9870_v42 }
 0x18c   : > { %v1421_v56 = vor.u32 %v1420_v27, %v1419_v38  ;;  %v9934_v44 = vadd.f32 %v9739_v33, %v589_v62  ;;  %v1426_v2 = vand.u32 2147483647, %v1425_v11  ;;  %vm8133_vm9 = vcmp.lt.s32.totalorder %v8132_v26, 0 }
 0x18d   : > { %v1508_v31 = vadd.s32 1, %v9913_v24  ;;  %vm1773_vm10 = vcmp.gt.s32.totalorder %v1772_v34, 0  ;;  %v9938_v40 = vsub.s32 %v9880_v30, %v1617_v39  ;;  %v1505_v48 = vmul.u32 %v1498_v54, %v1489_v60 }
 0x18e   : > { %vm1507_vm14 = vc.u32 %v9920_v1, %v9912_v8  ;;  %v1774_v7 = vsel %vm1773_vm10, %v1772_v34, 0  ;;  %v15617_v28 = vand.u32 2147483647, %v9865_v47  ;;  %v1428_v11 = vcvt.s32.f32 %v1421_v56 }
 0x18f   : > { %v1509_v27 = vsel %vm1507_vm14, %v1508_v31, %v9913_v24  ;;  %v1776_v35 = vand.u32 31, %v1774_v7  ;;  %v1298_v49 = vadd.s32 %v9712_v21, %v9720_v51  ;;  %v9947_v17 = vsel %vm8133_vm9, 0, %v8132_v26 }
 0x190   : > { %v1510_v30 = vadd.s32 %v1509_v27, %v1505_v48  ;;  %v9952_v50 = vmul.f32 %v1428_v11, %v1426_v2  ;;  %v1620_v32 = vsub.s32 0, %v9938_v40  ;;  %v1769_v21 = vand.u32 8388607, %v15617_v28 }
 0x191   : > { %v1777_v62 = vsub.s32 32, %v1776_v35  ;;  %v1779_v0 = vshll.u32 %v15905_v36, %v1776_v35  ;;  %v1782_v61 = vshll.u32 %v15900_v53, %v1776_v35  ;;  %v1785_v54 = vshll.u32 %v15902_v52, %v1776_v35 }
 0x192   : > { %v1511_v22 = vadd.s32 536870912, %v1510_v30  ;;  %v1788_v29 = vshll.u32 %v15903_v37, %v1776_v35  ;;  %v1314_v9 = vsub.s32 32, %v9947_v17  ;;  %v1775_v39 = vshrl.u32 %v1774_v7, 5 }
 0x193   : > { %v1780_v51 = vshrl.u32 %v15900_v53, %v1777_v62  ;;  %v1783_v26 = vshrl.u32 %v15902_v52, %v1777_v62  ;;  %v1786_v24 = vshrl.u32 %v15903_v37, %v1777_v62  ;;  %v1789_v23 = vshrl.u32 %v15913_v19, %v1777_v62 }
 0x194   : > { %v9962_v38 = vshrl.u32 %v1511_v22, 30  ;;  %vm15643_vm1 = vcmp.lt.s32.totalorder %v9446_v43, 0  ;;  %v1791_v2 = vshll.u32 %v15913_v19, %v1776_v35  ;;  %v1318_v31 = vsub.s32 4294967266, %v9947_v17 }
 0x195   : > { %v1781_v60 = vor.u32 %v1780_v51, %v1779_v0  ;;  %v1784_v34 = vor.u32 %v1783_v26, %v1782_v61  ;;  %v1787_v56 = vor.u32 %v1786_v24, %v1785_v54  ;;  %v8143_v48 = vmin.u32 %v1620_v32, %v9938_v40 }
 0x196   : > { %15928 = vst [vmem:[#allocation26_spill] sm:$0xff] %v9962_v38  ;;  %v1513_v27 = vshll.u32 %v9962_v38, 30  ;;  %v1790_v11 = vor.u32 %v1789_v23, %v1788_v29  ;;  %v1770_v28 = vor.u32 8388608, %v1769_v21  ;;  %v1778_v22 = vshrl.u32 %v15905_v36, %v1777_v62 }
 0x197   : > { %v1792_v7 = vshrl.u32 %v15904_v41, %v1777_v62  ;;  %v1661_v42 = vand.u32 2139095040, %v9934_v44  ;;  %v9973_v59 = vpop.eup %8901  ;;  %vm1794_vm4 = vcmp.lt.s32.totalorder %v1775_v39, 1  ;;  %vm1796_vm7 = vcmp.lt.s32.totalorder %v1775_v39, 3 }
 0x198   : > { %15929 = vst [vmem:[#allocation27_spill] sm:$0xff] %v9973_v59  ;;  %v9975_v0 = vsub.s32 %v1510_v30, %v1513_v27  ;;  %vm1797_vm9 = vcmp.lt.s32.totalorder %v1775_v39, 4  ;;  %v9977_v35 = vpop.eup %8903  ;;  %v15931_v61 = vand.u32 2147483647, %v9446_v43  ;;  %v15932_v54 = vmov 0 }
 0x199   : > { %15930 = vst [vmem:[#allocation28_spill] sm:$0xff] %v9977_v35  ;;  %v1793_v32 = vor.u32 %v1792_v7, %v1791_v2  ;;  %v1799_v29 = vsel %vm1797_vm9, %v1787_v56, 2102212464  ;;  %v1802_v62 = vsel %vm1794_vm4, %v1781_v60, %v1784_v34  ;;  %v1803_v21 = vsel %vm1797_vm9, %v1790_v11, 920167782 }
 0x19a   : > { %vm9981_vm10 = vcmp.le.f32.partialorder %v15931_v61, 0.7853982  ;;  %v1319_v51 = vadd.s32 127, %v1318_v31  ;;  %v1622_v26 = vclz %v8143_v48  ;;  %vm1795_vm14 = vcmp.lt.s32.totalorder %v1775_v39, 2 }
 0x19b   : > { %v15933_v54 = vsel %vm9981_vm10, 4294967295, %v15932_v54  ;;  %v1804_v30 = vsel %vm1796_vm7, %v1787_v56, %v1803_v21  ;;  %v1806_v23 = vsel %vm1794_vm4, %v1784_v34, %v1787_v56  ;;  %v1807_v27 = vsel %vm1797_vm9, %v1793_v32, 1326507024 }
 0x19c   : > { %15934 = vst [vmem:[#allocation29_spill] sm:$0xff] %v15933_v54  ;;  %v1805_v24 = vsel %vm1795_vm14, %v1802_v62, %v1804_v30  ;;  %v1810_v38 = vshll.u32 %v1770_v28, 8  ;;  %v1516_v61 = vsub.s32 0, %v9975_v0  ;;  %v1798_v59 = vsel %vm1794_vm4, %v1778_v22, %v1781_v60 }
 0x19d   : > { %v1800_v2 = vsel %vm1796_vm7, %v1784_v34, %v1799_v29  ;;  %v1808_v7 = vsel %vm1796_vm7, %v1790_v11, %v1807_v27  ;;  %v1662_v21 = vshrl.u32 %v1661_v42, 23  ;;  %8905 = vsinq.f32 %v9858_v15 }
 0x19e   : > { %v1809_v31 = vsel %vm1795_vm14, %v1806_v23, %v1808_v7  ;;  %v9994_v48 = vmul.u32.u64.low %v1810_v38, %v1805_v24  ;;  %v9995_v5 = vmul.u32.u64.high %v1810_v38, %v1805_v24, %v9994_v48  ;;  %v15935_v28 = vxor.u32 2147483648, %v9923_v20 }
 0x19f   : > { %v10004_v60 = vmul.u32.u64.low %v1810_v38, %v1809_v31  ;;  %v10005_v22 = vmul.u32.u64.high %v1810_v38, %v1809_v31, %v10004_v60  ;;  %v1316_v34 = vshrl.u32 %v1298_v49, %v1314_v9  ;;  %v8144_v11 = vadd.s32 4294967294, %v1622_v26 }
 0x1a0   : > { %v1119_v56 = vsel %vm15643_vm1, %v15935_v28, %v9923_v20  ;;  %v1801_v32 = vsel %vm1795_vm14, %v1798_v59, %v1800_v2  ;;  %v8146_v29 = vadd.s32 4294967169, %v1662_v21  ;;  %8907 = vcosq.f32 %v9931_v16 }
 0x1a1   : > { %vm15636_vm4 = vcmp.lt.s32.totalorder %v9515_v6, 0  ;;  %v1430_v15 = vxor.u32 2147483648, %v9952_v50  ;;  %v1320_v42 = vshll.u32 %v1319_v51, 23  ;;  %v1315_v62 = vshll.u32 %v9845_v25, %v9947_v17 }
 0x1a2   : > { %v8139_v20 = vmin.u32 %v1516_v61, %v9975_v0  ;;  %v1820_v30 = vadd.s32 1, %v9995_v5  ;;  %v1668_v24 = vadd.s32 1, %v8146_v29  ;;  %8909 = vsinq.f32 %v9931_v16 }
 0x1a3   : > { %v1122_v59 = vsel %vm9981_vm10, %v9446_v43, %v1119_v56  ;;  %v1817_v49 = vmul.u32 %v1810_v38, %v1801_v32  ;;  %vm1819_vm7 = vc.u32 %v10005_v22, %v9994_v48  ;;  %v1317_v9 = vor.u32 %v1316_v34, %v1315_v62  ;;  %v415_v56 = vld [vmem:[%s15560_s3 + $0x10] sm:$0xff] }
 0x1a4   : > { %vm8145_vm9 = vcmp.lt.s32.totalorder %v8144_v11, 0  ;;  %v1821_v39 = vsel %vm1819_vm7, %v1820_v30, %v9995_v5  ;;  %vm1669_vm14 = vcmp.gt.s32.totalorder %v1668_v24, 0  ;;  %v1431_v25 = vsel %vm15636_vm4, %v1430_v15, %v9952_v50  ;;  %v8525_v5 = vpop.f32.mrf.mxu0 }
 0x1a5   : > { %v1321_v17 = vor.u32 4788187, %v1320_v42  ;;  %v1822_v51 = vadd.s32 %v1821_v39, %v1817_v49  ;;  %v15624_v16 = vand.u32 2147483647, %v9934_v44  ;;  %v15936_v26 = vor.u32 %v9575_v3, %v9571_v55  ;;  %v416_v55 = vld [vmem:[%s15560_s3 + $0x18] sm:$0xff]  ;;  %v414_v42 = vld [vmem:[%s15560_s3 + $0x8] sm:$0xff] }
 0x1a6   : > { %8911 = vcosq.f32 %v1122_v59  ;;  %v1518_v23 = vclz %v8139_v20  ;;  %v1670_v27 = vsel %vm1669_vm14, %v1668_v24, 0  ;;  %v15937_v61 = vand.u32 2147483647, %v9515_v6  ;;  %8529 = vmatprep.subr.mxu1 %v416_v55 }
 0x1a7   : > { %v10031_v38 = vsel %vm653_vm3, %v15936_v26, 1326507024  ;;  %8913 = vsinq.f32 %v1122_v59  ;;  %v15938_v50 = vmov 0  ;;  %v10039_v2 = vsel %vm8145_vm9, 0, %v8144_v11  ;;  %8530 = vmatpush3.msra.mxu1 %v416_v55 }
 0x1a8   : > { %vm10035_vm7 = vcmp.le.f32.partialorder %v15937_v61, 0.7853982  ;;  %v1823_v7 = vadd.s32 536870912, %v1822_v51  ;;  %v1324_v31 = vcvt.s32.f32 %v1317_v9  ;;  %v1610_v21 = vadd.s32 %v9823_v46, %v9835_v57  ;;  %8531 = vmatprep.subr.mxu1 %v415_v56 }
 0x1a9   : > { %v15939_v50 = vsel %vm10035_vm7, 4294967295, %v15938_v50  ;;  %v10047_v3 = vsel %vm10035_vm7, %v9515_v6, %v1431_v25  ;;  %v1672_v28 = vand.u32 31, %v1670_v27  ;;  %v1322_v60 = vand.u32 2147483647, %v1321_v17  ;;  %8532 = vmatpush3.msra.mxu1 %v415_v56  ;;  %v413_v17 = vld [vmem:[%s15560_s3] sm:$0xff] }
 0x1aa   : > { %15940 = vst [vmem:[#allocation30_spill] sm:$0xff] %v15939_v50  ;;  %v10054_v34 = vshrl.u32 %v1823_v7, 30  ;;  %v1665_v11 = vand.u32 8388607, %v15624_v16  ;;  %v10059_v32 = vadd.f32 %v9739_v33, %v8525_v5  ;;  %v1626_v29 = vsub.s32 32, %v10039_v2  ;;  %v10071_v59 = vpop.eup %8905  ;;  %8533 = vmatprep.subr.mxu1 %v414_v42 }
 0x1ab   : > { %v1630_v46 = vsub.s32 4294967266, %v10039_v2  ;;  %v8140_v57 = vadd.s32 4294967294, %v1518_v23  ;;  %v1673_v15 = vsub.s32 32, %v1672_v28  ;;  %v10067_v20 = vshrl.u32 %v1670_v27, 5  ;;  %8534 = vmatpush3.msra.mxu1 %v414_v42 }
 0x1ac   : > { %15941 = vst [vmem:[#allocation31_spill] sm:$0xff] %v10054_v34  ;;  %v1825_v62 = vshll.u32 %v10054_v34, 30  ;;  %v1675_v30 = vshll.u32 %v15905_v36, %v1672_v28  ;;  %v1678_v24 = vshll.u32 %v15900_v53, %v1672_v28  ;;  %v1681_v39 = vshll.u32 %v15902_v52, %v1672_v28  ;;  %8535 = vmatprep.subr.mxu1 %v413_v17 }
 0x1ad   : > { %v1676_v49 = vshrl.u32 %v15900_v53, %v1673_v15  ;;  %v1679_v9 = vshrl.u32 %v15902_v52, %v1673_v15  ;;  %v1682_v25 = vshrl.u32 %v15903_v37, %v1673_v15  ;;  %v1684_v26 = vshll.u32 %v15903_v37, %v1672_v28  ;;  %v10084_v61 = vpop.eup %8907  ;;  %8536 = vmatpush3.msra.mxu1 %v413_v17 }
 0x1ae   : > { %v1685_v23 = vshrl.u32 %v15913_v19, %v1673_v15  ;;  %v1687_v27 = vshll.u32 %v15913_v19, %v1672_v28  ;;  %v1973_v5 = vand.u32 2139095040, %v10059_v32  ;;  %15942 = vst [vmem:[#allocation32_spill] sm:$0xff] %v10084_v61  ;;  %v1688_v16 = vshrl.u32 %v15904_v41, %v1673_v15 }
 0x1af   : > { %v1677_v7 = vor.u32 %v1676_v49, %v1675_v30  ;;  %v1680_v55 = vor.u32 %v1679_v9, %v1678_v24  ;;  %v1683_v56 = vor.u32 %v1682_v25, %v1681_v39  ;;  %v10087_v34 = vmul.f32 %v1324_v31, %v1322_v60  ;;  %v10091_v63 = vpop.eup %8909 }
 0x1b0   : > { %v1628_v50 = vshrl.u32 %v1610_v21, %v1626_v29  ;;  %v10089_v6 = vsub.s32 %v1822_v51, %v1825_v62  ;;  %v1686_v54 = vor.u32 %v1685_v23, %v1684_v26  ;;  %15943 = vst [vmem:[#allocation33_spill] sm:$0xff] %v10091_v63  ;;  %v1631_v28 = vadd.s32 127, %v1630_v46 }
 0x1b1   : > { %v1666_v43 = vor.u32 8388608, %v1665_v11  ;;  %v1689_v42 = vor.u32 %v1688_v16, %v1687_v27  ;;  %vm1690_vm9 = vcmp.lt.s32.totalorder %v10067_v20, 1  ;;  %vm8141_vm14 = vcmp.lt.s32.totalorder %v8140_v57, 0  ;;  %v599_v27 = vpop.f32.mrf.mxu0 }
 0x1b2   : > { %vm1693_vm0 = vcmp.lt.s32.totalorder %v10067_v20, 4  ;;  %v1698_v30 = vsel %vm1690_vm9, %v1677_v7, %v1680_v55  ;;  %v1974_v31 = vshrl.u32 %v1973_v5, 23  ;;  %vm1692_vm4 = vcmp.lt.s32.totalorder %v10067_v20, 3 }
 0x1b3   : > { %v1699_v51 = vsel %vm1693_vm0, %v1686_v54, 920167782  ;;  %v1702_v21 = vsel %vm1690_vm9, %v1680_v55, %v1683_v56  ;;  %v1703_v60 = vsel %vm1693_vm0, %v1689_v42, 1326507024  ;;  %v10100_v29 = vpop.eup %8911  ;;  %v1828_v16 = vsub.s32 0, %v10089_v6 }
 0x1b4   : > { %15944 = vst [vmem:[#allocation34_spill] sm:$0xff] %v10100_v29  ;;  %vm1691_vm8 = vcmp.lt.s32.totalorder %v10067_v20, 2  ;;  %v1695_v11 = vsel %vm1693_vm0, %v1683_v56, 2102212464  ;;  %v1700_v46 = vsel %vm1692_vm4, %v1683_v56, %v1699_v51  ;;  %v10106_v62 = vpop.eup %8913  ;;  %v1674_v24 = vshrl.u32 %v15905_v36, %v1673_v15 }
 0x1b5   : > { %15945 = vst [vmem:[#allocation35_spill] sm:$0xff] %v10106_v62  ;;  %v1701_v49 = vsel %vm1691_vm8, %v1698_v30, %v1700_v46  ;;  %v1704_v9 = vsel %vm1692_vm4, %v1686_v54, %v1703_v60  ;;  %v1706_v39 = vshll.u32 %v1666_v43, 8  ;;  %v10114_v25 = vsel %vm8141_vm14, 0, %v8140_v57 }
 0x1b6   : > { %v1705_v17 = vsel %vm1691_vm8, %v1702_v21, %v1704_v9  ;;  %v15638_v26 = vand.u32 2147483647, %v10059_v32  ;;  %v8158_v23 = vadd.s32 4294967169, %v1974_v31  ;;  %v1694_v15 = vsel %vm1690_vm9, %v1674_v24, %v1677_v7 }
 0x1b7   : > { %v1696_v5 = vsel %vm1692_vm4, %v1680_v55, %v1695_v11  ;;  %v10123_v56 = vmul.u32.u64.low %v1706_v39, %v1705_v17  ;;  %v10124_v42 = vmul.u32.u64.high %v1706_v39, %v1705_v17, %v10123_v56  ;;  %v8151_v43 = vmin.u32 %v1828_v16, %v10089_v6 }
 0x1b8   : > { %v10127_v54 = vmul.u32.u64.low %v1706_v39, %v1701_v49  ;;  %v10128_v57 = vmul.u32.u64.high %v1706_v39, %v1701_v49, %v10127_v54  ;;  %v1980_v30 = vadd.s32 1, %v8158_v23  ;;  %8915 = vcosq.f32 %v10047_v3 }
 0x1b9   : > { %v1627_v31 = vshll.u32 %v9938_v40, %v10039_v2  ;;  %v1632_v51 = vshll.u32 %v1631_v28, 23  ;;  %v10135_v7 = vadd.f32 %v9739_v33, %v599_v27  ;;  %v1522_v55 = vsub.s32 32, %v10114_v25 }
 0x1ba   : > { %v1526_v21 = vsub.s32 4294967266, %v10114_v25  ;;  %v1697_v60 = vsel %vm1691_vm8, %v1694_v15, %v1696_v5  ;;  %vm1981_vm0 = vcmp.gt.s32.totalorder %v1980_v30, 0  ;;  %v1506_v11 = vadd.s32 %v9912_v8, %v9920_v1 }
 0x1bb   : > { %vm1715_vm4 = vc.u32 %v10124_v42, %v10127_v54  ;;  %v1982_v40 = vsel %vm1981_vm0, %v1980_v30, 0  ;;  %v10146_v2 = vor.u32 %v1628_v50, %v1627_v31  ;;  %v1830_v28 = vclz %v8151_v43 }
 0x1bc   : > { %v1716_v46 = vadd.s32 1, %v10128_v57  ;;  %v1977_v24 = vand.u32 8388607, %v15638_v26  ;;  %v10151_v20 = vor.u32 4788187, %v1632_v51  ;;  %v1713_v9 = vmul.u32 %v1706_v39, %v1697_v60 }
 0x1bd   : > { %v1984_v17 = vand.u32 31, %v1982_v40  ;;  %v10155_v8 = vshrl.u32 %v1506_v11, %v1522_v55  ;;  %v10157_v1 = vadd.s32 127, %v1526_v21  ;;  %v1869_v23 = vand.u32 2139095040, %v10135_v7 }
 0x1be   : > { %v1717_v50 = vsel %vm1715_vm4, %v1716_v46, %v10128_v57  ;;  %v8152_v43 = vadd.s32 4294967294, %v1830_v28  ;;  %v1978_v30 = vor.u32 8388608, %v1977_v24  ;;  %v1983_v55 = vshrl.u32 %v1982_v40, 5 }
 0x1bf   : > { %v1718_v27 = vadd.s32 %v1717_v50, %v1713_v9  ;;  %v1985_v15 = vsub.s32 32, %v1984_v17  ;;  %v1987_v5 = vshll.u32 %v15905_v36, %v1984_v17  ;;  %v1990_v56 = vshll.u32 %v15900_v53, %v1984_v17 }
 0x1c0   : > { %v1993_v31 = vshll.u32 %v15902_v52, %v1984_v17  ;;  %v1996_v39 = vshll.u32 %v15903_v37, %v1984_v17  ;;  %v1999_v46 = vshll.u32 %v15913_v19, %v1984_v17  ;;  %v1870_v9 = vshrl.u32 %v1869_v23, 23 }
 0x1c1   : > { %v1719_v51 = vadd.s32 536870912, %v1718_v27  ;;  %v1988_v21 = vshrl.u32 %v15900_v53, %v1985_v15  ;;  %v1991_v57 = vshrl.u32 %v15902_v52, %v1985_v15  ;;  %v1994_v60 = vshrl.u32 %v15903_v37, %v1985_v15 }
 0x1c2   : > { %v1997_v11 = vshrl.u32 %v15913_v19, %v1985_v15  ;;  %vm15657_vm8 = vcmp.lt.s32.totalorder %v9597_v58, 0  ;;  %v2000_v26 = vshrl.u32 %v15904_v41, %v1985_v15  ;;  %v1986_v40 = vshrl.u32 %v15905_v36, %v1985_v15 }
 0x1c3   : > { %v10171_v28 = vshrl.u32 %v1719_v51, 30  ;;  %v1989_v24 = vor.u32 %v1988_v21, %v1987_v5  ;;  %v1992_v50 = vor.u32 %v1991_v57, %v1990_v56  ;;  %v1995_v49 = vor.u32 %v1994_v60, %v1993_v31 }
 0x1c4   : > { %v1998_v16 = vor.u32 %v1997_v11, %v1996_v39  ;;  %v2018_v61 = vshll.u32 %v1978_v30, 8  ;;  %v2001_v29 = vor.u32 %v2000_v26, %v1999_v46  ;;  %vm2002_vm9 = vcmp.lt.s32.totalorder %v1983_v55, 1 }
 0x1c5   : > { %15946 = vst [vmem:[#allocation36_spill] sm:$0xff] %v10171_v28  ;;  %v1721_v63 = vshll.u32 %v10171_v28, 30  ;;  %vm2005_vm14 = vcmp.lt.s32.totalorder %v1983_v55, 4  ;;  %v10176_v17 = vpop.eup %8915  ;;  %vm8153_vm0 = vcmp.lt.s32.totalorder %v8152_v43, 0  ;;  %v2010_v51 = vsel %vm2002_vm9, %v1989_v24, %v1992_v50 }
 0x1c6   : > { %15947 = vst [vmem:[#allocation37_spill] sm:$0xff] %v10176_v17  ;;  %v2007_v23 = vsel %vm2005_vm14, %v1995_v49, 2102212464  ;;  %v8154_v62 = vadd.s32 4294967169, %v1870_v9  ;;  %vm2004_vm4 = vcmp.lt.s32.totalorder %v1983_v55, 3  ;;  %v2014_v21 = vsel %vm2002_vm9, %v1992_v50, %v1995_v49 }
 0x1c7   : > { %v10178_v5 = vsub.s32 %v1718_v27, %v1721_v63  ;;  %v2011_v56 = vsel %vm2005_vm14, %v1998_v16, 920167782  ;;  %v15948_v15 = vand.u32 2147483647, %v9597_v58  ;;  %v15949_v30 = vmov 0 }
 0x1c8   : > { %vm2003_vm15 = vcmp.lt.s32.totalorder %v1983_v55, 2  ;;  %v2006_v26 = vsel %vm2002_vm9, %v1986_v40, %v1989_v24  ;;  %v2012_v31 = vsel %vm2004_vm4, %v1995_v49, %v2011_v56  ;;  %v2015_v39 = vsel %vm2005_vm14, %v2001_v29, 1326507024 }
 0x1c9   : > { %vm10182_vm1 = vcmp.le.f32.partialorder %v15948_v15, 0.7853982  ;;  %v1724_v57 = vsub.s32 0, %v10178_v5  ;;  %v2008_v60 = vsel %vm2004_vm4, %v1992_v50, %v2007_v23  ;;  %v2013_v11 = vsel %vm2003_vm15, %v2010_v51, %v2012_v31 }
 0x1ca   : > { %v15950_v30 = vsel %vm10182_vm1, 4294967295, %v15949_v30  ;;  %v2016_v63 = vsel %vm2004_vm4, %v1998_v16, %v2015_v39  ;;  %v1528_v27 = vshll.u32 %v10157_v1, 23  ;;  %v10195_v15 = vsel %vm8153_vm0, 0, %v8152_v43  ;;  %v8528_v39 = vpop.f32.mrf.mxu0 }
 0x1cb   : > { %15951 = vst [vmem:[#allocation38_spill] sm:$0xff] %v15950_v30  ;;  %v2017_v46 = vsel %vm2003_vm15, %v2014_v21, %v2016_v63  ;;  %v10190_v9 = vmul.u32.u64.low %v2018_v61, %v2013_v11  ;;  %v10191_v17 = vmul.u32.u64.high %v2018_v61, %v2013_v11, %v10190_v9  ;;  %v8147_v49 = vmin.u32 %v1724_v57, %v10178_v5 }
 0x1cc   : > { %v10198_v29 = vmul.u32.u64.low %v2018_v61, %v2017_v46  ;;  %v10199_v24 = vmul.u32.u64.high %v2018_v61, %v2017_v46, %v10198_v29  ;;  %v15952_v50 = vxor.u32 2147483648, %v10087_v34  ;;  %v1636_v1 = vcvt.s32.f32 %v10146_v2 }
 0x1cd   : > { %v2009_v40 = vsel %vm2003_vm15, %v2006_v26, %v2008_v60  ;;  %v1876_v23 = vadd.s32 1, %v8154_v62  ;;  %v1634_v51 = vand.u32 2147483647, %v10151_v20  ;;  %v15953_v43 = vshll.u32 %v9975_v0, %v10114_v25 }
 0x1ce   : > { %v1327_v16 = vsel %vm15657_vm8, %v15952_v50, %v10087_v34  ;;  %v1726_v21 = vclz %v8147_v49  ;;  %v15646_v31 = vand.u32 2147483647, %v10135_v7  ;;  %v10216_v57 = vor.u32 4788187, %v1528_v27 }
 0x1cf   : > { %v10213_v56 = vor.u32 %v10155_v8, %v15953_v43  ;;  %v1834_v34 = vsub.s32 32, %v10195_v15  ;;  %v2028_v2 = vadd.s32 1, %v10191_v17  ;;  %vm1877_vm15 = vcmp.gt.s32.totalorder %v1876_v23, 0 }
 0x1d0   : > { %v1838_v62 = vsub.s32 4294967266, %v10195_v15  ;;  %v2025_v20 = vmul.u32 %v2018_v61, %v2009_v40  ;;  %vm2027_vm9 = vc.u32 %v10199_v24, %v10190_v9  ;;  %v1878_v0 = vsel %vm1877_vm15, %v1876_v23, 0 }
 0x1d1   : > { %v8148_v25 = vadd.s32 4294967294, %v1726_v21  ;;  %v2029_v8 = vsel %vm2027_vm9, %v2028_v2, %v10191_v17  ;;  %v1880_v55 = vand.u32 31, %v1878_v0  ;;  %v10225_v26 = vadd.f32 %v9739_v33, %v8528_v39 }
 0x1d2   : > { %v10230_v60 = vsel %vm10182_vm1, %v9597_v58, %v1327_v16  ;;  %v10232_v11 = vmul.f32 %v1636_v1, %v1634_v51  ;;  %v1818_v61 = vadd.s32 %v9994_v48, %v10005_v22  ;;  %v2030_v63 = vadd.s32 %v2029_v8, %v2025_v20 }
 0x1d3   : > { %v1881_v33 = vsub.s32 32, %v1880_v55  ;;  %v10242_v29 = vadd.s32 127, %v1838_v62  ;;  %v1873_v16 = vand.u32 8388607, %v15646_v31  ;;  %vm8149_vm14 = vcmp.lt.s32.totalorder %v8148_v25, 0 }
 0x1d4   : > { %v10240_v49 = vshrl.u32 %v1818_v61, %v1834_v34  ;;  %v2031_v50 = vadd.s32 536870912, %v2030_v63  ;;  %v2181_v1 = vand.u32 2139095040, %v10225_v26  ;;  %v1883_v23 = vshll.u32 %v15905_v36, %v1880_v55 }
 0x1d5   : > { %v1884_v48 = vshrl.u32 %v15900_v53, %v1881_v33  ;;  %v1887_v22 = vshrl.u32 %v15902_v52, %v1881_v33  ;;  %v1886_v51 = vshll.u32 %v15900_v53, %v1880_v55  ;;  %v1890_v43 = vshrl.u32 %v15903_v37, %v1881_v33 }
 0x1d6   : > { %v10249_v40 = vshrl.u32 %v2031_v50, 30  ;;  %v1879_v21 = vshrl.u32 %v1878_v0, 5  ;;  %v1889_v39 = vshll.u32 %v15902_v52, %v1880_v55  ;;  %v1892_v34 = vshll.u32 %v15903_v37, %v1880_v55 }
 0x1d7   : > { %v1893_v2 = vshrl.u32 %v15913_v19, %v1881_v33  ;;  %v10257_v62 = vsel %vm8149_vm14, 0, %v8148_v25  ;;  %v1885_v8 = vor.u32 %v1884_v48, %v1883_v23  ;;  %v1888_v61 = vor.u32 %v1887_v22, %v1886_v51 }
 0x1d8   : > { %15954 = vst [vmem:[#allocation39_spill] sm:$0xff] %v10249_v40  ;;  %v2033_v20 = vshll.u32 %v10249_v40, 30  ;;  %v1891_v50 = vor.u32 %v1890_v43, %v1889_v39  ;;  %v1895_v17 = vshll.u32 %v15913_v19, %v1880_v55  ;;  %v1896_v46 = vshrl.u32 %v15904_v41, %v1881_v33 }
 0x1d9   : > { %v1894_v31 = vor.u32 %v1893_v2, %v1892_v34  ;;  %v1840_v0 = vshll.u32 %v10242_v29, 23  ;;  %v1874_v28 = vor.u32 8388608, %v1873_v16  ;;  %v1734_v25 = vsub.s32 4294967266, %v10257_v62 }
 0x1da   : > { %v10263_v27 = vsub.s32 %v2030_v63, %v2033_v20  ;;  %v1897_v58 = vor.u32 %v1896_v46, %v1895_v17  ;;  %vm1898_vm0 = vcmp.lt.s32.totalorder %v1879_v21, 1  ;;  %v2182_v40 = vshrl.u32 %v2181_v1, 23 }
 0x1db   : > { %vm1900_vm4 = vcmp.lt.s32.totalorder %v1879_v21, 3  ;;  %vm1901_vm15 = vcmp.lt.s32.totalorder %v1879_v21, 4  ;;  %v1906_v55 = vsel %vm1898_vm0, %v1885_v8, %v1888_v61  ;;  %v1910_v29 = vsel %vm1898_vm0, %v1888_v61, %v1891_v50 }
 0x1dc   : > { %v2036_v48 = vsub.s32 0, %v10263_v27  ;;  %v1903_v22 = vsel %vm1901_vm15, %v1891_v50, 2102212464  ;;  %v1907_v23 = vsel %vm1901_vm15, %v1894_v31, 920167782  ;;  %vm15656_vm9 = vcmp.lt.s32.totalorder %v9647_v45, 0 }
 0x1dd   : > { %v1911_v63 = vsel %vm1901_vm15, %v1897_v58, 1326507024  ;;  %v1882_v51 = vshrl.u32 %v15905_v36, %v1881_v33  ;;  %vm1899_vm14 = vcmp.lt.s32.totalorder %v1879_v21, 2  ;;  %v1908_v46 = vsel %vm1900_vm4, %v1891_v50, %v1907_v23  ;;  %v609_v23 = vpop.f32.mrf.mxu0 }
 0x1de   : > { %v8159_v16 = vmin.u32 %v2036_v48, %v10263_v27  ;;  %v1909_v17 = vsel %vm1899_vm14, %v1906_v55, %v1908_v46  ;;  %v1912_v1 = vsel %vm1900_vm4, %v1894_v31, %v1911_v63  ;;  %v1914_v43 = vshll.u32 %v1874_v28, 8 }
 0x1df   : > { %v8166_v39 = vadd.s32 4294967169, %v2182_v40  ;;  %v1902_v2 = vsel %vm1898_vm0, %v1882_v51, %v1885_v8  ;;  %v1904_v58 = vsel %vm1900_vm4, %v1888_v61, %v1903_v22  ;;  %v1913_v20 = vsel %vm1899_vm14, %v1910_v29, %v1912_v1 }
 0x1e0   : > { %v2038_v34 = vclz %v8159_v16  ;;  %v10279_v30 = vmul.u32.u64.low %v1914_v43, %v1913_v20  ;;  %v10280_v48 = vmul.u32.u64.high %v1914_v43, %v1913_v20, %v10279_v30  ;;  %v1730_v50 = vsub.s32 32, %v10257_v62 }
 0x1e1   : > { %v10282_v33 = vmul.u32.u64.low %v1914_v43, %v1909_v17  ;;  %v10283_v35 = vmul.u32.u64.high %v1914_v43, %v1909_v17, %v10282_v33  ;;  %v1735_v55 = vadd.s32 127, %v1734_v25  ;;  %v15955_v28 = vand.u32 2147483647, %v10225_v26 }
 0x1e2   : > { %v2188_v40 = vadd.s32 1, %v8166_v39  ;;  %8917 = vsinq.f32 %v10047_v3  ;;  %v1638_v8 = vxor.u32 2147483648, %v10232_v11  ;;  %v15956_v61 = vand.u32 2147483647, %v10216_v57 }
 0x1e3   : > { %v2185_v31 = vand.u32 8388607, %v15955_v28  ;;  %v15957_v30 = vcvt.s32.f32 %v10213_v56  ;;  %v8160_v29 = vadd.s32 4294967294, %v2038_v34  ;;  %v15958_v63 = vshll.u32 %v10089_v6, %v10195_v15  ;;  %v9152_v6 = vld [vmem:[%s15559_s2] ss:$0 sm:$0xff] }
 0x1e4   : > { %v1714_v16 = vadd.s32 %v10127_v54, %v10124_v42  ;;  %v1905_v3 = vsel %vm1899_vm14, %v1902_v2, %v1904_v58  ;;  %vm2189_vm0 = vcmp.gt.s32.totalorder %v2188_v40, 0  ;;  %8919 = vcosq.f32 %v10230_v60 }
 0x1e5   : > { %v10295_v22 = vmul.f32 %v15957_v30, %v15956_v61  ;;  %v10301_v25 = vor.u32 %v10240_v49, %v15958_v63  ;;  %v10307_v57 = vor.u32 4788187, %v1840_v0  ;;  %vm1923_vm4 = vc.u32 %v10280_v48, %v10282_v33 }
 0x1e6   : > { %v10314_v15 = vadd.f32 %v9152_v6, %v609_v23  ;;  %v1732_v56 = vshrl.u32 %v1714_v16, %v1730_v50  ;;  %v1736_v49 = vshll.u32 %v1735_v55, 23  ;;  %v1924_v42 = vadd.s32 1, %v10283_v35 }
 0x1e7   : > { %v2186_v54 = vor.u32 8388608, %v2185_v31  ;;  %v10320_v21 = vsel %vm15656_vm9, %v1638_v8, %v10232_v11  ;;  %vm8161_vm15 = vcmp.lt.s32.totalorder %v8160_v29, 0  ;;  %v1921_v0 = vmul.u32 %v1914_v43, %v1905_v3 }
 0x1e8   : > { %v2190_v51 = vsel %vm2189_vm0, %v2188_v40, 0  ;;  %v1731_v1 = vshll.u32 %v10178_v5, %v10257_v62  ;;  %v1925_v39 = vsel %vm1923_vm4, %v1924_v42, %v10283_v35  ;;  %v1842_v34 = vand.u32 2147483647, %v10307_v57 }
 0x1e9   : > { %v1926_v2 = vadd.s32 %v1925_v39, %v1921_v0  ;;  %v2192_v58 = vand.u32 31, %v2190_v51  ;;  %v15655_v20 = vand.u32 2147483647, %v10314_v15  ;;  %v10331_v50 = vor.u32 4788187, %v1736_v49 }
 0x1ea   : > { %v10329_v11 = vor.u32 %v1732_v56, %v1731_v1  ;;  %v10333_v43 = vsel %vm8161_vm15, 0, %v8160_v29  ;;  %v10335_v55 = vshll.u32 %v2186_v54, 8  ;;  %v2191_v62 = vshrl.u32 %v2190_v51, 5 }
 0x1eb   : > { %v1927_v28 = vadd.s32 536870912, %v1926_v2  ;;  %v2193_v31 = vsub.s32 32, %v2192_v58  ;;  %v2195_v5 = vshll.u32 %v15905_v36, %v2192_v58  ;;  %v2198_v35 = vshll.u32 %v15900_v53, %v2192_v58 }
 0x1ec   : > { %v2201_v40 = vshll.u32 %v15902_v52, %v2192_v58  ;;  %v2204_v23 = vshll.u32 %v15903_v37, %v2192_v58  ;;  %v2077_v8 = vand.u32 2139095040, %v10314_v15  ;;  %v10348_v63 = vand.u32 8388607, %v15655_v20 }
 0x1ed   : > { %v10342_v61 = vshrl.u32 %v1927_v28, 30  ;;  %v2196_v30 = vshrl.u32 %v15900_v53, %v2193_v31  ;;  %v2199_v29 = vshrl.u32 %v15902_v52, %v2193_v31  ;;  %v15960_v16 = vand.u32 2147483647, %v9647_v45 }
 0x1ee   : > { %v2046_v57 = vsub.s32 4294967266, %v10333_v43  ;;  %v2202_v6 = vshrl.u32 %v15903_v37, %v2193_v31  ;;  %v2205_v56 = vshrl.u32 %v15913_v19, %v2193_v31  ;;  %v2207_v49 = vshll.u32 %v15913_v19, %v2192_v58 }
 0x1ef   : > { %15959 = vst [vmem:[#allocation40_spill] sm:$0xff] %v10342_v61  ;;  %vm10352_vm14 = vcmp.le.f32.partialorder %v15960_v16, 0.7853982  ;;  %v1929_v42 = vshll.u32 %v10342_v61, 30  ;;  %v2197_v54 = vor.u32 %v2196_v30, %v2195_v5  ;;  %v2200_v0 = vor.u32 %v2199_v29, %v2198_v35  ;;  %v10362_v1 = vpop.eup %8917 }
 0x1f0   : > { %v2208_v51 = vshrl.u32 %v15904_v41, %v2193_v31  ;;  %15963 = vst [vmem:[#allocation41_spill] sm:$0xff] %v10362_v1  ;;  %vm15663_vm0 = vcmp.lt.s32.totalorder %v9742_v18, 0  ;;  %v2203_v39 = vor.u32 %v2202_v6, %v2201_v40  ;;  %v2206_v28 = vor.u32 %v2205_v56, %v2204_v23 }
 0x1f1   : > { %vm2210_vm4 = vcmp.lt.s32.totalorder %v2191_v62, 1  ;;  %v2078_v16 = vshrl.u32 %v2077_v8, 23  ;;  %v10365_v20 = vsub.s32 %v1926_v2, %v1929_v42  ;;  %v2194_v46 = vshrl.u32 %v15905_v36, %v2193_v31  ;;  %v10368_v58 = vpop.eup %8919 }
 0x1f2   : > { %v2209_v17 = vor.u32 %v2208_v51, %v2207_v49  ;;  %vm2213_vm15 = vcmp.lt.s32.totalorder %v2191_v62, 4  ;;  %15964 = vst [vmem:[#allocation42_spill] sm:$0xff] %v10368_v58  ;;  %vm2212_vm9 = vcmp.lt.s32.totalorder %v2191_v62, 3  ;;  %v2218_v35 = vsel %vm2210_vm4, %v2197_v54, %v2200_v0 }
 0x1f3   : > { %v2215_v5 = vsel %vm2213_vm15, %v2203_v39, 2102212464  ;;  %v2219_v30 = vsel %vm2213_vm15, %v2206_v28, 920167782  ;;  %v1932_v29 = vsub.s32 0, %v10365_v20  ;;  %vm2211_vm8 = vcmp.lt.s32.totalorder %v2191_v62, 2 }
 0x1f4   : > { %v2220_v40 = vsel %vm2212_vm9, %v2203_v39, %v2219_v30  ;;  %v2222_v23 = vsel %vm2210_vm4, %v2200_v0, %v2203_v39  ;;  %v2042_v2 = vsub.s32 32, %v10333_v43  ;;  %v2223_v31 = vsel %vm2213_vm15, %v2209_v17, 1326507024 }
 0x1f5   : > { %v2221_v8 = vsel %vm2211_vm8, %v2218_v35, %v2220_v40  ;;  %v8162_v6 = vadd.s32 4294967169, %v2078_v16  ;;  %v8155_v56 = vmin.u32 %v1932_v29, %v10365_v20  ;;  %v2214_v49 = vsel %vm2210_vm4, %v2194_v46, %v2197_v54 }
 0x1f6   : > { %v2216_v42 = vsel %vm2212_vm9, %v2200_v0, %v2215_v5  ;;  %v2224_v51 = vsel %vm2212_vm9, %v2206_v28, %v2223_v31  ;;  %v2047_v61 = vadd.s32 127, %v2046_v57  ;;  %v10387_v17 = vsel %vm10352_vm14, %v9647_v45, %v10320_v21 }
 0x1f7   : > { %v2225_v1 = vsel %vm2211_vm8, %v2222_v23, %v2224_v51  ;;  %v10379_v58 = vmul.u32.u64.low %v10335_v55, %v2221_v8  ;;  %v10380_v30 = vmul.u32.u64.high %v10335_v55, %v2221_v8, %v10379_v58  ;;  %v1934_v39 = vclz %v8155_v56 }
 0x1f8   : > { %v10390_v16 = vmul.u32.u64.low %v10335_v55, %v2225_v1  ;;  %v10391_v46 = vmul.u32.u64.high %v10335_v55, %v2225_v1, %v10390_v16  ;;  %v15965_v57 = vcvt.s32.f32 %v10301_v25  ;;  %v2026_v0 = vadd.s32 %v10190_v9, %v10199_v24 }
 0x1f9   : > { %v2217_v28 = vsel %vm2211_vm8, %v2214_v49, %v2216_v42  ;;  %v2084_v5 = vadd.s32 1, %v8162_v6  ;;  %v15966_v35 = vxor.u32 2147483648, %v10295_v22  ;;  %v1738_v1 = vand.u32 2147483647, %v10331_v50 }
 0x1fa   : > { %v10395_v54 = vmul.f32 %v15965_v57, %v1842_v34  ;;  %v1740_v29 = vcvt.s32.f32 %v10329_v11  ;;  %v2082_v25 = vor.u32 8388608, %v10348_v63  ;;  %v2044_v34 = vshrl.u32 %v2026_v0, %v2042_v2 }
 0x1fb   : > { %v10405_v21 = vsel %vm15663_vm0, %v15966_v35, %v10295_v22  ;;  %v2048_v40 = vshll.u32 %v2047_v61, 23  ;;  %v2236_v9 = vadd.s32 1, %v10380_v30  ;;  %vm2085_vm9 = vcmp.gt.s32.totalorder %v2084_v5, 0 }
 0x1fc   : > { %v8156_v24 = vadd.s32 4294967294, %v1934_v39  ;;  %v2233_v62 = vmul.u32 %v10335_v55, %v2217_v28  ;;  %vm2235_vm8 = vc.u32 %v10391_v46, %v10379_v58  ;;  %v2086_v23 = vsel %vm2085_vm9, %v2084_v5, 0 }
 0x1fd   : > { %v1846_v22 = vxor.u32 2147483648, %v10395_v54  ;;  %v2043_v50 = vshll.u32 %v10263_v27, %v10333_v43  ;;  %v2237_v11 = vsel %vm2235_vm8, %v2236_v9, %v10380_v30  ;;  %v2088_v63 = vand.u32 31, %v2086_v23 }
 0x1fe   : > { %v10418_v2 = vmul.f32 %v1740_v29, %v1738_v1  ;;  %v10422_v61 = vadd.s32 %v10282_v33, %v10280_v48  ;;  %v2238_v8 = vadd.s32 %v2237_v11, %v2233_v62  ;;  %v15662_v55 = vand.u32 2147483647, %v9383_v14 }
 0x1ff   : > { %v10425_v31 = vor.u32 %v2044_v34, %v2043_v50  ;;  %v10427_v6 = vor.u32 4788187, %v2048_v40  ;;  %v2089_v56 = vsub.s32 32, %v2088_v63  ;;  %v10429_v49 = vshll.u32 %v2082_v25, 8 }
 0x200   : > { %vm8157_vm4 = vcmp.lt.s32.totalorder %v8156_v24, 0  ;;  %v2239_v27 = vadd.s32 536870912, %v2238_v8  ;;  %v2091_v43 = vshll.u32 %v15905_v36, %v2088_v63  ;;  %v2094_v42 = vshll.u32 %v15900_v53, %v2088_v63 }
 0x201   : > { %v2092_v51 = vshrl.u32 %v15900_v53, %v2089_v56  ;;  %v2095_v48 = vshrl.u32 %v15902_v52, %v2089_v56  ;;  %v2097_v33 = vshll.u32 %v15902_v52, %v2088_v63  ;;  %v2098_v30 = vshrl.u32 %v15903_v37, %v2089_v56 }
 0x202   : > { %v10437_v39 = vshrl.u32 %v2239_v27, 30  ;;  %v2087_v16 = vshrl.u32 %v2086_v23, 5  ;;  %v2100_v57 = vshll.u32 %v15903_v37, %v2088_v63  ;;  %v2101_v0 = vshrl.u32 %v15913_v19, %v2089_v56 }
 0x203   : > { %v2052_v28 = vcvt.s32.f32 %v10425_v31  ;;  %v2093_v5 = vor.u32 %v2092_v51, %v2091_v43  ;;  %v2096_v35 = vor.u32 %v2095_v48, %v2094_v42  ;;  %v2099_v1 = vor.u32 %v2098_v30, %v2097_v33 }
 0x204   : > { %v2241_v29 = vshll.u32 %v10437_v39, 30  ;;  %v2102_v25 = vor.u32 %v2101_v0, %v2100_v57  ;;  %v10445_v34 = vand.u32 8388607, %v15662_v55  ;;  %v636_v40 = vshrl.u32 %v15900_v53, %v9490_v12 }
 0x205   : > { %v10450_v9 = vsel %vm8157_vm4, 0, %v8156_v24  ;;  %v2103_v62 = vshll.u32 %v15913_v19, %v2088_v63  ;;  %v2104_v23 = vshrl.u32 %v15904_v41, %v2089_v56  ;;  %v639_v50 = vshrl.u32 %v15902_v52, %v9490_v12 }
 0x206   : > { %v10456_v11 = vsub.s32 %v2238_v8, %v2241_v29  ;;  %vm2106_vm15 = vcmp.lt.s32.totalorder %v2087_v16, 1  ;;  %vm2108_vm9 = vcmp.lt.s32.totalorder %v2087_v16, 3  ;;  %vm2109_vm8 = vcmp.lt.s32.totalorder %v2087_v16, 4 }
 0x207   : > { %v2105_v27 = vor.u32 %v2104_v23, %v2103_v62  ;;  %v2111_v43 = vsel %vm2109_vm8, %v2099_v1, 2102212464  ;;  %v2114_v42 = vsel %vm2106_vm15, %v2093_v5, %v2096_v35  ;;  %v2115_v51 = vsel %vm2109_vm8, %v2102_v25, 920167782 }
 0x208   : > { %v2244_v24 = vsub.s32 0, %v10456_v11  ;;  %v2090_v48 = vshrl.u32 %v15905_v36, %v2089_v56  ;;  %vm2107_vm4 = vcmp.lt.s32.totalorder %v2087_v16, 2  ;;  %v2116_v63 = vsel %vm2108_vm9, %v2099_v1, %v2115_v51 }
 0x209   : > { %v1942_v33 = vsub.s32 4294967266, %v10450_v9  ;;  %v2117_v8 = vsel %vm2107_vm4, %v2114_v42, %v2116_v63  ;;  %v2118_v30 = vsel %vm2106_vm15, %v2096_v35, %v2099_v1  ;;  %v2119_v57 = vsel %vm2109_vm8, %v2105_v27, 1326507024 }
 0x20a   : > { %v8167_v0 = vmin.u32 %v2244_v24, %v10456_v11  ;;  %v2110_v29 = vsel %vm2106_vm15, %v2090_v48, %v2093_v5  ;;  %v2112_v62 = vsel %vm2108_vm9, %v2096_v35, %v2111_v43  ;;  %v2120_v23 = vsel %vm2108_vm9, %v2102_v25, %v2119_v57 }
 0x20b   : > { %v2121_v56 = vsel %vm2107_vm4, %v2118_v30, %v2120_v23  ;;  %v10471_v55 = vmul.u32.u64.low %v10429_v49, %v2117_v8  ;;  %v10472_v51 = vmul.u32.u64.high %v10429_v49, %v2117_v8, %v10471_v55  ;;  %v635_v42 = vshll.u32 %v15905_v36, %v9460_v13 }
 0x20c   : > { %v2246_v1 = vclz %v8167_v0  ;;  %v10478_v27 = vmul.u32.u64.low %v10429_v49, %v2121_v56  ;;  %v10479_v24 = vmul.u32.u64.high %v10429_v49, %v2121_v56, %v10478_v27  ;;  %v638_v5 = vshll.u32 %v15900_v53, %v9460_v13 }
 0x20d   : > { %v1943_v35 = vadd.s32 127, %v1942_v33  ;;  %v2113_v25 = vsel %vm2107_vm4, %v2110_v29, %v2112_v62  ;;  %v641_v43 = vshll.u32 %v15902_v52, %v9460_v13  ;;  %v642_v48 = vshrl.u32 %v15903_v37, %v9490_v12  ;;  %v15970_v27 = vld [vmem:[#allocation13_spill] sm:$0xff]  ;;  %v16003_v37 = vld [vmem:[#allocation15_spill] sm:$0xff] }
 0x20e   : > { %v1938_v63 = vsub.s32 32, %v10450_v9  ;;  %v8168_v8 = vadd.s32 4294967294, %v2246_v1  ;;  %v637_v30 = vor.u32 %v636_v40, %v635_v42  ;;  %v640_v57 = vor.u32 %v639_v50, %v638_v5 }
 0x20f   : > { %v2050_v0 = vand.u32 2147483647, %v10427_v6  ;;  %v2132_v23 = vadd.s32 1, %v10472_v51  ;;  %v634_v33 = vshrl.u32 %v15905_v36, %v9490_v12  ;;  %v643_v16 = vor.u32 %v642_v48, %v641_v43 }
 0x210   : > { %vm8169_vm15 = vcmp.lt.s32.totalorder %v8168_v8, 0  ;;  %v2129_v29 = vmul.u32 %v10429_v49, %v2113_v25  ;;  %vm2131_vm9 = vc.u32 %v10479_v24, %v10471_v55  ;;  %v626_v13 = vor.u32 8388608, %v10445_v34 }
 0x211   : > { %v15967_v62 = vand.u32 2147483647, %v9742_v18  ;;  %vm15666_vm4 = vcmp.lt.s32.totalorder %v9865_v47, 0  ;;  %v1944_v6 = vshll.u32 %v1943_v35, 23  ;;  %v10504_v50 = vsel %vm8169_vm15, 0, %v8168_v8 }
 0x212   : > { %v2133_v12 = vsel %vm2131_vm9, %v2132_v23, %v10472_v51  ;;  %vm650_vm0 = vcmp.lt.s32.totalorder %v9552_v4, 1  ;;  %v1940_v49 = vshrl.u32 %v10422_v61, %v1938_v63  ;;  %vm652_vm13 = vcmp.lt.s32.totalorder %v9552_v4, 3 }
 0x213   : > { %vm10499_vm8 = vcmp.le.f32.partialorder %v15967_v62, 0.7853982  ;;  %v2134_v56 = vadd.s32 %v2133_v12, %v2129_v29  ;;  %v658_v34 = vsel %vm650_vm0, %v637_v30, %v640_v57  ;;  %v655_v42 = vsel %vm653_vm3, %v643_v16, 2102212464 }
 0x214   : > { %v660_v1 = vsel %vm652_vm13, %v643_v16, %v9748_v10  ;;  %v662_v51 = vsel %vm650_vm0, %v640_v57, %v643_v16  ;;  %v664_v61 = vsel %vm652_vm13, %v15970_v27, %v10031_v38  ;;  %v1939_v5 = vshll.u32 %v10365_v20, %v10450_v9 }
 0x215   : > { %v2254_v35 = vsub.s32 4294967266, %v10504_v50  ;;  %v2135_v25 = vadd.s32 536870912, %v2134_v56  ;;  %vm651_vm3 = vcmp.lt.s32.totalorder %v9552_v4, 2  ;;  %v1945_v43 = vor.u32 4788187, %v1944_v6 }
 0x216   : > { %v661_v10 = vsel %vm651_vm3, %v658_v34, %v660_v1  ;;  %v665_v48 = vsel %vm651_vm3, %v662_v51, %v664_v61  ;;  %v666_v63 = vshll.u32 %v626_v13, 8  ;;  %v15971_v8 = vand.u32 2147483647, %v9865_v47 }
 0x217   : > { %v15972_v38 = vmov 0  ;;  %v1941_v20 = vor.u32 %v1940_v49, %v1939_v5  ;;  %v10537_v9 = vshrl.u32 %v2135_v25, 30  ;;  %v654_v23 = vsel %vm650_vm0, %v634_v33, %v637_v30 }
 0x218   : > { %vm10533_vm15 = vcmp.le.f32.partialorder %v15971_v8, 0.7853982  ;;  %v656_v16 = vsel %vm652_vm13, %v640_v57, %v655_v42  ;;  %v10543_v29 = vmul.u32.u64.low %v666_v63, %v665_v48  ;;  %v10544_v62 = vmul.u32.u64.high %v666_v63, %v665_v48, %v10543_v29 }
 0x219   : > { %v15973_v38 = vsel %vm10533_vm15, 4294967295, %v15972_v38  ;;  %v10546_v6 = vmul.u32.u64.low %v666_v63, %v661_v10  ;;  %v10547_v13 = vmul.u32.u64.high %v666_v63, %v661_v10, %v10546_v6  ;;  %8921 = vsinq.f32 %v10230_v60  ;;  %v15978_v29 = vld [vmem:[#allocation3_spill] sm:$0xff] }
 0x21a   : > { %vm15668_vm9 = vcmp.lt.s32.totalorder %v9934_v44, 0  ;;  %v2255_v12 = vadd.s32 127, %v2254_v35  ;;  %v2137_v49 = vshll.u32 %v10537_v9, 30  ;;  %8923 = vcosq.f32 %v10387_v17  ;;  %v15977_v35 = vld [vmem:[#allocation6_spill] sm:$0xff] }
 0x21b   : > { %v2053_v30 = vmul.f32 %v2052_v28, %v2050_v0  ;;  %v1946_v57 = vand.u32 2147483647, %v1945_v43  ;;  %v657_v33 = vsel %vm651_vm3, %v654_v23, %v656_v16  ;;  %v1538_v34 = vsel %vm10499_vm8, %v9742_v18, %v10405_v21 }
 0x21c   : > { %v1847_v60 = vsel %vm15666_vm4, %v1846_v22, %v10395_v54  ;;  %v15974_v42 = vand.u32 2147483647, %v9934_v44  ;;  %v2250_v4 = vsub.s32 32, %v10504_v50  ;;  %v10574_v28 = vsub.s32 %v2134_v56, %v2137_v49 }
 0x21d   : > { %v1742_v0 = vxor.u32 2147483648, %v10418_v2  ;;  %v1948_v1 = vcvt.s32.f32 %v1941_v20  ;;  %vm675_vm0 = vc.u32 %v10544_v62, %v10546_v6  ;;  %v676_v21 = vadd.s32 1, %v10547_v13 }
 0x21e   : > { %vm10569_vm13 = vcmp.le.f32.partialorder %v15974_v42, 0.7853982  ;;  %v2234_v54 = vadd.s32 %v10379_v58, %v10391_v46  ;;  %v2256_v22 = vshll.u32 %v2255_v12, 23  ;;  %v2140_v51 = vsub.s32 0, %v10574_v28  ;;  %v15994_v42 = vld [vmem:[#allocation22_spill] sm:$0xff] }
 0x21f   : > { %v673_v27 = vmul.u32 %v666_v63, %v657_v33  ;;  %v2054_v61 = vxor.u32 2147483648, %v2053_v30  ;;  %v1949_v5 = vmul.f32 %v1948_v1, %v1946_v57  ;;  %v677_v56 = vsel %vm675_vm0, %v676_v21, %v10547_v13  ;;  %v15979_v57 = vld [vmem:[#allocation10_spill] sm:$0xff] }
 0x220   : > { %v808_v25 = vsub.s32 4, %v15977_v35  ;;  %8925 = vsinq.f32 %v10387_v17  ;;  %v2252_v43 = vshrl.u32 %v2234_v54, %v2250_v4  ;;  %v8163_v10 = vmin.u32 %v2140_v51, %v10574_v28 }
 0x221   : > { %v678_v48 = vadd.s32 %v677_v56, %v673_v27  ;;  %8927 = vcosq.f32 %v1538_v34  ;;  %v1850_v58 = vsel %vm10533_vm15, %v9865_v47, %v1847_v60  ;;  %v1743_v46 = vsel %vm15668_vm9, %v1742_v0, %v10418_v2  ;;  %v15984_v56 = vld [vmem:[#allocation5_spill] sm:$0xff] }
 0x222   : > { %vm15665_vm3 = vcmp.lt.s32.totalorder %v10059_v32, 0  ;;  %v2251_v63 = vshll.u32 %v10456_v11, %v10504_v50  ;;  %v2257_v8 = vor.u32 4788187, %v2256_v22  ;;  %v2142_v17 = vclz %v8163_v10 }
 0x223   : > { %v679_v20 = vadd.s32 536870912, %v678_v48  ;;  %8929 = vsinq.f32 %v1538_v34  ;;  %v2055_v23 = vsel %vm15665_vm3, %v2054_v61, %v2053_v30  ;;  %v1950_v16 = vxor.u32 2147483648, %v1949_v5 }
 0x224   : > { %v809_v13 = vsel %vm724_vm6, %v808_v25, %v15977_v35  ;;  %v2253_v12 = vor.u32 %v2252_v43, %v2251_v63  ;;  %v8164_v49 = vadd.s32 4294967294, %v2142_v17  ;;  %v912_v33 = vsub.s32 4, %v15979_v57 }
 0x225   : > { %v10601_v2 = vshrl.u32 %v679_v20, 30  ;;  %8931 = vcosq.f32 %v1850_v58  ;;  %v1746_v11 = vsel %vm10569_vm13, %v9934_v44, %v1743_v46  ;;  %v15980_v50 = vand.u32 2147483647, %v10059_v32  ;;  %v15990_v20 = vld [vmem:[#allocation8_spill] sm:$0xff] }
 0x226   : > { %v15981_v30 = vmov 0  ;;  %vm15667_vm3 = vcmp.lt.s32.totalorder %v10135_v7, 0  ;;  %v2258_v34 = vand.u32 2147483647, %v2257_v8  ;;  %vm8165_vm6 = vcmp.lt.s32.totalorder %v8164_v49, 0  ;;  %v10617_v0 = vpop.eup %8921 }
 0x227   : > { %vm10609_vm0 = vcmp.le.f32.partialorder %v15980_v50, 0.7853982  ;;  %v681_v60 = vshll.u32 %v10601_v2, 30  ;;  %v811_v4 = vsel %vm9618_vm11, 0, %v809_v13  ;;  %8933 = vsinq.f32 %v1850_v58  ;;  %v10626_v22 = vpop.eup %8923 }
 0x228   : > { %v15982_v30 = vsel %vm10609_vm0, 4294967295, %v15981_v30  ;;  %v2058_v1 = vsel %vm10609_vm0, %v10059_v32, %v2055_v23  ;;  %v1951_v21 = vsel %vm15667_vm3, %v1950_v16, %v1949_v5  ;;  %v10624_v54 = vsel %vm8165_vm6, 0, %v8164_v49 }
 0x229   : > { %v2260_v51 = vcvt.s32.f32 %v2253_v12  ;;  %v2150_v27 = vsub.s32 4294967266, %v10624_v54  ;;  %v10629_v61 = vsub.s32 %v678_v48, %v681_v60  ;;  %vm15985_vm11 = vcmp.lt.s32.totalorder %v15984_v56, 0 }
 0x22a   : > { %v913_v35 = vsel %vm15985_vm11, %v912_v33, %v15979_v57  ;;  %8935 = vcosq.f32 %v1746_v11  ;;  %v15986_v25 = vand.u32 2147483647, %v10135_v7  ;;  %v15987_v43 = vmov 0 }
 0x22b   : > { %v815_v5 = vadd.s32 3, %v811_v4  ;;  %8937 = vsinq.f32 %v1746_v11  ;;  %v2261_v58 = vmul.f32 %v2260_v51, %v2258_v34  ;;  %v684_v48 = vsub.s32 0, %v10629_v61 }
 0x22c   : > { %vm10636_vm4 = vcmp.le.f32.partialorder %v15986_v25, 0.7853982  ;;  %8939 = vcosq.f32 %v2058_v1  ;;  %v915_v63 = vsel %vm9798_vm2, 0, %v913_v35  ;;  %v2151_v8 = vadd.s32 127, %v2150_v27 }
 0x22d   : > { %v15988_v43 = vsel %vm10636_vm4, 4294967295, %v15987_v43  ;;  %v1954_v10 = vsel %vm10636_vm4, %v10135_v7, %v1951_v21  ;;  %8941 = vsinq.f32 %v2058_v1  ;;  %v8107_v17 = vmin.u32 %v684_v48, %v10629_v61  ;;  %v10648_v16 = vpop.eup %8925  ;;  %v15995_v1 = vld [vmem:[#allocation19_spill] sm:$0xff] }
 0x22e   : > { %v1016_v23 = vsub.s32 4, %v15990_v20  ;;  %8943 = vcosq.f32 %v1954_v10  ;;  %v816_v13 = vand.u32 3, %v815_v5  ;;  %v10651_v12 = vpop.eup %8927  ;;  %v15991_v49 = vand.u32 2147483647, %v10225_v26  ;;  %v15996_v5 = vld [vmem:[#allocation4_spill] sm:$0xff] }
 0x22f   : > { %v2262_v33 = vxor.u32 2147483648, %v2261_v58  ;;  %v2146_v11 = vsub.s32 32, %v10624_v54  ;;  %v686_v50 = vclz %v8107_v17  ;;  %v919_v34 = vadd.s32 3, %v915_v63 }
 0x230   : > { %vm10655_vm11 = vcmp.le.f32.partialorder %v15991_v49, 0.7853982  ;;  %8945 = vsinq.f32 %v1954_v10  ;;  %v2130_v60 = vadd.s32 %v10471_v55, %v10479_v24  ;;  %v819_v4 = vxor.u32 2147483648, %v15994_v42  ;;  %v10665_v51 = vpop.eup %8929 }
 0x231   : > { %v822_v21 = vxor.u32 2147483648, %v15995_v1  ;;  %v2152_v27 = vshll.u32 %v2151_v8, 23  ;;  %v674_v35 = vadd.s32 %v10546_v6, %v10544_v62  ;;  %v8108_v25 = vadd.s32 4294967294, %v686_v50 }
 0x232   : > { %vm15997_vm3 = vcmp.lt.s32.totalorder %v15996_v5, 0  ;;  %v15998_v10 = vand.u32 2147483647, %v9383_v14  ;;  %vm817_vm2 = vcmp.lt.s32.totalorder %v816_v13, 2  ;;  %vm818_vm6 = vcmp.eq.s32.totalorder %v816_v13, 0  ;;  %v10679_v24 = vpop.eup %8931 }
 0x233   : > { %v1017_v48 = vsel %vm15997_vm3, %v1016_v23, %v15990_v20  ;;  %vm821_vm0 = vcmp.eq.s32.totalorder %v816_v13, 2  ;;  %v923_v55 = vxor.u32 2147483648, %v10071_v59  ;;  %vm16001_vm4 = vcmp.lt.s32.totalorder %v10225_v26, 0  ;;  %v16020_v13 = vld [vmem:[#allocation25_spill] sm:$0xff] }
 0x234   : > { %vm10674_vm9 = vcmp.le.f32.partialorder %v15998_v10, 0.7853982  ;;  %v2263_v62 = vsel %vm16001_vm4, %v2262_v33, %v2261_v58  ;;  %v2148_v6 = vshrl.u32 %v2130_v60, %v2146_v11  ;;  %vm8109_vm15 = vcmp.lt.s32.totalorder %v8108_v25, 0  ;;  %v10688_v50 = vpop.eup %8933  ;;  %v16005_v11 = vld [vmem:[#allocation12_spill] sm:$0xff] }
 0x235   : > { %v920_v63 = vand.u32 3, %v919_v34  ;;  %v2147_v8 = vshll.u32 %v10574_v28, %v10624_v54  ;;  %v689_v17 = vsel %vm8109_vm15, 0, %v8108_v25  ;;  %v704_v20 = vsub.s32 4, %v10601_v2  ;;  %v16004_v28 = vld [vmem:[#allocation28_spill] sm:$0xff] }
 0x236   : > { %v1019_v49 = vsel %vm9703_vm5, 0, %v1017_v48  ;;  %v2153_v10 = vor.u32 4788187, %v2152_v27  ;;  %v690_v41 = vsub.s32 32, %v689_v17  ;;  %v694_v19 = vsub.s32 4294967266, %v689_v17 }
 0x237   : > { %v1120_v52 = vsub.s32 4, %v16003_v37  ;;  %v820_v58 = vsel %vm818_vm6, %v15995_v1, %v819_v4  ;;  %v823_v33 = vsel %vm821_vm0, %v822_v21, %v15994_v42  ;;  %v926_v54 = vxor.u32 2147483648, %v16004_v28  ;;  %v10697_v60 = vpop.eup %8935 }
 0x238   : > { %v1224_v34 = vsub.s32 4, %v16005_v11  ;;  %v2149_v25 = vor.u32 %v2148_v6, %v2147_v8  ;;  %v691_v48 = vshll.u32 %v10629_v61, %v689_v17  ;;  %v692_v27 = vshrl.u32 %v674_v35, %v690_v41  ;;  %v10701_v53 = vpop.eup %8937  ;;  %v16008_v35 = vld [vmem:[#allocation9_spill] sm:$0xff] }
 0x239   : > { %v695_v23 = vadd.s32 127, %v694_v19  ;;  %vm814_vm5 = vweird.f32 %v15978_v29  ;;  %v2266_v4 = vsel %vm10655_vm11, %v10225_v26, %v2263_v62  ;;  %vm16006_vm4 = vcmp.lt.s32.totalorder %v9383_v14, 0  ;;  %v10710_v21 = vpop.eup %8939 }
 0x23a   : > { %v705_v42 = vsel %vm16006_vm4, %v704_v20, %v10601_v2  ;;  %vm922_vm3 = vcmp.eq.s32.totalorder %v920_v63, 0  ;;  %v1023_v1 = vadd.s32 3, %v1019_v49  ;;  %16007 = vst [vmem:[#allocation13_spill] sm:$0xff] %v10710_v21  ;;  %v2154_v41 = vand.u32 2147483647, %v2153_v10  ;;  %v10715_v8 = vpop.eup %8941  ;;  %v16011_v2 = vld [vmem:[#allocation7_spill] sm:$0xff] }
 0x23b   : > { %v693_v19 = vor.u32 %v692_v27, %v691_v48  ;;  %v696_v61 = vshll.u32 %v695_v23, 23  ;;  %vm16009_vm0 = vcmp.lt.s32.totalorder %v16008_v35, 0  ;;  %16010 = vst [vmem:[#allocation6_spill] sm:$0xff] %v10715_v8  ;;  %v824_v62 = vsel %vm817_vm2, %v820_v58, %v823_v33  ;;  %v10722_v49 = vpop.eup %8943  ;;  %v16014_v58 = vld [vmem:[#allocation20_spill] sm:$0xff] }
 0x23c   : > { %v1121_v6 = vsel %vm16009_vm0, %v1120_v52, %v16003_v37  ;;  %v924_v17 = vsel %vm922_vm3, %v16004_v28, %v923_v55  ;;  %vm925_vm6 = vcmp.eq.s32.totalorder %v920_v63, 2  ;;  %vm16012_vm4 = vcmp.lt.s32.totalorder %v16011_v2, 0 }
 0x23d   : > { %v1225_v20 = vsel %vm16012_vm4, %v1224_v34, %v16005_v11  ;;  %v2156_v10 = vcvt.s32.f32 %v2149_v25  ;;  %v697_v48 = vor.u32 4788187, %v696_v61  ;;  %v707_v27 = vsel %vm10674_vm9, 0, %v705_v42  ;;  %v10731_v28 = vpop.eup %8945 }
 0x23e   : > { %v927_v52 = vsel %vm925_vm6, %v926_v54, %v10071_v59  ;;  %vm15680_vm0 = vcmp.lt.s32.totalorder %v10314_v15, 0  ;;  %vm921_vm15 = vcmp.lt.s32.totalorder %v920_v63, 2  ;;  %v1024_v37 = vand.u32 3, %v1023_v1  ;;  %v16016_v54 = vld [vmem:[#allocation27_spill] sm:$0xff] }
 0x23f   : > { %v1123_v55 = vsel %vm9981_vm10, 0, %v1121_v6  ;;  %v1328_v33 = vsub.s32 4, %v16014_v58  ;;  %v2157_v11 = vmul.f32 %v2156_v10, %v2154_v41  ;;  %v698_v34 = vand.u32 2147483647, %v697_v48 }
 0x240   : > { %v700_v25 = vcvt.s32.f32 %v693_v19  ;;  %v1227_v61 = vsel %vm9894_vm12, 0, %v1225_v20  ;;  %8947 = vcosq.f32 %v2266_v4  ;;  %v711_v42 = vadd.s32 3, %v707_v27 }
 0x241   : > { %v928_v59 = vsel %vm921_vm15, %v924_v17, %v927_v52  ;;  %v1027_v36 = vxor.u32 2147483648, %v16016_v54  ;;  %8949 = vsinq.f32 %v2266_v4  ;;  %v16017_v63 = vand.u32 2147483647, %v10314_v15  ;;  %v16021_v17 = vld [vmem:[#allocation14_spill] sm:$0xff]  ;;  %v16023_v4 = vld [vmem:[#allocation17_spill] sm:$0xff] }
 0x242   : > { %v701_v6 = vmul.f32 %v700_v25, %v698_v34  ;;  %v1030_v41 = vxor.u32 2147483648, %v16020_v13  ;;  %v1127_v10 = vadd.s32 3, %v1123_v55  ;;  %v10745_v19 = vsel %vm814_vm5, nan, %v824_v62  ;;  %v16025_v62 = vld [vmem:[#allocation35_spill] sm:$0xff] }
 0x243   : > { %vm10738_vm2 = vcmp.le.f32.partialorder %v16017_v63, 0.7853982  ;;  %v1231_v20 = vadd.s32 3, %v1227_v61  ;;  %vm16022_vm12 = vcmp.lt.s32.totalorder %v16021_v17, 0  ;;  %v1432_v27 = vsub.s32 4, %v16023_v4 }
 0x244   : > { %v1329_v48 = vsel %vm16022_vm12, %v1328_v33, %v16014_v58  ;;  %v2158_v52 = vxor.u32 2147483648, %v2157_v11  ;;  %v702_v23 = vxor.u32 2147483648, %v701_v6  ;;  %vm16024_vm10 = vweird.f32 %v15984_v56 }
 0x245   : > { %v10753_v63 = vsel %vm16024_vm10, nan, %v928_v59  ;;  %vm1026_vm15 = vcmp.eq.s32.totalorder %v1024_v37, 0  ;;  %v10755_v34 = vand.u32 3, %v711_v42  ;;  %vm1022_vm3 = vweird.f32 %v15996_v5  ;;  %v16028_v59 = vld [vmem:[#allocation34_spill] sm:$0xff] }
 0x246   : > { %v1028_v29 = vsel %vm1026_vm15, %v16020_v13, %v1027_v36  ;;  %vm1029_vm5 = vcmp.eq.s32.totalorder %v1024_v37, 2  ;;  %v1131_v55 = vxor.u32 2147483648, %v16025_v62  ;;  %vm16026_vm6 = vcmp.lt.s32.totalorder %v9383_v14, 0  ;;  %v16029_v36 = vld [vmem:[#allocation11_spill] sm:$0xff] }
 0x247   : > { %v703_v58 = vsel %vm16026_vm6, %v702_v23, %v701_v6  ;;  %v1031_v33 = vsel %vm1029_vm5, %v1030_v41, %v16016_v54  ;;  %v1128_v25 = vand.u32 3, %v1127_v10  ;;  %v1331_v56 = vsel %vm10182_vm1, 0, %v1329_v48  ;;  %v16031_v54 = vld [vmem:[#allocation33_spill] sm:$0xff]  ;;  %v16032_v10 = vld [vmem:[#allocation26_spill] sm:$0xff]  ;;  %v16033_v48 = vld [vmem:[#allocation32_spill] sm:$0xff] }
 0x248   : > { %v706_v42 = vsel %vm10674_vm9, %v9383_v14, %v703_v58  ;;  %v1134_v21 = vxor.u32 2147483648, %v16028_v59  ;;  %v1232_v8 = vand.u32 3, %v1231_v20  ;;  %vm16030_vm4 = vcmp.lt.s32.totalorder %v16029_v36, 0 }
 0x249   : > { %v1433_v13 = vsel %vm16030_vm4, %v1432_v27, %v16023_v4  ;;  %v2159_v6 = vsel %vm15680_vm0, %v2158_v52, %v2157_v11  ;;  %8951 = vcosq.f32 %v706_v42  ;;  %v1235_v41 = vxor.u32 2147483648, %v16031_v54 }
 0x24a   : > { %v1536_v23 = vsub.s32 4, %v16032_v10  ;;  %8953 = vsinq.f32 %v706_v42  ;;  %vm1025_vm1 = vcmp.lt.s32.totalorder %v1024_v37, 2  ;;  %v1238_v46 = vxor.u32 2147483648, %v16033_v48 }
 0x24b   : > { %v1335_v58 = vadd.s32 3, %v1331_v56  ;;  %v1032_v61 = vsel %vm1025_vm1, %v1028_v29, %v1031_v33  ;;  %vm1126_vm9 = vweird.f32 %v16008_v35  ;;  %vm1130_vm12 = vcmp.eq.s32.totalorder %v1128_v25, 0 }
 0x24c   : > { %v1435_v4 = vsel %vm10035_vm7, 0, %v1433_v13  ;;  %v2162_v11 = vsel %vm10738_vm2, %v10314_v15, %v2159_v6  ;;  %v1132_v27 = vsel %vm1130_vm12, %v16028_v59, %v1131_v55  ;;  %vm1133_vm10 = vcmp.eq.s32.totalorder %v1128_v25, 2  ;;  %v16036_v13 = vld [vmem:[#allocation24_spill] sm:$0xff] }
 0x24d   : > { %vm1234_vm15 = vcmp.eq.s32.totalorder %v1232_v8, 0  ;;  %v1135_v37 = vsel %vm1133_vm10, %v1134_v21, %v16025_v62  ;;  %vm1237_vm5 = vcmp.eq.s32.totalorder %v1232_v8, 2  ;;  %vm16035_vm6 = vcmp.lt.s32.totalorder %v9742_v18, 0  ;;  %v10791_v6 = vpop.eup %8947  ;;  %v16037_v62 = vld [vmem:[#allocation42_spill] sm:$0xff] }
 0x24e   : > { %v1236_v52 = vsel %vm1234_vm15, %v16033_v48, %v1235_v41  ;;  %v1537_v29 = vsel %vm16035_vm6, %v1536_v23, %v16032_v10  ;;  %v1239_v33 = vsel %vm1237_vm5, %v1238_v46, %v16031_v54  ;;  %v1336_v56 = vand.u32 3, %v1335_v58  ;;  %v10800_v41 = vpop.eup %8949  ;;  %v16038_v23 = vld [vmem:[#allocation41_spill] sm:$0xff]  ;;  %v16039_v46 = vld [vmem:[#allocation36_spill] sm:$0xff] }
 0x24f   : > { %v1439_v42 = vadd.s32 3, %v1435_v4  ;;  %v1640_v20 = vsub.s32 4, %v16036_v13  ;;  %v10795_v55 = vsel %vm1022_vm3, nan, %v1032_v61  ;;  %vm1230_vm7 = vweird.f32 %v16011_v2  ;;  %v16041_v4 = vld [vmem:[#allocation37_spill] sm:$0xff]  ;;  %v16044_v2 = vld [vmem:[#allocation40_spill] sm:$0xff] }
 0x250   : > { %v1339_v21 = vxor.u32 2147483648, %v10617_v0  ;;  %v1342_v59 = vxor.u32 2147483648, %v16037_v62  ;;  %8955 = vcosq.f32 %v2162_v11  ;;  %vm717_vm4 = vcmp.eq.s32.totalorder %v10755_v34, 2 }
 0x251   : > { %vm1129_vm1 = vcmp.lt.s32.totalorder %v1128_v25, 2  ;;  %vm1233_vm12 = vcmp.lt.s32.totalorder %v1232_v8, 2  ;;  %v1539_v54 = vsel %vm10499_vm8, 0, %v1537_v29  ;;  %vm714_vm10 = vcmp.eq.s32.totalorder %v10755_v34, 0 }
 0x252   : > { %v1136_v5 = vsel %vm1129_vm1, %v1132_v27, %v1135_v37  ;;  %v1240_v10 = vsel %vm1233_vm12, %v1236_v52, %v1239_v33  ;;  %v1443_v48 = vxor.u32 2147483648, %v16038_v23  ;;  %v1744_v58 = vsub.s32 4, %v16039_v46  ;;  %v16043_v33 = vld [vmem:[#allocation31_spill] sm:$0xff] }
 0x253   : > { %vm713_vm3 = vcmp.lt.s32.totalorder %v10755_v34, 2  ;;  %vm1338_vm15 = vcmp.eq.s32.totalorder %v1336_v56, 0  ;;  %vm1341_vm5 = vcmp.eq.s32.totalorder %v1336_v56, 2  ;;  %v1440_v61 = vand.u32 3, %v1439_v42 }
 0x254   : > { %vm16040_vm6 = vcmp.lt.s32.totalorder %v9647_v45, 0  ;;  %vm710_vm0 = vweird.f32 %v9383_v14  ;;  %v1340_v40 = vsel %vm1338_vm15, %v16037_v62, %v1339_v21  ;;  %v1343_v25 = vsel %vm1341_vm5, %v1342_v59, %v10617_v0 }
 0x255   : > { %v1641_v8 = vsel %vm16040_vm6, %v1640_v20, %v16036_v13  ;;  %v1446_v27 = vxor.u32 2147483648, %v16041_v4  ;;  %v1543_v37 = vadd.s32 3, %v1539_v54  ;;  %8957 = vsinq.f32 %v2162_v11 }
 0x256   : > { %v10818_v52 = vsel %vm1126_vm9, nan, %v1136_v5  ;;  %v10822_v29 = vsel %vm1230_vm7, nan, %v1240_v10  ;;  %vm1334_vm8 = vweird.f32 %v16021_v17  ;;  %vm1337_vm1 = vcmp.lt.s32.totalorder %v1336_v56, 2  ;;  %v8952_v42 = vpop.eup %8951 }
 0x257   : > { %vm1438_vm12 = vweird.f32 %v16029_v36  ;;  %v1643_v0 = vsel %vm10352_vm14, 0, %v1641_v8  ;;  %vm16042_vm15 = vcmp.lt.s32.totalorder %v9934_v44, 0  ;;  %v1848_v35 = vsub.s32 4, %v16043_v33  ;;  %v8954_v21 = vpop.eup %8953 }
 0x258   : > { %v1745_v11 = vsel %vm16042_vm15, %v1744_v58, %v16039_v46  ;;  %v1344_v13 = vsel %vm1337_vm1, %v1340_v40, %v1343_v25  ;;  %vm1442_vm9 = vcmp.eq.s32.totalorder %v1440_v61, 0  ;;  %vm1445_vm5 = vcmp.eq.s32.totalorder %v1440_v61, 2 }
 0x259   : > { %v1952_v20 = vsub.s32 4, %v16044_v2  ;;  %v718_v62 = vxor.u32 2147483648, %v8952_v42  ;;  %v1444_v56 = vsel %vm1442_vm9, %v16041_v4, %v1443_v48  ;;  %v1447_v59 = vsel %vm1445_vm5, %v1446_v27, %v16038_v23  ;;  %v16047_v27 = vld [vmem:[#allocation39_spill] sm:$0xff] }
 0x25a   : > { %v1544_v3 = vand.u32 3, %v1543_v37  ;;  %v715_v54 = vxor.u32 2147483648, %v8954_v21  ;;  %v1547_v5 = vxor.u32 2147483648, %v10665_v51  ;;  %v1647_v10 = vadd.s32 3, %v1643_v0 }
 0x25b   : > { %v1747_v46 = vsel %vm10569_vm13, 0, %v1745_v11  ;;  %v719_v58 = vsel %vm717_vm4, %v718_v62, %v8954_v21  ;;  %vm1441_vm14 = vcmp.lt.s32.totalorder %v1440_v61, 2  ;;  %v1550_v8 = vxor.u32 2147483648, %v10651_v12 }
 0x25c   : > { %vm16045_vm7 = vcmp.lt.s32.totalorder %v9865_v47, 0  ;;  %v716_v23 = vsel %vm714_vm10, %v8952_v42, %v715_v54  ;;  %v1345_v40 = vsel %vm1334_vm8, nan, %v1344_v13  ;;  %v1448_v25 = vsel %vm1441_vm14, %v1444_v56, %v1447_v59 }
 0x25d   : > { %v1849_v48 = vsel %vm16045_vm7, %v1848_v35, %v16043_v33  ;;  %vm16046_vm13 = vcmp.lt.s32.totalorder %v10135_v7, 0  ;;  %v720_v61 = vsel %vm713_vm3, %v716_v23, %v719_v58  ;;  %vm1546_vm4 = vcmp.eq.s32.totalorder %v1544_v3, 0  ;;  %v10858_v33 = vpop.eup %8955 }
 0x25e   : > { %v1953_v31 = vsel %vm16046_vm13, %v1952_v20, %v16044_v2  ;;  %v1751_v4 = vadd.s32 3, %v1747_v46  ;;  %v2056_v37 = vsub.s32 4, %v16047_v27  ;;  %v721_v0 = vsel %vm710_vm0, nan, %v720_v61 }
 0x25f   : > { %vm1549_vm6 = vcmp.eq.s32.totalorder %v1544_v3, 2  ;;  %v1648_v11 = vand.u32 3, %v1647_v10  ;;  %vm16048_vm10 = vnez %v15973_v38  ;;  %vm16049_vm8 = vcmask 261120  }
 0x260   : > { %v1851_v17 = vsel %vm16048_vm10, 0, %v1849_v48  ;;  %8537 = vmatprep.mubr.msk.f32.mxu1 %vm16049_vm8, %v721_v0  ;;  %vm1542_vm1 = vweird.f32 %v9742_v18  ;;  %v1548_v34 = vsel %vm1546_vm4, %v10651_v12, %v1547_v5  ;;  %v1551_v35 = vsel %vm1549_vm6, %v1550_v8, %v10665_v51  ;;  %vm16051_vm0 = vmmov %vm16049_vm8 }
 0x261   : > { %v1651_v42 = vxor.u32 2147483648, %v10648_v16  ;;  %vm16050_vm3 = vnez %v15988_v43  ;;  %8538 = vmatmul.mubr.msk.f32.vlgmr.msra.gmra.mxu1 %vm16051_vm0, %v10745_v19  ;;  %v1449_v38 = vsel %vm1438_vm12, nan, %v1448_v25  ;;  %v1654_v13 = vxor.u32 2147483648, %v10626_v22  ;;  %vm16052_vm15 = vmmov %vm16051_vm0 }
 0x262   : > { %v1955_v14 = vsel %vm16050_vm3, 0, %v1953_v31  ;;  %v1755_v2 = vxor.u32 2147483648, %v10701_v53  ;;  %v1758_v20 = vxor.u32 2147483648, %v10697_v60  ;;  %8540 = vmatprep.mubr.msk.f32.mxu1 %vm16052_vm15, %v10753_v63  ;;  %vm1545_vm9 = vcmp.lt.s32.totalorder %v1544_v3, 2  ;;  %v10880_v62 = vpop.eup %8957  ;;  %vm16054_vm7 = vmmov %vm16051_vm0 }
 0x263   : > { %v1752_v12 = vand.u32 3, %v1751_v4  ;;  %v1855_v51 = vadd.s32 3, %v1851_v17  ;;  %vm16053_vm5 = vcmp.lt.s32.totalorder %v10059_v32, 0  ;;  %v1552_v19 = vsel %vm1545_vm9, %v1548_v34, %v1551_v35  ;;  %vm16057_vm10 = vmmov %vm16051_vm0 }
 0x264   : > { %v2057_v43 = vsel %vm16053_vm5, %v2056_v37, %v16047_v27  ;;  %vm1650_vm14 = vcmp.eq.s32.totalorder %v1648_v11, 0  ;;  %v1959_v36 = vadd.s32 3, %v1955_v14  ;;  %v2160_v21 = vsub.s32 4, %v10537_v9  ;;  %vm16059_vm9 = vmmov %vm16054_vm7  ;;  %v16064_v27 = vld [vmem:[#allocation13_spill] sm:$0xff] }
 0x265   : > { %v1652_v56 = vsel %vm1650_vm14, %v10626_v22, %v1651_v42  ;;  %vm1653_vm12 = vcmp.eq.s32.totalorder %v1648_v11, 2  ;;  %v1859_v59 = vxor.u32 2147483648, %v10688_v50  ;;  %v1862_v63 = vxor.u32 2147483648, %v10679_v24  ;;  %8541 = vmatmul.mubr.msk.f32.gmra.mxu1 %vm16054_vm7, %v10795_v55  ;;  %vm16060_vm5 = vmmov %vm16054_vm7 }
 0x266   : > { %vm1646_vm13 = vweird.f32 %v9647_v45  ;;  %v1655_v3 = vsel %vm1653_vm12, %v1654_v13, %v10648_v16  ;;  %vm16055_vm4 = vnez %v15982_v30  ;;  %vm16056_vm6 = vcmp.lt.s32.totalorder %v10314_v15, 0  ;;  %8543 = vmatprep.mubr.msk.f32.mxu1 %vm16057_vm10, %v10818_v52 }
 0x267   : > { %v2059_v54 = vsel %vm16055_vm4, 0, %v2057_v43  ;;  %v2161_v5 = vsel %vm16056_vm6, %v2160_v21, %v10537_v9  ;;  %v2264_v22 = vsub.s32 4, %v10437_v39  ;;  %vm1754_vm8 = vcmp.eq.s32.totalorder %v1752_v12, 0  ;;  %vm16061_vm6 = vmmov %vm16060_vm5 }
 0x268   : > { %vm1757_vm3 = vcmp.eq.s32.totalorder %v1752_v12, 2  ;;  %v1856_v10 = vand.u32 3, %v1855_v51  ;;  %v2163_v55 = vsel %vm10738_vm2, 0, %v2161_v5  ;;  %vm1649_vm0 = vcmp.lt.s32.totalorder %v1648_v11, 2 }
 0x269   : > { %v1756_v16 = vsel %vm1754_vm8, %v10697_v60, %v1755_v2  ;;  %v1759_v30 = vsel %vm1757_vm3, %v1758_v20, %v10701_v53  ;;  %v1960_v46 = vand.u32 3, %v1959_v36  ;;  %v1963_v58 = vxor.u32 2147483648, %v10731_v28  ;;  %8544 = vmatmul.mubr.msk.f32.gmra.mxu1 %vm16059_vm9, %v10822_v29 }
 0x26a   : > { %v2063_v9 = vadd.s32 3, %v2059_v54  ;;  %v2167_v8 = vadd.s32 3, %v2163_v55  ;;  %vm16058_vm15 = vcmp.lt.s32.totalorder %v10225_v26, 0  ;;  %v1553_v1 = vsel %vm1542_vm1, nan, %v1552_v19  ;;  %8546 = vmatprep.mubr.msk.f32.mxu1 %vm16060_vm5, %v1345_v40 }
 0x26b   : > { %v2265_v52 = vsel %vm16058_vm15, %v2264_v22, %v10437_v39  ;;  %v1656_v48 = vsel %vm1649_vm0, %v1652_v56, %v1655_v3  ;;  %vm1750_vm2 = vweird.f32 %v9934_v44  ;;  %v1966_v53 = vxor.u32 2147483648, %v10722_v49 }
 0x26c   : > { %vm1753_vm14 = vcmp.lt.s32.totalorder %v1752_v12, 2  ;;  %vm1858_vm12 = vcmp.eq.s32.totalorder %v1856_v10, 0  ;;  %vm1861_vm7 = vcmp.eq.s32.totalorder %v1856_v10, 2  ;;  %v2267_v60 = vsel %vm10655_vm11, 0, %v2265_v52  ;;  %vm16062_vm11 = vmmov %vm16060_vm5 }
 0x26d   : > { %v1760_v39 = vsel %vm1753_vm14, %v1756_v16, %v1759_v30  ;;  %v1860_v23 = vsel %vm1858_vm12, %v10679_v24, %v1859_v59  ;;  %v1863_v29 = vsel %vm1861_vm7, %v1862_v63, %v10688_v50  ;;  %vm1962_vm4 = vcmp.eq.s32.totalorder %v1960_v46, 0  ;;  %8547 = vmatmul.mubr.msk.f32.gmra.mxu1 %vm16061_vm6, %v1449_v38  ;;  %v16063_v50 = vld [vmem:[#allocation6_spill] sm:$0xff] }
 0x26e   : > { %v1964_v18 = vsel %vm1962_vm4, %v10722_v49, %v1963_v58  ;;  %vm1965_vm1 = vcmp.eq.s32.totalorder %v1960_v46, 2  ;;  %v2064_v25 = vand.u32 3, %v2063_v9  ;;  %v2168_v31 = vand.u32 3, %v2167_v8  ;;  %8549 = vmatprep.mubr.msk.f32.mxu1 %vm16062_vm11, %v1553_v1  ;;  %vm16066_vm4 = vmmov %vm16060_vm5 }
 0x26f   : > { %v1967_v40 = vsel %vm1965_vm1, %v1966_v53, %v10731_v28  ;;  %v2171_v61 = vxor.u32 2147483648, %v10880_v62  ;;  %v2174_v57 = vxor.u32 2147483648, %v10858_v33  ;;  %v2271_v4 = vadd.s32 3, %v2267_v60  ;;  %vm16067_vm11 = vmmov %vm16066_vm4 }
 0x270   : > { %v1657_v24 = vsel %vm1646_vm13, nan, %v1656_v48  ;;  %vm1857_vm10 = vcmp.lt.s32.totalorder %v1856_v10, 2  ;;  %v2067_v49 = vxor.u32 2147483648, %v16063_v50  ;;  %v2070_v37 = vxor.u32 2147483648, %v16064_v27  ;;  %vm16065_vm13 = vmmov %vm16060_vm5 }
 0x271   : > { %v1761_v0 = vsel %vm1750_vm2, nan, %v1760_v39  ;;  %v1864_v11 = vsel %vm1857_vm10, %v1860_v23, %v1863_v29  ;;  %vm1958_vm8 = vweird.f32 %v10135_v7  ;;  %vm1961_vm3 = vcmp.lt.s32.totalorder %v1960_v46, 2  ;;  %8550 = vmatmul.mubr.msk.f32.gmra.mxu1 %vm16060_vm5, %v1657_v24 }
 0x272   : > { %v1968_v28 = vsel %vm1961_vm3, %v1964_v18, %v1967_v40  ;;  %vm2066_vm0 = vcmp.eq.s32.totalorder %v2064_v25, 0  ;;  %vm2170_vm15 = vcmp.eq.s32.totalorder %v2168_v31, 0  ;;  %vm2173_vm9 = vcmp.eq.s32.totalorder %v2168_v31, 2  ;;  %8552 = vmatprep.mubr.msk.f32.mxu1 %vm16065_vm13, %v1761_v0 }
 0x273   : > { %vm2069_vm14 = vcmp.eq.s32.totalorder %v2064_v25, 2  ;;  %v2172_v45 = vsel %vm2170_vm15, %v10858_v33, %v2171_v61  ;;  %v2175_v17 = vsel %vm2173_vm9, %v2174_v57, %v10880_v62  ;;  %v2272_v34 = vand.u32 3, %v2271_v4 }
 0x274   : > { %v2068_v44 = vsel %vm2066_vm0, %v16064_v27, %v2067_v49  ;;  %v2071_v35 = vsel %vm2069_vm14, %v2070_v37, %v16063_v50  ;;  %v2275_v42 = vxor.u32 2147483648, %v10800_v41  ;;  %v2278_v14 = vxor.u32 2147483648, %v10791_v6  ;;  %vm16068_vm0 = vmmov %vm16066_vm4 }
 0x275   : > { %vm1854_vm2 = vweird.f32 %v9865_v47  ;;  %v1969_v38 = vsel %vm1958_vm8, nan, %v1968_v28  ;;  %vm2169_vm12 = vcmp.lt.s32.totalorder %v2168_v31, 2  ;;  %vm2065_vm7 = vcmp.lt.s32.totalorder %v2064_v25, 2  ;;  %vm16069_vm15 = vmmov %vm16068_vm0 }
 0x276   : > { %v1865_v33 = vsel %vm1854_vm2, nan, %v1864_v11  ;;  %v2176_v13 = vsel %vm2169_vm12, %v2172_v45, %v2175_v17  ;;  %v2072_v2 = vsel %vm2065_vm7, %v2068_v44, %v2071_v35  ;;  %vm2274_vm1 = vcmp.eq.s32.totalorder %v2272_v34, 0  ;;  %vm16070_vm5 = vmmov %vm16068_vm0 }
 0x277   : > { %8553 = vmatmul.mubr.msk.f32.gmra.mxu1 %vm16066_vm4, %v1865_v33  ;;  %vm2277_vm6 = vcmp.eq.s32.totalorder %v2272_v34, 2  ;;  %vm2166_vm10 = vweird.f32 %v10314_v15  ;;  %v2276_v20 = vsel %vm2274_vm1, %v10791_v6, %v2275_v42  ;;  %vm2062_vm3 = vweird.f32 %v10059_v32  ;;  %v10953_v15 = vld [vmem:[%s15561_s4] ss:$0 sm:$0xff] }
 0x278   : > { %8555 = vmatprep.mubr.msk.f32.mxu1 %vm16067_vm11, %v1969_v38  ;;  %v2279_v47 = vsel %vm2277_vm6, %v2278_v14, %v10800_v41  ;;  %v2177_v7 = vsel %vm2166_vm10, nan, %v2176_v13  ;;  %v2073_v12 = vsel %vm2062_vm3, nan, %v2072_v2  ;;  %vm2273_vm8 = vcmp.lt.s32.totalorder %v2272_v34, 2 }
 0x279   : > { %v2280_v51 = vsel %vm2273_vm8, %v2276_v20, %v2279_v47  ;;  %vm2270_vm9 = vweird.f32 %v10225_v26  ;;  %v16071_v29 = vmov 683565275   ;;  %v16072_v25 = vmov 2475754826  }
 0x27a   : > { %v2281_v43 = vsel %vm2270_vm9, nan, %v2280_v51  ;;  %v16073_v40 = vmov 2131351028   ;;  %v16074_v57 = vmov 2102212464  }
 0x27b   : > { %8556 = vmatmul.mubr.msk.f32.gmra.mxu1 %vm16068_vm0, %v2073_v12  ;;  %v16075_v24 = vmov 920167782   ;;  %v16076_v28 = vmov 1326507024  }
 0x27c   : > { %8558 = vmatprep.mubr.msk.f32.mxu1 %vm16069_vm15, %v2177_v7 }
 0x27f   : > { %8559 = vmatmul.mubr.msk.f32.gmra.mxu1 %vm16070_vm5, %v2281_v43 }
 0x321   : > { %v8539_v6 = vpop.f32.mrf.mxu1 }
 0x322   : > { %v10956_v32 = vadd.f32 %v8539_v6, %v10953_v15 }
 0x323   : > { %v2402_v41 = vpop.f32.mrf.mxu1 }
 0x324   : > { %v2585_v19 = vand.u32 2147483647, %v10956_v32  ;;  %v2588_v36 = vand.u32 2139095040, %v10956_v32  ;;  %v10961_v21 = vadd.f32 %v10953_v15, %v2402_v41 }
 0x325   : > { %v8542_v26 = vpop.f32.mrf.mxu1 }
 0x326   : > { %v2589_v62 = vshrl.u32 %v2588_v36, 23  ;;  %v10964_v56 = vadd.f32 %v8542_v26, %v10953_v15  ;;  %v2592_v59 = vand.u32 8388607, %v2585_v19  ;;  %v2481_v63 = vand.u32 2147483647, %v10961_v21 }
 0x327   : > { %v2484_v3 = vand.u32 2139095040, %v10961_v21 }
 0x328   : > { %v8191_v54 = vadd.s32 4294967169, %v2589_v62  ;;  %v2488_v22 = vand.u32 8388607, %v2481_v63  ;;  %v2796_v10 = vand.u32 2139095040, %v10964_v56  ;;  %v2593_v16 = vor.u32 8388608, %v2592_v59 }
 0x329   : > { %v2485_v5 = vshrl.u32 %v2484_v3, 23  ;;  %v2793_v60 = vand.u32 2147483647, %v10964_v56 }
 0x32a   : > { %v2595_v55 = vadd.s32 1, %v8191_v54  ;;  %v2489_v46 = vor.u32 8388608, %v2488_v22  ;;  %v2797_v58 = vshrl.u32 %v2796_v10, 23  ;;  %v10973_v48 = vshll.u32 %v2593_v16, 8 }
 0x32b   : > { %v8187_v30 = vadd.s32 4294967169, %v2485_v5 }
 0x32c   : > { %vm2596_vm14 = vcmp.gt.s32.totalorder %v2595_v55, 0  ;;  %v10975_v53 = vshll.u32 %v2489_v46, 8  ;;  %v8199_v39 = vadd.s32 4294967169, %v2797_v58 }
 0x32d   : > { %v2597_v9 = vsel %vm2596_vm14, %v2595_v55, 0  ;;  %v2491_v8 = vadd.s32 1, %v8187_v30 }
 0x32e   : > { %v2598_v52 = vshrl.u32 %v2597_v9, 5  ;;  %v2599_v1 = vand.u32 31, %v2597_v9  ;;  %v2803_v36 = vadd.s32 1, %v8199_v39 }
 0x32f   : > { %vm2492_vm13 = vcmp.gt.s32.totalorder %v2491_v8, 0 }
 0x330   : > { %v2600_v23 = vsub.s32 32, %v2599_v1  ;;  %v2602_v18 = vshll.u32 %v16071_v29, %v2599_v1  ;;  %v2605_v31 = vshll.u32 %v16072_v25, %v2599_v1  ;;  %v2608_v61 = vshll.u32 %v16073_v40, %v2599_v1 }
 0x331   : > { %v2611_v4 = vshll.u32 %v16074_v57, %v2599_v1  ;;  %v2614_v50 = vshll.u32 %v16075_v24, %v2599_v1  ;;  %vm2617_vm2 = vcmp.lt.s32.totalorder %v2598_v52, 1  ;;  %vm2618_vm12 = vcmp.lt.s32.totalorder %v2598_v52, 2 }
 0x332   : > { %v2603_v49 = vshrl.u32 %v16072_v25, %v2600_v23  ;;  %v2606_v27 = vshrl.u32 %v16073_v40, %v2600_v23  ;;  %v2609_v37 = vshrl.u32 %v16074_v57, %v2600_v23  ;;  %v2601_v0 = vshrl.u32 %v16071_v29, %v2600_v23 }
 0x333   : > { %v2612_v11 = vshrl.u32 %v16075_v24, %v2600_v23  ;;  %v2615_v45 = vshrl.u32 %v16076_v28, %v2600_v23  ;;  %vm2619_vm7 = vcmp.lt.s32.totalorder %v2598_v52, 3  ;;  %v2493_v35 = vsel %vm2492_vm13, %v2491_v8, 0 }
 0x334   : > { %v2604_v17 = vor.u32 %v2603_v49, %v2602_v18  ;;  %v2607_v34 = vor.u32 %v2606_v27, %v2605_v31  ;;  %v2610_v44 = vor.u32 %v2609_v37, %v2608_v61  ;;  %vm2620_vm4 = vcmp.lt.s32.totalorder %v2598_v52, 4 }
 0x335   : > { %v2613_v42 = vor.u32 %v2612_v11, %v2611_v4  ;;  %v2616_v14 = vor.u32 %v2615_v45, %v2614_v50  ;;  %v2495_v38 = vand.u32 31, %v2493_v35  ;;  %v2494_v59 = vshrl.u32 %v2493_v35, 5 }
 0x336   : > { %v2621_v33 = vsel %vm2617_vm2, %v2601_v0, %v2604_v17  ;;  %v2622_v13 = vsel %vm2620_vm4, %v2610_v44, 2102212464  ;;  %v2625_v2 = vsel %vm2617_vm2, %v2604_v17, %v2607_v34  ;;  %v2629_v20 = vsel %vm2617_vm2, %v2607_v34, %v2610_v44 }
 0x337   : > { %v2623_v47 = vsel %vm2619_vm7, %v2607_v34, %v2622_v13  ;;  %v2626_v7 = vsel %vm2620_vm4, %v2613_v42, 920167782  ;;  %v2630_v12 = vsel %vm2620_vm4, %v2616_v14, 1326507024  ;;  %v2496_v51 = vsub.s32 32, %v2495_v38 }
 0x338   : > { %v2624_v43 = vsel %vm2618_vm12, %v2621_v33, %v2623_v47  ;;  %v2627_v6 = vsel %vm2619_vm7, %v2610_v44, %v2626_v7  ;;  %v2631_v41 = vsel %vm2619_vm7, %v2613_v42, %v2630_v12  ;;  %v2498_v3 = vshll.u32 %v16071_v29, %v2495_v38 }
 0x339   : > { %v2628_v26 = vsel %vm2618_vm12, %v2625_v2, %v2627_v6  ;;  %v2632_v62 = vsel %vm2618_vm12, %v2629_v20, %v2631_v41  ;;  %v2640_v55 = vmul.u32 %v10973_v48, %v2624_v43  ;;  %v2499_v16 = vshrl.u32 %v16072_v25, %v2496_v51  ;;  %v2412_v20 = vpop.f32.mrf.mxu1 }
 0x33a   : > { %v11001_v54 = vmul.u32.u64.low %v10973_v48, %v2632_v62  ;;  %v11002_v5 = vmul.u32.u64.high %v10973_v48, %v2632_v62, %v11001_v54  ;;  %v11005_v22 = vmul.u32.u64.low %v10973_v48, %v2628_v26  ;;  %v11006_v10 = vmul.u32.u64.high %v10973_v48, %v2628_v26, %v11005_v22 }
 0x33b   : > { %v2501_v30 = vshll.u32 %v16072_v25, %v2495_v38  ;;  %v2502_v46 = vshrl.u32 %v16073_v40, %v2496_v51  ;;  %v2504_v58 = vshll.u32 %v16073_v40, %v2495_v38  ;;  %v2505_v9 = vshrl.u32 %v16074_v57, %v2496_v51 }
 0x33c   : > { %v2507_v8 = vshll.u32 %v16074_v57, %v2495_v38  ;;  %v2508_v52 = vshrl.u32 %v16075_v24, %v2496_v51  ;;  %v2500_v1 = vor.u32 %v2499_v16, %v2498_v3  ;;  %v2510_v23 = vshll.u32 %v16075_v24, %v2495_v38 }
 0x33d   : > { %v2503_v39 = vor.u32 %v2502_v46, %v2501_v30  ;;  %v2511_v48 = vshrl.u32 %v16076_v28, %v2496_v51  ;;  %vm2642_vm1 = vc.u32 %v11002_v5, %v11005_v22  ;;  %v2643_v18 = vadd.s32 1, %v11006_v10 }
 0x33e   : > { %v2497_v31 = vshrl.u32 %v16071_v29, %v2496_v51  ;;  %v2506_v61 = vor.u32 %v2505_v9, %v2504_v58  ;;  %v2509_v4 = vor.u32 %v2508_v52, %v2507_v8  ;;  %vm2513_vm6 = vcmp.lt.s32.totalorder %v2494_v59, 1 }
 0x33f   : > { %v2512_v50 = vor.u32 %v2511_v48, %v2510_v23  ;;  %vm2514_vm11 = vcmp.lt.s32.totalorder %v2494_v59, 2  ;;  %v2644_v49 = vsel %vm2642_vm1, %v2643_v18, %v11006_v10  ;;  %vm2515_vm10 = vcmp.lt.s32.totalorder %v2494_v59, 3 }
 0x340   : > { %vm2516_vm3 = vcmp.lt.s32.totalorder %v2494_v59, 4  ;;  %v2521_v27 = vsel %vm2513_vm6, %v2500_v1, %v2503_v39  ;;  %v2645_v37 = vadd.s32 %v2644_v49, %v2640_v55  ;;  %v2525_v45 = vsel %vm2513_vm6, %v2503_v39, %v2506_v61 }
 0x341   : > { %v2518_v0 = vsel %vm2516_vm3, %v2506_v61, 2102212464  ;;  %v2522_v11 = vsel %vm2516_vm3, %v2509_v4, 920167782  ;;  %v2517_v17 = vsel %vm2513_vm6, %v2497_v31, %v2500_v1  ;;  %v2526_v44 = vsel %vm2516_vm3, %v2512_v50, 1326507024 }
 0x342   : > { %v2523_v34 = vsel %vm2515_vm10, %v2506_v61, %v2522_v11  ;;  %vm2804_vm8 = vcmp.gt.s32.totalorder %v2803_v36, 0  ;;  %v2646_v35 = vadd.s32 536870912, %v2645_v37  ;;  %v2519_v42 = vsel %vm2515_vm10, %v2503_v39, %v2518_v0 }
 0x343   : > { %v2524_v14 = vsel %vm2514_vm11, %v2521_v27, %v2523_v34  ;;  %v2527_v38 = vsel %vm2515_vm10, %v2509_v4, %v2526_v44  ;;  %v2805_v51 = vsel %vm2804_vm8, %v2803_v36, 0  ;;  %v2520_v43 = vsel %vm2514_vm11, %v2517_v17, %v2519_v42 }
 0x344   : > { %v2528_v33 = vsel %vm2514_vm11, %v2525_v45, %v2527_v38  ;;  %v11027_v13 = vmul.u32.u64.low %v10975_v53, %v2524_v14  ;;  %v11028_v2 = vmul.u32.u64.high %v10975_v53, %v2524_v14, %v11027_v13  ;;  %v11031_v47 = vshrl.u32 %v2646_v35, 30 }
 0x345   : > { %v11034_v7 = vmul.u32.u64.low %v10975_v53, %v2528_v33  ;;  %v11035_v12 = vmul.u32.u64.high %v10975_v53, %v2528_v33, %v11034_v7  ;;  %v2800_v6 = vand.u32 8388607, %v2793_v60  ;;  %v2807_v41 = vand.u32 31, %v2805_v51 }
 0x346   : > { %v2648_v26 = vshll.u32 %v11031_v47, 30  ;;  %v11042_v62 = vadd.f32 %v10953_v15, %v2412_v20  ;;  %v2539_v3 = vadd.s32 1, %v11028_v2  ;;  %v2536_v55 = vmul.u32 %v10975_v53, %v2520_v43 }
 0x347   : > { %v2808_v54 = vsub.s32 32, %v2807_v41  ;;  %vm2538_vm0 = vc.u32 %v11035_v12, %v11027_v13  ;;  %v2801_v59 = vor.u32 8388608, %v2800_v6  ;;  %v2806_v9 = vshrl.u32 %v2805_v51, 5 }
 0x348   : > { %v2649_v10 = vsub.s32 %v2645_v37, %v2648_v26  ;;  %v2540_v36 = vsel %vm2538_vm0, %v2539_v3, %v11028_v2  ;;  %v2692_v58 = vand.u32 2139095040, %v11042_v62  ;;  %v2816_v52 = vshll.u32 %v16073_v40, %v2807_v41 }
 0x349   : > { %v2541_v30 = vadd.s32 %v2540_v36, %v2536_v55  ;;  %v2811_v46 = vshrl.u32 %v16072_v25, %v2808_v54  ;;  %v2814_v8 = vshrl.u32 %v16073_v40, %v2808_v54  ;;  %v2817_v1 = vshrl.u32 %v16074_v57, %v2808_v54 }
 0x34a   : > { %v2651_v16 = vsub.s32 0, %v2649_v10  ;;  %v2810_v23 = vshll.u32 %v16071_v29, %v2807_v41  ;;  %v2813_v48 = vshll.u32 %v16072_v25, %v2807_v41  ;;  %v2819_v31 = vshll.u32 %v16074_v57, %v2807_v41 }
 0x34b   : > { %v2542_v39 = vadd.s32 536870912, %v2541_v30  ;;  %v2818_v18 = vor.u32 %v2817_v1, %v2816_v52  ;;  %v2820_v61 = vshrl.u32 %v16075_v24, %v2808_v54  ;;  %v2823_v4 = vshrl.u32 %v16076_v28, %v2808_v54 }
 0x34c   : > { %v8192_v53 = vmin.u32 %v2651_v16, %v2649_v10  ;;  %v2812_v49 = vor.u32 %v2811_v46, %v2810_v23  ;;  %v11059_v27 = vshll.u32 %v2801_v59, 8  ;;  %v2815_v0 = vor.u32 %v2814_v8, %v2813_v48 }
 0x34d   : > { %v11061_v37 = vshrl.u32 %v2542_v39, 30  ;;  %v2821_v11 = vor.u32 %v2820_v61, %v2819_v31  ;;  %v2822_v45 = vshll.u32 %v16075_v24, %v2807_v41  ;;  %v2641_v17 = vadd.s32 %v11005_v22, %v11002_v5 }
 0x34e   : > { %v2653_v50 = vclz %v8192_v53  ;;  %vm2828_vm15 = vcmp.lt.s32.totalorder %v2806_v9, 4  ;;  %v2693_v44 = vshrl.u32 %v2692_v58, 23  ;;  %v2809_v42 = vshrl.u32 %v16071_v29, %v2808_v54 }
 0x34f   : > { %v2544_v35 = vshll.u32 %v11061_v37, 30  ;;  %v2824_v14 = vor.u32 %v2823_v4, %v2822_v45  ;;  %v2830_v38 = vsel %vm2828_vm15, %v2818_v18, 2102212464  ;;  %vm2825_vm5 = vcmp.lt.s32.totalorder %v2806_v9, 1 }
 0x350   : > { %v8193_v34 = vadd.s32 4294967294, %v2653_v50  ;;  %vm2826_vm14 = vcmp.lt.s32.totalorder %v2806_v9, 2  ;;  %v2834_v33 = vsel %vm2828_vm15, %v2821_v11, 920167782  ;;  %vm2827_vm13 = vcmp.lt.s32.totalorder %v2806_v9, 3 }
 0x351   : > { %v11070_v20 = vsub.s32 %v2541_v30, %v2544_v35  ;;  %v2833_v5 = vsel %vm2825_vm5, %v2812_v49, %v2815_v0  ;;  %v2829_v51 = vsel %vm2825_vm5, %v2809_v42, %v2812_v49  ;;  %v2831_v43 = vsel %vm2827_vm13, %v2815_v0, %v2830_v38 }
 0x352   : > { %vm8194_vm9 = vcmp.lt.s32.totalorder %v8193_v34, 0  ;;  %v2835_v26 = vsel %vm2827_vm13, %v2818_v18, %v2834_v33  ;;  %v2837_v3 = vsel %vm2825_vm5, %v2815_v0, %v2818_v18  ;;  %v2838_v59 = vsel %vm2828_vm15, %v2824_v14, 1326507024 }
 0x353   : > { %v2656_v2 = vsel %vm8194_vm9, 0, %v8193_v34  ;;  %v2547_v41 = vsub.s32 0, %v11070_v20  ;;  %v2836_v36 = vsel %vm2826_vm14, %v2833_v5, %v2835_v26  ;;  %v2839_v30 = vsel %vm2827_vm13, %v2821_v11, %v2838_v59 }
 0x354   : > { %v2657_v22 = vsub.s32 32, %v2656_v2  ;;  %v2661_v7 = vsub.s32 4294967266, %v2656_v2  ;;  %v2658_v6 = vshll.u32 %v2649_v10, %v2656_v2  ;;  %v2840_v52 = vsel %vm2826_vm14, %v2837_v3, %v2839_v30 }
 0x355   : > { %v8188_v16 = vmin.u32 %v2547_v41, %v11070_v20  ;;  %v11077_v46 = vmul.u32.u64.low %v11059_v27, %v2836_v36  ;;  %v11078_v58 = vmul.u32.u64.high %v11059_v27, %v2836_v36, %v11077_v46  ;;  %v8195_v23 = vadd.s32 4294967169, %v2693_v44 }
 0x356   : > { %v2659_v54 = vshrl.u32 %v2641_v17, %v2657_v22  ;;  %v2662_v55 = vadd.s32 127, %v2661_v7  ;;  %v11083_v53 = vmul.u32.u64.low %v11059_v27, %v2840_v52  ;;  %v11084_v39 = vmul.u32.u64.high %v11059_v27, %v2840_v52, %v11083_v53  ;;  %v8545_v17 = vpop.f32.mrf.mxu1 }
 0x357   : > { %v2549_v1 = vclz %v8188_v16  ;;  %v2832_v18 = vsel %vm2826_vm14, %v2829_v51, %v2831_v43  ;;  %v2851_v61 = vadd.s32 1, %v11078_v58  ;;  %v2689_v4 = vand.u32 2147483647, %v11042_v62 }
 0x358   : > { %v2660_v8 = vor.u32 %v2659_v54, %v2658_v6  ;;  %v2663_v10 = vshll.u32 %v2662_v55, 23  ;;  %v2699_v50 = vadd.s32 1, %v8195_v23  ;;  %v2671_v11 = vsub.s32 4, %v11031_v47 }
 0x359   : > { %v8189_v31 = vadd.s32 4294967294, %v2549_v1  ;;  %v2848_v45 = vmul.u32 %v11059_v27, %v2832_v18  ;;  %vm2850_vm12 = vc.u32 %v11084_v39, %v11077_v46  ;;  %v2696_v38 = vand.u32 8388607, %v2689_v4 }
 0x35a   : > { %v2664_v48 = vor.u32 4788187, %v2663_v10  ;;  %v2667_v0 = vcvt.s32.f32 %v2660_v8  ;;  %vm2700_vm7 = vcmp.gt.s32.totalorder %v2699_v50, 0  ;;  %v2852_v44 = vsel %vm2850_vm12, %v2851_v61, %v11078_v58 }
 0x35b   : > { %vm8190_vm2 = vcmp.lt.s32.totalorder %v8189_v31, 0  ;;  %v2701_v35 = vsel %vm2700_vm7, %v2699_v50, 0  ;;  %v2853_v14 = vadd.s32 %v2852_v44, %v2848_v45  ;;  %v11097_v5 = vadd.f32 %v8545_v17, %v10953_v15 }
 0x35c   : > { %v2665_v49 = vand.u32 2147483647, %v2664_v48  ;;  %v2552_v34 = vsel %vm8190_vm2, 0, %v8189_v31  ;;  %v2703_v2 = vand.u32 31, %v2701_v35  ;;  %vm11101_vm4 = vcmp.le.f32.partialorder %v2585_v19, 0.7853982 }
 0x35d   : > { %v2557_v42 = vsub.s32 4294967266, %v2552_v34  ;;  %16077 = vst [vmem:[#allocation3_spill] sm:$0xff] %v11097_v5  ;;  %vm2587_vm1 = vcmp.lt.s32.totalorder %v10956_v32, 0  ;;  %v2854_v22 = vadd.s32 536870912, %v2853_v14  ;;  %v2553_v51 = vsub.s32 32, %v2552_v34 }
 0x35e   : > { %v2668_v9 = vmul.f32 %v2667_v0, %v2665_v49  ;;  %v11107_v7 = vsel %vm2587_vm1, %v2671_v11, %v11031_v47  ;;  %v2704_v6 = vsub.s32 32, %v2703_v2  ;;  %v2537_v26 = vadd.s32 %v11027_v13, %v11035_v12 }
 0x35f   : > { %v2558_v43 = vadd.s32 127, %v2557_v42  ;;  %v11111_v3 = vshrl.u32 %v2854_v22, 30  ;;  %v2697_v54 = vor.u32 8388608, %v2696_v38  ;;  %v2706_v19 = vshll.u32 %v16071_v29, %v2703_v2 }
 0x360   : > { %v2669_v33 = vxor.u32 2147483648, %v2668_v9  ;;  %v2707_v55 = vshrl.u32 %v16072_v25, %v2704_v6  ;;  %v2710_v36 = vshrl.u32 %v16073_v40, %v2704_v6  ;;  %v3004_v59 = vand.u32 2139095040, %v11097_v5 }
 0x361   : > { %v2554_v47 = vshll.u32 %v11070_v20, %v2552_v34  ;;  %v2856_v16 = vshll.u32 %v11111_v3, 30  ;;  %v2702_v30 = vshrl.u32 %v2701_v35, 5  ;;  %v2709_v58 = vshll.u32 %v16072_v25, %v2703_v2 }
 0x362   : > { %v2670_v41 = vsel %vm2587_vm1, %v2669_v33, %v2668_v9  ;;  %v2555_v12 = vshrl.u32 %v2537_v26, %v2553_v51  ;;  %v2559_v8 = vshll.u32 %v2558_v43, 23  ;;  %v2708_v10 = vor.u32 %v2707_v55, %v2706_v19 }
 0x363   : > { %v2673_v13 = vsel %vm11101_vm4, %v10956_v32, %v2670_v41  ;;  %v11123_v52 = vsub.s32 %v2853_v14, %v2856_v16  ;;  %v2711_v1 = vor.u32 %v2710_v36, %v2709_v58  ;;  %v2712_v53 = vshll.u32 %v16073_v40, %v2703_v2 }
 0x364   : > { %v2713_v23 = vshrl.u32 %v16074_v57, %v2704_v6  ;;  %v2715_v20 = vshll.u32 %v16074_v57, %v2703_v2  ;;  %v2716_v48 = vshrl.u32 %v16075_v24, %v2704_v6  ;;  %v2718_v18 = vshll.u32 %v16075_v24, %v2703_v2 }
 0x365   : > { %v2719_v31 = vshrl.u32 %v16076_v28, %v2704_v6  ;;  %v2674_v61 = vsel %vm11101_vm4, 0, %v11107_v7  ;;  %v2859_v50 = vsub.s32 0, %v11123_v52  ;;  %v2737_v0 = vshll.u32 %v2697_v54, 8 }
 0x366   : > { %v2714_v49 = vor.u32 %v2713_v23, %v2712_v53  ;;  %v2556_v11 = vor.u32 %v2555_v12, %v2554_v47  ;;  %v2717_v45 = vor.u32 %v2716_v48, %v2715_v20  ;;  %v3005_v9 = vshrl.u32 %v3004_v59, 23 }
 0x367   : > { %v2720_v17 = vor.u32 %v2719_v31, %v2718_v18  ;;  %8959 = vcosq.f32 %v2673_v13  ;;  %v2560_v34 = vor.u32 4788187, %v2559_v8  ;;  %v8200_v44 = vmin.u32 %v2859_v50, %v11123_v52 }
 0x368   : > { %vm2721_vm6 = vcmp.lt.s32.totalorder %v2702_v30, 1  ;;  %8961 = vsinq.f32 %v2673_v13  ;;  %v2705_v35 = vshrl.u32 %v16071_v29, %v2704_v6  ;;  %vm2724_vm11 = vcmp.lt.s32.totalorder %v2702_v30, 4 }
 0x369   : > { %v2729_v42 = vsel %vm2721_vm6, %v2708_v10, %v2711_v1  ;;  %v2861_v14 = vclz %v8200_v44  ;;  %vm2723_vm10 = vcmp.lt.s32.totalorder %v2702_v30, 3  ;;  %v2726_v38 = vsel %vm2724_vm11, %v2714_v49, 2102212464 }
 0x36a   : > { %v2730_v33 = vsel %vm2724_vm11, %v2717_v45, 920167782  ;;  %vm2722_vm3 = vcmp.lt.s32.totalorder %v2702_v30, 2  ;;  %v2733_v27 = vsel %vm2721_vm6, %v2711_v1, %v2714_v49  ;;  %v2734_v22 = vsel %vm2724_vm11, %v2720_v17, 1326507024  ;;  %v2422_v30 = vpop.f32.mrf.mxu1 }
 0x36b   : > { %v2731_v2 = vsel %vm2723_vm10, %v2714_v49, %v2730_v33  ;;  %v2561_v7 = vand.u32 2147483647, %v2560_v34  ;;  %v8201_v51 = vadd.s32 4294967294, %v2861_v14  ;;  %v2725_v43 = vsel %vm2721_vm6, %v2705_v35, %v2708_v10 }
 0x36c   : > { %v2732_v41 = vsel %vm2722_vm3, %v2729_v42, %v2731_v2  ;;  %v2727_v26 = vsel %vm2723_vm10, %v2711_v1, %v2726_v38  ;;  %v2735_v54 = vsel %vm2723_vm10, %v2717_v45, %v2734_v22  ;;  %v2563_v6 = vcvt.s32.f32 %v2556_v11 }
 0x36d   : > { %v11138_v19 = vmul.u32.u64.low %v2737_v0, %v2732_v41  ;;  %v11139_v55 = vmul.u32.u64.high %v2737_v0, %v2732_v41, %v11138_v19  ;;  %vm8202_vm8 = vcmp.lt.s32.totalorder %v8201_v51, 0  ;;  %v2736_v36 = vsel %vm2722_vm3, %v2733_v27, %v2735_v54 }
 0x36e   : > { %v8207_v59 = vadd.s32 4294967169, %v3005_v9  ;;  %v2567_v47 = vsub.s32 4, %v11061_v37  ;;  %v11144_v16 = vsel %vm8202_vm8, 0, %v8201_v51  ;;  %v2564_v12 = vmul.f32 %v2563_v6, %v2561_v7 }
 0x36f   : > { %v11146_v58 = vmul.u32.u64.low %v2737_v0, %v2736_v36  ;;  %v11147_v13 = vmul.u32.u64.high %v2737_v0, %v2736_v36, %v11146_v58  ;;  %v2869_v8 = vsub.s32 4294967266, %v11144_v16  ;;  %v2728_v10 = vsel %vm2722_vm3, %v2725_v43, %v2727_v26 }
 0x370   : > { %v3001_v1 = vand.u32 2147483647, %v11097_v5  ;;  %v2747_v53 = vadd.s32 1, %v11139_v55  ;;  %v3011_v23 = vadd.s32 1, %v8207_v59  ;;  %v2678_v20 = vadd.s32 3, %v2674_v61 }
 0x371   : > { %vm2483_vm0 = vcmp.lt.s32.totalorder %v10961_v21, 0  ;;  %v2870_v48 = vadd.s32 127, %v2869_v8  ;;  %v2744_v31 = vmul.u32 %v2737_v0, %v2728_v10  ;;  %vm2746_vm15 = vc.u32 %v11147_v13, %v11138_v19 }
 0x372   : > { %v11157_v18 = vsel %vm2483_vm0, %v2567_v47, %v11061_v37  ;;  %vm3012_vm9 = vcmp.gt.s32.totalorder %v3011_v23, 0  ;;  %v2565_v50 = vxor.u32 2147483648, %v2564_v12  ;;  %v2879_v49 = vsub.s32 4, %v11111_v3 }
 0x373   : > { %v2748_v11 = vsel %vm2746_vm15, %v2747_v53, %v11139_v55  ;;  %v3008_v61 = vand.u32 8388607, %v3001_v1  ;;  %v2865_v17 = vsub.s32 32, %v11144_v16  ;;  %v2871_v37 = vshll.u32 %v2870_v48, 23 }
 0x374   : > { %v11165_v45 = vpop.eup %8959  ;;  %v2749_v9 = vadd.s32 %v2748_v11, %v2744_v31  ;;  %v3013_v0 = vsel %vm3012_vm9, %v3011_v23, 0  ;;  %vm11172_vm5 = vcmp.le.f32.partialorder %v2481_v63, 0.7853982  ;;  %vm2795_vm14 = vcmp.lt.s32.totalorder %v10964_v56, 0 }
 0x375   : > { %v11168_v34 = vpop.eup %8961  ;;  %v3015_v35 = vand.u32 31, %v3013_v0  ;;  %v11178_v42 = vadd.f32 %v10953_v15, %v2422_v30  ;;  %v11180_v14 = vand.u32 3, %v2678_v20  ;;  %v2570_v38 = vsel %vm11172_vm5, 0, %v11157_v18 }
 0x376   : > { %v2849_v33 = vadd.s32 %v11077_v46, %v11084_v39  ;;  %v2750_v2 = vadd.s32 536870912, %v2749_v9  ;;  %v11189_v63 = vsel %vm2483_vm0, %v2565_v50, %v2564_v12  ;;  %v11194_v27 = vsel %vm2795_vm14, %v2879_v49, %v11111_v3 }
 0x377   : > { %16082 = vst [vmem:[#allocation10_spill] sm:$0xff] %v11178_v42  ;;  %v3009_v22 = vor.u32 8388608, %v3008_v61  ;;  %v3016_v7 = vsub.s32 32, %v3015_v35  ;;  %v2685_v51 = vxor.u32 2147483648, %v11165_v45  ;;  %v11197_v41 = vor.u32 4788187, %v2871_v37 }
 0x378   : > { %v2867_v43 = vshrl.u32 %v2849_v33, %v2865_v17  ;;  %v11199_v26 = vshrl.u32 %v2750_v2, 30  ;;  %v3014_v46 = vshrl.u32 %v3013_v0, 5  ;;  %v3018_v39 = vshll.u32 %v16071_v29, %v3015_v35 }
 0x379   : > { %v3019_v54 = vshrl.u32 %v16072_v25, %v3016_v7  ;;  %v3022_v55 = vshrl.u32 %v16073_v40, %v3016_v7  ;;  %v3021_v3 = vshll.u32 %v16072_v25, %v3015_v35  ;;  %v3025_v36 = vshrl.u32 %v16074_v57, %v3016_v7 }
 0x37a   : > { %v2752_v6 = vshll.u32 %v11199_v26, 30  ;;  %v3028_v59 = vshrl.u32 %v16075_v24, %v3016_v7  ;;  %v3024_v47 = vshll.u32 %v16073_v40, %v3015_v35  ;;  %v3027_v58 = vshll.u32 %v16074_v57, %v3015_v35 }
 0x37b   : > { %v3030_v12 = vshll.u32 %v16075_v24, %v3015_v35  ;;  %v3031_v8 = vshrl.u32 %v16076_v28, %v3016_v7  ;;  %v2866_v10 = vshll.u32 %v11123_v52, %v11144_v16  ;;  %v3020_v23 = vor.u32 %v3019_v54, %v3018_v39 }
 0x37c   : > { %v11214_v53 = vsub.s32 %v2749_v9, %v2752_v6  ;;  %v3023_v20 = vor.u32 %v3022_v55, %v3021_v3  ;;  %v2682_v48 = vxor.u32 2147483648, %v11168_v34  ;;  %vm11219_vm13 = vcmp.le.f32.partialorder %v2793_v60, 0.7853982 }
 0x37d   : > { %v3026_v30 = vor.u32 %v3025_v36, %v3024_v47  ;;  %v3029_v50 = vor.u32 %v3028_v59, %v3027_v58  ;;  %v3032_v49 = vor.u32 %v3031_v8, %v3030_v12  ;;  %v2868_v11 = vor.u32 %v2867_v43, %v2866_v10 }
 0x37e   : > { %v2755_v61 = vsub.s32 0, %v11214_v53  ;;  %v3049_v17 = vshll.u32 %v3009_v22, 8  ;;  %v2897_v52 = vand.u32 2147483647, %v11178_v42  ;;  %vm2681_vm2 = vcmp.eq.s32.totalorder %v11180_v14, 0 }
 0x37f   : > { %v2873_v16 = vand.u32 2147483647, %v11197_v41  ;;  %v3017_v37 = vshrl.u32 %v16071_v29, %v3016_v7  ;;  %vm3033_vm12 = vcmp.lt.s32.totalorder %v3014_v46, 1  ;;  %v2900_v60 = vand.u32 2139095040, %v11178_v42 }
 0x380   : > { %v8196_v9 = vmin.u32 %v2755_v61, %v11214_v53  ;;  %vm3035_vm7 = vcmp.lt.s32.totalorder %v3014_v46, 3  ;;  %vm3036_vm4 = vcmp.lt.s32.totalorder %v3014_v46, 4  ;;  %v3041_v0 = vsel %vm3033_vm12, %v3020_v23, %v3023_v20 }
 0x381   : > { %v3038_v35 = vsel %vm3036_vm4, %v3026_v30, 2102212464  ;;  %v3042_v33 = vsel %vm3036_vm4, %v3029_v50, 920167782  ;;  %v3045_v2 = vsel %vm3033_vm12, %v3023_v20, %v3026_v30  ;;  %v3046_v22 = vsel %vm3036_vm4, %v3032_v49, 1326507024 }
 0x382   : > { %v2757_v43 = vclz %v8196_v9  ;;  %vm3034_vm1 = vcmp.lt.s32.totalorder %v3014_v46, 2  ;;  %v3043_v39 = vsel %vm3035_vm7, %v3026_v30, %v3042_v33  ;;  %v3047_v41 = vsel %vm3035_vm7, %v3029_v50, %v3046_v22 }
 0x383   : > { %vm2680_vm6 = vcmp.lt.s32.totalorder %v11180_v14, 2  ;;  %v3037_v7 = vsel %vm3033_vm12, %v3017_v37, %v3020_v23  ;;  %v3044_v54 = vsel %vm3034_vm1, %v3041_v0, %v3043_v39  ;;  %v3048_v55 = vsel %vm3034_vm1, %v3045_v2, %v3047_v41  ;;  %v8548_v37 = vpop.f32.mrf.mxu1 }
 0x384   : > { %v2901_v6 = vshrl.u32 %v2900_v60, 23  ;;  %v8197_v3 = vadd.s32 4294967294, %v2757_v43  ;;  %v3039_v36 = vsel %vm3035_vm7, %v3023_v20, %v3038_v35  ;;  %vm2684_vm11 = vcmp.eq.s32.totalorder %v11180_v14, 2 }
 0x385   : > { %v11236_v59 = vmul.u32.u64.low %v3049_v17, %v3048_v55  ;;  %v11237_v47 = vmul.u32.u64.high %v3049_v17, %v3048_v55, %v11236_v59  ;;  %v11240_v58 = vmul.u32.u64.low %v3049_v17, %v3044_v54  ;;  %v11241_v12 = vmul.u32.u64.high %v3049_v17, %v3044_v54, %v11240_v58 }
 0x386   : > { %v8203_v8 = vadd.s32 4294967169, %v2901_v6  ;;  %v11248_v10 = vadd.s32 3, %v2570_v38  ;;  %v2875_v23 = vcvt.s32.f32 %v2868_v11  ;;  %v2882_v20 = vsel %vm11219_vm13, 0, %v11194_v27 }
 0x387   : > { %vm8198_vm10 = vcmp.lt.s32.totalorder %v8197_v3, 0  ;;  %v11257_v30 = vsel %vm11172_vm5, %v10961_v21, %v11189_v63  ;;  %v3040_v49 = vsel %vm3034_vm1, %v3037_v7, %v3039_v36  ;;  %v2683_v18 = vsel %vm2681_vm2, %v11165_v45, %v2682_v48 }
 0x388   : > { %v2760_v50 = vsel %vm8198_vm10, 0, %v8197_v3  ;;  %v2907_v61 = vadd.s32 1, %v8203_v8  ;;  %v2686_v38 = vsel %vm2684_vm11, %v2685_v51, %v11168_v34  ;;  %v2876_v27 = vmul.f32 %v2875_v23, %v2873_v16 }
 0x389   : > { %v2904_v11 = vand.u32 8388607, %v2897_v52  ;;  %v2765_v44 = vsub.s32 4294967266, %v2760_v50  ;;  %vm3058_vm3 = vc.u32 %v11237_v47, %v11240_v58  ;;  %v3059_v63 = vadd.s32 1, %v11241_v12 }
 0x38a   : > { %vm2908_vm8 = vcmp.gt.s32.totalorder %v2907_v61, 0  ;;  %vm2691_vm0 = vcmp.lt.s32.totalorder %v11042_v62, 0  ;;  %v2761_v46 = vsub.s32 32, %v2760_v50  ;;  %v3056_v60 = vmul.u32 %v3049_v17, %v3040_v49  ;;  %v2432_v49 = vpop.f32.mrf.mxu1 }
 0x38b   : > { %v2909_v48 = vsel %vm2908_vm8, %v2907_v61, 0  ;;  %v11273_v9 = vadd.f32 %v8548_v37, %v10953_v15  ;;  %8963 = vcosq.f32 %v11257_v30  ;;  %v11276_v45 = vadd.s32 3, %v2882_v20 }
 0x38c   : > { %v3060_v34 = vsel %vm3058_vm3, %v3059_v63, %v11241_v12  ;;  %v2911_v51 = vand.u32 31, %v2909_v48  ;;  %v11281_v16 = vsel %vm2680_vm6, %v2683_v18, %v2686_v38  ;;  %v2745_v0 = vadd.s32 %v11138_v19, %v11147_v13 }
 0x38d   : > { %16085 = vst [vmem:[#allocation16_spill] sm:$0xff] %v11273_v9  ;;  %v2775_v17 = vsub.s32 4, %v11199_v26  ;;  %v3061_v35 = vadd.s32 %v3060_v34, %v3056_v60  ;;  %v2877_v33 = vxor.u32 2147483648, %v2876_v27  ;;  %v2766_v2 = vadd.s32 127, %v2765_v44 }
 0x38e   : > { %v2905_v22 = vor.u32 8388608, %v2904_v11  ;;  %v2912_v43 = vsub.s32 32, %v2911_v51  ;;  %v2763_v39 = vshrl.u32 %v2745_v0, %v2761_v46  ;;  %v2910_v7 = vshrl.u32 %v2909_v48, 5 }
 0x38f   : > { %v3062_v41 = vadd.s32 536870912, %v3061_v35  ;;  %v3212_v54 = vand.u32 2139095040, %v11273_v9  ;;  %v2914_v55 = vshll.u32 %v16071_v29, %v2911_v51  ;;  %v2917_v3 = vshll.u32 %v16072_v25, %v2911_v51 }
 0x390   : > { %v2915_v14 = vshrl.u32 %v16072_v25, %v2912_v43  ;;  %v2918_v6 = vshrl.u32 %v16073_v40, %v2912_v43  ;;  %v2921_v19 = vshrl.u32 %v16074_v57, %v2912_v43  ;;  %v2920_v36 = vshll.u32 %v16073_v40, %v2911_v51 }
 0x391   : > { %v11291_v13 = vshrl.u32 %v3062_v41, 30  ;;  %v2924_v59 = vshrl.u32 %v16075_v24, %v2912_v43  ;;  %v2767_v12 = vshll.u32 %v2766_v2, 23  ;;  %v2923_v8 = vshll.u32 %v16074_v57, %v2911_v51 }
 0x392   : > { %v2926_v23 = vshll.u32 %v16075_v24, %v2911_v51  ;;  %v2927_v20 = vshrl.u32 %v16076_v28, %v2912_v43  ;;  %v2916_v37 = vor.u32 %v2915_v14, %v2914_v55  ;;  %v2919_v18 = vor.u32 %v2918_v6, %v2917_v3 }
 0x393   : > { %v3064_v61 = vshll.u32 %v11291_v13, 30  ;;  %v2922_v38 = vor.u32 %v2921_v19, %v2920_v36  ;;  %vm2677_vm15 = vweird.f32 %v10956_v32  ;;  %v2878_v11 = vsel %vm2795_vm14, %v2877_v33, %v2876_v27 }
 0x394   : > { %v2762_v44 = vshll.u32 %v11214_v53, %v2760_v50  ;;  %v11307_v63 = vsel %vm2691_vm0, %v2775_v17, %v11199_v26  ;;  %v2925_v46 = vor.u32 %v2924_v59, %v2923_v8  ;;  %vm11311_vm9 = vcmp.le.f32.partialorder %v2689_v4, 0.7853982 }
 0x395   : > { %v11315_v48 = vsub.s32 %v3061_v35, %v3064_v61  ;;  %v2928_v34 = vor.u32 %v2927_v20, %v2926_v23  ;;  %v2945_v51 = vshll.u32 %v2905_v22, 8  ;;  %v11318_v27 = vadd.f32 %v10953_v15, %v2432_v49 }
 0x396   : > { %v2764_v53 = vor.u32 %v2763_v39, %v2762_v44  ;;  %vm2929_vm5 = vcmp.lt.s32.totalorder %v2910_v7, 1  ;;  %vm2932_vm14 = vcmp.lt.s32.totalorder %v2910_v7, 4  ;;  %v3213_v50 = vshrl.u32 %v3212_v54, 23 }
 0x397   : > { %16088 = vst [vmem:[#allocation5_spill] sm:$0xff] %v11318_v27  ;;  %v2768_v26 = vor.u32 4788187, %v2767_v12  ;;  %v3067_v0 = vsub.s32 0, %v11315_v48  ;;  %v2934_v17 = vsel %vm2932_vm14, %v2922_v38, 2102212464  ;;  %v2937_v4 = vsel %vm2929_vm5, %v2916_v37, %v2919_v18 }
 0x398   : > { %v2913_v33 = vshrl.u32 %v16071_v29, %v2912_v43  ;;  %vm2931_vm2 = vcmp.lt.s32.totalorder %v2910_v7, 3  ;;  %v2938_v35 = vsel %vm2932_vm14, %v2925_v46, 920167782  ;;  %v2941_v2 = vsel %vm2929_vm5, %v2919_v18, %v2922_v38  ;;  %v11324_v22 = vpop.eup %8963 }
 0x399   : > { %v8208_v41 = vmin.u32 %v3067_v0, %v11315_v48  ;;  %vm2930_vm12 = vcmp.lt.s32.totalorder %v2910_v7, 2  ;;  %v2939_v39 = vsel %vm2931_vm2, %v2922_v38, %v2938_v35  ;;  %v2942_v55 = vsel %vm2932_vm14, %v2928_v34, 1326507024 }
 0x39a   : > { %v2933_v54 = vsel %vm2929_vm5, %v2913_v33, %v2916_v37  ;;  %v2935_v14 = vsel %vm2931_vm2, %v2919_v18, %v2934_v17  ;;  %v2940_v6 = vsel %vm2930_vm12, %v2937_v4, %v2939_v39  ;;  %v2943_v19 = vsel %vm2931_vm2, %v2925_v46, %v2942_v55 }
 0x39b   : > { %v3069_v3 = vclz %v8208_v41  ;;  %v2944_v43 = vsel %vm2930_vm12, %v2941_v2, %v2943_v19  ;;  %v11330_v36 = vmul.u32.u64.low %v2945_v51, %v2940_v6  ;;  %v11331_v59 = vmul.u32.u64.high %v2945_v51, %v2940_v6, %v11330_v36 }
 0x39c   : > { %8965 = vsinq.f32 %v11257_v30  ;;  %vm3003_vm7 = vcmp.lt.s32.totalorder %v11097_v5, 0  ;;  %v11336_v12 = vmul.u32.u64.low %v2945_v51, %v2944_v43  ;;  %v11337_v8 = vmul.u32.u64.high %v2945_v51, %v2944_v43, %v11336_v12 }
 0x39d   : > { %v8215_v23 = vadd.s32 4294967169, %v3213_v50  ;;  %v2688_v20 = vsel %vm2677_vm15, nan, %v11281_v16  ;;  %v2769_v49 = vand.u32 2147483647, %v2768_v26  ;;  %v8209_v61 = vadd.s32 4294967294, %v3069_v3  ;;  %v8551_v26 = vpop.f32.mrf.mxu1 }
 0x39e   : > { %v2936_v37 = vsel %vm2930_vm12, %v2933_v54, %v2935_v14  ;;  %v2881_v18 = vsel %vm11219_vm13, %v10964_v56, %v2878_v11  ;;  %v2778_v30 = vsel %vm11311_vm9, 0, %v11307_v63  ;;  %v3209_v38 = vand.u32 2147483647, %v11273_v9 }
 0x39f   : > { %v3219_v44 = vadd.s32 1, %v8215_v23  ;;  %v2771_v46 = vcvt.s32.f32 %v2764_v53  ;;  %vm8210_vm4 = vcmp.lt.s32.totalorder %v8209_v61, 0  ;;  %v2955_v32 = vadd.s32 1, %v11331_v59  ;;  %v9153_v53 = vld [vmem:[%s9279_s13 + $0x8] sm:$0xff] }
 0x3a0   : > { %v3108_v16 = vand.u32 2139095040, %v11318_v27  ;;  %v3072_v7 = vsel %vm8210_vm4, 0, %v8209_v61  ;;  %v2952_v34 = vmul.u32 %v2945_v51, %v2936_v37  ;;  %vm2954_vm1 = vc.u32 %v11337_v8, %v11330_v36 }
 0x3a1   : > { %vm3220_vm13 = vcmp.gt.s32.totalorder %v3219_v44, 0  ;;  %v11354_v31 = vmul.f32 %v2771_v46, %v2769_v49  ;;  %v3077_v11 = vsub.s32 4294967266, %v3072_v7  ;;  %v3087_v63 = vsub.s32 4, %v11291_v13 }
 0x3a2   : > { %v2956_v50 = vsel %vm2954_vm1, %v2955_v32, %v11331_v59  ;;  %v11359_v0 = vadd.f32 %v9153_v53, %v2688_v20  ;;  %v3216_v4 = vand.u32 8388607, %v3209_v38  ;;  %v3221_v51 = vsel %vm3220_vm13, %v3219_v44, 0 }
 0x3a3   : > { %v2957_v17 = vadd.s32 %v2956_v50, %v2952_v34  ;;  %8967 = vcosq.f32 %v2881_v18  ;;  %v11363_v33 = vadd.s32 3, %v2778_v30  ;;  %v3223_v35 = vand.u32 31, %v3221_v51 }
 0x3a4   : > { %16089 = vst [vmem:[#allocation21_spill] sm:$0xff] %v11359_v0  ;;  %v3109_v2 = vshrl.u32 %v3108_v16, 23  ;;  %8969 = vsinq.f32 %v2881_v18  ;;  %v3057_v41 = vadd.s32 %v11240_v58, %v11237_v47  ;;  %v11368_v55 = vadd.f32 %v8551_v26, %v10953_v15 }
 0x3a5   : > { %v2958_v39 = vadd.s32 536870912, %v2957_v17  ;;  %v2773_v54 = vxor.u32 2147483648, %v11354_v31  ;;  %v3078_v14 = vadd.s32 127, %v3077_v11  ;;  %v11374_v6 = vsel %vm3003_vm7, %v3087_v63, %v11291_v13 }
 0x3a6   : > { %16090 = vst [vmem:[#allocation8_spill] sm:$0xff] %v11368_v55  ;;  %v3224_v19 = vsub.s32 32, %v3223_v35  ;;  %v3073_v3 = vsub.s32 32, %v3072_v7  ;;  %v3217_v59 = vor.u32 8388608, %v3216_v4  ;;  %v15683_v12 = vand.u32 2147483647, %v11318_v27 }
 0x3a7   : > { %v11376_v43 = vshrl.u32 %v2958_v39, 30  ;;  %v3222_v47 = vshrl.u32 %v3221_v51, 5  ;;  %v3226_v58 = vshll.u32 %v16071_v29, %v3223_v35  ;;  %v8211_v23 = vadd.s32 4294967169, %v3109_v2 }
 0x3a8   : > { %v3227_v15 = vshrl.u32 %v16072_v25, %v3224_v19  ;;  %v3229_v49 = vshll.u32 %v16072_v25, %v3223_v35  ;;  %v3230_v13 = vshrl.u32 %v16073_v40, %v3224_v19  ;;  %v3233_v61 = vshrl.u32 %v16074_v57, %v3224_v19 }
 0x3a9   : > { %v2960_v20 = vshll.u32 %v11376_v43, 30  ;;  %v11385_v37 = vpop.eup %8965  ;;  %v3079_v18 = vshll.u32 %v3078_v14, 23  ;;  %v3232_v30 = vshll.u32 %v16073_v40, %v3223_v35  ;;  %v3235_v44 = vshll.u32 %v16074_v57, %v3223_v35 }
 0x3aa   : > { %v3236_v46 = vshrl.u32 %v16075_v24, %v3224_v19  ;;  %v3075_v32 = vshrl.u32 %v3057_v41, %v3073_v3  ;;  %v3228_v34 = vor.u32 %v3227_v15, %v3226_v58  ;;  %v3231_v11 = vor.u32 %v3230_v13, %v3229_v49 }
 0x3ab   : > { %v11390_v16 = vsub.s32 %v2957_v17, %v2960_v20  ;;  %vm11394_vm6 = vcmp.le.f32.partialorder %v3001_v1, 0.7853982  ;;  %v3234_v50 = vor.u32 %v3233_v61, %v3232_v30  ;;  %v3238_v53 = vshll.u32 %v16075_v24, %v3223_v35 }
 0x3ac   : > { %v3237_v26 = vor.u32 %v3236_v46, %v3235_v44  ;;  %v3239_v4 = vshrl.u32 %v16076_v28, %v3224_v19  ;;  %v3074_v51 = vshll.u32 %v11315_v48, %v3072_v7  ;;  %v3257_v17 = vshll.u32 %v3217_v59, 8 }
 0x3ad   : > { %v2963_v2 = vsub.s32 0, %v11390_v16  ;;  %v11404_v41 = vand.u32 8388607, %v15683_v12  ;;  %v3080_v39 = vor.u32 4788187, %v3079_v18  ;;  %vm3241_vm11 = vcmp.lt.s32.totalorder %v3222_v47, 1 }
 0x3ae   : > { %v3240_v1 = vor.u32 %v3239_v4, %v3238_v53  ;;  %v3115_v14 = vadd.s32 1, %v8211_v23  ;;  %v3076_v3 = vor.u32 %v3075_v32, %v3074_v51  ;;  %vm3244_vm10 = vcmp.lt.s32.totalorder %v3222_v47, 4 }
 0x3af   : > { %v8204_v58 = vmin.u32 %v2963_v2, %v11390_v16  ;;  %v3249_v35 = vsel %vm3241_vm11, %v3228_v34, %v3231_v11  ;;  %v3225_v15 = vshrl.u32 %v16071_v29, %v3224_v19  ;;  %vm3243_vm3 = vcmp.lt.s32.totalorder %v3222_v47, 3 }
 0x3b0   : > { %v3246_v48 = vsel %vm3244_vm10, %v3234_v50, 2102212464  ;;  %v3250_v7 = vsel %vm3244_vm10, %v3237_v26, 920167782  ;;  %v11409_v59 = vpop.eup %8967  ;;  %vm3242_vm8 = vcmp.lt.s32.totalorder %v3222_v47, 2  ;;  %v3253_v13 = vsel %vm3241_vm11, %v3231_v11, %v3234_v50 }
 0x3b1   : > { %v2965_v20 = vclz %v8204_v58  ;;  %v3251_v49 = vsel %vm3243_vm3, %v3234_v50, %v3250_v7  ;;  %v11412_v61 = vpop.eup %8969  ;;  %v3081_v23 = vand.u32 2147483647, %v3080_v39  ;;  %v3245_v18 = vsel %vm3241_vm11, %v3225_v15, %v3228_v34 }
 0x3b2   : > { %v3252_v30 = vsel %vm3242_vm8, %v3249_v35, %v3251_v49  ;;  %v3254_v44 = vsel %vm3244_vm10, %v3240_v1, 1326507024  ;;  %v3247_v19 = vsel %vm3243_vm3, %v3231_v11, %v3246_v48  ;;  %vm3116_vm15 = vcmp.gt.s32.totalorder %v3115_v14, 0 }
 0x3b3   : > { %v8205_v46 = vadd.s32 4294967294, %v2965_v20  ;;  %v3255_v32 = vsel %vm3243_vm3, %v3237_v26, %v3254_v44  ;;  %v11417_v4 = vmul.u32.u64.low %v3257_v17, %v3252_v30  ;;  %v11418_v51 = vmul.u32.u64.high %v3257_v17, %v3252_v30, %v11417_v4 }
 0x3b4   : > { %v3256_v53 = vsel %vm3242_vm8, %v3253_v13, %v3255_v32  ;;  %v3117_v2 = vsel %vm3116_vm15, %v3115_v14, 0  ;;  %v3090_v50 = vsel %vm11394_vm6, 0, %v11374_v6  ;;  %v3083_v1 = vcvt.s32.f32 %v3076_v3 }
 0x3b5   : > { %vm8206_vm5 = vcmp.lt.s32.totalorder %v8205_v46, 0  ;;  %v11424_v34 = vmul.u32.u64.low %v3257_v17, %v3256_v53  ;;  %v11425_v39 = vmul.u32.u64.high %v3257_v17, %v3256_v53, %v11424_v34  ;;  %v3248_v11 = vsel %vm3242_vm8, %v3245_v18, %v3247_v19 }
 0x3b6   : > { %v2968_v58 = vsel %vm8206_vm5, 0, %v8205_v46  ;;  %v3119_v26 = vand.u32 31, %v3117_v2  ;;  %v11433_v35 = vsel %vm2691_vm0, %v2773_v54, %v11354_v31  ;;  %v2953_v14 = vadd.s32 %v11330_v36, %v11337_v8 }
 0x3b7   : > { %v2969_v15 = vsub.s32 32, %v2968_v58  ;;  %v2973_v48 = vsub.s32 4294967266, %v2968_v58  ;;  %v11437_v7 = vmul.f32 %v3083_v1, %v3081_v23  ;;  %v3267_v3 = vadd.s32 1, %v11418_v51 }
 0x3b8   : > { %v3113_v47 = vor.u32 8388608, %v11404_v41  ;;  %v3120_v20 = vsub.s32 32, %v3119_v26  ;;  %v3264_v13 = vmul.u32 %v3257_v17, %v3248_v11  ;;  %vm3266_vm14 = vc.u32 %v11425_v39, %v11417_v4 }
 0x3b9   : > { %v2974_v49 = vadd.s32 127, %v2973_v48  ;;  %v11443_v18 = vshrl.u32 %v3117_v2, 5  ;;  %v3268_v31 = vsel %vm3266_vm14, %v3267_v3, %v11418_v51  ;;  %v3122_v36 = vshll.u32 %v16071_v29, %v3119_v26 }
 0x3ba   : > { %v3123_v8 = vshrl.u32 %v16072_v25, %v3120_v20  ;;  %v3126_v54 = vshrl.u32 %v16073_v40, %v3120_v20  ;;  %v2970_v23 = vshll.u32 %v11390_v16, %v2968_v58  ;;  %v2971_v30 = vshrl.u32 %v2953_v14, %v2969_v15 }
 0x3bb   : > { %v2975_v41 = vshll.u32 %v2974_v49, 23  ;;  %v3269_v44 = vadd.s32 %v3268_v31, %v3264_v13  ;;  %v3125_v17 = vshll.u32 %v16072_v25, %v3119_v26  ;;  %v3128_v19 = vshll.u32 %v16073_v40, %v3119_v26 }
 0x3bc   : > { %v3124_v46 = vor.u32 %v3123_v8, %v3122_v36  ;;  %v3129_v32 = vshrl.u32 %v16074_v57, %v3120_v20  ;;  %v3131_v2 = vshll.u32 %v16074_v57, %v3119_v26  ;;  %v3132_v34 = vshrl.u32 %v16075_v24, %v3120_v20 }
 0x3bd   : > { %v2976_v53 = vor.u32 4788187, %v2975_v41  ;;  %v3270_v51 = vadd.s32 536870912, %v3269_v44  ;;  %v3127_v1 = vor.u32 %v3126_v54, %v3125_v17  ;;  %v3134_v16 = vshll.u32 %v16075_v24, %v3119_v26 }
 0x3be   : > { %v3130_v11 = vor.u32 %v3129_v32, %v3128_v19  ;;  %v3135_v58 = vshrl.u32 %v16076_v28, %v3120_v20  ;;  %v3085_v14 = vxor.u32 2147483648, %v11437_v7  ;;  %v2972_v15 = vor.u32 %v2971_v30, %v2970_v23 }
 0x3bf   : > { %v3271_v48 = vshrl.u32 %v3270_v51, 30  ;;  %v3133_v3 = vor.u32 %v3132_v34, %v3131_v2  ;;  %vm3137_vm0 = vcmp.lt.s32.totalorder %v11443_v18, 1  ;;  %v3153_v13 = vshll.u32 %v3113_v47, 8 }
 0x3c0   : > { %v3136_v49 = vor.u32 %v3135_v58, %v3134_v16  ;;  %v3420_v31 = vand.u32 2139095040, %v11368_v55  ;;  %v2977_v36 = vand.u32 2147483647, %v2976_v53  ;;  %v3121_v54 = vshrl.u32 %v16071_v29, %v3120_v20 }
 0x3c1   : > { %v3272_v8 = vshll.u32 %v3271_v48, 30  ;;  %vm3140_vm2 = vcmp.lt.s32.totalorder %v11443_v18, 4  ;;  %vm2899_vm12 = vcmp.lt.s32.totalorder %v11178_v42, 0  ;;  %v3145_v23 = vsel %vm3137_vm0, %v3124_v46, %v3127_v1 }
 0x3c2   : > { %v3142_v26 = vsel %vm3140_vm2, %v3130_v11, 2102212464  ;;  %v3146_v30 = vsel %vm3140_vm2, %v3133_v3, 920167782  ;;  %v3150_v41 = vsel %vm3140_vm2, %v3136_v49, 1326507024  ;;  %v2979_v17 = vcvt.s32.f32 %v2972_v15 }
 0x3c3   : > { %vm3211_vm4 = vcmp.lt.s32.totalorder %v11273_v9, 0  ;;  %v11466_v47 = vsub.s32 %v3269_v44, %v3272_v8  ;;  %vm3139_vm1 = vcmp.lt.s32.totalorder %v11443_v18, 3  ;;  %v3149_v20 = vsel %vm3137_vm0, %v3127_v1, %v3130_v11 }
 0x3c4   : > { %vm3138_vm13 = vcmp.lt.s32.totalorder %v11443_v18, 2  ;;  %v3141_v19 = vsel %vm3137_vm0, %v3121_v54, %v3124_v46  ;;  %v3147_v32 = vsel %vm3139_vm1, %v3130_v11, %v3146_v30  ;;  %v3151_v53 = vsel %vm3139_vm1, %v3133_v3, %v3150_v41 }
 0x3c5   : > { %vm11476_vm11 = vcmp.le.f32.partialorder %v2897_v52, 0.7853982  ;;  %v2980_v44 = vmul.f32 %v2979_v17, %v2977_v36  ;;  %v3275_v2 = vsub.s32 0, %v11466_v47  ;;  %v3143_v34 = vsel %vm3139_vm1, %v3127_v1, %v3142_v26 }
 0x3c6   : > { %v3148_v16 = vsel %vm3138_vm13, %v3145_v23, %v3147_v32  ;;  %v2777_v46 = vsel %vm11311_vm9, %v11042_v62, %v11433_v35  ;;  %vm11489_vm10 = vcmp.le.f32.partialorder %v3209_v38, 0.7853982  ;;  %v3152_v52 = vsel %vm3138_vm13, %v3149_v20, %v3151_v53 }
 0x3c7   : > { %v11495_v58 = vmul.u32.u64.low %v3153_v13, %v3148_v16  ;;  %v11496_v15 = vmul.u32.u64.high %v3153_v13, %v3148_v16, %v11495_v58  ;;  %v2983_v1 = vsub.s32 4, %v11376_v43  ;;  %v8216_v3 = vmin.u32 %v3275_v2, %v11466_v47 }
 0x3c8   : > { %v11501_v49 = vmul.u32.u64.low %v3153_v13, %v3152_v52  ;;  %v11502_v60 = vmul.u32.u64.high %v3153_v13, %v3152_v52, %v11501_v49  ;;  %v11508_v38 = vadd.s32 3, %v3090_v50  ;;  %v3295_v35 = vsub.s32 4, %v3271_v48  ;;  %v2442_v50 = vpop.f32.mrf.mxu1 }
 0x3c9   : > { %v3144_v36 = vsel %vm3138_vm13, %v3141_v19, %v3143_v34  ;;  %v3421_v8 = vshrl.u32 %v3420_v31, 23  ;;  %8971 = vcosq.f32 %v2777_v46  ;;  %v3086_v54 = vsel %vm3003_vm7, %v3085_v14, %v11437_v7 }
 0x3ca   : > { %16097 = vst [vmem:[#allocation22_spill] sm:$0xff] %v11508_v38  ;;  %v2981_v26 = vxor.u32 2147483648, %v2980_v44  ;;  %v3277_v23 = vclz %v8216_v3  ;;  %8973 = vsinq.f32 %v2777_v46  ;;  %v3163_v30 = vadd.s32 1, %v11496_v15 }
 0x3cb   : > { %v15682_v41 = vand.u32 2147483647, %v11368_v55  ;;  %v8223_v6 = vadd.s32 4294967169, %v3421_v8  ;;  %v2984_v18 = vsel %vm2899_vm12, %v2983_v1, %v11376_v43  ;;  %v3160_v31 = vmul.u32 %v3153_v13, %v3144_v36  ;;  %v11533_v13 = vld [vmem:[%s15561_s4] ss:$0 sm:$0xff] }
 0x3cc   : > { %v8217_v17 = vadd.s32 4294967294, %v3277_v23  ;;  %vm3162_vm9 = vc.u32 %v11502_v60, %v11495_v58  ;;  %v3089_v7 = vsel %vm11394_vm6, %v11097_v5, %v3086_v54  ;;  %v3296_v14 = vsel %vm3211_vm4, %v3295_v35, %v3271_v48  ;;  %v8554_v35 = vpop.f32.mrf.mxu1 }
 0x3cd   : > { %v3164_v20 = vsel %vm3162_vm9, %v3163_v30, %v11496_v15  ;;  %v3427_v19 = vadd.s32 1, %v8223_v6  ;;  %v2982_v32 = vsel %vm2899_vm12, %v2981_v26, %v2980_v44  ;;  %v11536_v53 = vadd.f32 %v11533_v13, %v2442_v50 }
 0x3ce   : > { %vm8218_vm7 = vcmp.lt.s32.totalorder %v8217_v17, 0  ;;  %v3165_v43 = vadd.s32 %v3164_v20, %v3160_v31  ;;  %v2986_v63 = vsel %vm11476_vm11, 0, %v2984_v18  ;;  %v3265_v48 = vadd.s32 %v11417_v4, %v11425_v39 }
 0x3cf   : > { %16098 = vst [vmem:[#allocation19_spill] sm:$0xff] %v11536_v53  ;;  %v3280_v2 = vsel %vm8218_vm7, 0, %v8217_v17  ;;  %vm3428_vm6 = vcmp.gt.s32.totalorder %v3427_v19, 0  ;;  %v3298_v16 = vsel %vm11489_vm10, 0, %v3296_v14  ;;  %8975 = vcosq.f32 %v3089_v7 }
 0x3d0   : > { %v3281_v34 = vsub.s32 32, %v3280_v2  ;;  %v3285_v44 = vsub.s32 4294967266, %v3280_v2  ;;  %v3166_v46 = vadd.s32 536870912, %v3165_v43  ;;  %v11547_v52 = vsel %vm11476_vm11, %v11178_v42, %v2982_v32 }
 0x3d1   : > { %v3424_v15 = vand.u32 8388607, %v15682_v41  ;;  %v3429_v1 = vsel %vm3428_vm6, %v3427_v19, 0  ;;  %v3316_v49 = vand.u32 2139095040, %v11536_v53  ;;  %8977 = vsinq.f32 %v3089_v7 }
 0x3d2   : > { %v3283_v3 = vshrl.u32 %v3265_v48, %v3281_v34  ;;  %v3286_v4 = vadd.s32 127, %v3285_v44  ;;  %v11551_v39 = vshrl.u32 %v3166_v46, 30  ;;  %v11554_v36 = vadd.s32 3, %v2986_v63 }
 0x3d3   : > { %v11556_v8 = vadd.s32 3, %v3298_v16  ;;  %v3431_v54 = vand.u32 31, %v3429_v1  ;;  %8979 = vcosq.f32 %v11547_v52  ;;  %v3282_v51 = vshll.u32 %v11466_v47, %v3280_v2 }
 0x3d4   : > { %v3287_v26 = vshll.u32 %v3286_v4, 23  ;;  %v3168_v23 = vshll.u32 %v11551_v39, 30  ;;  %v3425_v30 = vor.u32 8388608, %v3424_v15  ;;  %v15681_v50 = vand.u32 2147483647, %v11536_v53 }
 0x3d5   : > { %16099 = vst [vmem:[#allocation4_spill] sm:$0xff] %v11556_v8  ;;  %v3432_v6 = vsub.s32 32, %v3431_v54  ;;  %v11563_v18 = vadd.f32 %v11533_v13, %v8554_v35  ;;  %v3284_v17 = vor.u32 %v3283_v3, %v3282_v51  ;;  %v11567_v7 = vshrl.u32 %v3429_v1, 5 }
 0x3d6   : > { %v11565_v31 = vsub.s32 %v3165_v43, %v3168_v23  ;;  %v3317_v14 = vshrl.u32 %v3316_v49, 23  ;;  %v11569_v20 = vpop.eup %8971  ;;  %v3434_v47 = vshll.u32 %v16071_v29, %v3431_v54  ;;  %v3437_v32 = vshll.u32 %v16072_v25, %v3431_v54 }
 0x3d7   : > { %16100 = vst [vmem:[#allocation18_spill] sm:$0xff] %v11563_v18  ;;  %v3435_v19 = vshrl.u32 %v16072_v25, %v3432_v6  ;;  %v3438_v63 = vshrl.u32 %v16073_v40, %v3432_v6  ;;  %v11575_v48 = vpop.eup %8973  ;;  %v3288_v2 = vor.u32 4788187, %v3287_v26  ;;  %v3440_v43 = vshll.u32 %v16073_v40, %v3431_v54 }
 0x3d8   : > { %v3171_v34 = vsub.s32 0, %v11565_v31  ;;  %v3441_v44 = vshrl.u32 %v16074_v57, %v3432_v6  ;;  %v3443_v15 = vshll.u32 %v16074_v57, %v3431_v54  ;;  %v3444_v1 = vshrl.u32 %v16075_v24, %v3432_v6 }
 0x3d9   : > { %v3436_v16 = vor.u32 %v3435_v19, %v3434_v47  ;;  %v3439_v46 = vor.u32 %v3438_v63, %v3437_v32  ;;  %v3161_v3 = vadd.s32 %v11495_v58, %v11502_v60  ;;  %v11585_v49 = vshll.u32 %v3425_v30, 8 }
 0x3da   : > { %v8212_v4 = vmin.u32 %v3171_v34, %v11565_v31  ;;  %v11589_v35 = vand.u32 8388607, %v15681_v50  ;;  %v3442_v51 = vor.u32 %v3441_v44, %v3440_v43  ;;  %v3445_v26 = vor.u32 %v3444_v1, %v3443_v15 }
 0x3db   : > { %v3446_v23 = vshll.u32 %v16075_v24, %v3431_v54  ;;  %v3447_v47 = vshrl.u32 %v16076_v28, %v3432_v6  ;;  %v3291_v19 = vcvt.s32.f32 %v3284_v17  ;;  %vm3449_vm3 = vcmp.lt.s32.totalorder %v11567_v7, 1 }
 0x3dc   : > { %v3173_v32 = vclz %v8212_v4  ;;  %v8219_v63 = vadd.s32 4294967169, %v3317_v14  ;;  %v3289_v58 = vand.u32 2147483647, %v3288_v2  ;;  %vm3452_vm8 = vcmp.lt.s32.totalorder %v11567_v7, 4  ;;  %v11597_v34 = vpop.eup %8975 }
 0x3dd   : > { %v3448_v60 = vor.u32 %v3447_v47, %v3446_v23  ;;  %v3457_v30 = vsel %vm3449_vm3, %v3436_v16, %v3439_v46  ;;  %16101 = vst [vmem:[#allocation15_spill] sm:$0xff] %v11597_v34  ;;  %v3433_v44 = vshrl.u32 %v16071_v29, %v3432_v6  ;;  %vm3451_vm15 = vcmp.lt.s32.totalorder %v11567_v7, 3 }
 0x3de   : > { %v8213_v43 = vadd.s32 4294967294, %v3173_v32  ;;  %v3458_v54 = vsel %vm3452_vm8, %v3445_v26, 920167782  ;;  %vm3450_vm5 = vcmp.lt.s32.totalorder %v11567_v7, 2  ;;  %v3454_v17 = vsel %vm3452_vm8, %v3442_v51, 2102212464  ;;  %v11606_v15 = vpop.eup %8977 }
 0x3df   : > { %v3459_v14 = vsel %vm3451_vm15, %v3442_v51, %v3458_v54  ;;  %v3461_v2 = vsel %vm3449_vm3, %v3439_v46, %v3442_v51  ;;  %16102 = vst [vmem:[#allocation28_spill] sm:$0xff] %v11606_v15  ;;  %v3462_v4 = vsel %vm3452_vm8, %v3448_v60, 1326507024  ;;  %v3628_v6 = vand.u32 2139095040, %v11563_v18 }
 0x3e0   : > { %vm8214_vm14 = vcmp.lt.s32.totalorder %v8213_v43, 0  ;;  %v3460_v1 = vsel %vm3450_vm5, %v3457_v30, %v3459_v14  ;;  %v11611_v23 = vpop.eup %8979  ;;  %v3292_v47 = vmul.f32 %v3291_v19, %v3289_v58  ;;  %v3453_v50 = vsel %vm3449_vm3, %v3433_v44, %v3436_v16  ;;  %v2452_v16 = vpop.f32.mrf.mxu1 }
 0x3e1   : > { %16103 = vst [vmem:[#allocation12_spill] sm:$0xff] %v11611_v23  ;;  %v3176_v32 = vsel %vm8214_vm14, 0, %v8213_v43  ;;  %v3463_v54 = vsel %vm3451_vm15, %v3445_v26, %v3462_v4  ;;  %v3455_v12 = vsel %vm3451_vm15, %v3439_v46, %v3454_v17  ;;  %v3323_v4 = vadd.s32 1, %v8219_v63 }
 0x3e2   : > { %v3177_v51 = vsub.s32 32, %v3176_v32  ;;  %v3181_v41 = vsub.s32 4294967266, %v3176_v32  ;;  %v3464_v60 = vsel %vm3450_vm5, %v3461_v2, %v3463_v54  ;;  %v3178_v26 = vshll.u32 %v11565_v31, %v3176_v32 }
 0x3e3   : > { %v11622_v30 = vmul.u32.u64.low %v11585_v49, %v3464_v60  ;;  %v11623_v14 = vmul.u32.u64.high %v11585_v49, %v3464_v60, %v11622_v30  ;;  %v11626_v19 = vmul.u32.u64.low %v11585_v49, %v3460_v1  ;;  %v11627_v58 = vmul.u32.u64.high %v11585_v49, %v3460_v1, %v11626_v19 }
 0x3e4   : > { %v3179_v43 = vshrl.u32 %v3161_v3, %v3177_v51  ;;  %v3182_v44 = vadd.s32 127, %v3181_v41  ;;  %8981 = vsinq.f32 %v11547_v52  ;;  %v3293_v46 = vxor.u32 2147483648, %v3292_v47 }
 0x3e5   : > { %v3456_v17 = vsel %vm3450_vm5, %v3453_v50, %v3455_v12  ;;  %v15684_v2 = vand.u32 2147483647, %v11563_v18  ;;  %vm3324_vm0 = vcmp.gt.s32.totalorder %v3323_v4, 0  ;;  %v11636_v1 = vadd.f32 %v11533_v13, %v2452_v16 }
 0x3e6   : > { %v3180_v54 = vor.u32 %v3179_v43, %v3178_v26  ;;  %v3183_v60 = vshll.u32 %v3182_v44, 23  ;;  %vm3107_vm2 = vcmp.lt.s32.totalorder %v11318_v27, 0  ;;  %vm3474_vm12 = vc.u32 %v11623_v14, %v11626_v19 }
 0x3e7   : > { %v3475_v41 = vadd.s32 1, %v11627_v58  ;;  %v3325_v52 = vsel %vm3324_vm0, %v3323_v4, 0  ;;  %v3629_v31 = vshrl.u32 %v3628_v6, 23  ;;  %v3472_v12 = vmul.u32 %v11585_v49, %v3456_v17 }
 0x3e8   : > { %v3184_v3 = vor.u32 4788187, %v3183_v60  ;;  %v3321_v50 = vor.u32 8388608, %v11589_v35  ;;  %v3327_v7 = vand.u32 31, %v3325_v52  ;;  %v3294_v63 = vsel %vm3211_vm4, %v3293_v46, %v3292_v47 }
 0x3e9   : > { %v3191_v32 = vsub.s32 4, %v11551_v39  ;;  %v3476_v51 = vsel %vm3474_vm12, %v3475_v41, %v11627_v58  ;;  %v11650_v30 = vand.u32 8388607, %v15684_v2  ;;  %v3187_v26 = vcvt.s32.f32 %v3180_v54 }
 0x3ea   : > { %v3185_v16 = vand.u32 2147483647, %v3184_v3  ;;  %v3477_v6 = vadd.s32 %v3476_v51, %v3472_v12  ;;  %v3328_v43 = vsub.s32 32, %v3327_v7  ;;  %v3326_v44 = vshrl.u32 %v3325_v52, 5 }
 0x3eb   : > { %v3330_v49 = vshll.u32 %v16071_v29, %v3327_v7  ;;  %v3333_v35 = vshll.u32 %v16072_v25, %v3327_v7  ;;  %v8231_v4 = vadd.s32 4294967169, %v3629_v31  ;;  %v3336_v58 = vshll.u32 %v16073_v40, %v3327_v7 }
 0x3ec   : > { %v3188_v17 = vmul.f32 %v3187_v26, %v3185_v16  ;;  %v3478_v47 = vadd.s32 536870912, %v3477_v6  ;;  %v3331_v46 = vshrl.u32 %v16072_v25, %v3328_v43  ;;  %v3334_v60 = vshrl.u32 %v16073_v40, %v3328_v43 }
 0x3ed   : > { %v3337_v41 = vshrl.u32 %v16074_v57, %v3328_v43  ;;  %v3340_v54 = vshrl.u32 %v16075_v24, %v3328_v43  ;;  %v3343_v3 = vshrl.u32 %v16076_v28, %v3328_v43  ;;  %v3339_v12 = vshll.u32 %v16074_v57, %v3327_v7 }
 0x3ee   : > { %v3479_v52 = vshrl.u32 %v3478_v47, 30  ;;  %v3342_v51 = vshll.u32 %v16075_v24, %v3327_v7  ;;  %v11662_v31 = vshll.u32 %v3321_v50, 8  ;;  %v3189_v16 = vxor.u32 2147483648, %v3188_v17 }
 0x3ef   : > { %v3332_v26 = vor.u32 %v3331_v46, %v3330_v49  ;;  %v3335_v2 = vor.u32 %v3334_v60, %v3333_v35  ;;  %v3338_v8 = vor.u32 %v3337_v41, %v3336_v58  ;;  %v11667_v34 = vsel %vm11489_vm10, %v11273_v9, %v3294_v63 }
 0x3f0   : > { %v16104_v5 = vand.u32 2147483647, %v11318_v27  ;;  %v11678_v50 = vsel %vm3107_vm2, %v3191_v32, %v11551_v39  ;;  %v3480_v7 = vshll.u32 %v3479_v52, 30  ;;  %v3341_v49 = vor.u32 %v3340_v54, %v3339_v12 }
 0x3f1   : > { %v3344_v35 = vor.u32 %v3343_v3, %v3342_v51  ;;  %vm3348_vm1 = vcmp.lt.s32.totalorder %v3326_v44, 4  ;;  %v3633_v47 = vor.u32 8388608, %v11650_v30  ;;  %v3635_v11 = vadd.s32 1, %v8231_v4  ;;  %v11681_v63 = vpop.eup %8981 }
 0x3f2   : > { %vm11671_vm4 = vcmp.le.f32.partialorder %v16104_v5, 0.7853982  ;;  %16107 = vst [vmem:[#allocation9_spill] sm:$0xff] %v11681_v63  ;;  %vm3419_vm13 = vcmp.lt.s32.totalorder %v11368_v55, 0  ;;  %v11684_v5 = vsub.s32 %v3477_v6, %v3480_v7  ;;  %v3329_v46 = vshrl.u32 %v16071_v29, %v3328_v43 }
 0x3f3   : > { %vm3345_vm11 = vcmp.lt.s32.totalorder %v3326_v44, 1  ;;  %v3350_v58 = vsel %vm3348_vm1, %v3338_v8, 2102212464  ;;  %v3190_v39 = vsel %vm3107_vm2, %v3189_v16, %v3188_v17  ;;  %v3503_v32 = vsub.s32 4, %v3479_v52  ;;  %v8557_v17 = vpop.f32.mrf.mxu1 }
 0x3f4   : > { %vm3346_vm10 = vcmp.lt.s32.totalorder %v3326_v44, 2  ;;  %v3353_v60 = vsel %vm3345_vm11, %v3332_v26, %v3335_v2  ;;  %v3483_v30 = vsub.s32 0, %v11684_v5  ;;  %vm3347_vm9 = vcmp.lt.s32.totalorder %v3326_v44, 3 }
 0x3f5   : > { %v3349_v4 = vsel %vm3345_vm11, %v3329_v46, %v3332_v26  ;;  %v3354_v41 = vsel %vm3348_vm1, %v3341_v49, 920167782  ;;  %v3351_v54 = vsel %vm3347_vm9, %v3335_v2, %v3350_v58  ;;  %v3357_v3 = vsel %vm3345_vm11, %v3335_v2, %v3338_v8 }
 0x3f6   : > { %v3355_v6 = vsel %vm3347_vm9, %v3338_v8, %v3354_v41  ;;  %v3358_v43 = vsel %vm3348_vm1, %v3344_v35, 1326507024  ;;  %v8224_v12 = vmin.u32 %v3483_v30, %v11684_v5  ;;  %vm3636_vm7 = vcmp.gt.s32.totalorder %v3635_v11, 0 }
 0x3f7   : > { %v3356_v51 = vsel %vm3346_vm10, %v3353_v60, %v3355_v6  ;;  %v3359_v7 = vsel %vm3347_vm9, %v3341_v49, %v3358_v43  ;;  %v3637_v26 = vsel %vm3636_vm7, %v3635_v11, 0  ;;  %v3352_v8 = vsel %vm3346_vm10, %v3349_v4, %v3351_v54 }
 0x3f8   : > { %v3360_v16 = vsel %vm3346_vm10, %v3357_v3, %v3359_v7  ;;  %v11697_v9 = vmul.u32.u64.low %v11662_v31, %v3356_v51  ;;  %v11698_v42 = vmul.u32.u64.high %v11662_v31, %v3356_v51, %v11697_v9  ;;  %v3485_v46 = vclz %v8224_v12 }
 0x3f9   : > { %v11703_v2 = vmul.u32.u64.low %v11662_v31, %v3360_v16  ;;  %v11704_v35 = vmul.u32.u64.high %v11662_v31, %v3360_v16, %v11703_v2  ;;  %8983 = vcosq.f32 %v11667_v34  ;;  %v3639_v58 = vand.u32 31, %v3637_v26 }
 0x3fa   : > { %v11711_v60 = vadd.f32 %v11533_v13, %v8557_v17  ;;  %v11716_v11 = vsel %vm11671_vm4, %v11318_v27, %v3190_v39  ;;  %v3473_v44 = vadd.s32 %v11626_v19, %v11623_v14  ;;  %v8225_v30 = vadd.s32 4294967294, %v3485_v46 }
 0x3fb   : > { %v3524_v4 = vand.u32 2139095040, %v11636_v1  ;;  %v11723_v41 = vsel %vm3419_vm13, %v3503_v32, %v3479_v52  ;;  %v3368_v54 = vmul.u32 %v11662_v31, %v3352_v8  ;;  %v3371_v6 = vadd.s32 1, %v11698_v42 }
 0x3fc   : > { %v3640_v3 = vsub.s32 32, %v3639_v58  ;;  %vm8226_vm6 = vcmp.lt.s32.totalorder %v8225_v30, 0  ;;  %vm3370_vm3 = vc.u32 %v11704_v35, %v11697_v9  ;;  %v11729_v39 = vshrl.u32 %v3637_v26, 5 }
 0x3fd   : > { %v11731_v43 = vshll.u32 %v3633_v47, 8  ;;  %v3488_v14 = vsel %vm8226_vm6, 0, %v8225_v30  ;;  %v3372_v19 = vsel %vm3370_vm3, %v3371_v6, %v11698_v42  ;;  %v3642_v12 = vshll.u32 %v16071_v29, %v3639_v58 }
 0x3fe   : > { %v3643_v52 = vshrl.u32 %v16072_v25, %v3640_v3  ;;  %v3493_v32 = vsub.s32 4294967266, %v3488_v14  ;;  %v3373_v31 = vadd.s32 %v3372_v19, %v3368_v54  ;;  %v3645_v51 = vshll.u32 %v16072_v25, %v3639_v58 }
 0x3ff   : > { %v3648_v7 = vshll.u32 %v16073_v40, %v3639_v58  ;;  %v3489_v17 = vsub.s32 32, %v3488_v14  ;;  %v3646_v26 = vshrl.u32 %v16073_v40, %v3640_v3  ;;  %v3649_v47 = vshrl.u32 %v16074_v57, %v3640_v3 }
 0x400   : > { %v3644_v16 = vor.u32 %v3643_v52, %v3642_v12  ;;  %v3494_v46 = vadd.s32 127, %v3493_v32  ;;  %v3374_v8 = vadd.s32 536870912, %v3373_v31  ;;  %v3651_v42 = vshll.u32 %v16074_v57, %v3639_v58 }
 0x401   : > { %v3652_v2 = vshrl.u32 %v16075_v24, %v3640_v3  ;;  %vm3315_vm8 = vcmp.lt.s32.totalorder %v11536_v53, 0  ;;  %v3647_v30 = vor.u32 %v3646_v26, %v3645_v51  ;;  %v3650_v54 = vor.u32 %v3649_v47, %v3648_v7 }
 0x402   : > { %v3654_v6 = vshll.u32 %v16075_v24, %v3639_v58  ;;  %v3655_v19 = vshrl.u32 %v16076_v28, %v3640_v3  ;;  %v3495_v49 = vshll.u32 %v3494_v46, 23  ;;  %v3375_v12 = vshrl.u32 %v3374_v8, 30 }
 0x403   : > { %v3653_v52 = vor.u32 %v3652_v2, %v3651_v42  ;;  %v3525_v27 = vshrl.u32 %v3524_v4, 23  ;;  %v3491_v38 = vshrl.u32 %v3473_v44, %v3489_v17  ;;  %vm3657_vm15 = vcmp.lt.s32.totalorder %v11729_v39, 1 }
 0x404   : > { %v3656_v23 = vor.u32 %v3655_v19, %v3654_v6  ;;  %vm3659_vm5 = vcmp.lt.s32.totalorder %v11729_v39, 3  ;;  %v16108_v32 = vand.u32 2147483647, %v11368_v55  ;;  %v3490_v58 = vshll.u32 %v11684_v5, %v3488_v14 }
 0x405   : > { %v3496_v51 = vor.u32 4788187, %v3495_v49  ;;  %v16111_v7 = vand.u32 2147483647, %v11536_v53  ;;  %v3376_v44 = vshll.u32 %v3375_v12, 30  ;;  %vm3660_vm2 = vcmp.lt.s32.totalorder %v11729_v39, 4 }
 0x406   : > { %vm11749_vm14 = vcmp.le.f32.partialorder %v16108_v32, 0.7853982  ;;  %v3662_v4 = vsel %vm3660_vm2, %v3650_v54, 2102212464  ;;  %v3665_v17 = vsel %vm3657_vm15, %v3644_v16, %v3647_v30  ;;  %v3666_v47 = vsel %vm3660_vm2, %v3653_v52, 920167782  ;;  %v11763_v8 = vpop.eup %8983 }
 0x407   : > { %vm11756_vm0 = vcmp.le.f32.partialorder %v16111_v7, 0.7853982  ;;  %v3670_v46 = vsel %vm3660_vm2, %v3656_v23, 1326507024  ;;  %16114 = vst [vmem:[#allocation7_spill] sm:$0xff] %v11763_v8  ;;  %v11765_v42 = vsub.s32 %v3373_v31, %v3376_v44  ;;  %v3399_v5 = vsub.s32 4, %v3375_v12 }
 0x408   : > { %v3641_v49 = vshrl.u32 %v16071_v29, %v3640_v3  ;;  %v3669_v14 = vsel %vm3657_vm15, %v3647_v30, %v3650_v54  ;;  %v3492_v2 = vor.u32 %v3491_v38, %v3490_v58  ;;  %vm3658_vm12 = vcmp.lt.s32.totalorder %v11729_v39, 2 }
 0x409   : > { %v3667_v6 = vsel %vm3659_vm5, %v3650_v54, %v3666_v47  ;;  %v3671_v19 = vsel %vm3659_vm5, %v3653_v52, %v3670_v46  ;;  %v3379_v23 = vsub.s32 0, %v11765_v42  ;;  %v3663_v3 = vsel %vm3659_vm5, %v3647_v30, %v3662_v4 }
 0x40a   : > { %v3661_v31 = vsel %vm3657_vm15, %v3641_v49, %v3644_v16  ;;  %v3668_v32 = vsel %vm3658_vm12, %v3665_v17, %v3667_v6  ;;  %v3497_v7 = vand.u32 2147483647, %v3496_v51  ;;  %v3672_v44 = vsel %vm3658_vm12, %v3669_v14, %v3671_v19 }
 0x40b   : > { %v11781_v38 = vmul.u32.u64.low %v11731_v43, %v3668_v32  ;;  %v11782_v58 = vmul.u32.u64.high %v11731_v43, %v3668_v32, %v11781_v38  ;;  %v8220_v54 = vmin.u32 %v3379_v23, %v11765_v42  ;;  %v3400_v52 = vsel %vm3315_vm8, %v3399_v5, %v3375_v12 }
 0x40c   : > { %v11789_v47 = vmul.u32.u64.low %v11731_v43, %v3672_v44  ;;  %v11790_v46 = vmul.u32.u64.high %v11731_v43, %v3672_v44, %v11789_v47  ;;  %8985 = vsinq.f32 %v11667_v34  ;;  %v3664_v39 = vsel %vm3658_vm12, %v3661_v31, %v3663_v3 }
 0x40d   : > { %v15696_v16 = vand.u32 2147483647, %v11636_v1  ;;  %v8227_v30 = vadd.s32 4294967169, %v3525_v27  ;;  %8987 = vcosq.f32 %v11716_v11  ;;  %v16115_v51 = vsel %vm11671_vm4, 0, %v11678_v50 }
 0x40e   : > { %v11799_v4 = vadd.s32 3, %v16115_v51  ;;  %v3499_v17 = vcvt.s32.f32 %v3492_v2  ;;  %v3381_v12 = vclz %v8220_v54  ;;  %v3506_v5 = vsel %vm11749_vm14, 0, %v11723_v41 }
 0x40f   : > { %v3402_v34 = vsel %vm11756_vm0, 0, %v3400_v52  ;;  %v3683_v49 = vadd.s32 1, %v11782_v58  ;;  %v3531_v27 = vadd.s32 1, %v8227_v30  ;;  %v3680_v15 = vmul.u32 %v11731_v43, %v3664_v39 }
 0x410   : > { %v3500_v14 = vmul.f32 %v3499_v17, %v3497_v7  ;;  %v8221_v6 = vadd.s32 4294967294, %v3381_v12  ;;  %vm3682_vm4 = vc.u32 %v11790_v46, %v11781_v38  ;;  %8989 = vsinq.f32 %v11716_v11 }
 0x411   : > { %v3684_v50 = vsel %vm3682_vm4, %v3683_v49, %v11782_v58  ;;  %v3528_v41 = vand.u32 8388607, %v15696_v16  ;;  %vm3532_vm1 = vcmp.gt.s32.totalorder %v3531_v27, 0  ;;  %v11814_v2 = vadd.s32 3, %v3506_v5 }
 0x412   : > { %vm8222_vm11 = vcmp.lt.s32.totalorder %v8221_v6, 0  ;;  %v3685_v19 = vadd.s32 %v3684_v50, %v3680_v15  ;;  %v3533_v23 = vsel %vm3532_vm1, %v3531_v27, 0  ;;  %v3369_v31 = vadd.s32 %v11697_v9, %v11704_v35 }
 0x413   : > { %16116 = vst [vmem:[#allocation29_spill] sm:$0xff] %v11814_v2  ;;  %v3384_v43 = vsel %vm8222_vm11, 0, %v8221_v6  ;;  %v11818_v3 = vadd.s32 3, %v3402_v34  ;;  %v3535_v32 = vand.u32 31, %v3533_v23  ;;  %v3501_v7 = vxor.u32 2147483648, %v3500_v14  ;;  %v4164_v2 = vld [vmem:[%s15562_s5 + $0x18] sm:$0xff] }
 0x414   : > { %v3385_v11 = vsub.s32 32, %v3384_v43  ;;  %v3389_v44 = vsub.s32 4294967266, %v3384_v43  ;;  %v3686_v58 = vadd.s32 536870912, %v3685_v19  ;;  %v3529_v54 = vor.u32 8388608, %v3528_v41  ;;  %8561 = vmatprep.subr.mxu0 %v4164_v2 }
 0x415   : > { %16117 = vst [vmem:[#allocation20_spill] sm:$0xff] %v11818_v3  ;;  %v3536_v52 = vsub.s32 32, %v3535_v32  ;;  %v3836_v39 = vand.u32 2139095040, %v11711_v60  ;;  %v11824_v12 = vshrl.u32 %v3533_v23, 5  ;;  %v3386_v9 = vshll.u32 %v11765_v42, %v3384_v43  ;;  %8562 = vmatpush3.msra.mxu0 %v4164_v2 }
 0x416   : > { %v3387_v30 = vshrl.u32 %v3369_v31, %v3385_v11  ;;  %v3390_v51 = vadd.s32 127, %v3389_v44  ;;  %v11822_v17 = vshrl.u32 %v3686_v58, 30  ;;  %v3538_v6 = vshll.u32 %v16071_v29, %v3535_v32 }
 0x417   : > { %v3539_v35 = vshrl.u32 %v16072_v25, %v3536_v52  ;;  %v3542_v5 = vshrl.u32 %v16073_v40, %v3536_v52  ;;  %v3545_v34 = vshrl.u32 %v16074_v57, %v3536_v52  ;;  %v3541_v15 = vshll.u32 %v16072_v25, %v3535_v32 }
 0x418   : > { %v3391_v49 = vshll.u32 %v3390_v51, 23  ;;  %v3688_v27 = vshll.u32 %v11822_v17, 30  ;;  %v3388_v50 = vor.u32 %v3387_v30, %v3386_v9  ;;  %v3544_v41 = vshll.u32 %v16073_v40, %v3535_v32 }
 0x419   : > { %v3547_v23 = vshll.u32 %v16074_v57, %v3535_v32  ;;  %v3548_v42 = vshrl.u32 %v16075_v24, %v3536_v52  ;;  %v11836_v31 = vpop.eup %8985  ;;  %v3540_v44 = vor.u32 %v3539_v35, %v3538_v6  ;;  %v3543_v58 = vor.u32 %v3542_v5, %v3541_v15  ;;  %v4163_v15 = vld [vmem:[%s15562_s5 + $0x10] sm:$0xff] }
 0x41a   : > { %16118 = vst [vmem:[#allocation23_spill] sm:$0xff] %v11836_v31  ;;  %v3392_v43 = vor.u32 4788187, %v3391_v49  ;;  %v11838_v11 = vsub.s32 %v3685_v19, %v3688_v27  ;;  %v11840_v51 = vpop.eup %8987  ;;  %vm3627_vm10 = vcmp.lt.s32.totalorder %v11563_v18, 0  ;;  %v3546_v16 = vor.u32 %v3545_v34, %v3544_v41  ;;  %8563 = vmatprep.subr.mxu0 %v4163_v15 }
 0x41b   : > { %16119 = vst [vmem:[#allocation27_spill] sm:$0xff] %v11840_v51  ;;  %v3549_v47 = vor.u32 %v3548_v42, %v3547_v23  ;;  %v3550_v30 = vshll.u32 %v16075_v24, %v3535_v32  ;;  %v3551_v9 = vshrl.u32 %v16076_v28, %v3536_v52  ;;  %v3502_v19 = vsel %vm3419_vm13, %v3501_v7, %v3500_v14  ;;  %v4162_v23 = vld [vmem:[%s15562_s5 + $0x8] sm:$0xff] }
 0x41c   : > { %v3691_v35 = vsub.s32 0, %v11838_v11  ;;  %v11851_v5 = vshll.u32 %v3529_v54, 8  ;;  %v3837_v49 = vshrl.u32 %v3836_v39, 23  ;;  %v3393_v27 = vand.u32 2147483647, %v3392_v43  ;;  %8564 = vmatpush3.msra.mxu0 %v4163_v15 }
 0x41d   : > { %v3711_v34 = vsub.s32 4, %v11822_v17  ;;  %v3537_v32 = vshrl.u32 %v16071_v29, %v3536_v52  ;;  %v3552_v6 = vor.u32 %v3551_v9, %v3550_v30  ;;  %v11858_v41 = vpop.eup %8989  ;;  %v3395_v14 = vcvt.s32.f32 %v3388_v50  ;;  %v2462_v9 = vpop.f32.mrf.mxu1  ;;  %8565 = vmatprep.subr.mxu0 %v4162_v23 }
 0x41e   : > { %v16120_v7 = vand.u32 2147483647, %v11563_v18  ;;  %v8232_v39 = vmin.u32 %v3691_v35, %v11838_v11  ;;  %vm3553_vm9 = vcmp.lt.s32.totalorder %v11824_v12, 1  ;;  %vm3556_vm7 = vcmp.lt.s32.totalorder %v11824_v12, 4  ;;  %8566 = vmatpush3.msra.mxu0 %v4162_v23 }
 0x41f   : > { %vm3555_vm6 = vcmp.lt.s32.totalorder %v11824_v12, 3  ;;  %v3558_v2 = vsel %vm3556_vm7, %v3546_v16, 2102212464  ;;  %v3561_v52 = vsel %vm3553_vm9, %v3540_v44, %v3543_v58  ;;  %v3562_v50 = vsel %vm3556_vm7, %v3549_v47, 920167782 }
 0x420   : > { %vm11862_vm13 = vcmp.le.f32.partialorder %v16120_v7, 0.7853982  ;;  %v3693_v42 = vclz %v8232_v39  ;;  %vm3554_vm3 = vcmp.lt.s32.totalorder %v11824_v12, 2  ;;  %v3563_v43 = vsel %vm3555_vm6, %v3546_v16, %v3562_v50  ;;  %v4161_v39 = vld [vmem:[%s15562_s5] sm:$0xff] }
 0x421   : > { %v3565_v30 = vsel %vm3553_vm9, %v3543_v58, %v3546_v16  ;;  %v3396_v35 = vmul.f32 %v3395_v14, %v3393_v27  ;;  %v3564_v7 = vsel %vm3554_vm3, %v3561_v52, %v3563_v43  ;;  %v3566_v15 = vsel %vm3556_vm7, %v3552_v6, 1326507024  ;;  %8567 = vmatprep.subr.mxu0 %v4161_v39 }
 0x422   : > { %v8239_v3 = vadd.s32 4294967169, %v3837_v49  ;;  %v8233_v8 = vadd.s32 4294967294, %v3693_v42  ;;  %v3557_v50 = vsel %vm3553_vm9, %v3537_v32, %v3540_v44  ;;  %v3559_v16 = vsel %vm3555_vm6, %v3543_v58, %v3558_v2  ;;  %8568 = vmatpush3.msra.mxu0 %v4161_v39 }
 0x423   : > { %v3567_v27 = vsel %vm3555_vm6, %v3549_v47, %v3566_v15  ;;  %v11900_v49 = vmul.u32.u64.low %v11851_v5, %v3564_v7  ;;  %v11901_v14 = vmul.u32.u64.high %v11851_v5, %v3564_v7, %v11900_v49  ;;  %v11905_v52 = vadd.f32 %v11533_v13, %v2462_v9 }
 0x424   : > { %v3568_v6 = vsel %vm3554_vm3, %v3565_v30, %v3567_v27  ;;  %vm8234_vm15 = vcmp.lt.s32.totalorder %v8233_v8, 0  ;;  %v3712_v44 = vsel %vm3627_vm10, %v3711_v34, %v11822_v17  ;;  %v3397_v32 = vxor.u32 2147483648, %v3396_v35 }
 0x425   : > { %v11911_v47 = vmul.u32.u64.low %v11851_v5, %v3568_v6  ;;  %v11912_v58 = vmul.u32.u64.high %v11851_v5, %v3568_v6, %v11911_v47  ;;  %v3696_v2 = vsel %vm8234_vm15, 0, %v8233_v8  ;;  %v3560_v23 = vsel %vm3554_vm3, %v3557_v50, %v3559_v16 }
 0x426   : > { %v3843_v42 = vadd.s32 1, %v8239_v3  ;;  %v3505_v43 = vsel %vm11749_vm14, %v11368_v55, %v3502_v19  ;;  %v3681_v30 = vadd.s32 %v11781_v38, %v11790_v46  ;;  %v3697_v9 = vsub.s32 32, %v3696_v2 }
 0x427   : > { %v3701_v7 = vsub.s32 4294967266, %v3696_v2  ;;  %v3714_v17 = vsel %vm11862_vm13, 0, %v3712_v44  ;;  %v3579_v34 = vadd.s32 1, %v11901_v14  ;;  %v16123_v8 = vand.u32 2147483647, %v11711_v60 }
 0x428   : > { %vm3844_vm5 = vcmp.gt.s32.totalorder %v3843_v42, 0  ;;  %v3699_v12 = vshrl.u32 %v3681_v30, %v3697_v9  ;;  %v3576_v39 = vmul.u32 %v11851_v5, %v3560_v23  ;;  %vm3578_vm14 = vc.u32 %v11912_v58, %v11900_v49 }
 0x429   : > { %v3840_v15 = vand.u32 8388607, %v16123_v8  ;;  %v3702_v3 = vadd.s32 127, %v3701_v7  ;;  %v3398_v63 = vsel %vm3315_vm8, %v3397_v32, %v3396_v35  ;;  %v3580_v38 = vsel %vm3578_vm14, %v3579_v34, %v11901_v14 }
 0x42a   : > { %v3845_v46 = vsel %vm3844_vm5, %v3843_v42, 0  ;;  %v3732_v19 = vand.u32 2139095040, %v11905_v52  ;;  %8991 = vcosq.f32 %v3505_v43  ;;  %v3698_v50 = vshll.u32 %v11838_v11, %v3696_v2 }
 0x42b   : > { %v3703_v16 = vshll.u32 %v3702_v3, 23  ;;  %v3581_v27 = vadd.s32 %v3580_v38, %v3576_v39  ;;  %8993 = vsinq.f32 %v3505_v43  ;;  %v11934_v6 = vadd.s32 3, %v3714_v17 }
 0x42c   : > { %v3841_v5 = vor.u32 8388608, %v3840_v15  ;;  %v3847_v44 = vand.u32 31, %v3845_v46  ;;  %v11939_v47 = vsel %vm11756_vm0, %v11536_v53, %v3398_v63  ;;  %v3700_v35 = vor.u32 %v3699_v12, %v3698_v50 }
 0x42d   : > { %16124 = vst [vmem:[#allocation25_spill] sm:$0xff] %v11934_v6  ;;  %v3704_v14 = vor.u32 4788187, %v3703_v16  ;;  %v3582_v32 = vadd.s32 536870912, %v3581_v27  ;;  %v11941_v23 = vshrl.u32 %v3845_v46, 5  ;;  %v3733_v2 = vshrl.u32 %v3732_v19, 23 }
 0x42e   : > { %v3848_v42 = vsub.s32 32, %v3847_v44  ;;  %v3850_v9 = vshll.u32 %v16071_v29, %v3847_v44  ;;  %v3853_v7 = vshll.u32 %v16072_v25, %v3847_v44  ;;  %v3856_v34 = vshll.u32 %v16073_v40, %v3847_v44 }
 0x42f   : > { %v3705_v30 = vand.u32 2147483647, %v3704_v14  ;;  %v3583_v43 = vshrl.u32 %v3582_v32, 30  ;;  %v3707_v15 = vcvt.s32.f32 %v3700_v35  ;;  %v3859_v3 = vshll.u32 %v16074_v57, %v3847_v44 }
 0x430   : > { %v3851_v17 = vshrl.u32 %v16072_v25, %v3848_v42  ;;  %v3854_v26 = vshrl.u32 %v16073_v40, %v3848_v42  ;;  %v3857_v8 = vshrl.u32 %v16074_v57, %v3848_v42  ;;  %v3860_v39 = vshrl.u32 %v16075_v24, %v3848_v42 }
 0x431   : > { %v3584_v12 = vshll.u32 %v3583_v43, 30  ;;  %vm3523_vm8 = vcmp.lt.s32.totalorder %v11636_v1, 0  ;;  %v3863_v19 = vshrl.u32 %v16076_v28, %v3848_v42  ;;  %v3708_v50 = vmul.f32 %v3707_v15, %v3705_v30 }
 0x432   : > { %v3852_v63 = vor.u32 %v3851_v17, %v3850_v9  ;;  %v3855_v38 = vor.u32 %v3854_v26, %v3853_v7  ;;  %v3858_v46 = vor.u32 %v3857_v8, %v3856_v34  ;;  %v3861_v14 = vor.u32 %v3860_v39, %v3859_v3  ;;  %v8560_v8 = vpop.f32.mrf.mxu1 }
 0x433   : > { %v11954_v16 = vsub.s32 %v3581_v27, %v3584_v12  ;;  %v3862_v32 = vshll.u32 %v16075_v24, %v3847_v44  ;;  %8995 = vcosq.f32 %v11939_v47  ;;  %v3881_v35 = vshll.u32 %v3841_v5, 8 }
 0x434   : > { %v8235_v11 = vadd.s32 4294967169, %v3733_v2  ;;  %v16125_v6 = vand.u32 2147483647, %v11905_v52  ;;  %v16126_v9 = vand.u32 2147483647, %v11636_v1  ;;  %vm3865_vm2 = vcmp.lt.s32.totalorder %v11941_v23, 1 }
 0x435   : > { %v3587_v27 = vsub.s32 0, %v11954_v16  ;;  %v3864_v30 = vor.u32 %v3863_v19, %v3862_v32  ;;  %vm3868_vm12 = vcmp.lt.s32.totalorder %v11941_v23, 4  ;;  %v3607_v44 = vsub.s32 4, %v3583_v43 }
 0x436   : > { %v11960_v55 = vand.u32 8388607, %v16125_v6  ;;  %vm11964_vm0 = vcmp.le.f32.partialorder %v16126_v9, 0.7853982  ;;  %v3849_v5 = vshrl.u32 %v16071_v29, %v3848_v42  ;;  %v3870_v6 = vsel %vm3868_vm12, %v3858_v46, 2102212464 }
 0x437   : > { %v3873_v2 = vsel %vm3865_vm2, %v3852_v63, %v3855_v38  ;;  %v3709_v17 = vxor.u32 2147483648, %v3708_v50  ;;  %v8228_v26 = vmin.u32 %v3587_v27, %v11954_v16  ;;  %vm3867_vm4 = vcmp.lt.s32.totalorder %v11941_v23, 3  ;;  %v11978_v15 = vpop.eup %8991 }
 0x438   : > { %v3874_v34 = vsel %vm3868_vm12, %v3861_v14, 920167782  ;;  %16129 = vst [vmem:[#allocation14_spill] sm:$0xff] %v11978_v15  ;;  %vm3866_vm1 = vcmp.lt.s32.totalorder %v11941_v23, 2  ;;  %v3869_v12 = vsel %vm3865_vm2, %v3849_v5, %v3852_v63  ;;  %v3877_v42 = vsel %vm3865_vm2, %v3855_v38, %v3858_v46  ;;  %v11981_v39 = vpop.eup %8993 }
 0x439   : > { %v3875_v3 = vsel %vm3867_vm4, %v3858_v46, %v3874_v34  ;;  %v3589_v19 = vclz %v8228_v26  ;;  %v3871_v32 = vsel %vm3867_vm4, %v3855_v38, %v3870_v6  ;;  %v3878_v27 = vsel %vm3868_vm12, %v3864_v30, 1326507024 }
 0x43a   : > { %v3876_v9 = vsel %vm3866_vm1, %v3873_v2, %v3875_v3  ;;  %v3879_v53 = vsel %vm3867_vm4, %v3861_v14, %v3878_v27  ;;  %v11992_v15 = vadd.f32 %v11533_v13, %v8560_v8  ;;  %v11996_v46 = vsel %vm3523_vm8, %v3607_v44, %v3583_v43 }
 0x43b   : > { %v11987_v31 = vmul.u32.u64.low %v3881_v35, %v3876_v9  ;;  %v11988_v51 = vmul.u32.u64.high %v3881_v35, %v3876_v9, %v11987_v31  ;;  %v8229_v63 = vadd.s32 4294967294, %v3589_v19  ;;  %v3880_v38 = vsel %vm3866_vm1, %v3877_v42, %v3879_v53 }
 0x43c   : > { %v3739_v5 = vadd.s32 1, %v8235_v11  ;;  %v3710_v30 = vsel %vm3627_vm10, %v3709_v17, %v3708_v50  ;;  %v3872_v14 = vsel %vm3866_vm1, %v3869_v12, %v3871_v32  ;;  %8997 = vsinq.f32 %v11939_v47 }
 0x43d   : > { %v12004_v6 = vmul.u32.u64.low %v3881_v35, %v3880_v38  ;;  %v12005_v2 = vmul.u32.u64.high %v3881_v35, %v3880_v38, %v12004_v6  ;;  %v3577_v13 = vadd.s32 %v11900_v49, %v11912_v58  ;;  %vm8230_vm11 = vcmp.lt.s32.totalorder %v8229_v63, 0 }
 0x43e   : > { %vm3740_vm9 = vcmp.gt.s32.totalorder %v3739_v5, 0  ;;  %v3592_v43 = vsel %vm8230_vm11, 0, %v8229_v63  ;;  %v3891_v11 = vadd.s32 1, %v11988_v51  ;;  %v12017_v23 = vsel %vm11862_vm13, %v11563_v18, %v3710_v30 }
 0x43f   : > { %v3741_v50 = vsel %vm3740_vm9, %v3739_v5, 0  ;;  %v3593_v44 = vsub.s32 32, %v3592_v43  ;;  %v3597_v47 = vsub.s32 4294967266, %v3592_v43  ;;  %v3888_v17 = vmul.u32 %v3881_v35, %v3872_v14 }
 0x440   : > { %vm3890_vm10 = vc.u32 %v12005_v2, %v11987_v31  ;;  %v3737_v49 = vor.u32 8388608, %v11960_v55  ;;  %v3743_v58 = vand.u32 31, %v3741_v50  ;;  %v4044_v26 = vand.u32 2139095040, %v11992_v15  ;;  %v12023_v34 = vpop.eup %8995 }
 0x441   : > { %v3594_v8 = vshll.u32 %v11954_v16, %v3592_v43  ;;  %v3595_v12 = vshrl.u32 %v3577_v13, %v3593_v44  ;;  %v3598_v3 = vadd.s32 127, %v3597_v47  ;;  %v3892_v54 = vsel %vm3890_vm10, %v3891_v11, %v11988_v51 }
 0x442   : > { %v3893_v42 = vadd.s32 %v3892_v54, %v3888_v17  ;;  %v12027_v19 = vshrl.u32 %v3741_v50, 5  ;;  %v3744_v35 = vsub.s32 32, %v3743_v58  ;;  %v3746_v32 = vshll.u32 %v16071_v29, %v3743_v58 }
 0x443   : > { %v3596_v9 = vor.u32 %v3595_v12, %v3594_v8  ;;  %v3599_v27 = vshll.u32 %v3598_v3, 23  ;;  %v3749_v55 = vshll.u32 %v16072_v25, %v3743_v58  ;;  %v3752_v63 = vshll.u32 %v16073_v40, %v3743_v58 }
 0x444   : > { %vm3835_vm13 = vcmp.lt.s32.totalorder %v11711_v60, 0  ;;  %v3894_v38 = vadd.s32 536870912, %v3893_v42  ;;  %v3747_v16 = vshrl.u32 %v16072_v25, %v3744_v35  ;;  %v3750_v5 = vshrl.u32 %v16073_v40, %v3744_v35 }
 0x445   : > { %v3755_v51 = vshll.u32 %v16074_v57, %v3743_v58  ;;  %v3600_v30 = vor.u32 4788187, %v3599_v27  ;;  %v3603_v14 = vcvt.s32.f32 %v3596_v9  ;;  %v3753_v6 = vshrl.u32 %v16074_v57, %v3744_v35 }
 0x446   : > { %v3756_v13 = vshrl.u32 %v16075_v24, %v3744_v35  ;;  %v3895_v43 = vshrl.u32 %v3894_v38, 30  ;;  %v3748_v11 = vor.u32 %v3747_v16, %v3746_v32  ;;  %v3751_v50 = vor.u32 %v3750_v5, %v3749_v55 }
 0x447   : > { %v3758_v44 = vshll.u32 %v16075_v24, %v3743_v58  ;;  %v3601_v47 = vand.u32 2147483647, %v3600_v30  ;;  %v16130_v17 = vand.u32 2147483647, %v11711_v60  ;;  %v3754_v12 = vor.u32 %v3753_v6, %v3752_v63 }
 0x448   : > { %v3757_v3 = vor.u32 %v3756_v13, %v3755_v51  ;;  %v3759_v54 = vshrl.u32 %v16076_v28, %v3744_v35  ;;  %v3896_v9 = vshll.u32 %v3895_v43, 30  ;;  %v3777_v27 = vshll.u32 %v3737_v49, 8 }
 0x449   : > { %vm12041_vm7 = vcmp.le.f32.partialorder %v16130_v17, 0.7853982  ;;  %v4045_v38 = vshrl.u32 %v4044_v26, 23  ;;  %v3604_v32 = vmul.f32 %v3603_v14, %v3601_v47  ;;  %v3919_v55 = vsub.s32 4, %v3895_v43  ;;  %v12048_v58 = vpop.eup %8997 }
 0x44a   : > { %v3760_v16 = vor.u32 %v3759_v54, %v3758_v44  ;;  %vm3761_vm6 = vcmp.lt.s32.totalorder %v12027_v19, 1  ;;  %v12050_v5 = vsub.s32 %v3893_v42, %v3896_v9  ;;  %v3745_v30 = vshrl.u32 %v16071_v29, %v3744_v35 }
 0x44b   : > { %vm3764_vm3 = vcmp.lt.s32.totalorder %v12027_v19, 4  ;;  %v3769_v63 = vsel %vm3761_vm6, %v3748_v11, %v3751_v50  ;;  %v3605_v49 = vxor.u32 2147483648, %v3604_v32  ;;  %vm3763_vm15 = vcmp.lt.s32.totalorder %v12027_v19, 3 }
 0x44c   : > { %v3766_v26 = vsel %vm3764_vm3, %v3754_v12, 2102212464  ;;  %v3770_v51 = vsel %vm3764_vm3, %v3757_v3, 920167782  ;;  %v3899_v14 = vsub.s32 0, %v12050_v5  ;;  %vm3762_vm5 = vcmp.lt.s32.totalorder %v12027_v19, 2 }
 0x44d   : > { %v3765_v42 = vsel %vm3761_vm6, %v3745_v30, %v3748_v11  ;;  %v3771_v6 = vsel %vm3763_vm15, %v3754_v12, %v3770_v51  ;;  %v3920_v35 = vsel %vm3835_vm13, %v3919_v55, %v3895_v43  ;;  %v3773_v44 = vsel %vm3761_vm6, %v3751_v50, %v3754_v12 }
 0x44e   : > { %v3772_v13 = vsel %vm3762_vm5, %v3769_v63, %v3771_v6  ;;  %v3774_v47 = vsel %vm3764_vm3, %v3760_v16, 1326507024  ;;  %v3606_v17 = vsel %vm3523_vm8, %v3605_v49, %v3604_v32  ;;  %v8240_v54 = vmin.u32 %v3899_v14, %v12050_v5  ;;  %v2472_v32 = vpop.f32.mrf.mxu1 }
 0x44f   : > { %v3767_v9 = vsel %vm3763_vm15, %v3751_v50, %v3766_v26  ;;  %v3775_v53 = vsel %vm3763_vm15, %v3757_v3, %v3774_v47  ;;  %8999 = vcosq.f32 %v12017_v23  ;;  %v3922_v12 = vsel %vm12041_vm7, 0, %v3920_v35 }
 0x450   : > { %v3776_v11 = vsel %vm3762_vm5, %v3773_v44, %v3775_v53  ;;  %v12073_v43 = vmul.u32.u64.low %v3777_v27, %v3772_v13  ;;  %v12074_v55 = vmul.u32.u64.high %v3777_v27, %v3772_v13, %v12073_v43  ;;  %v3901_v30 = vclz %v8240_v54 }
 0x451   : > { %v12078_v16 = vmul.u32.u64.low %v3777_v27, %v3776_v11  ;;  %v12079_v63 = vmul.u32.u64.high %v3777_v27, %v3776_v11, %v12078_v16  ;;  %v3609_v50 = vsel %vm11964_vm0, %v11636_v1, %v3606_v17  ;;  %v3768_v3 = vsel %vm3762_vm5, %v3765_v42, %v3767_v9  ;;  %v9155_v42 = vld [vmem:[%s15561_s4] ss:$0 sm:$0xff] }
 0x452   : > { %v8247_v49 = vadd.s32 4294967169, %v4045_v38  ;;  %v16133_v53 = vand.u32 2147483647, %v11992_v15  ;;  %9001 = vsinq.f32 %v12017_v23  ;;  %v16134_v51 = vsel %vm11964_vm0, 0, %v11996_v46 }
 0x453   : > { %v12093_v14 = vadd.s32 3, %v16134_v51  ;;  %v3889_v6 = vadd.s32 %v11987_v31, %v12005_v2  ;;  %v8241_v35 = vadd.s32 4294967294, %v3901_v30  ;;  %v12097_v13 = vadd.s32 3, %v3922_v12 }
 0x454   : > { %v4048_v26 = vand.u32 8388607, %v16133_v53  ;;  %v3787_v19 = vadd.s32 1, %v12074_v55  ;;  %v4051_v38 = vadd.s32 1, %v8247_v49  ;;  %v12103_v23 = vadd.f32 %v9155_v42, %v2472_v32 }
 0x455   : > { %16135 = vst [vmem:[#allocation17_spill] sm:$0xff] %v12093_v14  ;;  %16136 = vst [vmem:[#allocation35_spill] sm:$0xff] %v12097_v13  ;;  %9003 = vcosq.f32 %v3609_v50  ;;  %vm8242_vm14 = vcmp.lt.s32.totalorder %v8241_v35, 0  ;;  %v3784_v7 = vmul.u32 %v3777_v27, %v3768_v3  ;;  %vm3786_vm8 = vc.u32 %v12079_v63, %v12073_v43 }
 0x456   : > { %v3904_v46 = vsel %vm8242_vm14, 0, %v8241_v35  ;;  %v3788_v31 = vsel %vm3786_vm8, %v3787_v19, %v12074_v55  ;;  %v4049_v2 = vor.u32 8388608, %v4048_v26  ;;  %vm4052_vm0 = vcmp.gt.s32.totalorder %v4051_v38, 0 }
 0x457   : > { %9005 = vsinq.f32 %v3609_v50  ;;  %v3905_v44 = vsub.s32 32, %v3904_v46  ;;  %v3909_v47 = vsub.s32 4294967266, %v3904_v46  ;;  %v3789_v17 = vadd.s32 %v3788_v31, %v3784_v7 }
 0x458   : > { %v4053_v54 = vsel %vm4052_vm0, %v4051_v38, 0  ;;  %v15705_v9 = vand.u32 2147483647, %v12103_v23  ;;  %v3940_v11 = vand.u32 2139095040, %v12103_v23  ;;  %v12110_v30 = vand.u32 3, %v11248_v10 }
 0x459   : > { %v3906_v27 = vshll.u32 %v12050_v5, %v3904_v46  ;;  %v3907_v12 = vshrl.u32 %v3889_v6, %v3905_v44  ;;  %v3910_v16 = vadd.s32 127, %v3909_v47  ;;  %v3790_v32 = vadd.s32 536870912, %v3789_v17 }
 0x45a   : > { %vm3731_vm2 = vcmp.lt.s32.totalorder %v11905_v52, 0  ;;  %v4055_v55 = vand.u32 31, %v4053_v54  ;;  %v12114_v50 = vshll.u32 %v4049_v2, 8  ;;  %v12119_v51 = vadd.s32 %v12073_v43, %v12079_v63 }
 0x45b   : > { %v3908_v53 = vor.u32 %v3907_v12, %v3906_v27  ;;  %v3911_v26 = vshll.u32 %v3910_v16, 23  ;;  %v3791_v10 = vshrl.u32 %v3790_v32, 30  ;;  %v4054_v35 = vshrl.u32 %v4053_v54, 5 }
 0x45c   : > { %v4056_v5 = vsub.s32 32, %v4055_v55  ;;  %v3941_v6 = vshrl.u32 %v3940_v11, 23  ;;  %v12123_v19 = vand.u32 8388607, %v15705_v9  ;;  %v12125_v38 = vpop.eup %8999  ;;  %v4058_v46 = vshll.u32 %v16071_v29, %v4055_v55 }
 0x45d   : > { %16137 = vst [vmem:[#allocation38_spill] sm:$0xff] %v12125_v38  ;;  %v3912_v42 = vor.u32 4788187, %v3911_v26  ;;  %v3792_v7 = vshll.u32 %v3791_v10, 30  ;;  %v4061_v31 = vshll.u32 %v16072_v25, %v4055_v55  ;;  %v16138_v2 = vand.u32 2147483647, %v11905_v52 }
 0x45e   : > { %v4059_v63 = vshrl.u32 %v16072_v25, %v4056_v5  ;;  %v4062_v44 = vshrl.u32 %v16073_v40, %v4056_v5  ;;  %v4064_v47 = vshll.u32 %v16073_v40, %v4055_v55  ;;  %v4065_v54 = vshrl.u32 %v16074_v57, %v4056_v5 }
 0x45f   : > { %vm12131_vm12 = vcmp.le.f32.partialorder %v16138_v2, 0.7853982  ;;  %v3913_v11 = vand.u32 2147483647, %v3912_v42  ;;  %v3915_v27 = vcvt.s32.f32 %v3908_v53  ;;  %v12139_v12 = vsub.s32 %v3789_v17, %v3792_v7  ;;  %v12141_v32 = vpop.eup %9001 }
 0x460   : > { %v3815_v16 = vsub.s32 4, %v3791_v10  ;;  %16141 = vst [vmem:[#allocation34_spill] sm:$0xff] %v12141_v32  ;;  %v4060_v26 = vor.u32 %v4059_v63, %v4058_v46  ;;  %v4063_v2 = vor.u32 %v4062_v44, %v4061_v31  ;;  %v4066_v9 = vor.u32 %v4065_v54, %v4064_v47 }
 0x461   : > { %v3916_v3 = vmul.f32 %v3915_v27, %v3913_v11  ;;  %v3795_v13 = vsub.s32 0, %v12139_v12  ;;  %v4067_v18 = vshll.u32 %v16074_v57, %v4055_v55  ;;  %v4068_v38 = vshrl.u32 %v16075_v24, %v4056_v5 }
 0x462   : > { %v12147_v14 = vpop.eup %9003  ;;  %v4057_v17 = vshrl.u32 %v16071_v29, %v4056_v5  ;;  %v4070_v53 = vshll.u32 %v16075_v24, %v4055_v55  ;;  %v4071_v42 = vshrl.u32 %v16076_v28, %v4056_v5  ;;  %vm4073_vm4 = vcmp.lt.s32.totalorder %v4054_v35, 1 }
 0x463   : > { %16142 = vst [vmem:[#allocation11_spill] sm:$0xff] %v12147_v14  ;;  %v8236_v7 = vmin.u32 %v3795_v13, %v12139_v12  ;;  %v3816_v46 = vsel %vm3731_vm2, %v3815_v16, %v3791_v10  ;;  %v4069_v31 = vor.u32 %v4068_v38, %v4067_v18  ;;  %vm4076_vm1 = vcmp.lt.s32.totalorder %v4054_v35, 4 }
 0x464   : > { %v12155_v63 = vpop.eup %9005  ;;  %v3917_v44 = vxor.u32 2147483648, %v3916_v3  ;;  %v4072_v47 = vor.u32 %v4071_v42, %v4070_v53  ;;  %v4078_v54 = vsel %vm4076_vm1, %v4066_v9, 2102212464  ;;  %v4081_v11 = vsel %vm4073_vm4, %v4060_v26, %v4063_v2 }
 0x465   : > { %v3797_v27 = vclz %v8236_v7  ;;  %vm4074_vm11 = vcmp.lt.s32.totalorder %v4054_v35, 2  ;;  %vm4075_vm9 = vcmp.lt.s32.totalorder %v4054_v35, 3  ;;  %v4082_v55 = vsel %vm4076_vm1, %v4069_v31, 920167782 }
 0x466   : > { %v4077_v13 = vsel %vm4073_vm4, %v4057_v17, %v4060_v26  ;;  %v4079_v5 = vsel %vm4075_vm9, %v4063_v2, %v4078_v54  ;;  %v4083_v49 = vsel %vm4075_vm9, %v4066_v9, %v4082_v55  ;;  %v4085_v18 = vsel %vm4073_vm4, %v4063_v2, %v4066_v9 }
 0x467   : > { %v8237_v10 = vadd.s32 4294967294, %v3797_v27  ;;  %v3818_v38 = vsel %vm12131_vm12, 0, %v3816_v46  ;;  %v4084_v16 = vsel %vm4074_vm11, %v4081_v11, %v4083_v49  ;;  %v4086_v53 = vsel %vm4076_vm1, %v4072_v47, 1326507024 }
 0x468   : > { %v3918_v42 = vsel %vm3835_vm13, %v3917_v44, %v3916_v3  ;;  %v4087_v7 = vsel %vm4075_vm9, %v4069_v31, %v4086_v53  ;;  %v12169_v32 = vmul.u32.u64.low %v12114_v50, %v4084_v16  ;;  %v12170_v14 = vmul.u32.u64.high %v12114_v50, %v4084_v16, %v12169_v32 }
 0x469   : > { %vm2576_vm10 = vcmp.lt.s32.totalorder %v12110_v30, 2  ;;  %vm8238_vm6 = vcmp.lt.s32.totalorder %v8237_v10, 0  ;;  %v4080_v9 = vsel %vm4074_vm11, %v4077_v13, %v4079_v5  ;;  %v4088_v26 = vsel %vm4074_vm11, %v4085_v18, %v4087_v7 }
 0x46a   : > { %v8243_v2 = vadd.s32 4294967169, %v3941_v6  ;;  %v3800_v17 = vsel %vm8238_vm6, 0, %v8237_v10  ;;  %v12176_v49 = vmul.u32.u64.low %v12114_v50, %v4088_v26  ;;  %v12177_v46 = vmul.u32.u64.high %v12114_v50, %v4088_v26, %v12176_v49 }
 0x46b   : > { %vm2577_vm13 = vcmp.eq.s32.totalorder %v12110_v30, 0  ;;  %v3801_v3 = vsub.s32 32, %v3800_v17  ;;  %v3805_v31 = vsub.s32 4294967266, %v3800_v17  ;;  %v12180_v44 = vadd.s32 3, %v3818_v38 }
 0x46c   : > { %v3947_v47 = vadd.s32 1, %v8243_v2  ;;  %v3921_v54 = vsel %vm12041_vm7, %v11711_v60, %v3918_v42  ;;  %v3802_v35 = vshll.u32 %v12139_v12, %v3800_v17  ;;  %v4096_v6 = vmul.u32 %v12114_v50, %v4080_v9 }
 0x46d   : > { %v4099_v11 = vadd.s32 1, %v12170_v14  ;;  %v3803_v27 = vshrl.u32 %v12119_v51, %v3801_v3  ;;  %v3806_v55 = vadd.s32 127, %v3805_v31  ;;  %vm2580_vm15 = vcmp.eq.s32.totalorder %v12110_v30, 2 }
 0x46e   : > { %vm3948_vm3 = vcmp.gt.s32.totalorder %v3947_v47, 0  ;;  %vm4098_vm5 = vc.u32 %v12177_v46, %v12169_v32  ;;  %v16143_v5 = vxor.u32 2147483648, %v11385_v37  ;;  %v16144_v50 = vxor.u32 2147483648, %v11324_v22 }
 0x46f   : > { %v3949_v13 = vsel %vm3948_vm3, %v3947_v47, 0  ;;  %9007 = vcosq.f32 %v3921_v54  ;;  %v3804_v18 = vor.u32 %v3803_v27, %v3802_v35  ;;  %v3807_v51 = vshll.u32 %v3806_v55, 23 }
 0x470   : > { %v2579_v8 = vsel %vm2577_vm13, %v11324_v22, %v16143_v5  ;;  %v2582_v12 = vsel %vm2580_vm15, %v16144_v50, %v11385_v37  ;;  %v4100_v10 = vsel %vm4098_vm5, %v4099_v11, %v12170_v14  ;;  %vm2573_vm7 = vweird.f32 %v10961_v21 }
 0x471   : > { %9009 = vsinq.f32 %v3921_v54  ;;  %v4101_v38 = vadd.s32 %v4100_v10, %v4096_v6  ;;  %v3951_v16 = vand.u32 31, %v3949_v13  ;;  %v16145_v53 = vor.u32 8388608, %v12123_v19 }
 0x472   : > { %v3808_v7 = vor.u32 4788187, %v3807_v51  ;;  %vm4043_vm14 = vcmp.lt.s32.totalorder %v11992_v15, 0  ;;  %v12207_v22 = vadd.s32 %v12169_v32, %v12177_v46  ;;  %v3950_v37 = vshrl.u32 %v3949_v13, 5 }
 0x473   : > { %v12203_v42 = vshll.u32 %v16145_v53, 8  ;;  %v2583_v9 = vsel %vm2576_vm10, %v2579_v8, %v2582_v12  ;;  %v3811_v14 = vcvt.s32.f32 %v3804_v18  ;;  %v4102_v26 = vadd.s32 536870912, %v4101_v38 }
 0x474   : > { %v3952_v2 = vsub.s32 32, %v3951_v16  ;;  %v3954_v17 = vshll.u32 %v16071_v29, %v3951_v16  ;;  %v3809_v49 = vand.u32 2147483647, %v3808_v7  ;;  %v3957_v19 = vshll.u32 %v16072_v25, %v3951_v16 }
 0x475   : > { %v3960_v3 = vshll.u32 %v16073_v40, %v3951_v16  ;;  %v3963_v31 = vshll.u32 %v16074_v57, %v3951_v16  ;;  %v16146_v47 = vand.u32 2147483647, %v11992_v15  ;;  %v4103_v30 = vshrl.u32 %v4102_v26, 30 }
 0x476   : > { %v3955_v46 = vshrl.u32 %v16072_v25, %v3952_v2  ;;  %v3958_v54 = vshrl.u32 %v16073_v40, %v3952_v2  ;;  %v3966_v35 = vshll.u32 %v16075_v24, %v3951_v16  ;;  %v3812_v6 = vmul.f32 %v3811_v14, %v3809_v49 }
 0x477   : > { %vm12217_vm8 = vcmp.le.f32.partialorder %v16146_v47, 0.7853982  ;;  %v3961_v11 = vshrl.u32 %v16074_v57, %v3952_v2  ;;  %v3964_v27 = vshrl.u32 %v16075_v24, %v3952_v2  ;;  %v3967_v55 = vshrl.u32 %v16076_v28, %v3952_v2 }
 0x478   : > { %v4104_v13 = vshll.u32 %v4103_v30, 30  ;;  %v4127_v5 = vsub.s32 4, %v4103_v30  ;;  %v3956_v8 = vor.u32 %v3955_v46, %v3954_v17  ;;  %v3959_v50 = vor.u32 %v3958_v54, %v3957_v19 }
 0x479   : > { %v3813_v12 = vxor.u32 2147483648, %v3812_v6  ;;  %v3953_v18 = vshrl.u32 %v16071_v29, %v3952_v2  ;;  %v3962_v51 = vor.u32 %v3961_v11, %v3960_v3  ;;  %v3965_v10 = vor.u32 %v3964_v27, %v3963_v31  ;;  %v9156_v11 = vld [vmem:[%s9279_s13] sm:$0xff] }
 0x47a   : > { %v12228_v53 = vsub.s32 %v4101_v38, %v4104_v13  ;;  %vm3969_vm0 = vcmp.lt.s32.totalorder %v3950_v37, 1  ;;  %vm3972_vm4 = vcmp.lt.s32.totalorder %v3950_v37, 4  ;;  %v2584_v16 = vsel %vm2573_vm7, nan, %v2583_v9 }
 0x47b   : > { %v3968_v7 = vor.u32 %v3967_v55, %v3966_v35  ;;  %vm3971_vm1 = vcmp.lt.s32.totalorder %v3950_v37, 3  ;;  %v3973_v14 = vsel %vm3969_vm0, %v3953_v18, %v3956_v8  ;;  %v3974_v26 = vsel %vm3972_vm4, %v3962_v51, 2102212464 }
 0x47c   : > { %v4107_v17 = vsub.s32 0, %v12228_v53  ;;  %v12237_v2 = vsel %vm4043_vm14, %v4127_v5, %v4103_v30  ;;  %v3975_v38 = vsel %vm3971_vm1, %v3959_v50, %v3974_v26  ;;  %v2783_v49 = vand.u32 3, %v11363_v33  ;;  %v12245_v3 = vpop.eup %9007 }
 0x47d   : > { %v3814_v21 = vsel %vm3731_vm2, %v3813_v12, %v3812_v6  ;;  %vm3970_vm11 = vcmp.lt.s32.totalorder %v3950_v37, 2  ;;  %v3977_v9 = vsel %vm3969_vm0, %v3956_v8, %v3959_v50  ;;  %v3978_v19 = vsel %vm3972_vm4, %v3965_v10, 920167782 }
 0x47e   : > { %v8248_v31 = vmin.u32 %v4107_v17, %v12228_v53  ;;  %v3976_v47 = vsel %vm3970_vm11, %v3973_v14, %v3975_v38  ;;  %v3979_v30 = vsel %vm3971_vm1, %v3962_v51, %v3978_v19  ;;  %v3981_v46 = vsel %vm3969_vm0, %v3959_v50, %v3962_v51  ;;  %v12251_v54 = vpop.eup %9009 }
 0x47f   : > { %v4130_v33 = vsel %vm12217_vm8, 0, %v12237_v2  ;;  %v3980_v35 = vsel %vm3970_vm11, %v3977_v9, %v3979_v30  ;;  %v3982_v6 = vsel %vm3972_vm4, %v3968_v7, 1326507024  ;;  %v12259_v27 = vadd.f32 %v9156_v11, %v2584_v16 }
 0x480   : > { %vm2781_vm2 = vweird.f32 %v11042_v62  ;;  %v4109_v55 = vclz %v8248_v31  ;;  %v3983_v13 = vsel %vm3971_vm1, %v3965_v10, %v3982_v6  ;;  %v12271_v50 = vsel %vm12131_vm12, %v11905_v52, %v3814_v21 }
 0x481   : > { %16149 = vst [vmem:[#allocation33_spill] sm:$0xff] %v12259_v27  ;;  %v12264_v5 = vmul.u32.u64.low %v12203_v42, %v3980_v35  ;;  %v12265_v8 = vmul.u32.u64.high %v12203_v42, %v3980_v35, %v12264_v5  ;;  %v3984_v12 = vsel %vm3970_vm11, %v3981_v46, %v3983_v13  ;;  %v3992_v18 = vmul.u32 %v12203_v42, %v3976_v47 }
 0x482   : > { %vm16150_vm9 = vcmask 261120   ;;  %v2786_v51 = vxor.u32 2147483648, %v11575_v48  ;;  %v8249_v10 = vadd.s32 4294967294, %v4109_v55  ;;  %vm2784_vm6 = vcmp.lt.s32.totalorder %v2783_v49, 2 }
 0x483   : > { %8569 = vmatprep.mubr.msk.f32.mxu0 %vm16150_vm9, %v12259_v27  ;;  %v12279_v16 = vmul.u32.u64.low %v12203_v42, %v3984_v12  ;;  %v12280_v7 = vmul.u32.u64.high %v12203_v42, %v3984_v12, %v12279_v16  ;;  %vm16151_vm10 = vmmov %vm16150_vm9  ;;  %vm2785_vm12 = vcmp.eq.s32.totalorder %v2783_v49, 0  ;;  %vm2788_vm13 = vcmp.eq.s32.totalorder %v2783_v49, 2 }
 0x484   : > { %8570 = vmatmul.mubr.msk.f32.vlgmr.msra.gmra.mxu0 %vm16151_vm10, %v11359_v0  ;;  %v2789_v43 = vxor.u32 2147483648, %v11569_v20  ;;  %v2887_v37 = vand.u32 3, %v11276_v45  ;;  %vm8250_vm3 = vcmp.lt.s32.totalorder %v8249_v10, 0  ;;  %v3995_v14 = vadd.s32 1, %v12265_v8  ;;  %vm16153_vm1 = vmmov %vm16150_vm9  ;;  %v9158_v16 = vld [vmem:[%s9279_s13 + $0x18] sm:$0xff] }
 0x485   : > { %v2787_v26 = vsel %vm2785_vm12, %v11569_v20, %v2786_v51  ;;  %v2890_v17 = vxor.u32 2147483648, %v11412_v61  ;;  %v4112_v38 = vsel %vm8250_vm3, 0, %v8249_v10  ;;  %vm2885_vm15 = vweird.f32 %v10964_v56  ;;  %vm16157_vm10 = vmmov %vm16153_vm1 }
 0x486   : > { %v2790_v42 = vsel %vm2788_vm13, %v2789_v43, %v11575_v48  ;;  %v2893_v21 = vxor.u32 2147483648, %v11409_v59  ;;  %v4113_v9 = vsub.s32 32, %v4112_v38  ;;  %v4114_v19 = vshll.u32 %v12228_v53, %v4112_v38  ;;  %v9157_v53 = vld [vmem:[%s9279_s13 + $0x10] sm:$0xff]  ;;  %vm16164_vm3 = vmmov %vm16153_vm1 }
 0x487   : > { %v4117_v31 = vsub.s32 4294967266, %v4112_v38  ;;  %vm2889_vm5 = vcmp.eq.s32.totalorder %v2887_v37, 0  ;;  %vm3994_vm7 = vc.u32 %v12280_v7, %v12264_v5  ;;  %v2791_v45 = vsel %vm2784_vm6, %v2787_v26, %v2790_v42  ;;  %v16158_v26 = vld [vmem:[#allocation22_spill] sm:$0xff] }
 0x488   : > { %v2891_v20 = vsel %vm2889_vm5, %v11409_v59, %v2890_v17  ;;  %vm2892_vm0 = vcmp.eq.s32.totalorder %v2887_v37, 2  ;;  %v4115_v48 = vshrl.u32 %v12207_v22, %v4113_v9  ;;  %v3996_v30 = vsel %vm3994_vm7, %v3995_v14, %v12265_v8  ;;  %v16154_v8 = vld [vmem:[#allocation9_spill] sm:$0xff]  ;;  %v16159_v42 = vld [vmem:[#allocation10_spill] sm:$0xff]  ;;  %v16160_v9 = vld [vmem:[#allocation28_spill] sm:$0xff] }
 0x489   : > { %v4118_v47 = vadd.s32 127, %v4117_v31  ;;  %v2792_v46 = vsel %vm2781_vm2, nan, %v2791_v45  ;;  %v3997_v35 = vadd.s32 %v3996_v30, %v3992_v18  ;;  %vm2888_vm4 = vcmp.lt.s32.totalorder %v2887_v37, 2  ;;  %v16155_v18 = vld [vmem:[#allocation12_spill] sm:$0xff] }
 0x48a   : > { %v12302_v6 = vadd.f32 %v9157_v53, %v2792_v46  ;;  %v2894_v49 = vsel %vm2892_vm0, %v2893_v21, %v11412_v61  ;;  %v4116_v11 = vor.u32 %v4115_v48, %v4114_v19  ;;  %v2991_v13 = vand.u32 3, %v11554_v36  ;;  %v16162_v46 = vld [vmem:[#allocation3_spill] sm:$0xff] }
 0x48b   : > { %v4119_v55 = vshll.u32 %v4118_v47, 23  ;;  %v2895_v59 = vsel %vm2888_vm4, %v2891_v20, %v2894_v49  ;;  %v3998_v22 = vadd.s32 536870912, %v3997_v35  ;;  %v2994_v12 = vxor.u32 2147483648, %v16154_v8  ;;  %v9159_v47 = vld [vmem:[%s9279_s13 + $0x20] sm:$0xff] }
 0x48c   : > { %16152 = vst [vmem:[#allocation26_spill] sm:$0xff] %v12302_v6  ;;  %8572 = vmatprep.mubr.msk.f32.mxu0 %vm16153_vm1, %v12302_v6  ;;  %v2896_v62 = vsel %vm2885_vm15, nan, %v2895_v59  ;;  %v2997_v51 = vxor.u32 2147483648, %v16155_v18  ;;  %9011 = vcosq.f32 %v12271_v50  ;;  %v4123_v61 = vcvt.s32.f32 %v4116_v11  ;;  %v16163_v11 = vld [vmem:[#allocation15_spill] sm:$0xff] }
 0x48d   : > { %v4120_v10 = vor.u32 4788187, %v4119_v55  ;;  %v12314_v43 = vadd.f32 %v9158_v16, %v2896_v62  ;;  %v12316_v37 = vshrl.u32 %v3998_v22, 30  ;;  %vm2992_vm11 = vcmp.lt.s32.totalorder %v2991_v13, 2  ;;  %v16165_v22 = vld [vmem:[#allocation27_spill] sm:$0xff] }
 0x48e   : > { %vm2993_vm2 = vcmp.eq.s32.totalorder %v2991_v13, 0  ;;  %vm2996_vm9 = vcmp.eq.s32.totalorder %v2991_v13, 2  ;;  %v3095_v17 = vand.u32 3, %v16158_v26  ;;  %vm2989_vm6 = vweird.f32 %v16159_v42 }
 0x48f   : > { %16156 = vst [vmem:[#allocation32_spill] sm:$0xff] %v12314_v43  ;;  %v4121_v36 = vand.u32 2147483647, %v4120_v10  ;;  %8573 = vmatmul.mubr.msk.f32.gmra.mxu0 %vm16157_vm10, %v12314_v43  ;;  %v2995_v56 = vsel %vm2993_vm2, %v16155_v18, %v2994_v12  ;;  %v2998_v14 = vsel %vm2996_vm9, %v2997_v51, %v16154_v8  ;;  %v4000_v38 = vshll.u32 %v12316_v37, 30  ;;  %v16166_v51 = vld [vmem:[#allocation5_spill] sm:$0xff] }
 0x490   : > { %v2999_v21 = vsel %vm2992_vm11, %v2995_v56, %v2998_v14  ;;  %v3098_v19 = vxor.u32 2147483648, %v16160_v9  ;;  %9013 = vsinq.f32 %v12271_v50  ;;  %v12329_v45 = vadd.s32 %v12264_v5, %v12280_v7  ;;  %v16168_v14 = vld [vmem:[#allocation4_spill] sm:$0xff] }
 0x491   : > { %v4124_v31 = vmul.f32 %v4123_v61, %v4121_v36  ;;  %v3000_v20 = vsel %vm2989_vm6, nan, %v2999_v21  ;;  %v12331_v48 = vsub.s32 %v3997_v35, %v4000_v38  ;;  %vm3093_vm12 = vweird.f32 %v16162_v46  ;;  %v9160_v61 = vld [vmem:[%s9279_s13 + $0x28] sm:$0xff] }
 0x492   : > { %v12334_v30 = vadd.f32 %v9159_v47, %v3000_v20  ;;  %vm3097_vm13 = vcmp.eq.s32.totalorder %v3095_v17, 0  ;;  %v4023_v49 = vsub.s32 4, %v12316_v37  ;;  %v3101_v50 = vxor.u32 2147483648, %v16163_v11 }
 0x493   : > { %v4125_v53 = vxor.u32 2147483648, %v4124_v31  ;;  %v3099_v55 = vsel %vm3097_vm13, %v16163_v11, %v3098_v19  ;;  %v4003_v59 = vsub.s32 0, %v12331_v48  ;;  %vm3096_vm15 = vcmp.lt.s32.totalorder %v3095_v17, 2  ;;  %v16170_v19 = vld [vmem:[#allocation16_spill] sm:$0xff] }
 0x494   : > { %16161 = vst [vmem:[#allocation30_spill] sm:$0xff] %v12334_v30  ;;  %8575 = vmatprep.mubr.msk.f32.mxu0 %vm16164_vm3, %v12334_v30  ;;  %vm3100_vm5 = vcmp.eq.s32.totalorder %v3095_v17, 2  ;;  %v3199_v5 = vand.u32 3, %v11799_v4  ;;  %v3202_v13 = vxor.u32 2147483648, %v11858_v41  ;;  %v3205_v62 = vxor.u32 2147483648, %v16165_v22  ;;  %v16169_v17 = vld [vmem:[#allocation23_spill] sm:$0xff] }
 0x495   : > { %v4126_v7 = vsel %vm4043_vm14, %v4125_v53, %v4124_v31  ;;  %v3102_v35 = vsel %vm3100_vm5, %v3101_v50, %v16160_v9  ;;  %v8244_v12 = vmin.u32 %v4003_v59, %v12331_v48  ;;  %vm3197_vm7 = vweird.f32 %v16166_v51  ;;  %v16171_v31 = vld [vmem:[#allocation7_spill] sm:$0xff]  ;;  %v16173_v59 = vld [vmem:[#allocation20_spill] sm:$0xff] }
 0x496   : > { %v4129_v8 = vsel %vm12217_vm8, %v11992_v15, %v4126_v7  ;;  %v3103_v18 = vsel %vm3096_vm15, %v3099_v55, %v3102_v35  ;;  %vm3200_vm14 = vcmp.lt.s32.totalorder %v3199_v5, 2  ;;  %vm3201_vm0 = vcmp.eq.s32.totalorder %v3199_v5, 0 }
 0x497   : > { %9015 = vcosq.f32 %v4129_v8  ;;  %v3104_v4 = vsel %vm3093_vm12, nan, %v3103_v18  ;;  %v4005_v10 = vclz %v8244_v12  ;;  %v3203_v36 = vsel %vm3201_vm0, %v16165_v22, %v3202_v13  ;;  %vm16174_vm12 = vmmov %vm16153_vm1  ;;  %v9162_v18 = vld [vmem:[%s9279_s13 + $0x38] sm:$0xff] }
 0x498   : > { %v12357_v16 = vadd.f32 %v9160_v61, %v3104_v4  ;;  %vm3204_vm4 = vcmp.eq.s32.totalorder %v3199_v5, 2  ;;  %9017 = vsinq.f32 %v4129_v8  ;;  %v3303_v26 = vand.u32 3, %v16168_v14  ;;  %v16175_v8 = vld [vmem:[#allocation19_spill] sm:$0xff] }
 0x499   : > { %v3206_v56 = vsel %vm3204_vm4, %v3205_v62, %v11858_v41  ;;  %v3306_v38 = vxor.u32 2147483648, %v16169_v17  ;;  %v12363_v42 = vpop.eup %9011  ;;  %v8245_v21 = vadd.s32 4294967294, %v4005_v10  ;;  %vm3301_vm11 = vweird.f32 %v16170_v19  ;;  %v9161_v41 = vld [vmem:[%s9279_s13 + $0x30] sm:$0xff] }
 0x49a   : > { %16167 = vst [vmem:[#allocation24_spill] sm:$0xff] %v12357_v16  ;;  %8576 = vmatmul.mubr.msk.f32.gmra.mxu0 %vm16153_vm1, %v12357_v16  ;;  %v3207_v9 = vsel %vm3200_vm14, %v3203_v36, %v3206_v56  ;;  %v3309_v20 = vxor.u32 2147483648, %v16171_v31  ;;  %vm3304_vm2 = vcmp.lt.s32.totalorder %v3303_v26, 2  ;;  %vm3305_vm9 = vcmp.eq.s32.totalorder %v3303_v26, 0  ;;  %v16178_v56 = vld [vmem:[#allocation29_spill] sm:$0xff] }
 0x49b   : > { %v3208_v47 = vsel %vm3197_vm7, nan, %v3207_v9  ;;  %vm3308_vm10 = vcmp.eq.s32.totalorder %v3303_v26, 2  ;;  %vm8246_vm6 = vcmp.lt.s32.totalorder %v8245_v21, 0  ;;  %v3307_v53 = vsel %vm3305_vm9, %v16171_v31, %v3306_v38  ;;  %vm16177_vm7 = vmmov %vm16153_vm1  ;;  %v16179_v26 = vld [vmem:[#allocation14_spill] sm:$0xff]  ;;  %v16180_v9 = vld [vmem:[#allocation8_spill] sm:$0xff] }
 0x49c   : > { %v12372_v46 = vadd.f32 %v9161_v41, %v3208_v47  ;;  %v3310_v11 = vsel %vm3308_vm10, %v3309_v20, %v16169_v17  ;;  %v4008_v55 = vsel %vm8246_vm6, 0, %v8245_v21  ;;  %v3407_v5 = vand.u32 3, %v16173_v59  ;;  %vm16187_vm10 = vmmov %vm16177_vm7 }
 0x49d   : > { %v3311_v50 = vsel %vm3304_vm2, %v3307_v53, %v3310_v11  ;;  %v3410_v7 = vxor.u32 2147483648, %v12048_v58  ;;  %v12378_v35 = vpop.eup %9013  ;;  %v4009_v13 = vsub.s32 32, %v4008_v55  ;;  %v4013_v22 = vsub.s32 4294967266, %v4008_v55  ;;  %v9163_v53 = vld [vmem:[%s9279_s13 + $0x40] sm:$0xff] }
 0x49e   : > { %16172 = vst [vmem:[#allocation42_spill] sm:$0xff] %v12372_v46  ;;  %8578 = vmatprep.mubr.msk.f32.mxu0 %vm16174_vm12, %v12372_v46  ;;  %v3312_v62 = vsel %vm3301_vm11, nan, %v3311_v50  ;;  %vm3405_vm13 = vweird.f32 %v16175_v8  ;;  %v4010_v12 = vshll.u32 %v12331_v48, %v4008_v55  ;;  %vm3408_vm3 = vcmp.lt.s32.totalorder %v3407_v5, 2  ;;  %v16185_v50 = vld [vmem:[#allocation17_spill] sm:$0xff]  ;;  %v16186_v8 = vld [vmem:[#allocation11_spill] sm:$0xff] }
 0x49f   : > { %v12387_v51 = vadd.f32 %v9162_v18, %v3312_v62  ;;  %vm3409_vm15 = vcmp.eq.s32.totalorder %v3407_v5, 0  ;;  %v4011_v4 = vshrl.u32 %v12329_v45, %v4009_v13  ;;  %v4014_v10 = vadd.s32 127, %v4013_v22 }
 0x4a0   : > { %v3411_v61 = vsel %vm3409_vm15, %v12023_v34, %v3410_v7  ;;  %v3413_v36 = vxor.u32 2147483648, %v12023_v34  ;;  %vm3939_vm5 = vcmp.lt.s32.totalorder %v12103_v23, 0  ;;  %vm3412_vm14 = vcmp.eq.s32.totalorder %v3407_v5, 2 }
 0x4a1   : > { %16176 = vst [vmem:[#allocation41_spill] sm:$0xff] %v12387_v51  ;;  %8579 = vmatmul.mubr.msk.f32.gmra.mxu0 %vm16177_vm7, %v12387_v51  ;;  %v3511_v48 = vand.u32 3, %v16178_v56  ;;  %v3514_v14 = vxor.u32 2147483648, %v11981_v39  ;;  %v3517_v17 = vxor.u32 2147483648, %v16179_v26  ;;  %v4012_v38 = vor.u32 %v4011_v4, %v4010_v12  ;;  %v9164_v4 = vld [vmem:[%s9279_s13 + $0x48] sm:$0xff] }
 0x4a2   : > { %v4015_v45 = vshll.u32 %v4014_v10, 23  ;;  %v3414_v21 = vsel %vm3412_vm14, %v3413_v36, %v12048_v58  ;;  %vm3509_vm0 = vweird.f32 %v16180_v9  ;;  %vm3613_vm11 = vweird.f32 %v11636_v1 }
 0x4a3   : > { %v3415_v34 = vsel %vm3408_vm3, %v3411_v61, %v3414_v21  ;;  %vm3512_vm4 = vcmp.lt.s32.totalorder %v3511_v48, 2  ;;  %vm3513_vm1 = vcmp.eq.s32.totalorder %v3511_v48, 0  ;;  %v16181_v31 = vand.u32 2147483647, %v12103_v23  ;;  %vm16192_vm3 = vmmov %vm16177_vm7 }
 0x4a4   : > { %v12402_v19 = vpop.eup %9015  ;;  %v4016_v47 = vor.u32 4788187, %v4015_v45  ;;  %v3416_v58 = vsel %vm3405_vm13, nan, %v3415_v34  ;;  %v3515_v41 = vsel %vm3513_vm1, %v16179_v26, %v3514_v14  ;;  %vm3516_vm9 = vcmp.eq.s32.totalorder %v3511_v48, 2  ;;  %v16189_v48 = vld [vmem:[#allocation25_spill] sm:$0xff]  ;;  %v16190_v26 = vld [vmem:[#allocation34_spill] sm:$0xff] }
 0x4a5   : > { %vm12406_vm2 = vcmp.le.f32.partialorder %v16181_v31, 0.7853982  ;;  %v12414_v11 = vadd.f32 %v9163_v53, %v3416_v58  ;;  %v3518_v55 = vsel %vm3516_vm9, %v3517_v17, %v11981_v39  ;;  %v3615_v59 = vand.u32 3, %v16185_v50  ;;  %v12419_v7 = vpop.eup %9017  ;;  %v9165_v31 = vld [vmem:[%s9279_s13 + $0x50] sm:$0xff]  ;;  %v16194_v58 = vld [vmem:[#allocation18_spill] sm:$0xff]  ;;  %vm16198_vm9 = vmmov %vm16192_vm3 }
 0x4a6   : > { %v3618_v5 = vxor.u32 2147483648, %v12155_v63  ;;  %v4017_v13 = vand.u32 2147483647, %v4016_v47  ;;  %v4019_v22 = vcvt.s32.f32 %v4012_v38  ;;  %v3519_v62 = vsel %vm3512_vm4, %v3515_v41, %v3518_v55  ;;  %v16191_v38 = vld [vmem:[#allocation38_spill] sm:$0xff]  ;;  %vm16195_vm4 = vmmov %vm16192_vm3 }
 0x4a7   : > { %16184 = vst [vmem:[#allocation36_spill] sm:$0xff] %v12414_v11  ;;  %v3621_v12 = vxor.u32 2147483648, %v16186_v8  ;;  %8581 = vmatprep.mubr.msk.f32.mxu0 %vm16187_vm10, %v12414_v11  ;;  %v3520_v18 = vsel %vm3509_vm0, nan, %v3519_v62  ;;  %vm3616_vm6 = vcmp.lt.s32.totalorder %v3615_v59, 2  ;;  %vm3617_vm12 = vcmp.eq.s32.totalorder %v3615_v59, 0  ;;  %v16197_v62 = vld [vmem:[#allocation35_spill] sm:$0xff] }
 0x4a8   : > { %vm3620_vm13 = vcmp.eq.s32.totalorder %v3615_v59, 2  ;;  %v4020_v39 = vmul.f32 %v4019_v22, %v4017_v13  ;;  %v12428_v10 = vadd.f32 %v9164_v4, %v3520_v18  ;;  %v3619_v61 = vsel %vm3617_vm12, %v16186_v8, %v3618_v5  ;;  %v9166_v59 = vld [vmem:[%s9279_s13 + $0x58] sm:$0xff] }
 0x4a9   : > { %v3622_v36 = vsel %vm3620_vm13, %v3621_v12, %v12155_v63  ;;  %v3719_v14 = vand.u32 3, %v16189_v48  ;;  %v3722_v17 = vxor.u32 2147483648, %v16190_v26  ;;  %v3725_v45 = vxor.u32 2147483648, %v16191_v38  ;;  %v9168_v48 = vld [vmem:[%s9279_s13 + $0x68] sm:$0xff] }
 0x4aa   : > { %16188 = vst [vmem:[#allocation37_spill] sm:$0xff] %v12428_v10  ;;  %v3623_v56 = vsel %vm3616_vm6, %v3619_v61, %v3622_v36  ;;  %v4021_v21 = vxor.u32 2147483648, %v4020_v39  ;;  %v4024_v9 = vsel %vm3939_vm5, %v4023_v49, %v12316_v37  ;;  %8582 = vmatmul.mubr.msk.f32.gmra.mxu0 %vm16192_vm3, %v12428_v10  ;;  %v3823_v34 = vand.u32 3, %v12180_v44  ;;  %v9167_v61 = vld [vmem:[%s9279_s13 + $0x60] sm:$0xff] }
 0x4ab   : > { %v3624_v63 = vsel %vm3613_vm11, nan, %v3623_v56  ;;  %vm3717_vm15 = vweird.f32 %v16194_v58  ;;  %vm3721_vm7 = vcmp.eq.s32.totalorder %v3719_v14, 0  ;;  %vm3724_vm14 = vcmp.eq.s32.totalorder %v3719_v14, 2 }
 0x4ac   : > { %v12446_v47 = vadd.f32 %v9165_v31, %v3624_v63  ;;  %v4022_v41 = vsel %vm3939_vm5, %v4021_v21, %v4020_v39  ;;  %vm3720_vm0 = vcmp.lt.s32.totalorder %v3719_v14, 2  ;;  %v3723_v37 = vsel %vm3721_vm7, %v16191_v38, %v3722_v17 }
 0x4ad   : > { %v3726_v49 = vsel %vm3724_vm14, %v3725_v45, %v16190_v26  ;;  %v4025_v1 = vsel %vm12406_vm2, %v12103_v23, %v4022_v41  ;;  %vm3824_vm1 = vcmp.lt.s32.totalorder %v3823_v34, 2  ;;  %v3826_v53 = vxor.u32 2147483648, %v12378_v35  ;;  %v9169_v41 = vld [vmem:[%s9279_s13 + $0x70] sm:$0xff] }
 0x4ae   : > { %16193 = vst [vmem:[#allocation31_spill] sm:$0xff] %v12446_v47  ;;  %8584 = vmatprep.mubr.msk.f32.mxu0 %vm16195_vm4, %v12446_v47  ;;  %v3727_v44 = vsel %vm3720_vm0, %v3723_v37, %v3726_v49  ;;  %9019 = vcosq.f32 %v4025_v1  ;;  %vm3825_vm11 = vcmp.eq.s32.totalorder %v3823_v34, 0  ;;  %v3829_v50 = vxor.u32 2147483648, %v12363_v42  ;;  %v9170_v49 = vld [vmem:[%s9279_s13 + $0x78] sm:$0xff] }
 0x4af   : > { %v3728_v55 = vsel %vm3717_vm15, nan, %v3727_v44  ;;  %9021 = vsinq.f32 %v4025_v1  ;;  %v3827_v13 = vsel %vm3825_vm11, %v12363_v42, %v3826_v53  ;;  %vm3828_vm5 = vcmp.eq.s32.totalorder %v3823_v34, 2 }
 0x4b0   : > { %v12461_v5 = vadd.f32 %v9166_v59, %v3728_v55  ;;  %v3830_v22 = vsel %vm3828_vm5, %v3829_v50, %v12378_v35  ;;  %v3927_v8 = vand.u32 3, %v16197_v62  ;;  %v3930_v12 = vxor.u32 2147483648, %v12251_v54 }
 0x4b1   : > { %v3933_v18 = vxor.u32 2147483648, %v12245_v3  ;;  %v4134_v39 = vadd.s32 3, %v4130_v33  ;;  %vm3821_vm10 = vweird.f32 %v11905_v52  ;;  %v3831_v42 = vsel %vm3824_vm1, %v3827_v13, %v3830_v22 }
 0x4b2   : > { %16196 = vst [vmem:[#allocation40_spill] sm:$0xff] %v12461_v5  ;;  %8585 = vmatmul.mubr.msk.f32.gmra.mxu0 %vm16198_vm9, %v12461_v5  ;;  %v4026_v35 = vsel %vm12406_vm2, 0, %v4024_v9  ;;  %v3832_v4 = vsel %vm3821_vm10, nan, %v3831_v42  ;;  %vm3929_vm6 = vcmp.eq.s32.totalorder %v3927_v8, 0  ;;  %vm3932_vm12 = vcmp.eq.s32.totalorder %v3927_v8, 2  ;;  %vm16201_vm2 = vmmov %vm16192_vm3 }
 0x4b3   : > { %v12479_v36 = vadd.f32 %v9167_v61, %v3832_v4  ;;  %vm3928_vm13 = vcmp.lt.s32.totalorder %v3927_v8, 2  ;;  %v3931_v32 = vsel %vm3929_vm6, %v12245_v3, %v3930_v12  ;;  %v3934_v2 = vsel %vm3932_vm12, %v3933_v18, %v12251_v54  ;;  %vm16204_vm9 = vmmov %vm16201_vm2 }
 0x4b4   : > { %vm3925_vm8 = vweird.f32 %v11711_v60  ;;  %v3935_v52 = vsel %vm3928_vm13, %v3931_v32, %v3934_v2  ;;  %v4030_v33 = vadd.s32 3, %v4026_v35  ;;  %v4135_v56 = vand.u32 3, %v4134_v39  ;;  %vm16205_vm10 = vmmov %vm16201_vm2 }
 0x4b5   : > { %16199 = vst [vmem:[#allocation39_spill] sm:$0xff] %v12479_v36  ;;  %8587 = vmatprep.mubr.msk.f32.mxu0 %vm16192_vm3, %v12479_v36  ;;  %v3936_v20 = vsel %vm3925_vm8, nan, %v3935_v52  ;;  %v4138_v26 = vxor.u32 2147483648, %v12419_v7  ;;  %v4141_v17 = vxor.u32 2147483648, %v12402_v19  ;;  %vm4133_vm11 = vweird.f32 %v11992_v15  ;;  %v12510_v15 = vld [vmem:[%s15563_s6] ss:$0 sm:$0xff] }
 0x4b6   : > { %v12487_v14 = vadd.f32 %v9168_v48, %v3936_v20  ;;  %v4031_v3 = vand.u32 3, %v4030_v33  ;;  %vm4137_vm15 = vcmp.eq.s32.totalorder %v4135_v56, 0  ;;  %vm4140_vm7 = vcmp.eq.s32.totalorder %v4135_v56, 2 }
 0x4b7   : > { %v4139_v60 = vsel %vm4137_vm15, %v12402_v19, %v4138_v26  ;;  %v4142_v54 = vsel %vm4140_vm7, %v4141_v17, %v12419_v7  ;;  %vm4136_vm14 = vcmp.lt.s32.totalorder %v4135_v56, 2  ;;  %vm4029_vm5 = vweird.f32 %v12103_v23 }
 0x4b8   : > { %16200 = vst [vmem:[#allocation6_spill] sm:$0xff] %v12487_v14  ;;  %8588 = vmatmul.mubr.msk.f32.gmra.mxu0 %vm16201_vm2, %v12487_v14  ;;  %vm4036_vm0 = vcmp.eq.s32.totalorder %v4031_v3, 2  ;;  %v4143_v63 = vsel %vm4136_vm14, %v4139_v60, %v4142_v54  ;;  %vm4033_vm4 = vcmp.eq.s32.totalorder %v4031_v3, 0  ;;  %vm4032_vm1 = vcmp.lt.s32.totalorder %v4031_v3, 2 }
 0x4b9   : > { %v4144_v58 = vsel %vm4133_vm11, nan, %v4143_v63 }
 0x4ba   : > { %v12501_v1 = vadd.f32 %v9170_v49, %v4144_v58 }
 0x4bb   : > { %v9020_v38 = vpop.eup %9019 }
 0x4bc   : > { %v9022_v45 = vpop.eup %9021  ;;  %v4037_v21 = vxor.u32 2147483648, %v9020_v38  ;;  %16203 = vst [vmem:[#allocation9_spill] sm:$0xff] %v12501_v1 }
 0x4bd   : > { %v4034_v9 = vxor.u32 2147483648, %v9022_v45 }
 0x4be   : > { %v4038_v34 = vsel %vm4036_vm0, %v4037_v21, %v9022_v45 }
 0x4bf   : > { %v4035_v31 = vsel %vm4033_vm4, %v9020_v38, %v4034_v9 }
 0x4c0   : > { %v4039_v19 = vsel %vm4032_vm1, %v4035_v31, %v4038_v34 }
 0x4c1   : > { %v4040_v7 = vsel %vm4029_vm5, nan, %v4039_v19 }
 0x4c2   : > { %v12498_v37 = vadd.f32 %v9169_v41, %v4040_v7 }
 0x4c4   : > { %16202 = vst [vmem:[#allocation13_spill] sm:$0xff] %v12498_v37  ;;  %8590 = vmatprep.mubr.msk.f32.mxu0 %vm16204_vm9, %v12498_v37 }
 0x4c5   : > { %8591 = vmatmul.mubr.msk.f32.gmra.mxu0 %vm16205_vm10, %v12501_v1 }
 0x544   : > { %v8571_v23 = vpop.f32.mrf.mxu0 }
 0x545   : > { %v12513_v44 = vadd.f32 %v8571_v23, %v12510_v15 }
 0x546   : > { %v4291_v53 = vpop.f32.mrf.mxu0 }
 0x547   : > { %v15712_v55 = vand.u32 2147483647, %v12513_v44  ;;  %v4477_v50 = vand.u32 2139095040, %v12513_v44  ;;  %v12518_v59 = vadd.f32 %v12510_v15, %v4291_v53 }
 0x549   : > { %v4478_v13 = vshrl.u32 %v4477_v50, 23  ;;  %v4481_v22 = vand.u32 8388607, %v15712_v55  ;;  %v15711_v62 = vand.u32 2147483647, %v12518_v59  ;;  %v4373_v8 = vand.u32 2139095040, %v12518_v59 }
 0x54b   : > { %v8272_v12 = vadd.s32 4294967169, %v4478_v13  ;;  %v4374_v18 = vshrl.u32 %v4373_v8, 23  ;;  %v4377_v39 = vand.u32 8388607, %v15711_v62  ;;  %v4482_v35 = vor.u32 8388608, %v4481_v22 }
 0x54d   : > { %v4484_v42 = vadd.s32 1, %v8272_v12  ;;  %v8268_v4 = vadd.s32 4294967169, %v4374_v18  ;;  %v4378_v61 = vor.u32 8388608, %v4377_v39  ;;  %v12526_v20 = vshll.u32 %v4482_v35, 8 }
 0x54f   : > { %vm4485_vm6 = vcmp.gt.s32.totalorder %v4484_v42, 0  ;;  %v4380_v2 = vadd.s32 1, %v8268_v4  ;;  %v12529_v26 = vshll.u32 %v4378_v61, 8  ;;  %v8574_v53 = vpop.f32.mrf.mxu0 }
 0x550   : > { %v4486_v32 = vsel %vm4485_vm6, %v4484_v42, 0  ;;  %v12549_v61 = vadd.f32 %v8574_v53, %v12510_v15 }
 0x551   : > { %v4487_v52 = vshrl.u32 %v4486_v32, 5  ;;  %v4488_v33 = vand.u32 31, %v4486_v32  ;;  %vm4381_vm12 = vcmp.gt.s32.totalorder %v4380_v2, 0 }
 0x552   : > { %v4382_v7 = vsel %vm4381_vm12, %v4380_v2, 0 }
 0x553   : > { %v4489_v56 = vsub.s32 32, %v4488_v33  ;;  %v4491_v48 = vshll.u32 %v16071_v29, %v4488_v33  ;;  %v4494_v17 = vshll.u32 %v16072_v25, %v4488_v33  ;;  %v4497_v3 = vshll.u32 %v16073_v40, %v4488_v33 }
 0x554   : > { %v4500_v60 = vshll.u32 %v16074_v57, %v4488_v33  ;;  %v4503_v54 = vshll.u32 %v16075_v24, %v4488_v33  ;;  %vm4506_vm13 = vcmp.lt.s32.totalorder %v4487_v52, 1  ;;  %vm4508_vm8 = vcmp.lt.s32.totalorder %v4487_v52, 3 }
 0x555   : > { %v4492_v38 = vshrl.u32 %v16072_v25, %v4489_v56  ;;  %v4495_v45 = vshrl.u32 %v16073_v40, %v4489_v56  ;;  %v4498_v21 = vshrl.u32 %v16074_v57, %v4489_v56  ;;  %v4490_v9 = vshrl.u32 %v16071_v29, %v4489_v56 }
 0x556   : > { %v4501_v63 = vshrl.u32 %v16075_v24, %v4489_v56  ;;  %v4504_v34 = vshrl.u32 %v16076_v28, %v4489_v56  ;;  %vm4509_vm3 = vcmp.lt.s32.totalorder %v4487_v52, 4  ;;  %v4384_v23 = vand.u32 31, %v4382_v7 }
 0x557   : > { %v4493_v31 = vor.u32 %v4492_v38, %v4491_v48  ;;  %v4496_v19 = vor.u32 %v4495_v45, %v4494_v17  ;;  %v4499_v58 = vor.u32 %v4498_v21, %v4497_v3  ;;  %vm4507_vm2 = vcmp.lt.s32.totalorder %v4487_v52, 2 }
 0x558   : > { %v4502_v41 = vor.u32 %v4501_v63, %v4500_v60  ;;  %v4505_v49 = vor.u32 %v4504_v34, %v4503_v54  ;;  %v4385_v42 = vsub.s32 32, %v4384_v23  ;;  %v4383_v56 = vshrl.u32 %v4382_v7, 5 }
 0x559   : > { %v4510_v50 = vsel %vm4506_vm13, %v4490_v9, %v4493_v31  ;;  %v4511_v13 = vsel %vm4509_vm3, %v4499_v58, 2102212464  ;;  %v4514_v22 = vsel %vm4506_vm13, %v4493_v31, %v4496_v19  ;;  %v4518_v8 = vsel %vm4506_vm13, %v4496_v19, %v4499_v58 }
 0x55a   : > { %v4512_v12 = vsel %vm4508_vm8, %v4496_v19, %v4511_v13  ;;  %v4515_v18 = vsel %vm4509_vm3, %v4502_v41, 920167782  ;;  %v4519_v39 = vsel %vm4509_vm3, %v4505_v49, 1326507024  ;;  %v4387_v54 = vshll.u32 %v16071_v29, %v4384_v23 }
 0x55b   : > { %v4516_v35 = vsel %vm4508_vm8, %v4499_v58, %v4515_v18  ;;  %v4520_v4 = vsel %vm4508_vm8, %v4502_v41, %v4519_v39  ;;  %v4513_v32 = vsel %vm4507_vm2, %v4510_v50, %v4512_v12  ;;  %v4388_v52 = vshrl.u32 %v16072_v25, %v4385_v42 }
 0x55c   : > { %v4517_v2 = vsel %vm4507_vm2, %v4514_v22, %v4516_v35  ;;  %v4521_v33 = vsel %vm4507_vm2, %v4518_v8, %v4520_v4  ;;  %v4390_v38 = vshll.u32 %v16072_v25, %v4384_v23  ;;  %v4391_v45 = vshrl.u32 %v16073_v40, %v4385_v42 }
 0x55d   : > { %v12552_v48 = vmul.u32.u64.low %v12526_v20, %v4521_v33  ;;  %v12553_v17 = vmul.u32.u64.high %v12526_v20, %v4521_v33, %v12552_v48  ;;  %v12556_v3 = vmul.u32.u64.low %v12526_v20, %v4517_v2  ;;  %v12557_v60 = vmul.u32.u64.high %v12526_v20, %v4517_v2, %v12556_v3 }
 0x55e   : > { %v4393_v21 = vshll.u32 %v16073_v40, %v4384_v23  ;;  %v4394_v9 = vshrl.u32 %v16074_v57, %v4385_v42  ;;  %v4396_v63 = vshll.u32 %v16074_v57, %v4384_v23  ;;  %v4397_v34 = vshrl.u32 %v16075_v24, %v4385_v42 }
 0x55f   : > { %v4389_v31 = vor.u32 %v4388_v52, %v4387_v54  ;;  %v4392_v19 = vor.u32 %v4391_v45, %v4390_v38  ;;  %v4399_v58 = vshll.u32 %v16075_v24, %v4384_v23  ;;  %v4400_v7 = vshrl.u32 %v16076_v28, %v4385_v42 }
 0x560   : > { %v4529_v41 = vmul.u32 %v12526_v20, %v4513_v32  ;;  %vm4531_vm15 = vc.u32 %v12553_v17, %v12556_v3  ;;  %v4532_v49 = vadd.s32 1, %v12557_v60  ;;  %v4395_v53 = vor.u32 %v4394_v9, %v4393_v21 }
 0x561   : > { %v4386_v50 = vshrl.u32 %v16071_v29, %v4385_v42  ;;  %v4398_v13 = vor.u32 %v4397_v34, %v4396_v63  ;;  %v4401_v22 = vor.u32 %v4400_v7, %v4399_v58  ;;  %vm4402_vm7 = vcmp.lt.s32.totalorder %v4383_v56, 1 }
 0x562   : > { %v4533_v8 = vsel %vm4531_vm15, %v4532_v49, %v12557_v60  ;;  %vm4404_vm14 = vcmp.lt.s32.totalorder %v4383_v56, 3  ;;  %vm4405_vm0 = vcmp.lt.s32.totalorder %v4383_v56, 4  ;;  %v4410_v23 = vsel %vm4402_vm7, %v4389_v31, %v4392_v19 }
 0x563   : > { %v4534_v12 = vadd.s32 %v4533_v8, %v4529_v41  ;;  %v4407_v18 = vsel %vm4405_vm0, %v4395_v53, 2102212464  ;;  %v4411_v39 = vsel %vm4405_vm0, %v4398_v13, 920167782  ;;  %v4414_v20 = vsel %vm4402_vm7, %v4392_v19, %v4395_v53 }
 0x564   : > { %vm4403_vm4 = vcmp.lt.s32.totalorder %v4383_v56, 2  ;;  %v4406_v35 = vsel %vm4402_vm7, %v4386_v50, %v4389_v31  ;;  %v4412_v4 = vsel %vm4404_vm14, %v4395_v53, %v4411_v39  ;;  %v4415_v32 = vsel %vm4405_vm0, %v4401_v22, 1326507024  ;;  %v4301_v31 = vpop.f32.mrf.mxu0 }
 0x565   : > { %v4535_v2 = vadd.s32 536870912, %v4534_v12  ;;  %v4408_v33 = vsel %vm4404_vm14, %v4392_v19, %v4407_v18  ;;  %v4413_v48 = vsel %vm4403_vm4, %v4410_v23, %v4412_v4  ;;  %v4416_v42 = vsel %vm4404_vm14, %v4398_v13, %v4415_v32 }
 0x566   : > { %v4417_v54 = vsel %vm4403_vm4, %v4414_v20, %v4416_v42  ;;  %v12577_v52 = vmul.u32.u64.low %v12529_v26, %v4413_v48  ;;  %v12578_v38 = vmul.u32.u64.high %v12529_v26, %v4413_v48, %v12577_v52  ;;  %v4409_v56 = vsel %vm4403_vm4, %v4406_v35, %v4408_v33  ;;  %v8577_v20 = vpop.f32.mrf.mxu0 }
 0x567   : > { %v12581_v60 = vshrl.u32 %v4535_v2, 30  ;;  %v12584_v45 = vmul.u32.u64.low %v12529_v26, %v4417_v54  ;;  %v12585_v21 = vmul.u32.u64.high %v12529_v26, %v4417_v54, %v12584_v45  ;;  %v15710_v9 = vand.u32 2147483647, %v12549_v61 }
 0x568   : > { %v4685_v63 = vand.u32 2139095040, %v12549_v61  ;;  %v4428_v19 = vadd.s32 1, %v12578_v38  ;;  %v4425_v41 = vmul.u32 %v12529_v26, %v4409_v56  ;;  %v12600_v13 = vadd.f32 %v12510_v15, %v4301_v31 }
 0x569   : > { %v4537_v34 = vshll.u32 %v12581_v60, 30  ;;  %vm4427_vm1 = vc.u32 %v12585_v21, %v12577_v52  ;;  %v4689_v50 = vand.u32 8388607, %v15710_v9  ;;  %v4530_v2 = vadd.s32 %v12556_v3, %v12553_v17 }
 0x56a   : > { %v4686_v58 = vshrl.u32 %v4685_v63, 23  ;;  %v4429_v49 = vsel %vm4427_vm1, %v4428_v19, %v12578_v38  ;;  %v4581_v39 = vand.u32 2139095040, %v12600_v13  ;;  %v15716_v54 = vand.u32 2147483647, %v12600_v13 }
 0x56b   : > { %v12591_v7 = vsub.s32 %v4534_v12, %v4537_v34  ;;  %v4430_v8 = vadd.s32 %v4429_v49, %v4425_v41  ;;  %v4690_v26 = vor.u32 8388608, %v4689_v50  ;;  %v12612_v38 = vadd.f32 %v8577_v20, %v12510_v15 }
 0x56c   : > { %v8280_v53 = vadd.s32 4294967169, %v4686_v58  ;;  %v4582_v34 = vshrl.u32 %v4581_v39, 23  ;;  %v4585_v62 = vand.u32 8388607, %v15716_v54  ;;  %vm4476_vm4 = vcmp.lt.s32.totalorder %v12513_v44, 0 }
 0x56d   : > { %v4540_v22 = vsub.s32 0, %v12591_v7  ;;  %v4431_v18 = vadd.s32 536870912, %v4430_v8  ;;  %16206 = vst [vmem:[#allocation12_spill] sm:$0xff] %v12612_v38  ;;  %v12616_v63 = vshll.u32 %v4690_v26, 8  ;;  %v16226_v27 = vand.u32 2147483647, %v12600_v13 }
 0x56e   : > { %v4692_v23 = vadd.s32 1, %v8280_v53  ;;  %v8276_v9 = vadd.s32 4294967169, %v4582_v34 }
 0x56f   : > { %v8273_v12 = vmin.u32 %v4540_v22, %v12591_v7  ;;  %v12605_v4 = vshrl.u32 %v4431_v18, 30 }
 0x570   : > { %vm4693_vm11 = vcmp.gt.s32.totalorder %v4692_v23, 0 }
 0x571   : > { %v4542_v35 = vclz %v8273_v12  ;;  %v4694_v32 = vsel %vm4693_vm11, %v4692_v23, 0  ;;  %v4433_v42 = vshll.u32 %v12605_v4, 30 }
 0x572   : > { %v4696_v33 = vand.u32 31, %v4694_v32  ;;  %v12614_v45 = vshrl.u32 %v4694_v32, 5 }
 0x573   : > { %v8274_v48 = vadd.s32 4294967294, %v4542_v35  ;;  %v12618_v31 = vsub.s32 %v4430_v8, %v4433_v42 }
 0x574   : > { %v4697_v56 = vsub.s32 32, %v4696_v33  ;;  %v4699_v17 = vshll.u32 %v16071_v29, %v4696_v33  ;;  %v4702_v3 = vshll.u32 %v16072_v25, %v4696_v33  ;;  %v4705_v49 = vshll.u32 %v16073_v40, %v4696_v33 }
 0x575   : > { %vm8275_vm5 = vcmp.lt.s32.totalorder %v8274_v48, 0  ;;  %v4436_v22 = vsub.s32 0, %v12618_v31  ;;  %v4708_v23 = vshll.u32 %v16074_v57, %v4696_v33  ;;  %v4711_v26 = vshll.u32 %v16075_v24, %v4696_v33 }
 0x576   : > { %v4545_v19 = vsel %vm8275_vm5, 0, %v8274_v48  ;;  %v4700_v58 = vshrl.u32 %v16072_v25, %v4697_v56  ;;  %v4703_v41 = vshrl.u32 %v16073_v40, %v4697_v56  ;;  %v4706_v8 = vshrl.u32 %v16074_v57, %v4697_v56 }
 0x577   : > { %v4546_v53 = vsub.s32 32, %v4545_v19  ;;  %v4550_v50 = vsub.s32 4294967266, %v4545_v19  ;;  %v4709_v18 = vshrl.u32 %v16075_v24, %v4697_v56  ;;  %v8269_v20 = vmin.u32 %v4436_v22, %v12618_v31 }
 0x578   : > { %v4701_v12 = vor.u32 %v4700_v58, %v4699_v17  ;;  %v4704_v35 = vor.u32 %v4703_v41, %v4702_v3  ;;  %v4712_v32 = vshrl.u32 %v16076_v28, %v4697_v56  ;;  %v4707_v48 = vor.u32 %v4706_v8, %v4705_v49 }
 0x579   : > { %v4551_v39 = vadd.s32 127, %v4550_v50  ;;  %v4710_v42 = vor.u32 %v4709_v18, %v4708_v23  ;;  %v4548_v55 = vshrl.u32 %v4530_v2, %v4546_v53  ;;  %v4438_v58 = vclz %v8269_v20 }
 0x57a   : > { %v4713_v1 = vor.u32 %v4712_v32, %v4711_v26  ;;  %v4547_v37 = vshll.u32 %v12591_v7, %v4545_v19  ;;  %vm4714_vm9 = vcmp.lt.s32.totalorder %v12614_v45, 1  ;;  %vm4715_vm10 = vcmp.lt.s32.totalorder %v12614_v45, 2 }
 0x57b   : > { %v4552_v17 = vshll.u32 %v4551_v39, 23  ;;  %vm4716_vm6 = vcmp.lt.s32.totalorder %v12614_v45, 3  ;;  %v8270_v3 = vadd.s32 4294967294, %v4438_v58  ;;  %vm4717_vm12 = vcmp.lt.s32.totalorder %v12614_v45, 4 }
 0x57c   : > { %v4722_v34 = vsel %vm4714_vm9, %v4701_v12, %v4704_v35  ;;  %v4698_v2 = vshrl.u32 %v16071_v29, %v4697_v56  ;;  %v4719_v41 = vsel %vm4717_vm12, %v4707_v48, 2102212464  ;;  %v4723_v49 = vsel %vm4717_vm12, %v4710_v42, 920167782 }
 0x57d   : > { %v4553_v33 = vor.u32 4788187, %v4552_v17  ;;  %v4727_v53 = vsel %vm4717_vm12, %v4713_v1, 1326507024  ;;  %v4549_v50 = vor.u32 %v4548_v55, %v4547_v37  ;;  %vm8271_vm13 = vcmp.lt.s32.totalorder %v8270_v3, 0 }
 0x57e   : > { %v4724_v7 = vsel %vm4716_vm6, %v4707_v48, %v4723_v49  ;;  %v4726_v19 = vsel %vm4714_vm9, %v4704_v35, %v4707_v48  ;;  %v12646_v22 = vsel %vm8271_vm13, 0, %v8270_v3  ;;  %v4728_v8 = vsel %vm4716_vm6, %v4710_v42, %v4727_v53 }
 0x57f   : > { %v4725_v23 = vsel %vm4715_vm10, %v4722_v34, %v4724_v7  ;;  %v4893_v56 = vand.u32 2139095040, %v12612_v38  ;;  %v4554_v18 = vand.u32 2147483647, %v4553_v33  ;;  %v4446_v37 = vsub.s32 4294967266, %v12646_v22 }
 0x580   : > { %v4718_v1 = vsel %vm4714_vm9, %v4698_v2, %v4701_v12  ;;  %v4720_v55 = vsel %vm4716_vm6, %v4704_v35, %v4719_v41  ;;  %v4729_v26 = vsel %vm4715_vm10, %v4726_v19, %v4728_v8  ;;  %v4588_v32 = vadd.s32 1, %v8276_v9 }
 0x581   : > { %v12661_v39 = vmul.u32.u64.low %v12616_v63, %v4725_v23  ;;  %v12662_v20 = vmul.u32.u64.high %v12616_v63, %v4725_v23, %v12661_v39  ;;  %v4556_v48 = vcvt.s32.f32 %v4549_v50  ;;  %v4586_v42 = vor.u32 8388608, %v4585_v62 }
 0x582   : > { %v15715_v17 = vand.u32 2147483647, %v12612_v38  ;;  %v4721_v58 = vsel %vm4715_vm10, %v4718_v1, %v4720_v55  ;;  %v12669_v12 = vmul.u32.u64.low %v12616_v63, %v4729_v26  ;;  %v12670_v33 = vmul.u32.u64.high %v12616_v63, %v4729_v26, %v12669_v12 }
 0x583   : > { %vm4589_vm8 = vcmp.gt.s32.totalorder %v4588_v32, 0  ;;  %v12672_v35 = vmul.f32 %v4556_v48, %v4554_v18  ;;  %v4447_v3 = vadd.s32 127, %v4446_v37  ;;  %v4894_v2 = vshrl.u32 %v4893_v56, 23 }
 0x584   : > { %v4590_v34 = vsel %vm4589_vm8, %v4588_v32, 0  ;;  %v4740_v41 = vadd.s32 1, %v12662_v20  ;;  %v4426_v62 = vadd.s32 %v12577_v52, %v12585_v21  ;;  %v4737_v49 = vmul.u32 %v12616_v63, %v4721_v58 }
 0x585   : > { %v4592_v9 = vand.u32 31, %v4590_v34  ;;  %v12678_v45 = vshll.u32 %v4586_v42, 8  ;;  %v12682_v53 = vand.u32 8388607, %v15715_v17  ;;  %v4442_v50 = vsub.s32 32, %v12646_v22 }
 0x586   : > { %v4443_v7 = vshll.u32 %v12618_v31, %v12646_v22  ;;  %vm4739_vm3 = vc.u32 %v12670_v33, %v12661_v39  ;;  %v4558_v23 = vxor.u32 2147483648, %v12672_v35  ;;  %v4448_v52 = vshll.u32 %v4447_v3, 23 }
 0x587   : > { %v4593_v19 = vsub.s32 32, %v4592_v9  ;;  %v4741_v21 = vsel %vm4739_vm3, %v4740_v41, %v12662_v20  ;;  %v8288_v63 = vadd.s32 4294967169, %v4894_v2  ;;  %v4595_v56 = vshll.u32 %v16071_v29, %v4592_v9 }
 0x588   : > { %v4742_v8 = vadd.s32 %v4741_v21, %v4737_v49  ;;  %v4591_v1 = vshrl.u32 %v4590_v34, 5  ;;  %v4598_v31 = vshll.u32 %v16072_v25, %v4592_v9  ;;  %v4601_v22 = vshll.u32 %v16073_v40, %v4592_v9 }
 0x589   : > { %v4596_v18 = vshrl.u32 %v16072_v25, %v4593_v19  ;;  %v4599_v37 = vshrl.u32 %v16073_v40, %v4593_v19  ;;  %v4602_v55 = vshrl.u32 %v16074_v57, %v4593_v19  ;;  %v4604_v48 = vshll.u32 %v16074_v57, %v4592_v9 }
 0x58a   : > { %v4743_v26 = vadd.s32 536870912, %v4742_v8  ;;  %v4605_v20 = vshrl.u32 %v16075_v24, %v4593_v19  ;;  %v4607_v12 = vshll.u32 %v16075_v24, %v4592_v9  ;;  %v4608_v3 = vshrl.u32 %v16076_v28, %v4593_v19 }
 0x58b   : > { %v4597_v32 = vor.u32 %v4596_v18, %v4595_v56  ;;  %v4600_v42 = vor.u32 %v4599_v37, %v4598_v31  ;;  %v4603_v58 = vor.u32 %v4602_v55, %v4601_v22  ;;  %v4444_v2 = vshrl.u32 %v4426_v62, %v4442_v50 }
 0x58c   : > { %v12701_v34 = vshrl.u32 %v4743_v26, 30  ;;  %v4606_v41 = vor.u32 %v4605_v20, %v4604_v48  ;;  %v4898_v49 = vor.u32 8388608, %v12682_v53  ;;  %v4449_v21 = vor.u32 4788187, %v4448_v52 }
 0x58d   : > { %v4609_v17 = vor.u32 %v4608_v3, %v4607_v12  ;;  %vm4613_vm2 = vcmp.lt.s32.totalorder %v4591_v1, 4  ;;  %v4900_v56 = vadd.s32 1, %v8288_v63  ;;  %v4594_v54 = vshrl.u32 %v16071_v29, %v4593_v19  ;;  %v4311_v3 = vpop.f32.mrf.mxu0 }
 0x58e   : > { %v4745_v18 = vshll.u32 %v12701_v34, 30  ;;  %vm4610_vm15 = vcmp.lt.s32.totalorder %v4591_v1, 1  ;;  %v4615_v37 = vsel %vm4613_vm2, %v4603_v58, 2102212464  ;;  %vm4611_vm7 = vcmp.lt.s32.totalorder %v4591_v1, 2 }
 0x58f   : > { %vm4612_vm14 = vcmp.lt.s32.totalorder %v4591_v1, 3  ;;  %v4618_v9 = vsel %vm4610_vm15, %v4597_v32, %v4600_v42  ;;  %v4619_v62 = vsel %vm4613_vm2, %v4606_v41, 920167782  ;;  %v4614_v31 = vsel %vm4610_vm15, %v4594_v54, %v4597_v32 }
 0x590   : > { %v12708_v50 = vsub.s32 %v4742_v8, %v4745_v18  ;;  %v4616_v53 = vsel %vm4612_vm14, %v4600_v42, %v4615_v37  ;;  %v4620_v52 = vsel %vm4612_vm14, %v4603_v58, %v4619_v62  ;;  %v4445_v22 = vor.u32 %v4444_v2, %v4443_v7 }
 0x591   : > { %v4621_v63 = vsel %vm4611_vm7, %v4618_v9, %v4620_v52  ;;  %v4622_v55 = vsel %vm4610_vm15, %v4600_v42, %v4603_v58  ;;  %v4623_v26 = vsel %vm4613_vm2, %v4609_v17, 1326507024  ;;  %v4450_v8 = vand.u32 2147483647, %v4449_v21 }
 0x592   : > { %v4748_v19 = vsub.s32 0, %v12708_v50  ;;  %v4624_v48 = vsel %vm4612_vm14, %v4606_v41, %v4623_v26  ;;  %v12714_v20 = vmul.u32.u64.low %v12678_v45, %v4621_v63  ;;  %v12715_v12 = vmul.u32.u64.high %v12678_v45, %v4621_v63, %v12714_v20 }
 0x593   : > { %v4617_v54 = vsel %vm4611_vm7, %v4614_v31, %v4616_v53  ;;  %v4625_v32 = vsel %vm4611_vm7, %v4622_v55, %v4624_v48  ;;  %vm4901_vm0 = vcmp.gt.s32.totalorder %v4900_v56, 0  ;;  %v4452_v2 = vcvt.s32.f32 %v4445_v22 }
 0x594   : > { %v8281_v7 = vmin.u32 %v4748_v19, %v12708_v50  ;;  %v12722_v42 = vmul.u32.u64.low %v12678_v45, %v4625_v32  ;;  %v12723_v17 = vmul.u32.u64.high %v12678_v45, %v4625_v32, %v12722_v42  ;;  %v4902_v58 = vsel %vm4901_vm0, %v4900_v56, 0 }
 0x595   : > { %v4904_v41 = vand.u32 31, %v4902_v58  ;;  %v12727_v18 = vadd.f32 %v12510_v15, %v4311_v3  ;;  %v12732_v1 = vsel %vm4476_vm4, %v4558_v23, %v12672_v35  ;;  %v4738_v21 = vadd.s32 %v12661_v39, %v12670_v33 }
 0x596   : > { %v4750_v37 = vclz %v8281_v7  ;;  %v4636_v9 = vadd.s32 1, %v12715_v12  ;;  %v12737_v62 = vmul.f32 %v4452_v2, %v4450_v8  ;;  %v4633_v56 = vmul.u32 %v12678_v45, %v4617_v54 }
 0x597   : > { %16207 = vst [vmem:[#allocation22_spill] sm:$0xff] %v12727_v18  ;;  %v4905_v31 = vsub.s32 32, %v4904_v41  ;;  %v12740_v53 = vshll.u32 %v4898_v49, 8  ;;  %vm4635_vm1 = vc.u32 %v12723_v17, %v12714_v20  ;;  %v4903_v22 = vshrl.u32 %v4902_v58, 5 }
 0x598   : > { %v8282_v52 = vadd.s32 4294967294, %v4750_v37  ;;  %v4907_v35 = vshll.u32 %v16071_v29, %v4904_v41  ;;  %v4637_v23 = vsel %vm4635_vm1, %v4636_v9, %v12715_v12  ;;  %v4910_v33 = vshll.u32 %v16072_v25, %v4904_v41 }
 0x599   : > { %v4908_v39 = vshrl.u32 %v16072_v25, %v4905_v31  ;;  %v4911_v63 = vshrl.u32 %v16073_v40, %v4905_v31  ;;  %v4638_v45 = vadd.s32 %v4637_v23, %v4633_v56  ;;  %v4914_v49 = vshrl.u32 %v16074_v57, %v4905_v31 }
 0x59a   : > { %vm8283_vm11 = vcmp.lt.s32.totalorder %v8282_v52, 0  ;;  %v4917_v55 = vshrl.u32 %v16075_v24, %v4905_v31  ;;  %v4913_v48 = vshll.u32 %v16073_v40, %v4904_v41  ;;  %v4916_v3 = vshll.u32 %v16074_v57, %v4904_v41 }
 0x59b   : > { %v4753_v26 = vsel %vm8283_vm11, 0, %v8282_v52  ;;  %v4909_v19 = vor.u32 %v4908_v39, %v4907_v35  ;;  %v4639_v54 = vadd.s32 536870912, %v4638_v45  ;;  %v4912_v32 = vor.u32 %v4911_v63, %v4910_v33 }
 0x59c   : > { %v4754_v8 = vsub.s32 32, %v4753_v26  ;;  %v4758_v12 = vsub.s32 4294967266, %v4753_v26  ;;  %v4915_v7 = vor.u32 %v4914_v49, %v4913_v48  ;;  %v4918_v42 = vor.u32 %v4917_v55, %v4916_v3 }
 0x59d   : > { %v4919_v58 = vshll.u32 %v16075_v24, %v4904_v41  ;;  %v4920_v2 = vshrl.u32 %v16076_v28, %v4905_v31  ;;  %v12755_v56 = vshrl.u32 %v4639_v54, 30  ;;  %v4789_v52 = vand.u32 2139095040, %v12727_v18 }
 0x59e   : > { %v4756_v37 = vshrl.u32 %v4738_v21, %v4754_v8  ;;  %v4759_v9 = vadd.s32 127, %v4758_v12  ;;  %v4755_v35 = vshll.u32 %v12708_v50, %v4753_v26  ;;  %v4906_v23 = vshrl.u32 %v16071_v29, %v4905_v31 }
 0x59f   : > { %v4921_v39 = vor.u32 %v4920_v2, %v4919_v58  ;;  %vm4922_vm5 = vcmp.lt.s32.totalorder %v4903_v22, 1  ;;  %v4641_v33 = vshll.u32 %v12755_v56, 30  ;;  %vm4923_vm9 = vcmp.lt.s32.totalorder %v4903_v22, 2 }
 0x5a0   : > { %v4760_v14 = vshll.u32 %v4759_v9, 23  ;;  %vm4925_vm10 = vcmp.lt.s32.totalorder %v4903_v22, 4  ;;  %vm4924_vm6 = vcmp.lt.s32.totalorder %v4903_v22, 3  ;;  %v4930_v63 = vsel %vm4922_vm5, %v4909_v19, %v4912_v32 }
 0x5a1   : > { %v4927_v41 = vsel %vm4925_vm10, %v4915_v7, 2102212464  ;;  %v4931_v21 = vsel %vm4925_vm10, %v4918_v42, 920167782  ;;  %v4757_v49 = vor.u32 %v4756_v37, %v4755_v35  ;;  %v12761_v55 = vsub.s32 %v4638_v45, %v4641_v33 }
 0x5a2   : > { %v4926_v48 = vsel %vm4922_vm5, %v4906_v23, %v4909_v19  ;;  %v4934_v3 = vsel %vm4922_vm5, %v4912_v32, %v4915_v7  ;;  %v4761_v8 = vor.u32 4788187, %v4760_v14  ;;  %v4932_v50 = vsel %vm4924_vm6, %v4915_v7, %v4931_v21 }
 0x5a3   : > { %v4935_v26 = vsel %vm4925_vm10, %v4921_v39, 1326507024  ;;  %v4790_v31 = vshrl.u32 %v4789_v52, 23  ;;  %v4644_v12 = vsub.s32 0, %v12761_v55  ;;  %v4928_v54 = vsel %vm4924_vm6, %v4912_v32, %v4927_v41  ;;  %v8580_v41 = vpop.f32.mrf.mxu0 }
 0x5a4   : > { %v4933_v58 = vsel %vm4923_vm9, %v4930_v63, %v4932_v50  ;;  %v4936_v2 = vsel %vm4924_vm6, %v4918_v42, %v4935_v26  ;;  %v15720_v37 = vand.u32 2147483647, %v12727_v18  ;;  %v16208_v32 = vand.u32 2147483647, %v12513_v44 }
 0x5a5   : > { %v4937_v9 = vsel %vm4923_vm9, %v4934_v3, %v4936_v2  ;;  %v12767_v36 = vmul.u32.u64.low %v12740_v53, %v4933_v58  ;;  %v12768_v5 = vmul.u32.u64.high %v12740_v53, %v4933_v58, %v12767_v36  ;;  %v8284_v45 = vadd.s32 4294967169, %v4790_v31 }
 0x5a6   : > { %v8277_v19 = vmin.u32 %v4644_v12, %v12761_v55  ;;  %v12773_v14 = vmul.u32.u64.low %v12740_v53, %v4937_v9  ;;  %v12774_v7 = vmul.u32.u64.high %v12740_v53, %v4937_v9, %v12773_v14  ;;  %vm12779_vm12 = vcmp.le.f32.partialorder %v16208_v32, 0.7853982 }
 0x5a7   : > { %v4762_v52 = vand.u32 2147483647, %v4761_v8  ;;  %v4929_v35 = vsel %vm4923_vm9, %v4926_v48, %v4928_v54  ;;  %v4796_v23 = vadd.s32 1, %v8284_v45  ;;  %v12788_v39 = vsel %vm12779_vm12, %v12513_v44, %v12732_v1 }
 0x5a8   : > { %v4646_v33 = vclz %v8277_v19  ;;  %v4454_v63 = vxor.u32 2147483648, %v12737_v62  ;;  %v4764_v21 = vcvt.s32.f32 %v4757_v49  ;;  %v4948_v3 = vadd.s32 1, %v12768_v5 }
 0x5a9   : > { %vm4797_vm13 = vcmp.gt.s32.totalorder %v4796_v23, 0  ;;  %v4945_v8 = vmul.u32 %v12740_v53, %v4929_v35  ;;  %vm4947_vm8 = vc.u32 %v12774_v7, %v12767_v36  ;;  %v4793_v22 = vand.u32 8388607, %v15720_v37  ;;  %v4321_v53 = vpop.f32.mrf.mxu0 }
 0x5aa   : > { %v8278_v50 = vadd.s32 4294967294, %v4646_v33  ;;  %vm15795_vm3 = vcmp.lt.s32.totalorder %v12518_v59, 0  ;;  %v12798_v1 = vmul.f32 %v4764_v21, %v4762_v52  ;;  %v4949_v48 = vsel %vm4947_vm8, %v4948_v3, %v12768_v5 }
 0x5ab   : > { %v4798_v26 = vsel %vm4797_vm13, %v4796_v23, 0  ;;  %9023 = vcosq.f32 %v12788_v39  ;;  %v4950_v31 = vadd.s32 %v4949_v48, %v4945_v8  ;;  %v12806_v12 = vsel %vm15795_vm3, %v4454_v63, %v12737_v62 }
 0x5ac   : > { %vm8279_vm2 = vcmp.lt.s32.totalorder %v8278_v50, 0  ;;  %v4634_v54 = vadd.s32 %v12714_v20, %v12723_v17  ;;  %v4800_v2 = vand.u32 31, %v4798_v26  ;;  %v4794_v45 = vor.u32 8388608, %v4793_v22 }
 0x5ad   : > { %v4649_v58 = vsel %vm8279_vm2, 0, %v8278_v50  ;;  %v4951_v5 = vadd.s32 536870912, %v4950_v31  ;;  %v12811_v19 = vadd.f32 %v8580_v41, %v12510_v15  ;;  %v12815_v35 = vadd.f32 %v12510_v15, %v4321_v53 }
 0x5ae   : > { %v4654_v9 = vsub.s32 4294967266, %v4649_v58  ;;  %v4650_v32 = vsub.s32 32, %v4649_v58  ;;  %v4801_v52 = vsub.s32 32, %v4800_v2  ;;  %v4803_v23 = vshll.u32 %v16071_v29, %v4800_v2 }
 0x5af   : > { %16211 = vst [vmem:[#allocation10_spill] sm:$0xff] %v12811_v19  ;;  %16212 = vst [vmem:[#allocation28_spill] sm:$0xff] %v12815_v35  ;;  %v12817_v62 = vshrl.u32 %v4951_v5, 30  ;;  %v4806_v20 = vshll.u32 %v16072_v25, %v4800_v2  ;;  %v4809_v17 = vshll.u32 %v16073_v40, %v4800_v2  ;;  %v4799_v50 = vshrl.u32 %v4798_v26, 5 }
 0x5b0   : > { %v4655_v33 = vadd.s32 127, %v4654_v9  ;;  %v4804_v63 = vshrl.u32 %v16072_v25, %v4801_v52  ;;  %v4807_v41 = vshrl.u32 %v16073_v40, %v4801_v52  ;;  %v4810_v21 = vshrl.u32 %v16074_v57, %v4801_v52 }
 0x5b1   : > { %16213 = vst [vmem:[#allocation3_spill] sm:$0xff] %v12817_v62  ;;  %v4953_v3 = vshll.u32 %v12817_v62, 30  ;;  %v4812_v8 = vshll.u32 %v16074_v57, %v4800_v2  ;;  %v4813_v22 = vshrl.u32 %v16075_v24, %v4801_v52  ;;  %v12828_v37 = vshll.u32 %v4794_v45, 8 }
 0x5b2   : > { %v4805_v48 = vor.u32 %v4804_v63, %v4803_v23  ;;  %v4808_v53 = vor.u32 %v4807_v41, %v4806_v20  ;;  %v4811_v5 = vor.u32 %v4810_v21, %v4809_v17  ;;  %v16214_v9 = vand.u32 2147483647, %v12518_v59 }
 0x5b3   : > { %v4651_v14 = vshll.u32 %v12761_v55, %v4649_v58  ;;  %v12837_v47 = vsub.s32 %v4950_v31, %v4953_v3  ;;  %v4814_v26 = vor.u32 %v4813_v22, %v4812_v8  ;;  %v15725_v10 = vand.u32 2147483647, %v12811_v19 }
 0x5b4   : > { %vm12832_vm15 = vcmp.le.f32.partialorder %v16214_v9, 0.7853982  ;;  %v4652_v11 = vshrl.u32 %v4634_v54, %v4650_v32  ;;  %v4656_v51 = vshll.u32 %v4655_v33, 23  ;;  %v4815_v23 = vshll.u32 %v16075_v24, %v4800_v2 }
 0x5b5   : > { %v4816_v45 = vshrl.u32 %v16076_v28, %v4801_v52  ;;  %v4956_v20 = vsub.s32 0, %v12837_v47  ;;  %vm4818_vm7 = vcmp.lt.s32.totalorder %v4799_v50, 1  ;;  %vm4820_vm14 = vcmp.lt.s32.totalorder %v4799_v50, 3 }
 0x5b6   : > { %vm4821_vm0 = vcmp.lt.s32.totalorder %v4799_v50, 4  ;;  %v4826_v55 = vsel %vm4818_vm7, %v4805_v48, %v4808_v53  ;;  %v4802_v41 = vshrl.u32 %v16071_v29, %v4801_v52  ;;  %vm4819_vm1 = vcmp.lt.s32.totalorder %v4799_v50, 2 }
 0x5b7   : > { %v4817_v17 = vor.u32 %v4816_v45, %v4815_v23  ;;  %v4823_v63 = vsel %vm4821_vm0, %v4811_v5, 2102212464  ;;  %v4827_v31 = vsel %vm4821_vm0, %v4814_v26, 920167782  ;;  %v8289_v58 = vmin.u32 %v4956_v20, %v12837_v47 }
 0x5b8   : > { %v4828_v54 = vsel %vm4820_vm14, %v4811_v5, %v4827_v31  ;;  %v12847_v2 = vpop.eup %9023  ;;  %v16217_v32 = vand.u32 2147483647, %v12549_v61  ;;  %v4657_v21 = vor.u32 4788187, %v4656_v51  ;;  %v4830_v8 = vsel %vm4818_vm7, %v4808_v53, %v4811_v5 }
 0x5b9   : > { %v4829_v3 = vsel %vm4819_vm1, %v4826_v55, %v4828_v54  ;;  %v4831_v22 = vsel %vm4821_vm0, %v4817_v17, 1326507024  ;;  %v4958_v9 = vclz %v8289_v58  ;;  %v4822_v52 = vsel %vm4818_vm7, %v4802_v41, %v4805_v48  ;;  %v8583_v58 = vpop.f32.mrf.mxu0 }
 0x5ba   : > { %vm12851_vm11 = vcmp.le.f32.partialorder %v16217_v32, 0.7853982  ;;  %v4824_v23 = vsel %vm4820_vm14, %v4808_v53, %v4823_v63  ;;  %v4832_v45 = vsel %vm4820_vm14, %v4814_v26, %v4831_v22  ;;  %v5101_v51 = vand.u32 2139095040, %v12811_v19 }
 0x5bb   : > { %v4833_v20 = vsel %vm4819_vm1, %v4830_v8, %v4832_v45  ;;  %v12862_v31 = vmul.u32.u64.low %v12828_v37, %v4829_v3  ;;  %v12863_v32 = vmul.u32.u64.high %v12828_v37, %v4829_v3, %v12862_v31  ;;  %v4653_v55 = vor.u32 %v4652_v11, %v4651_v14 }
 0x5bc   : > { %v8290_v54 = vadd.s32 4294967294, %v4958_v9  ;;  %v12868_v5 = vmul.u32.u64.low %v12828_v37, %v4833_v20  ;;  %v12869_v17 = vmul.u32.u64.high %v12828_v37, %v4833_v20, %v12868_v5  ;;  %9025 = vsinq.f32 %v12788_v39  ;;  %v4331_v20 = vpop.f32.mrf.mxu0 }
 0x5bd   : > { %v4458_v48 = vsel %vm12832_vm15, %v12518_v59, %v12806_v12  ;;  %vm15767_vm5 = vcmp.lt.s32.totalorder %v12549_v61, 0  ;;  %v5102_v53 = vshrl.u32 %v5101_v51, 23  ;;  %v16220_v26 = vxor.u32 2147483648, %v12798_v1 }
 0x5be   : > { %v4658_v14 = vand.u32 2147483647, %v4657_v21  ;;  %vm8291_vm9 = vcmp.lt.s32.totalorder %v8290_v54, 0  ;;  %v4825_v63 = vsel %vm4819_vm1, %v4822_v52, %v4824_v23  ;;  %v4844_v41 = vadd.s32 1, %v12863_v32 }
 0x5bf   : > { %v4767_v11 = vsel %vm15767_vm5, %v16220_v26, %v12798_v1  ;;  %v4961_v39 = vsel %vm8291_vm9, 0, %v8290_v54  ;;  %v8296_v3 = vadd.s32 4294967169, %v5102_v53  ;;  %v5105_v12 = vand.u32 8388607, %v15725_v10 }
 0x5c0   : > { %v16221_v8 = vsub.s32 4, %v12581_v60  ;;  %9027 = vcosq.f32 %v4458_v48  ;;  %v4660_v1 = vcvt.s32.f32 %v4653_v55  ;;  %v4997_v50 = vand.u32 2139095040, %v12815_v35 }
 0x5c1   : > { %9029 = vsinq.f32 %v4458_v48  ;;  %v4841_v21 = vmul.u32 %v12828_v37, %v4825_v63  ;;  %vm4843_vm10 = vc.u32 %v12869_v17, %v12862_v31  ;;  %v5108_v9 = vadd.s32 1, %v8296_v3 }
 0x5c2   : > { %v12891_v22 = vsel %vm4476_vm4, %v16221_v8, %v12581_v60  ;;  %v12900_v52 = vsel %vm12851_vm11, %v12549_v61, %v4767_v11  ;;  %v12902_v23 = vmul.f32 %v4660_v1, %v4658_v14  ;;  %v4962_v60 = vsub.s32 32, %v4961_v39 }
 0x5c3   : > { %v4845_v45 = vsel %vm4843_vm10, %v4844_v41, %v12863_v32  ;;  %v4966_v51 = vsub.s32 4294967266, %v4961_v39  ;;  %v5106_v54 = vor.u32 8388608, %v5105_v12  ;;  %vm5109_vm4 = vcmp.gt.s32.totalorder %v5108_v9, 0 }
 0x5c4   : > { %v4846_v55 = vadd.s32 %v4845_v45, %v4841_v21  ;;  %v4946_v37 = vadd.s32 %v12767_v36, %v12774_v7  ;;  %v5110_v5 = vsel %vm5109_vm4, %v5108_v9, 0  ;;  %v4998_v48 = vshrl.u32 %v4997_v50, 23 }
 0x5c5   : > { %v12908_v53 = vadd.f32 %v8583_v58, %v12510_v15  ;;  %9031 = vcosq.f32 %v12900_v52  ;;  %v5112_v11 = vand.u32 31, %v5110_v5  ;;  %v12912_v14 = vadd.f32 %v12510_v15, %v4331_v20 }
 0x5c6   : > { %v4847_v26 = vadd.s32 536870912, %v4846_v55  ;;  %v4662_v32 = vxor.u32 2147483648, %v12902_v23  ;;  %v4963_v63 = vshll.u32 %v12837_v47, %v4961_v39  ;;  %v4964_v41 = vshrl.u32 %v4946_v37, %v4962_v60 }
 0x5c7   : > { %16222 = vst [vmem:[#allocation15_spill] sm:$0xff] %v12908_v53  ;;  %16223 = vst [vmem:[#allocation27_spill] sm:$0xff] %v12912_v14  ;;  %v4967_v36 = vadd.s32 127, %v4966_v51  ;;  %v5113_v12 = vsub.s32 32, %v5112_v11  ;;  %v12919_v58 = vshll.u32 %v5106_v54, 8  ;;  %v5111_v8 = vshrl.u32 %v5110_v5, 5 }
 0x5c8   : > { %v12917_v7 = vshrl.u32 %v4847_v26, 30  ;;  %v5115_v1 = vshll.u32 %v16071_v29, %v5112_v11  ;;  %v5118_v50 = vshll.u32 %v16072_v25, %v5112_v11  ;;  %v8292_v15 = vadd.s32 4294967169, %v4998_v48 }
 0x5c9   : > { %v5116_v9 = vshrl.u32 %v16072_v25, %v5113_v12  ;;  %v5119_v47 = vshrl.u32 %v16073_v40, %v5113_v12  ;;  %v5121_v39 = vshll.u32 %v16073_v40, %v5112_v11  ;;  %v12927_v60 = vpop.eup %9025  ;;  %vm15768_vm6 = vcmp.lt.s32.totalorder %v12600_v13, 0 }
 0x5ca   : > { %16224 = vst [vmem:[#allocation5_spill] sm:$0xff] %v12917_v7  ;;  %v4849_v21 = vshll.u32 %v12917_v7, 30  ;;  %v5122_v45 = vshrl.u32 %v16074_v57, %v5113_v12  ;;  %v5124_v20 = vshll.u32 %v16074_v57, %v5112_v11  ;;  %v5125_v51 = vshrl.u32 %v16075_v24, %v5113_v12 }
 0x5cb   : > { %v5128_v54 = vshrl.u32 %v16076_v28, %v5113_v12  ;;  %v5117_v5 = vor.u32 %v5116_v9, %v5115_v1  ;;  %v5120_v48 = vor.u32 %v5119_v47, %v5118_v50  ;;  %v5127_v26 = vshll.u32 %v16075_v24, %v5112_v11 }
 0x5cc   : > { %v12934_v37 = vsub.s32 %v4846_v55, %v4849_v21  ;;  %v4968_v10 = vshll.u32 %v4967_v36, 23  ;;  %v5123_v3 = vor.u32 %v5122_v45, %v5121_v39  ;;  %v5126_v46 = vor.u32 %v5125_v51, %v5124_v20 }
 0x5cd   : > { %v16225_v16 = vand.u32 2147483647, %v12815_v35  ;;  %v12939_v6 = vpop.eup %9027  ;;  %vm12943_vm13 = vcmp.le.f32.partialorder %v16226_v27, 0.7853982  ;;  %v4965_v55 = vor.u32 %v4964_v41, %v4963_v63  ;;  %v5129_v50 = vor.u32 %v5128_v54, %v5127_v26 }
 0x5ce   : > { %v4852_v1 = vsub.s32 0, %v12934_v37  ;;  %vm5130_vm8 = vcmp.lt.s32.totalorder %v5111_v8, 1  ;;  %v12948_v11 = vpop.eup %9029  ;;  %v5114_v36 = vshrl.u32 %v16071_v29, %v5113_v12  ;;  %vm5133_vm2 = vcmp.lt.s32.totalorder %v5111_v8, 4 }
 0x5cf   : > { %v5001_v30 = vand.u32 8388607, %v16225_v16  ;;  %v5138_v21 = vsel %vm5130_vm8, %v5117_v5, %v5120_v48  ;;  %v5004_v16 = vadd.s32 1, %v8292_v15  ;;  %vm5132_vm7 = vcmp.lt.s32.totalorder %v5111_v8, 3 }
 0x5d0   : > { %v8285_v9 = vmin.u32 %v4852_v1, %v12934_v37  ;;  %v5135_v47 = vsel %vm5133_vm2, %v5123_v3, 2102212464  ;;  %v5139_v27 = vsel %vm5133_vm2, %v5126_v46, 920167782  ;;  %v4969_v39 = vor.u32 4788187, %v4968_v10 }
 0x5d1   : > { %vm5131_vm14 = vcmp.lt.s32.totalorder %v5111_v8, 2  ;;  %v5140_v45 = vsel %vm5132_vm7, %v5123_v3, %v5139_v27  ;;  %v5142_v63 = vsel %vm5130_vm8, %v5120_v48, %v5123_v3  ;;  %v5134_v20 = vsel %vm5130_vm8, %v5114_v36, %v5117_v5 }
 0x5d2   : > { %v4854_v41 = vclz %v8285_v9  ;;  %v5141_v51 = vsel %vm5131_vm14, %v5138_v21, %v5140_v45  ;;  %v5143_v54 = vsel %vm5133_vm2, %v5129_v50, 1326507024  ;;  %v12953_v26 = vpop.eup %9031  ;;  %v5136_v12 = vsel %vm5132_vm7, %v5120_v48, %v5135_v47 }
 0x5d3   : > { %16229 = vst [vmem:[#allocation4_spill] sm:$0xff] %v12953_v26  ;;  %v5144_v0 = vsel %vm5132_vm7, %v5126_v46, %v5143_v54  ;;  %v12956_v15 = vmul.u32.u64.low %v12919_v58, %v5141_v51  ;;  %v12957_v62 = vmul.u32.u64.high %v12919_v58, %v5141_v51, %v12956_v15  ;;  %v4663_v10 = vsel %vm15768_vm6, %v4662_v32, %v12902_v23 }
 0x5d4   : > { %v8286_v1 = vadd.s32 4294967294, %v4854_v41  ;;  %v5145_v3 = vsel %vm5131_vm14, %v5142_v63, %v5144_v0  ;;  %vm5005_vm0 = vcmp.gt.s32.totalorder %v5004_v16, 0  ;;  %v4970_v5 = vand.u32 2147483647, %v4969_v39 }
 0x5d5   : > { %v12965_v50 = vmul.u32.u64.low %v12919_v58, %v5145_v3  ;;  %v12966_v36 = vmul.u32.u64.high %v12919_v58, %v5145_v3, %v12965_v50  ;;  %v5006_v48 = vsel %vm5005_vm0, %v5004_v16, 0  ;;  %v5137_v46 = vsel %vm5131_vm14, %v5134_v20, %v5136_v12 }
 0x5d6   : > { %vm8287_vm1 = vcmp.lt.s32.totalorder %v8286_v1, 0  ;;  %v5002_v21 = vor.u32 8388608, %v5001_v30  ;;  %v5008_v9 = vand.u32 31, %v5006_v48  ;;  %v12972_v47 = vsel %vm12943_vm13, %v12600_v13, %v4663_v10 }
 0x5d7   : > { %v4972_v23 = vcvt.s32.f32 %v4965_v55  ;;  %v4857_v32 = vsel %vm8287_vm1, 0, %v8286_v1  ;;  %v5156_v0 = vadd.s32 1, %v12957_v62  ;;  %v4842_v27 = vadd.s32 %v12862_v31, %v12869_v17 }
 0x5d8   : > { %v4858_v39 = vsub.s32 32, %v4857_v32  ;;  %v4862_v45 = vsub.s32 4294967266, %v4857_v32  ;;  %v5009_v16 = vsub.s32 32, %v5008_v9  ;;  %v5153_v30 = vmul.u32 %v12919_v58, %v5137_v46 }
 0x5d9   : > { %v12977_v63 = vmul.f32 %v4972_v23, %v4970_v5  ;;  %vm5155_vm9 = vc.u32 %v12966_v36, %v12956_v15  ;;  %v5007_v20 = vshrl.u32 %v5006_v48, 5  ;;  %v12984_v51 = vshll.u32 %v5002_v21, 8 }
 0x5da   : > { %v4863_v41 = vadd.s32 127, %v4862_v45  ;;  %v5157_v55 = vsel %vm5155_vm9, %v5156_v0, %v12957_v62  ;;  %v5011_v31 = vshll.u32 %v16071_v29, %v5008_v9  ;;  %v5012_v17 = vshrl.u32 %v16072_v25, %v5009_v16 }
 0x5db   : > { %v5158_v54 = vadd.s32 %v5157_v55, %v5153_v30  ;;  %v5015_v12 = vshrl.u32 %v16073_v40, %v5009_v16  ;;  %v4860_v10 = vshrl.u32 %v4842_v27, %v4858_v39  ;;  %v5014_v58 = vshll.u32 %v16072_v25, %v5008_v9 }
 0x5dc   : > { %v5017_v1 = vshll.u32 %v16073_v40, %v5008_v9  ;;  %v5018_v3 = vshrl.u32 %v16074_v57, %v5009_v16  ;;  %v4859_v5 = vshll.u32 %v12934_v37, %v4857_v32  ;;  %v5020_v50 = vshll.u32 %v16074_v57, %v5008_v9 }
 0x5dd   : > { %v5159_v62 = vadd.s32 536870912, %v5158_v54  ;;  %v5021_v48 = vshrl.u32 %v16075_v24, %v5009_v16  ;;  %v4864_v46 = vshll.u32 %v4863_v41, 23  ;;  %v5013_v21 = vor.u32 %v5012_v17, %v5011_v31 }
 0x5de   : > { %v5016_v23 = vor.u32 %v5015_v12, %v5014_v58  ;;  %v5019_v0 = vor.u32 %v5018_v3, %v5017_v1  ;;  %v5023_v39 = vshll.u32 %v16075_v24, %v5008_v9  ;;  %v5024_v30 = vshrl.u32 %v16076_v28, %v5009_v16 }
 0x5df   : > { %v12995_v45 = vshrl.u32 %v5159_v62, 30  ;;  %v5022_v27 = vor.u32 %v5021_v48, %v5020_v50  ;;  %v4861_v55 = vor.u32 %v4860_v10, %v4859_v5  ;;  %v5010_v8 = vshrl.u32 %v16071_v29, %v5009_v16 }
 0x5e0   : > { %vm5029_vm10 = vcmp.lt.s32.totalorder %v5007_v20, 4  ;;  %v5309_v37 = vand.u32 2139095040, %v12908_v53  ;;  %v5025_v26 = vor.u32 %v5024_v30, %v5023_v39  ;;  %vm5026_vm4 = vcmp.lt.s32.totalorder %v5007_v20, 1 }
 0x5e1   : > { %16230 = vst [vmem:[#allocation23_spill] sm:$0xff] %v12995_v45  ;;  %v5161_v32 = vshll.u32 %v12995_v45, 30  ;;  %v5031_v41 = vsel %vm5029_vm10, %v5019_v0, 2102212464  ;;  %v4865_v31 = vor.u32 4788187, %v4864_v46  ;;  %v5034_v17 = vsel %vm5026_vm4, %v5013_v21, %v5016_v23 }
 0x5e2   : > { %vm5028_vm8 = vcmp.lt.s32.totalorder %v5007_v20, 3  ;;  %v5035_v12 = vsel %vm5029_vm10, %v5022_v27, 920167782  ;;  %vm5027_vm2 = vcmp.lt.s32.totalorder %v5007_v20, 2  ;;  %v5038_v58 = vsel %vm5026_vm4, %v5016_v23, %v5019_v0 }
 0x5e3   : > { %v13004_v9 = vsub.s32 %v5158_v54, %v5161_v32  ;;  %v5036_v10 = vsel %vm5028_vm8, %v5019_v0, %v5035_v12  ;;  %v5030_v16 = vsel %vm5026_vm4, %v5010_v8, %v5013_v21  ;;  %v5032_v1 = vsel %vm5028_vm8, %v5016_v23, %v5031_v41 }
 0x5e4   : > { %v5037_v3 = vsel %vm5027_vm2, %v5034_v17, %v5036_v10  ;;  %v5039_v5 = vsel %vm5029_vm10, %v5025_v26, 1326507024  ;;  %v4866_v39 = vand.u32 2147483647, %v4865_v31  ;;  %v5310_v30 = vshrl.u32 %v5309_v37, 23 }
 0x5e5   : > { %v5164_v62 = vsub.s32 0, %v13004_v9  ;;  %v5040_v50 = vsel %vm5028_vm8, %v5022_v27, %v5039_v5  ;;  %v13010_v48 = vmul.u32.u64.low %v12984_v51, %v5037_v3  ;;  %v13011_v46 = vmul.u32.u64.high %v12984_v51, %v5037_v3, %v13010_v48 }
 0x5e6   : > { %v5041_v54 = vsel %vm5027_vm2, %v5038_v58, %v5040_v50  ;;  %v16231_v0 = vand.u32 2147483647, %v12908_v53  ;;  %9033 = vsinq.f32 %v12900_v52  ;;  %v4974_v27 = vxor.u32 2147483648, %v12977_v63 }
 0x5e7   : > { %v8297_v21 = vmin.u32 %v5164_v62, %v13004_v9  ;;  %v13020_v26 = vmul.u32.u64.low %v12984_v51, %v5041_v54  ;;  %v13021_v23 = vmul.u32.u64.high %v12984_v51, %v5041_v54, %v13020_v26  ;;  %v4868_v32 = vcvt.s32.f32 %v4861_v55 }
 0x5e8   : > { %v5313_v8 = vand.u32 8388607, %v16231_v0  ;;  %v5033_v41 = vsel %vm5027_vm2, %v5030_v16, %v5032_v1  ;;  %v8304_v31 = vadd.s32 4294967169, %v5310_v30  ;;  %9035 = vcosq.f32 %v12972_v47 }
 0x5e9   : > { %vm15745_vm7 = vcmp.lt.s32.totalorder %v12612_v38, 0  ;;  %v5166_v37 = vclz %v8297_v21  ;;  %v5052_v17 = vadd.s32 1, %v13011_v46  ;;  %9037 = vsinq.f32 %v12972_v47 }
 0x5ea   : > { %v13029_v52 = vmul.f32 %v4868_v32, %v4866_v39  ;;  %v5314_v12 = vor.u32 8388608, %v5313_v8  ;;  %v5316_v10 = vadd.s32 1, %v8304_v31  ;;  %v5049_v3 = vmul.u32 %v12984_v51, %v5033_v41 }
 0x5eb   : > { %v8298_v58 = vadd.s32 4294967294, %v5166_v37  ;;  %vm5051_vm14 = vc.u32 %v13021_v23, %v13010_v48  ;;  %v15736_v20 = vand.u32 2147483647, %v12912_v14  ;;  %v13038_v55 = vsel %vm15745_vm7, %v4974_v27, %v12977_v63 }
 0x5ec   : > { %v5053_v16 = vsel %vm5051_vm14, %v5052_v17, %v13011_v46  ;;  %vm5317_vm0 = vcmp.gt.s32.totalorder %v5316_v10, 0  ;;  %v5205_v47 = vand.u32 2139095040, %v12912_v14  ;;  %v5154_v1 = vadd.s32 %v12956_v15, %v12966_v36 }
 0x5ed   : > { %vm8299_vm1 = vcmp.lt.s32.totalorder %v8298_v58, 0  ;;  %v5054_v51 = vadd.s32 %v5053_v16, %v5049_v3  ;;  %v5318_v5 = vsel %vm5317_vm0, %v5316_v10, 0  ;;  %v13045_v54 = vshll.u32 %v5314_v12, 8 }
 0x5ee   : > { %v5169_v50 = vsel %vm8299_vm1, 0, %v8298_v58  ;;  %v5320_v39 = vand.u32 31, %v5318_v5  ;;  %v13049_v46 = vand.u32 8388607, %v15736_v20  ;;  %v13051_v8 = vshrl.u32 %v5318_v5, 5 }
 0x5ef   : > { %v5170_v30 = vsub.s32 32, %v5169_v50  ;;  %v5174_v63 = vsub.s32 4294967266, %v5169_v50  ;;  %v5055_v0 = vadd.s32 536870912, %v5054_v51  ;;  %v5206_v36 = vshrl.u32 %v5205_v47, 23 }
 0x5f0   : > { %v5321_v21 = vsub.s32 32, %v5320_v39  ;;  %v5323_v15 = vshll.u32 %v16071_v29, %v5320_v39  ;;  %v5326_v32 = vshll.u32 %v16072_v25, %v5320_v39  ;;  %v5329_v41 = vshll.u32 %v16073_v40, %v5320_v39 }
 0x5f1   : > { %v5175_v26 = vadd.s32 127, %v5174_v63  ;;  %v13054_v27 = vshrl.u32 %v5055_v0, 30  ;;  %v5172_v31 = vshrl.u32 %v5154_v1, %v5170_v30  ;;  %v5332_v3 = vshll.u32 %v16074_v57, %v5320_v39 }
 0x5f2   : > { %v5324_v37 = vshrl.u32 %v16072_v25, %v5321_v21  ;;  %v5327_v17 = vshrl.u32 %v16073_v40, %v5321_v21  ;;  %v5330_v12 = vshrl.u32 %v16074_v57, %v5321_v21  ;;  %v5333_v16 = vshrl.u32 %v16075_v24, %v5321_v21 }
 0x5f3   : > { %16232 = vst [vmem:[#allocation16_spill] sm:$0xff] %v13054_v27  ;;  %v5176_v10 = vshll.u32 %v5175_v26, 23  ;;  %v5057_v58 = vshll.u32 %v13054_v27, 30  ;;  %v13064_v47 = vpop.eup %9033  ;;  %v5171_v5 = vshll.u32 %v13004_v9, %v5169_v50  ;;  %v16234_v30 = vand.u32 2147483647, %v12612_v38 }
 0x5f4   : > { %16233 = vst [vmem:[#allocation7_spill] sm:$0xff] %v13064_v47  ;;  %v5325_v63 = vor.u32 %v5324_v37, %v5323_v15  ;;  %v5328_v0 = vor.u32 %v5327_v17, %v5326_v32  ;;  %v5331_v1 = vor.u32 %v5330_v12, %v5329_v41  ;;  %v16235_v20 = vmov 0 }
 0x5f5   : > { %vm13069_vm9 = vcmp.le.f32.partialorder %v16234_v30, 0.7853982  ;;  %v5177_v26 = vor.u32 4788187, %v5176_v10  ;;  %v13073_v62 = vsub.s32 %v5054_v51, %v5057_v58  ;;  %v5334_v45 = vor.u32 %v5333_v16, %v5332_v3  ;;  %v13075_v7 = vpop.eup %9035 }
 0x5f6   : > { %v16236_v20 = vsel %vm13069_vm9, 4294967295, %v16235_v20  ;;  %v8300_v27 = vadd.s32 4294967169, %v5206_v36  ;;  %vm15746_vm10 = vcmp.lt.s32.totalorder %v12727_v18, 0  ;;  %v5173_v47 = vor.u32 %v5172_v31, %v5171_v5  ;;  %v13081_v32 = vpop.eup %9037 }
 0x5f7   : > { %16237 = vst [vmem:[#allocation20_spill] sm:$0xff] %v16236_v20  ;;  %v5322_v9 = vshrl.u32 %v16071_v29, %v5321_v21  ;;  %v5335_v50 = vshll.u32 %v16075_v24, %v5320_v39  ;;  %v5336_v15 = vshrl.u32 %v16076_v28, %v5321_v21  ;;  %v5060_v41 = vsub.s32 0, %v13073_v62 }
 0x5f8   : > { %vm5338_vm4 = vcmp.lt.s32.totalorder %v13051_v8, 1  ;;  %vm5340_vm8 = vcmp.lt.s32.totalorder %v13051_v8, 3  ;;  %vm5341_vm2 = vcmp.lt.s32.totalorder %v13051_v8, 4  ;;  %v5178_v17 = vand.u32 2147483647, %v5177_v26 }
 0x5f9   : > { %v5337_v51 = vor.u32 %v5336_v15, %v5335_v50  ;;  %v5343_v36 = vsel %vm5341_vm2, %v5331_v1, 2102212464  ;;  %v5346_v31 = vsel %vm5338_vm4, %v5325_v63, %v5328_v0  ;;  %v5347_v37 = vsel %vm5341_vm2, %v5334_v45, 920167782 }
 0x5fa   : > { %v8293_v39 = vmin.u32 %v5060_v41, %v13073_v62  ;;  %vm5339_vm14 = vcmp.lt.s32.totalorder %v13051_v8, 2  ;;  %v5348_v21 = vsel %vm5340_vm8, %v5331_v1, %v5347_v37  ;;  %v5180_v12 = vcvt.s32.f32 %v5173_v47 }
 0x5fb   : > { %v5349_v10 = vsel %vm5339_vm14, %v5346_v31, %v5348_v21  ;;  %v5350_v58 = vsel %vm5338_vm4, %v5328_v0, %v5331_v1  ;;  %v5351_v3 = vsel %vm5341_vm2, %v5337_v51, 1326507024  ;;  %v5342_v5 = vsel %vm5338_vm4, %v5322_v9, %v5325_v63 }
 0x5fc   : > { %v5062_v16 = vclz %v8293_v39  ;;  %v5344_v30 = vsel %vm5340_vm8, %v5328_v0, %v5343_v36  ;;  %v5352_v26 = vsel %vm5340_vm8, %v5334_v45, %v5351_v3  ;;  %v5212_v1 = vadd.s32 1, %v8300_v27  ;;  %v8586_v0 = vpop.f32.mrf.mxu0 }
 0x5fd   : > { %v5353_v47 = vsel %vm5339_vm14, %v5350_v58, %v5352_v26  ;;  %v13106_v50 = vmul.u32.u64.low %v13045_v54, %v5349_v10  ;;  %v13107_v15 = vmul.u32.u64.high %v13045_v54, %v5349_v10, %v13106_v50  ;;  %v13110_v41 = vmul.f32 %v5180_v12, %v5178_v17 }
 0x5fe   : > { %v8294_v51 = vadd.s32 4294967294, %v5062_v16  ;;  %v13113_v63 = vmul.u32.u64.low %v13045_v54, %v5353_v47  ;;  %v13114_v9 = vmul.u32.u64.high %v13045_v54, %v5353_v47, %v13113_v63  ;;  %v13120_v45 = vsel %vm13069_vm9, %v12612_v38, %v13038_v55 }
 0x5ff   : > { %v5345_v36 = vsel %vm5339_vm14, %v5342_v5, %v5344_v30  ;;  %v5210_v31 = vor.u32 8388608, %v13049_v46  ;;  %vm5213_vm0 = vcmp.gt.s32.totalorder %v5212_v1, 0  ;;  %v16238_v27 = vxor.u32 2147483648, %v13029_v52  ;;  %v13140_v46 = vld [vmem:[%s15563_s6] ss:$0 sm:$0xff] }
 0x600   : > { %v5050_v17 = vadd.s32 %v13010_v48, %v13021_v23  ;;  %vm8295_vm1 = vcmp.lt.s32.totalorder %v8294_v51, 0  ;;  %v5214_v39 = vsel %vm5213_vm0, %v5212_v1, 0  ;;  %v5364_v21 = vadd.s32 1, %v13107_v15 }
 0x601   : > { %v13130_v37 = vsel %vm15746_vm10, %v16238_v27, %v13029_v52  ;;  %v5065_v55 = vsel %vm8295_vm1, 0, %v8294_v51  ;;  %v13135_v8 = vshrl.u32 %v5214_v39, 5  ;;  %v13143_v12 = vadd.f32 %v13140_v46, %v8586_v0 }
 0x602   : > { %v5066_v10 = vsub.s32 32, %v5065_v55  ;;  %v5070_v58 = vsub.s32 4294967266, %v5065_v55  ;;  %v5361_v48 = vmul.u32 %v13045_v54, %v5345_v36  ;;  %v5067_v23 = vshll.u32 %v13073_v62, %v5065_v55 }
 0x603   : > { %16239 = vst [vmem:[#allocation19_spill] sm:$0xff] %v13143_v12  ;;  %vm5363_vm4 = vc.u32 %v13114_v9, %v13106_v50  ;;  %v5216_v3 = vand.u32 31, %v5214_v39  ;;  %v13150_v16 = vshll.u32 %v5210_v31, 8  ;;  %vm5234_vm8 = vcmp.lt.s32.totalorder %v13135_v8, 1 }
 0x604   : > { %v5068_v5 = vshrl.u32 %v5050_v17, %v5066_v10  ;;  %v5071_v30 = vadd.s32 127, %v5070_v58  ;;  %v5365_v26 = vsel %vm5363_vm4, %v5364_v21, %v13107_v15  ;;  %vm5235_vm2 = vcmp.lt.s32.totalorder %v13135_v8, 2 }
 0x605   : > { %v5366_v47 = vadd.s32 %v5365_v26, %v5361_v48  ;;  %v5217_v1 = vsub.s32 32, %v5216_v3  ;;  %vm5236_vm14 = vcmp.lt.s32.totalorder %v13135_v8, 3  ;;  %v5219_v51 = vshll.u32 %v16071_v29, %v5216_v3 }
 0x606   : > { %v5069_v54 = vor.u32 %v5068_v5, %v5067_v23  ;;  %v5072_v62 = vshll.u32 %v5071_v30, 23  ;;  %v5222_v63 = vshll.u32 %v16072_v25, %v5216_v3  ;;  %v5225_v15 = vshll.u32 %v16073_v40, %v5216_v3 }
 0x607   : > { %v5367_v0 = vadd.s32 536870912, %v5366_v47  ;;  %v5220_v36 = vshrl.u32 %v16072_v25, %v5217_v1  ;;  %v5223_v31 = vshrl.u32 %v16073_v40, %v5217_v1  ;;  %v16240_v27 = vand.u32 2147483647, %v12727_v18 }
 0x608   : > { %v16241_v17 = vmov 0  ;;  %v5073_v39 = vor.u32 4788187, %v5072_v62  ;;  %v5226_v55 = vshrl.u32 %v16074_v57, %v5217_v1  ;;  %v5228_v21 = vshll.u32 %v16074_v57, %v5216_v3 }
 0x609   : > { %vm13163_vm0 = vcmp.le.f32.partialorder %v16240_v27, 0.7853982  ;;  %v5229_v10 = vshrl.u32 %v16075_v24, %v5217_v1  ;;  %v13170_v58 = vshrl.u32 %v5367_v0, 30  ;;  %v5221_v48 = vor.u32 %v5220_v36, %v5219_v51 }
 0x60a   : > { %v16242_v17 = vsel %vm13163_vm0, 4294967295, %v16241_v17  ;;  %v5224_v23 = vor.u32 %v5223_v31, %v5222_v63  ;;  %v5231_v5 = vshll.u32 %v16075_v24, %v5216_v3  ;;  %vm15765_vm1 = vcmp.lt.s32.totalorder %v12811_v19, 0 }
 0x60b   : > { %16243 = vst [vmem:[#allocation29_spill] sm:$0xff] %v16242_v17  ;;  %16244 = vst [vmem:[#allocation14_spill] sm:$0xff] %v13170_v58  ;;  %v5074_v30 = vand.u32 2147483647, %v5073_v39  ;;  %v5227_v26 = vor.u32 %v5226_v55, %v5225_v15  ;;  %v5230_v27 = vor.u32 %v5229_v10, %v5228_v21  ;;  %v5232_v52 = vshrl.u32 %v16076_v28, %v5217_v1 }
 0x60c   : > { %v5369_v62 = vshll.u32 %v13170_v58, 30  ;;  %v5218_v20 = vshrl.u32 %v16071_v29, %v5217_v1  ;;  %vm5237_vm4 = vcmp.lt.s32.totalorder %v13135_v8, 4  ;;  %v5242_v0 = vsel %vm5234_vm8, %v5221_v48, %v5224_v23 }
 0x60d   : > { %v5076_v51 = vcvt.s32.f32 %v5069_v54  ;;  %v5233_v63 = vor.u32 %v5232_v52, %v5231_v5  ;;  %v5239_v36 = vsel %vm5237_vm4, %v5227_v26, 2102212464  ;;  %v5243_v3 = vsel %vm5237_vm4, %v5230_v27, 920167782 }
 0x60e   : > { %v16245_v31 = vand.u32 2147483647, %v12811_v19  ;;  %v16246_v15 = vmov 0  ;;  %v13186_v39 = vsub.s32 %v5366_v47, %v5369_v62  ;;  %v5238_v1 = vsel %vm5234_vm8, %v5218_v20, %v5221_v48 }
 0x60f   : > { %v5244_v55 = vsel %vm5236_vm14, %v5227_v26, %v5243_v3  ;;  %v5246_v54 = vsel %vm5234_vm8, %v5224_v23, %v5227_v26  ;;  %vm15766_vm10 = vcmp.lt.s32.totalorder %v12815_v35, 0  ;;  %v5077_v52 = vmul.f32 %v5076_v51, %v5074_v30  ;;  %v4341_v26 = vpop.f32.mrf.mxu0 }
 0x610   : > { %vm13182_vm7 = vcmp.le.f32.partialorder %v16245_v31, 0.7853982  ;;  %v5240_v21 = vsel %vm5236_vm14, %v5224_v23, %v5239_v36  ;;  %v5245_v10 = vsel %vm5235_vm2, %v5242_v0, %v5244_v55  ;;  %v5247_v47 = vsel %vm5237_vm4, %v5233_v63, 1326507024 }
 0x611   : > { %v16247_v15 = vsel %vm13182_vm7, 4294967295, %v16246_v15  ;;  %v5372_v5 = vsub.s32 0, %v13186_v39  ;;  %v5248_v20 = vsel %vm5236_vm14, %v5230_v27, %v5247_v47  ;;  %9039 = vcosq.f32 %v13120_v45 }
 0x612   : > { %16248 = vst [vmem:[#allocation8_spill] sm:$0xff] %v16247_v15  ;;  %v13203_v48 = vmul.u32.u64.low %v13150_v16, %v5245_v10  ;;  %v13204_v62 = vmul.u32.u64.high %v13150_v16, %v5245_v10, %v13203_v48  ;;  %v5249_v30 = vsel %vm5235_vm2, %v5246_v54, %v5248_v20  ;;  %v15747_v23 = vand.u32 2147483647, %v13143_v12 }
 0x613   : > { %v5517_v0 = vand.u32 2139095040, %v13143_v12  ;;  %v4874_v51 = vsel %vm13163_vm0, %v12727_v18, %v13130_v37  ;;  %v8305_v27 = vmin.u32 %v5372_v5, %v13186_v39  ;;  %9041 = vsinq.f32 %v13120_v45 }
 0x614   : > { %v13217_v63 = vmul.u32.u64.low %v13150_v16, %v5249_v30  ;;  %v13218_v36 = vmul.u32.u64.high %v13150_v16, %v5249_v30, %v13217_v63  ;;  %v5241_v3 = vsel %vm5235_vm2, %v5238_v1, %v5240_v21  ;;  %v13224_v55 = vadd.f32 %v13140_v46, %v4341_v26 }
 0x615   : > { %v5518_v31 = vshrl.u32 %v5517_v0, 23  ;;  %v16250_v54 = vxor.u32 2147483648, %v13110_v41  ;;  %v5078_v10 = vxor.u32 2147483648, %v5077_v52  ;;  %v5374_v47 = vclz %v8305_v27 }
 0x616   : > { %16249 = vst [vmem:[#allocation17_spill] sm:$0xff] %v13224_v55  ;;  %v5260_v5 = vadd.s32 1, %v13204_v62  ;;  %9043 = vcosq.f32 %v4874_v51  ;;  %v16251_v45 = vand.u32 2147483647, %v12815_v35  ;;  %v16252_v8 = vmov 0 }
 0x617   : > { %v5183_v37 = vsel %vm15765_vm1, %v16250_v54, %v13110_v41  ;;  %v8312_v1 = vadd.s32 4294967169, %v5518_v31  ;;  %v5521_v21 = vand.u32 8388607, %v15747_v23  ;;  %v8306_v20 = vadd.s32 4294967294, %v5374_v47  ;;  %v8589_v47 = vpop.f32.mrf.mxu0 }
 0x618   : > { %vm13234_vm8 = vcmp.le.f32.partialorder %v16251_v45, 0.7853982  ;;  %v5257_v26 = vmul.u32 %v13150_v16, %v5241_v3  ;;  %vm5259_vm2 = vc.u32 %v13218_v36, %v13203_v48  ;;  %v5413_v41 = vand.u32 2139095040, %v13224_v55 }
 0x619   : > { %v16253_v8 = vsel %vm13234_vm8, 4294967295, %v16252_v8  ;;  %9045 = vsinq.f32 %v4874_v51  ;;  %v13246_v30 = vsel %vm13182_vm7, %v12811_v19, %v5183_v37  ;;  %v5261_v0 = vsel %vm5259_vm2, %v5260_v5, %v13204_v62 }
 0x61a   : > { %16254 = vst [vmem:[#allocation11_spill] sm:$0xff] %v16253_v8  ;;  %v5524_v27 = vadd.s32 1, %v8312_v1  ;;  %v5079_v63 = vsel %vm15766_vm10, %v5078_v10, %v5077_v52  ;;  %v5362_v31 = vadd.s32 %v13106_v50, %v13114_v9  ;;  %vm8307_vm14 = vcmp.lt.s32.totalorder %v8306_v20, 0 }
 0x61b   : > { %v5262_v16 = vadd.s32 %v5261_v0, %v5257_v26  ;;  %v5377_v3 = vsel %vm8307_vm14, 0, %v8306_v20  ;;  %v5522_v54 = vor.u32 8388608, %v5521_v21  ;;  %v15750_v51 = vand.u32 2147483647, %v13224_v55 }
 0x61c   : > { %vm5525_vm4 = vcmp.gt.s32.totalorder %v5524_v27, 0  ;;  %v5378_v45 = vsub.s32 32, %v5377_v3  ;;  %v5382_v37 = vsub.s32 4294967266, %v5377_v3  ;;  %v5414_v58 = vshrl.u32 %v5413_v41, 23 }
 0x61d   : > { %v5263_v23 = vadd.s32 536870912, %v5262_v16  ;;  %9047 = vcosq.f32 %v13246_v30  ;;  %v13261_v50 = vsel %vm13234_vm8, %v12815_v35, %v5079_v63  ;;  %v5526_v9 = vsel %vm5525_vm4, %v5524_v27, 0 }
 0x61e   : > { %v5380_v52 = vshrl.u32 %v5362_v31, %v5378_v45  ;;  %v5383_v10 = vadd.s32 127, %v5382_v37  ;;  %v13266_v1 = vadd.f32 %v13140_v46, %v8589_v47  ;;  %v5379_v21 = vshll.u32 %v13186_v39, %v5377_v3  ;;  %v13274_v0 = vpop.eup %9039 }
 0x61f   : > { %v13263_v5 = vshrl.u32 %v5263_v23, 30  ;;  %v13270_v20 = vadd.s32 %v13203_v48, %v13218_v36  ;;  %v5528_v26 = vand.u32 31, %v5526_v9  ;;  %v13272_v41 = vshll.u32 %v5522_v54, 8  ;;  %16256 = vst [vmem:[#allocation34_spill] sm:$0xff] %v13274_v0 }
 0x620   : > { %v5384_v63 = vshll.u32 %v5383_v10, 23  ;;  %v8308_v31 = vadd.s32 4294967169, %v5414_v58  ;;  %v13279_v23 = vand.u32 8388607, %v15750_v51  ;;  %v5381_v47 = vor.u32 %v5380_v52, %v5379_v21  ;;  %v13282_v48 = vpop.eup %9041 }
 0x621   : > { %16255 = vst [vmem:[#allocation25_spill] sm:$0xff] %v13263_v5  ;;  %v5265_v27 = vshll.u32 %v13263_v5, 30  ;;  %v5527_v45 = vshrl.u32 %v5526_v9, 5  ;;  %v5529_v37 = vsub.s32 32, %v5528_v26  ;;  %v5531_v39 = vshll.u32 %v16071_v29, %v5528_v26  ;;  %16257 = vst [vmem:[#allocation38_spill] sm:$0xff] %v13282_v48 }
 0x622   : > { %v5385_v36 = vor.u32 4788187, %v5384_v63  ;;  %v5534_v54 = vshll.u32 %v16072_v25, %v5528_v26  ;;  %v5537_v10 = vshll.u32 %v16073_v40, %v5528_v26  ;;  %v5540_v9 = vshll.u32 %v16074_v57, %v5528_v26 }
 0x623   : > { %v13284_v3 = vsub.s32 %v5262_v16, %v5265_v27  ;;  %v5532_v58 = vshrl.u32 %v16072_v25, %v5529_v37  ;;  %v5535_v62 = vshrl.u32 %v16073_v40, %v5529_v37  ;;  %v5538_v51 = vshrl.u32 %v16074_v57, %v5529_v37  ;;  %v13292_v52 = vpop.eup %9043 }
 0x624   : > { %16258 = vst [vmem:[#allocation18_spill] sm:$0xff] %v13292_v52  ;;  %v5386_v21 = vand.u32 2147483647, %v5385_v36  ;;  %v5541_v16 = vshrl.u32 %v16075_v24, %v5529_v37  ;;  %v5543_v63 = vshll.u32 %v16075_v24, %v5528_v26  ;;  %v5544_v8 = vshrl.u32 %v16076_v28, %v5529_v37 }
 0x625   : > { %v5268_v5 = vsub.s32 0, %v13284_v3  ;;  %v5533_v27 = vor.u32 %v5532_v58, %v5531_v39  ;;  %v5536_v15 = vor.u32 %v5535_v62, %v5534_v54  ;;  %v5539_v19 = vor.u32 %v5538_v51, %v5537_v10 }
 0x626   : > { %v13298_v35 = vpop.eup %9045  ;;  %v5388_v0 = vcvt.s32.f32 %v5381_v47  ;;  %v5542_v38 = vor.u32 %v5541_v16, %v5540_v9  ;;  %v5420_v17 = vadd.s32 1, %v8308_v31  ;;  %v5530_v36 = vshrl.u32 %v16071_v29, %v5529_v37 }
 0x627   : > { %16259 = vst [vmem:[#allocation35_spill] sm:$0xff] %v13298_v35  ;;  %v8301_v48 = vmin.u32 %v5268_v5, %v13284_v3  ;;  %v5545_v52 = vor.u32 %v5544_v8, %v5543_v63  ;;  %vm5546_vm2 = vcmp.lt.s32.totalorder %v5527_v45, 1  ;;  %vm5549_vm14 = vcmp.lt.s32.totalorder %v5527_v45, 4 }
 0x628   : > { %vm15783_vm4 = vcmp.lt.s32.totalorder %v12908_v53, 0  ;;  %v5389_v26 = vmul.f32 %v5388_v0, %v5386_v21  ;;  %vm5548_vm1 = vcmp.lt.s32.totalorder %v5527_v45, 3  ;;  %v5551_v51 = vsel %vm5549_vm14, %v5539_v19, 2102212464 }
 0x629   : > { %v5270_v39 = vclz %v8301_v48  ;;  %v5554_v62 = vsel %vm5546_vm2, %v5533_v27, %v5536_v15  ;;  %v5555_v54 = vsel %vm5549_vm14, %v5542_v38, 920167782  ;;  %v5558_v47 = vsel %vm5546_vm2, %v5536_v15, %v5539_v19 }
 0x62a   : > { %v5559_v10 = vsel %vm5549_vm14, %v5545_v52, 1326507024  ;;  %v13305_v5 = vpop.eup %9047  ;;  %v5556_v58 = vsel %vm5548_vm1, %v5539_v19, %v5555_v54  ;;  %v5418_v8 = vor.u32 8388608, %v13279_v23  ;;  %vm5547_vm10 = vcmp.lt.s32.totalorder %v5527_v45, 2 }
 0x62b   : > { %16260 = vst [vmem:[#allocation43_spill] sm:$0xff] %v13305_v5  ;;  %v8302_v31 = vadd.s32 4294967294, %v5270_v39  ;;  %v5550_v0 = vsel %vm5546_vm2, %v5530_v36, %v5533_v27  ;;  %v5552_v48 = vsel %vm5548_vm1, %v5536_v15, %v5551_v51  ;;  %v5560_v9 = vsel %vm5548_vm1, %v5542_v38, %v5559_v10 }
 0x62c   : > { %v5557_v21 = vsel %vm5547_vm10, %v5554_v62, %v5556_v58  ;;  %v5561_v16 = vsel %vm5547_vm10, %v5558_v47, %v5560_v9  ;;  %vm5421_vm6 = vcmp.gt.s32.totalorder %v5420_v17, 0  ;;  %v5390_v63 = vxor.u32 2147483648, %v5389_v26  ;;  %v4169_v58 = vld [vmem:[%s15564_s7 + $0x18] sm:$0xff] }
 0x62d   : > { %vm8303_vm5 = vcmp.lt.s32.totalorder %v8302_v31, 0  ;;  %v13311_v52 = vmul.u32.u64.low %v13272_v41, %v5561_v16  ;;  %v13312_v5 = vmul.u32.u64.high %v13272_v41, %v5561_v16, %v13311_v52  ;;  %v5553_v23 = vsel %vm5547_vm10, %v5550_v0, %v5552_v48  ;;  %8593 = vmatprep.subr.mxu1 %v4169_v58  ;;  %v4168_v48 = vld [vmem:[%s15564_s7 + $0x10] sm:$0xff] }
 0x62e   : > { %v5273_v35 = vsel %vm8303_vm5, 0, %v8302_v31  ;;  %v5422_v54 = vsel %vm5421_vm6, %v5420_v17, 0  ;;  %v13315_v37 = vmul.u32.u64.low %v13272_v41, %v5557_v21  ;;  %v13316_v45 = vmul.u32.u64.high %v13272_v41, %v5557_v21, %v13315_v37  ;;  %8594 = vmatpush3.msra.mxu1 %v4169_v58 }
 0x62f   : > { %v5274_v19 = vsub.s32 32, %v5273_v35  ;;  %v5278_v39 = vsub.s32 4294967266, %v5273_v35  ;;  %v5424_v38 = vand.u32 31, %v5422_v54  ;;  %v13319_v15 = vshll.u32 %v5418_v8, 8  ;;  %8595 = vmatprep.subr.mxu1 %v4168_v48 }
 0x630   : > { %v5275_v27 = vshll.u32 %v13284_v3, %v5273_v35  ;;  %v5725_v62 = vand.u32 2139095040, %v13266_v1  ;;  %v13326_v47 = vsel %vm15783_vm4, %v5390_v63, %v5389_v26  ;;  %v5569_v17 = vmul.u32 %v13272_v41, %v5553_v23  ;;  %8596 = vmatpush3.msra.mxu1 %v4168_v48 }
 0x631   : > { %v5276_v36 = vshrl.u32 %v13270_v20, %v5274_v19  ;;  %v5279_v51 = vadd.s32 127, %v5278_v39  ;;  %v13329_v10 = vshrl.u32 %v5422_v54, 5  ;;  %v5425_v31 = vsub.s32 32, %v5424_v38  ;;  %v4167_v54 = vld [vmem:[%s15564_s7 + $0x8] sm:$0xff] }
 0x632   : > { %vm5571_vm5 = vc.u32 %v13312_v5, %v13315_v37  ;;  %v5427_v20 = vshll.u32 %v16071_v29, %v5424_v38  ;;  %v5572_v3 = vadd.s32 1, %v13316_v45  ;;  %v5430_v41 = vshll.u32 %v16072_v25, %v5424_v38  ;;  %8597 = vmatprep.subr.mxu1 %v4167_v54 }
 0x633   : > { %v5277_v8 = vor.u32 %v5276_v36, %v5275_v27  ;;  %v5280_v35 = vshll.u32 %v5279_v51, 23  ;;  %v5428_v26 = vshrl.u32 %v16072_v25, %v5425_v31  ;;  %v5431_v0 = vshrl.u32 %v16073_v40, %v5425_v31  ;;  %8598 = vmatpush3.msra.mxu1 %v4167_v54 }
 0x634   : > { %v5433_v21 = vshll.u32 %v16073_v40, %v5424_v38  ;;  %v5434_v16 = vshrl.u32 %v16074_v57, %v5425_v31  ;;  %v5436_v63 = vshll.u32 %v16074_v57, %v5424_v38  ;;  %v5573_v52 = vsel %vm5571_vm5, %v5572_v3, %v13316_v45 }
 0x635   : > { %v5281_v9 = vor.u32 4788187, %v5280_v35  ;;  %v5429_v19 = vor.u32 %v5428_v26, %v5427_v20  ;;  %v5432_v39 = vor.u32 %v5431_v0, %v5430_v41  ;;  %v5437_v23 = vshrl.u32 %v16075_v24, %v5425_v31 }
 0x636   : > { %v5574_v36 = vadd.s32 %v5573_v52, %v5569_v17  ;;  %v5435_v51 = vor.u32 %v5434_v16, %v5433_v21  ;;  %v5726_v58 = vshrl.u32 %v5725_v62, 23  ;;  %v16261_v35 = vand.u32 2147483647, %v12908_v53  ;;  %v4166_v17 = vld [vmem:[%s15564_s7] sm:$0xff] }
 0x637   : > { %v5282_v27 = vand.u32 2147483647, %v5281_v9  ;;  %v16262_v18 = vmov 0  ;;  %v5426_v45 = vshrl.u32 %v16071_v29, %v5425_v31  ;;  %v5438_v20 = vor.u32 %v5437_v23, %v5436_v63  ;;  %8599 = vmatprep.subr.mxu1 %v4166_v17 }
 0x638   : > { %vm13354_vm6 = vcmp.le.f32.partialorder %v16261_v35, 0.7853982  ;;  %v5439_v3 = vshll.u32 %v16075_v24, %v5424_v38  ;;  %v5440_v26 = vshrl.u32 %v16076_v28, %v5425_v31  ;;  %v5284_v62 = vcvt.s32.f32 %v5277_v8  ;;  %8600 = vmatpush3.msra.mxu1 %v4166_v17 }
 0x639   : > { %v16263_v18 = vsel %vm13354_vm6, 4294967295, %v16262_v18  ;;  %v5575_v41 = vadd.s32 536870912, %v5574_v36  ;;  %vm5442_vm10 = vcmp.lt.s32.totalorder %v13329_v10, 1  ;;  %vm5445_vm1 = vcmp.lt.s32.totalorder %v13329_v10, 4 }
 0x63a   : > { %16264 = vst [vmem:[#allocation44_spill] sm:$0xff] %v16263_v18  ;;  %vm15784_vm2 = vcmp.lt.s32.totalorder %v12912_v14, 0  ;;  %v5441_v0 = vor.u32 %v5440_v26, %v5439_v3  ;;  %vm5443_vm14 = vcmp.lt.s32.totalorder %v13329_v10, 2  ;;  %v5447_v38 = vsel %vm5445_vm1, %v5435_v51, 2102212464 }
 0x63b   : > { %v5450_v48 = vsel %vm5442_vm10, %v5429_v19, %v5432_v39  ;;  %v5285_v31 = vmul.f32 %v5284_v62, %v5282_v27  ;;  %v13368_v9 = vshrl.u32 %v5575_v41, 30  ;;  %vm5444_vm5 = vcmp.lt.s32.totalorder %v13329_v10, 3 }
 0x63c   : > { %v5451_v8 = vsel %vm5445_vm1, %v5438_v20, 920167782  ;;  %v5446_v21 = vsel %vm5442_vm10, %v5426_v45, %v5429_v19  ;;  %v5454_v63 = vsel %vm5442_vm10, %v5432_v39, %v5435_v51  ;;  %v5455_v52 = vsel %vm5445_vm1, %v5441_v0, 1326507024 }
 0x63d   : > { %16265 = vst [vmem:[#allocation45_spill] sm:$0xff] %v13368_v9  ;;  %v5452_v16 = vsel %vm5444_vm5, %v5435_v51, %v5451_v8  ;;  %v5577_v23 = vshll.u32 %v13368_v9, 30  ;;  %v5448_v54 = vsel %vm5444_vm5, %v5432_v39, %v5447_v38  ;;  %v5456_v3 = vsel %vm5444_vm5, %v5438_v20, %v5455_v52  ;;  %v4351_v51 = vpop.f32.mrf.mxu0 }
 0x63e   : > { %v5453_v35 = vsel %vm5443_vm14, %v5450_v48, %v5452_v16  ;;  %v5457_v26 = vsel %vm5443_vm14, %v5454_v63, %v5456_v3  ;;  %v16266_v19 = vand.u32 2147483647, %v13266_v1  ;;  %v5286_v62 = vxor.u32 2147483648, %v5285_v31 }
 0x63f   : > { %v13377_v27 = vmul.u32.u64.low %v13319_v15, %v5453_v35  ;;  %v13378_v17 = vmul.u32.u64.high %v13319_v15, %v5453_v35, %v13377_v27  ;;  %v13383_v41 = vsub.s32 %v5574_v36, %v5577_v23  ;;  %9049 = vsinq.f32 %v13246_v30 }
 0x640   : > { %v5729_v45 = vand.u32 8388607, %v16266_v19  ;;  %v13386_v39 = vmul.u32.u64.low %v13319_v15, %v5457_v26  ;;  %v13387_v0 = vmul.u32.u64.high %v13319_v15, %v5457_v26, %v13386_v39  ;;  %v16267_v20 = vand.u32 2147483647, %v12912_v14 }
 0x641   : > { %v16268_v38 = vmov 0  ;;  %v5449_v48 = vsel %vm5443_vm14, %v5446_v21, %v5448_v54  ;;  %v8320_v8 = vadd.s32 4294967169, %v5726_v58  ;;  %9051 = vcosq.f32 %v13261_v50 }
 0x642   : > { %vm13392_vm10 = vcmp.le.f32.partialorder %v16267_v20, 0.7853982  ;;  %v13403_v36 = vsel %vm13354_vm6, %v12908_v53, %v13326_v47  ;;  %v5580_v30 = vsub.s32 0, %v13383_v41  ;;  %v13407_v16 = vadd.f32 %v13140_v46, %v4351_v51  ;;  %v8592_v47 = vpop.f32.mrf.mxu0 }
 0x643   : > { %v16269_v38 = vsel %vm13392_vm10, 4294967295, %v16268_v38  ;;  %9053 = vsinq.f32 %v13261_v50  ;;  %v5468_v63 = vadd.s32 1, %v13378_v17  ;;  %v5730_v10 = vor.u32 8388608, %v5729_v45 }
 0x644   : > { %16270 = vst [vmem:[#allocation46_spill] sm:$0xff] %v16269_v38  ;;  %v5732_v21 = vadd.s32 1, %v8320_v8  ;;  %v5287_v58 = vsel %vm15784_vm2, %v5286_v62, %v5285_v31  ;;  %v8313_v52 = vmin.u32 %v5580_v30, %v13383_v41  ;;  %v5465_v23 = vmul.u32 %v13319_v15, %v5449_v48 }
 0x645   : > { %vm5467_vm1 = vc.u32 %v13387_v0, %v13377_v27  ;;  %9055 = vcosq.f32 %v13403_v36  ;;  %v5621_v50 = vand.u32 2139095040, %v13407_v16  ;;  %v5570_v35 = vadd.s32 %v13315_v37, %v13312_v5 }
 0x646   : > { %v5469_v54 = vsel %vm5467_vm1, %v5468_v63, %v13378_v17  ;;  %vm5733_vm14 = vcmp.gt.s32.totalorder %v5732_v21, 0  ;;  %v5582_v3 = vclz %v8313_v52  ;;  %v13425_v15 = vsel %vm13392_vm10, %v12912_v14, %v5287_v58 }
 0x647   : > { %v5470_v31 = vadd.s32 %v5469_v54, %v5465_v23  ;;  %v5734_v26 = vsel %vm5733_vm14, %v5732_v21, 0  ;;  %v13427_v45 = vshll.u32 %v5730_v10, 8  ;;  %v13430_v51 = vadd.f32 %v13140_v46, %v8592_v47 }
 0x648   : > { %v5736_v19 = vand.u32 31, %v5734_v26  ;;  %v8314_v17 = vadd.s32 4294967294, %v5582_v3  ;;  %v13432_v39 = vshrl.u32 %v5734_v26, 5  ;;  %v5622_v8 = vshrl.u32 %v5621_v50, 23 }
 0x649   : > { %v5471_v62 = vadd.s32 536870912, %v5470_v31  ;;  %vm15794_vm2 = vcmp.lt.s32.totalorder %v13143_v12, 0  ;;  %9057 = vsinq.f32 %v13403_v36  ;;  %v16291_v49 = vand.u32 2147483647, %v13266_v1 }
 0x64a   : > { %v5737_v37 = vsub.s32 32, %v5736_v19  ;;  %v5739_v20 = vshll.u32 %v16071_v29, %v5736_v19  ;;  %v5742_v48 = vshll.u32 %v16072_v25, %v5736_v19  ;;  %vm8315_vm5 = vcmp.lt.s32.totalorder %v8314_v17, 0 }
 0x64b   : > { %v13437_v30 = vshrl.u32 %v5471_v62, 30  ;;  %v5745_v63 = vshll.u32 %v16073_v40, %v5736_v19  ;;  %v5748_v10 = vshll.u32 %v16074_v57, %v5736_v19  ;;  %v5585_v21 = vsel %vm8315_vm5, 0, %v8314_v17 }
 0x64c   : > { %v5740_v58 = vshrl.u32 %v16072_v25, %v5737_v37  ;;  %v5743_v52 = vshrl.u32 %v16073_v40, %v5737_v37  ;;  %v5751_v23 = vshll.u32 %v16075_v24, %v5736_v19  ;;  %v5586_v47 = vsub.s32 32, %v5585_v21  ;;  %v13448_v18 = vpop.eup %9049 }
 0x64d   : > { %16271 = vst [vmem:[#allocation47_spill] sm:$0xff] %v13437_v30  ;;  %v5587_v54 = vshll.u32 %v13383_v41, %v5585_v21  ;;  %v5590_v3 = vsub.s32 4294967266, %v5585_v21  ;;  %v5473_v50 = vshll.u32 %v13437_v30, 30  ;;  %v5746_v5 = vshrl.u32 %v16074_v57, %v5737_v37  ;;  %16272 = vst [vmem:[#allocation48_spill] sm:$0xff] %v13448_v18 }
 0x64e   : > { %v5741_v26 = vor.u32 %v5740_v58, %v5739_v20  ;;  %v5744_v62 = vor.u32 %v5743_v52, %v5742_v48  ;;  %v5749_v9 = vshrl.u32 %v16075_v24, %v5737_v37  ;;  %v5588_v17 = vshrl.u32 %v5570_v35, %v5586_v47  ;;  %v13453_v14 = vpop.eup %9051 }
 0x64f   : > { %v5591_v53 = vadd.s32 127, %v5590_v3  ;;  %v13450_v38 = vsub.s32 %v5470_v31, %v5473_v50  ;;  %v5752_v19 = vshrl.u32 %v16076_v28, %v5737_v37  ;;  %v5738_v41 = vshrl.u32 %v16071_v29, %v5737_v37 }
 0x650   : > { %v5747_v21 = vor.u32 %v5746_v5, %v5745_v63  ;;  %v5750_v30 = vor.u32 %v5749_v9, %v5748_v10  ;;  %vm5754_vm1 = vcmp.lt.s32.totalorder %v13432_v39, 1  ;;  %v13457_v20 = vpop.eup %9053  ;;  %v5589_v48 = vor.u32 %v5588_v17, %v5587_v54 }
 0x651   : > { %v5592_v58 = vshll.u32 %v5591_v53, 23  ;;  %v5476_v52 = vsub.s32 0, %v13450_v38  ;;  %v5753_v35 = vor.u32 %v5752_v19, %v5751_v23  ;;  %vm5755_vm14 = vcmp.lt.s32.totalorder %v13432_v39, 2 }
 0x652   : > { %vm5756_vm5 = vcmp.lt.s32.totalorder %v13432_v39, 3  ;;  %vm5757_vm4 = vcmp.lt.s32.totalorder %v13432_v39, 4  ;;  %v5758_v31 = vsel %vm5754_vm1, %v5738_v41, %v5741_v26  ;;  %v13465_v5 = vpop.eup %9055  ;;  %v5762_v63 = vsel %vm5754_vm1, %v5741_v26, %v5744_v62 }
 0x653   : > { %16273 = vst [vmem:[#allocation49_spill] sm:$0xff] %v13465_v5  ;;  %v5593_v9 = vor.u32 4788187, %v5592_v58  ;;  %v8309_v37 = vmin.u32 %v5476_v52, %v13450_v38  ;;  %v5759_v53 = vsel %vm5757_vm4, %v5747_v21, 2102212464  ;;  %v5766_v47 = vsel %vm5754_vm1, %v5744_v62, %v5747_v21 }
 0x654   : > { %v5760_v10 = vsel %vm5756_vm5, %v5744_v62, %v5759_v53  ;;  %v5763_v23 = vsel %vm5757_vm4, %v5750_v30, 920167782  ;;  %v5767_v54 = vsel %vm5757_vm4, %v5753_v35, 1326507024  ;;  %v5596_v50 = vcvt.s32.f32 %v5589_v48 }
 0x655   : > { %v5594_v3 = vand.u32 2147483647, %v5593_v9  ;;  %v5478_v17 = vclz %v8309_v37  ;;  %v5764_v19 = vsel %vm5756_vm5, %v5747_v21, %v5763_v23  ;;  %v5768_v26 = vsel %vm5756_vm5, %v5750_v30, %v5767_v54 }
 0x656   : > { %v5765_v41 = vsel %vm5755_vm14, %v5762_v63, %v5764_v19  ;;  %v8316_v58 = vadd.s32 4294967169, %v5622_v8  ;;  %v16274_v52 = vand.u32 2147483647, %v13407_v16  ;;  %v16275_v5 = vand.u32 2147483647, %v13143_v12 }
 0x657   : > { %v16276_v62 = vmov 0  ;;  %v5597_v48 = vmul.f32 %v5596_v50, %v5594_v3  ;;  %v8310_v35 = vadd.s32 4294967294, %v5478_v17  ;;  %v5761_v21 = vsel %vm5755_vm14, %v5758_v31, %v5760_v10  ;;  %v4361_v17 = vpop.f32.mrf.mxu0 }
 0x658   : > { %v5625_v53 = vand.u32 8388607, %v16274_v52  ;;  %vm13485_vm1 = vcmp.le.f32.partialorder %v16275_v5, 0.7853982  ;;  %v5769_v9 = vsel %vm5755_vm14, %v5766_v47, %v5768_v26  ;;  %v5628_v23 = vadd.s32 1, %v8316_v58 }
 0x659   : > { %v16277_v62 = vsel %vm13485_vm1, 4294967295, %v16276_v62  ;;  %v13494_v30 = vmul.u32.u64.low %v13427_v45, %v5769_v9  ;;  %v13495_v8 = vmul.u32.u64.high %v13427_v45, %v5769_v9, %v13494_v30  ;;  %v5598_v5 = vxor.u32 2147483648, %v5597_v48 }
 0x65a   : > { %16278 = vst [vmem:[#allocation50_spill] sm:$0xff] %v16277_v62  ;;  %v13498_v37 = vmul.u32.u64.low %v13427_v45, %v5765_v41  ;;  %v13499_v63 = vmul.u32.u64.high %v13427_v45, %v5765_v41, %v13498_v37  ;;  %vm8311_vm4 = vcmp.lt.s32.totalorder %v8310_v35, 0  ;;  %9059 = vcosq.f32 %v13425_v15 }
 0x65b   : > { %v5466_v31 = vadd.s32 %v13377_v27, %v13387_v0  ;;  %v5481_v39 = vsel %vm8311_vm4, 0, %v8310_v35  ;;  %v15786_v10 = vand.u32 2147483647, %v13430_v51  ;;  %v5777_v3 = vmul.u32 %v13427_v45, %v5761_v21 }
 0x65c   : > { %v5482_v47 = vsub.s32 32, %v5481_v39  ;;  %v5486_v54 = vsub.s32 4294967266, %v5481_v39  ;;  %v5626_v50 = vor.u32 8388608, %v5625_v53  ;;  %v5599_v36 = vsel %vm15794_vm2, %v5598_v5, %v5597_v48 }
 0x65d   : > { %vm5779_vm14 = vc.u32 %v13495_v8, %v13498_v37  ;;  %v5780_v19 = vadd.s32 1, %v13499_v63  ;;  %v5933_v41 = vand.u32 2139095040, %v13430_v51  ;;  %v5483_v27 = vshll.u32 %v13450_v38, %v5481_v39 }
 0x65e   : > { %v5484_v0 = vshrl.u32 %v5466_v31, %v5482_v47  ;;  %v5487_v26 = vadd.s32 127, %v5486_v54  ;;  %vm5629_vm5 = vcmp.gt.s32.totalorder %v5628_v23, 0  ;;  %9061 = vsinq.f32 %v13425_v15 }
 0x65f   : > { %v5781_v45 = vsel %vm5779_vm14, %v5780_v19, %v13499_v63  ;;  %v5630_v58 = vsel %vm5629_vm5, %v5628_v23, 0  ;;  %v13516_v52 = vadd.f32 %v13140_v46, %v4361_v17  ;;  %v13522_v38 = vsel %vm13485_vm1, %v13143_v12, %v5599_v36 }
 0x660   : > { %v5485_v53 = vor.u32 %v5484_v0, %v5483_v27  ;;  %v5488_v48 = vshll.u32 %v5487_v26, 23  ;;  %v5782_v35 = vadd.s32 %v5781_v45, %v5777_v3  ;;  %v5632_v9 = vand.u32 31, %v5630_v58 }
 0x661   : > { %v13524_v30 = vshll.u32 %v5626_v50, 8  ;;  %v13528_v15 = vand.u32 8388607, %v15786_v10  ;;  %v13531_v46 = vadd.s32 %v13498_v37, %v13495_v8  ;;  %v5934_v23 = vshrl.u32 %v5933_v41, 23 }
 0x662   : > { %v5489_v63 = vor.u32 4788187, %v5488_v48  ;;  %v5783_v5 = vadd.s32 536870912, %v5782_v35  ;;  %v5492_v31 = vcvt.s32.f32 %v5485_v53  ;;  %v5631_v39 = vshrl.u32 %v5630_v58, 5  ;;  %v13547_v58 = vpop.eup %9057 }
 0x663   : > { %v5633_v47 = vsub.s32 32, %v5632_v9  ;;  %v5635_v54 = vshll.u32 %v16071_v29, %v5632_v9  ;;  %v5638_v50 = vshll.u32 %v16072_v25, %v5632_v9  ;;  %v5641_v36 = vshll.u32 %v16073_v40, %v5632_v9  ;;  %16280 = vst [vmem:[#allocation52_spill] sm:$0xff] %v13547_v58 }
 0x664   : > { %v5490_v3 = vand.u32 2147483647, %v5489_v63  ;;  %v13534_v17 = vshrl.u32 %v5783_v5, 30  ;;  %v5644_v37 = vshll.u32 %v16074_v57, %v5632_v9  ;;  %v5647_v26 = vshll.u32 %v16075_v24, %v5632_v9 }
 0x665   : > { %v5636_v19 = vshrl.u32 %v16072_v25, %v5633_v47  ;;  %v5639_v27 = vshrl.u32 %v16073_v40, %v5633_v47  ;;  %v5642_v8 = vshrl.u32 %v16074_v57, %v5633_v47  ;;  %v5645_v0 = vshrl.u32 %v16075_v24, %v5633_v47 }
 0x666   : > { %16279 = vst [vmem:[#allocation51_spill] sm:$0xff] %v13534_v17  ;;  %v5785_v41 = vshll.u32 %v13534_v17, 30  ;;  %v5648_v45 = vshrl.u32 %v16076_v28, %v5633_v47  ;;  %v5493_v53 = vmul.f32 %v5492_v31, %v5490_v3  ;;  %vm5650_vm14 = vcmp.lt.s32.totalorder %v5631_v39, 1 }
 0x667   : > { %v5637_v48 = vor.u32 %v5636_v19, %v5635_v54  ;;  %v5640_v63 = vor.u32 %v5639_v27, %v5638_v50  ;;  %v5643_v5 = vor.u32 %v5642_v8, %v5641_v36  ;;  %v13549_v10 = vpop.eup %9059  ;;  %v5646_v62 = vor.u32 %v5645_v0, %v5644_v37 }
 0x668   : > { %16281 = vst [vmem:[#allocation53_spill] sm:$0xff] %v13549_v10  ;;  %v13551_v21 = vsub.s32 %v5782_v35, %v5785_v41  ;;  %v8328_v12 = vadd.s32 4294967169, %v5934_v23  ;;  %v16282_v17 = vand.u32 2147483647, %v13224_v55  ;;  %v16283_v18 = vmov 0 }
 0x669   : > { %v5634_v9 = vshrl.u32 %v16071_v29, %v5633_v47  ;;  %v5649_v58 = vor.u32 %v5648_v45, %v5647_v26  ;;  %vm5653_vm2 = vcmp.lt.s32.totalorder %v5631_v39, 4  ;;  %v5658_v31 = vsel %vm5650_vm14, %v5637_v48, %v5640_v63 }
 0x66a   : > { %vm13555_vm5 = vcmp.le.f32.partialorder %v16282_v17, 0.7853982  ;;  %v5788_v54 = vsub.s32 0, %v13551_v21  ;;  %vm5652_vm3 = vcmp.lt.s32.totalorder %v5631_v39, 3  ;;  %v5655_v35 = vsel %vm5653_vm2, %v5643_v5, 2102212464 }
 0x66b   : > { %v16284_v18 = vsel %vm13555_vm5, 4294967295, %v16283_v18  ;;  %v5659_v3 = vsel %vm5653_vm2, %v5646_v62, 920167782  ;;  %v5494_v50 = vxor.u32 2147483648, %v5493_v53  ;;  %vm5651_vm4 = vcmp.lt.s32.totalorder %v5631_v39, 2  ;;  %v13564_v36 = vpop.eup %9061 }
 0x66c   : > { %16285 = vst [vmem:[#allocation54_spill] sm:$0xff] %v16284_v18  ;;  %v5654_v23 = vsel %vm5650_vm14, %v5634_v9, %v5637_v48  ;;  %v5660_v17 = vsel %vm5652_vm3, %v5643_v5, %v5659_v3  ;;  %v8321_v19 = vmin.u32 %v5788_v54, %v13551_v21  ;;  %v5656_v47 = vsel %vm5652_vm3, %v5640_v63, %v5655_v35 }
 0x66d   : > { %v5661_v27 = vsel %vm5651_vm4, %v5658_v31, %v5660_v17  ;;  %v5662_v8 = vsel %vm5650_vm14, %v5640_v63, %v5643_v5  ;;  %v5663_v37 = vsel %vm5653_vm2, %v5649_v58, 1326507024  ;;  %v15797_v26 = vand.u32 2147483647, %v13516_v52 }
 0x66e   : > { %v13571_v41 = vmul.u32.u64.low %v13524_v30, %v5661_v27  ;;  %v13572_v0 = vmul.u32.u64.high %v13524_v30, %v5661_v27, %v13571_v41  ;;  %9063 = vcosq.f32 %v13522_v38  ;;  %v5790_v45 = vclz %v8321_v19 }
 0x66f   : > { %v5664_v48 = vsel %vm5652_vm3, %v5646_v62, %v5663_v37  ;;  %v5940_v9 = vadd.s32 1, %v8328_v12  ;;  %vm16286_vm1 = vcmp.lt.s32.totalorder %v13224_v55, 0  ;;  %v5657_v31 = vsel %vm5651_vm4, %v5654_v23, %v5656_v47 }
 0x670   : > { %v5495_v54 = vsel %vm16286_vm1, %v5494_v50, %v5493_v53  ;;  %v5665_v58 = vsel %vm5651_vm4, %v5662_v8, %v5664_v48  ;;  %v5938_v63 = vor.u32 8388608, %v13528_v15  ;;  %v8322_v5 = vadd.s32 4294967294, %v5790_v45 }
 0x671   : > { %v13584_v35 = vmul.u32.u64.low %v13524_v30, %v5665_v58  ;;  %v13585_v3 = vmul.u32.u64.high %v13524_v30, %v5665_v58, %v13584_v35  ;;  %vm5941_vm2 = vcmp.gt.s32.totalorder %v5940_v9, 0  ;;  %9065 = vsinq.f32 %v13522_v38 }
 0x672   : > { %v5942_v17 = vsel %vm5941_vm2, %v5940_v9, 0  ;;  %v5829_v12 = vand.u32 2139095040, %v13516_v52  ;;  %v13591_v62 = vand.u32 8388607, %v15797_v26  ;;  %v13596_v39 = vsel %vm13555_vm5, %v13224_v55, %v5495_v54 }
 0x673   : > { %vm8323_vm3 = vcmp.lt.s32.totalorder %v8322_v5, 0  ;;  %v5676_v15 = vadd.s32 1, %v13572_v0  ;;  %v5944_v53 = vand.u32 31, %v5942_v17  ;;  %v5673_v23 = vmul.u32 %v13524_v30, %v5657_v31 }
 0x674   : > { %v5793_v50 = vsel %vm8323_vm3, 0, %v8322_v5  ;;  %v13600_v38 = vshrl.u32 %v5942_v17, 5  ;;  %v13602_v19 = vshll.u32 %v5938_v63, 8  ;;  %v5830_v8 = vshrl.u32 %v5829_v12, 23 }
 0x675   : > { %v5794_v47 = vsub.s32 32, %v5793_v50  ;;  %v5798_v27 = vsub.s32 4294967266, %v5793_v50  ;;  %v16287_v37 = vsub.s32 4, %v12605_v4  ;;  %vm16288_vm1 = vcmp.lt.s32.totalorder %v12518_v59, 0 }
 0x676   : > { %v5795_v48 = vshll.u32 %v13551_v21, %v5793_v50  ;;  %vm5675_vm4 = vc.u32 %v13585_v3, %v13571_v41  ;;  %v5945_v30 = vsub.s32 32, %v5944_v53  ;;  %v5947_v63 = vshll.u32 %v16071_v29, %v5944_v53 }
 0x677   : > { %v13609_v45 = vsel %vm16288_vm1, %v16287_v37, %v12605_v4  ;;  %v5796_v54 = vshrl.u32 %v13531_v46, %v5794_v47  ;;  %v5799_v31 = vadd.s32 127, %v5798_v27  ;;  %v5677_v58 = vsel %vm5675_vm4, %v5676_v15, %v13572_v0 }
 0x678   : > { %v5678_v5 = vadd.s32 %v5677_v58, %v5673_v23  ;;  %v5948_v35 = vshrl.u32 %v16072_v25, %v5945_v30  ;;  %v5950_v4 = vshll.u32 %v16072_v25, %v5944_v53  ;;  %v5951_v21 = vshrl.u32 %v16073_v40, %v5945_v30 }
 0x679   : > { %v5797_v17 = vor.u32 %v5796_v54, %v5795_v48  ;;  %v5800_v12 = vshll.u32 %v5799_v31, 23  ;;  %v5953_v50 = vshll.u32 %v16073_v40, %v5944_v53  ;;  %v5954_v37 = vshrl.u32 %v16074_v57, %v5945_v30 }
 0x67a   : > { %vm15803_vm14 = vcmp.lt.s32.totalorder %v13266_v1, 0  ;;  %v5679_v46 = vadd.s32 536870912, %v5678_v5  ;;  %v5946_v0 = vshrl.u32 %v16071_v29, %v5945_v30  ;;  %v5956_v15 = vshll.u32 %v16074_v57, %v5944_v53 }
 0x67b   : > { %v5957_v23 = vshrl.u32 %v16075_v24, %v5945_v30  ;;  %v5801_v47 = vor.u32 4788187, %v5800_v12  ;;  %v5949_v27 = vor.u32 %v5948_v35, %v5947_v63  ;;  %v5952_v58 = vor.u32 %v5951_v21, %v5950_v4  ;;  %v13627_v9 = vpop.eup %9063 }
 0x67c   : > { %v5955_v26 = vor.u32 %v5954_v37, %v5953_v50  ;;  %16289 = vst [vmem:[#allocation55_spill] sm:$0xff] %v13627_v9  ;;  %v13629_v48 = vshrl.u32 %v5679_v46, 30  ;;  %v5959_v31 = vshll.u32 %v16075_v24, %v5944_v53  ;;  %v5960_v18 = vshrl.u32 %v16076_v28, %v5945_v30 }
 0x67d   : > { %v5958_v54 = vor.u32 %v5957_v23, %v5956_v15  ;;  %v5802_v55 = vand.u32 2147483647, %v5801_v47  ;;  %v5804_v10 = vcvt.s32.f32 %v5797_v17  ;;  %vm5962_vm2 = vcmp.lt.s32.totalorder %v13600_v38, 1 }
 0x67e   : > { %vm5965_vm3 = vcmp.lt.s32.totalorder %v13600_v38, 4  ;;  %v5681_v12 = vshll.u32 %v13629_v48, 30  ;;  %v5961_v63 = vor.u32 %v5960_v18, %v5959_v31  ;;  %vm5963_vm1 = vcmp.lt.s32.totalorder %v13600_v38, 2  ;;  %v13639_v4 = vpop.eup %9065 }
 0x67f   : > { %v5967_v35 = vsel %vm5965_vm3, %v5955_v26, 2102212464  ;;  %v5805_v21 = vmul.f32 %v5804_v10, %v5802_v55  ;;  %vm5964_vm4 = vcmp.lt.s32.totalorder %v13600_v38, 3  ;;  %v5970_v53 = vsel %vm5962_vm2, %v5949_v27, %v5952_v58 }
 0x680   : > { %v5971_v30 = vsel %vm5965_vm3, %v5958_v54, 920167782  ;;  %v13644_v17 = vsub.s32 %v5678_v5, %v5681_v12  ;;  %v5966_v50 = vsel %vm5962_vm2, %v5946_v0, %v5949_v27  ;;  %v5974_v46 = vsel %vm5962_vm2, %v5952_v58, %v5955_v26 }
 0x681   : > { %v5972_v37 = vsel %vm5964_vm4, %v5955_v26, %v5971_v30  ;;  %v5806_v18 = vxor.u32 2147483648, %v5805_v21  ;;  %v5968_v15 = vsel %vm5964_vm4, %v5952_v58, %v5967_v35  ;;  %v5975_v47 = vsel %vm5965_vm3, %v5961_v63, 1326507024 }
 0x682   : > { %v5973_v23 = vsel %vm5963_vm1, %v5970_v53, %v5972_v37  ;;  %v5684_v55 = vsub.s32 0, %v13644_v17  ;;  %v5976_v10 = vsel %vm5964_vm4, %v5958_v54, %v5975_v47  ;;  %v8324_v0 = vadd.s32 4294967169, %v5830_v8 }
 0x683   : > { %v13652_v31 = vmul.u32.u64.low %v13602_v19, %v5973_v23  ;;  %v13653_v9 = vmul.u32.u64.high %v13602_v19, %v5973_v23, %v13652_v31  ;;  %v5807_v5 = vsel %vm15803_vm14, %v5806_v18, %v5805_v21  ;;  %v5977_v26 = vsel %vm5963_vm1, %v5974_v46, %v5976_v10 }
 0x684   : > { %v4459_v27 = vsel %vm12832_vm15, 0, %v13609_v45  ;;  %v8317_v58 = vmin.u32 %v5684_v55, %v13644_v17  ;;  %v5969_v54 = vsel %vm5963_vm1, %v5966_v50, %v5968_v15  ;;  %v16290_v35 = vsel %vm12779_vm12, 0, %v12891_v22 }
 0x685   : > { %v13667_v12 = vmul.u32.u64.low %v13602_v19, %v5977_v26  ;;  %v13668_v63 = vmul.u32.u64.high %v13602_v19, %v5977_v26, %v13667_v12  ;;  %v13674_v21 = vadd.s32 3, %v16290_v35  ;;  %9067 = vcosq.f32 %v13596_v39 }
 0x686   : > { %vm13679_vm15 = vcmp.le.f32.partialorder %v16291_v49, 0.7853982  ;;  %v16292_v8 = vmov 0  ;;  %v5836_v38 = vadd.s32 1, %v8324_v0  ;;  %v5686_v53 = vclz %v8317_v58 }
 0x687   : > { %v16293_v8 = vsel %vm13679_vm15, 4294967295, %v16292_v8  ;;  %v13686_v45 = vsel %vm13679_vm15, %v13266_v1, %v5807_v5  ;;  %v5988_v42 = vadd.s32 1, %v13653_v9  ;;  %v4463_v22 = vadd.s32 3, %v4459_v27 }
 0x688   : > { %9069 = vsinq.f32 %v13596_v39  ;;  %v5674_v30 = vadd.s32 %v13571_v41, %v13585_v3  ;;  %v5985_v50 = vmul.u32 %v13602_v19, %v5969_v54  ;;  %vm5837_vm12 = vcmp.gt.s32.totalorder %v5836_v38, 0 }
 0x689   : > { %v8318_v37 = vadd.s32 4294967294, %v5686_v53  ;;  %vm5987_vm2 = vc.u32 %v13668_v63, %v13652_v31  ;;  %v5838_v46 = vsel %vm5837_vm12, %v5836_v38, 0  ;;  %v16294_v18 = vor.u32 8388608, %v13591_v62 }
 0x68a   : > { %9071 = vcosq.f32 %v13686_v45  ;;  %v5989_v23 = vsel %vm5987_vm2, %v5988_v42, %v13653_v9  ;;  %v5840_v39 = vand.u32 31, %v5838_v46  ;;  %v4467_v47 = vxor.u32 2147483648, %v12948_v11 }
 0x68b   : > { %v13697_v15 = vshll.u32 %v16294_v18, 8  ;;  %vm8319_vm3 = vcmp.lt.s32.totalorder %v8318_v37, 0  ;;  %v5990_v41 = vadd.s32 %v5989_v23, %v5985_v50  ;;  %v13702_v3 = vand.u32 3, %v4463_v22 }
 0x68c   : > { %v5689_v55 = vsel %vm8319_vm3, 0, %v8318_v37  ;;  %v13705_v10 = vshrl.u32 %v5838_v46, 5  ;;  %v5841_v5 = vsub.s32 32, %v5840_v39  ;;  %v5843_v62 = vshll.u32 %v16071_v29, %v5840_v39 }
 0x68d   : > { %v5690_v26 = vsub.s32 32, %v5689_v55  ;;  %v5694_v0 = vsub.s32 4294967266, %v5689_v55  ;;  %v5991_v27 = vadd.s32 536870912, %v5990_v41  ;;  %v5846_v9 = vshll.u32 %v16072_v25, %v5840_v39 }
 0x68e   : > { %v5691_v58 = vshll.u32 %v13644_v17, %v5689_v55  ;;  %v5844_v54 = vshrl.u32 %v16072_v25, %v5841_v5  ;;  %v5847_v12 = vshrl.u32 %v16073_v40, %v5841_v5  ;;  %v5849_v35 = vshll.u32 %v16073_v40, %v5840_v39 }
 0x68f   : > { %v5692_v49 = vshrl.u32 %v5674_v30, %v5690_v26  ;;  %v5695_v38 = vadd.s32 127, %v5694_v0  ;;  %v13713_v53 = vshrl.u32 %v5991_v27, 30  ;;  %v5850_v42 = vshrl.u32 %v16074_v57, %v5841_v5 }
 0x690   : > { %vm4466_vm1 = vcmp.eq.s32.totalorder %v13702_v3, 0  ;;  %v5845_v22 = vor.u32 %v5844_v54, %v5843_v62  ;;  %v5848_v50 = vor.u32 %v5847_v12, %v5846_v9  ;;  %v5852_v37 = vshll.u32 %v16074_v57, %v5840_v39 }
 0x691   : > { %v5853_v17 = vshrl.u32 %v16075_v24, %v5841_v5  ;;  %v5693_v46 = vor.u32 %v5692_v49, %v5691_v58  ;;  %v5696_v18 = vshll.u32 %v5695_v38, 23  ;;  %v5993_v23 = vshll.u32 %v13713_v53, 30 }
 0x692   : > { %v5851_v30 = vor.u32 %v5850_v42, %v5849_v35  ;;  %v5842_v55 = vshrl.u32 %v16071_v29, %v5841_v5  ;;  %v5855_v0 = vshll.u32 %v16075_v24, %v5840_v39  ;;  %v5856_v62 = vshrl.u32 %v16076_v28, %v5841_v5  ;;  %v13726_v27 = vpop.eup %9067 }
 0x693   : > { %v5854_v26 = vor.u32 %v5853_v17, %v5852_v37  ;;  %v5697_v9 = vor.u32 4788187, %v5696_v18  ;;  %v5700_v54 = vcvt.s32.f32 %v5693_v46  ;;  %v13728_v58 = vsub.s32 %v5990_v41, %v5993_v23 }
 0x694   : > { %vm5858_vm3 = vcmp.lt.s32.totalorder %v13705_v10, 1  ;;  %v5857_v12 = vor.u32 %v5856_v62, %v5855_v0  ;;  %vm5860_vm12 = vcmp.lt.s32.totalorder %v13705_v10, 3  ;;  %vm5861_vm4 = vcmp.lt.s32.totalorder %v13705_v10, 4 }
 0x695   : > { %v5862_v39 = vsel %vm5858_vm3, %v5842_v55, %v5845_v22  ;;  %v13734_v35 = vpop.eup %9069  ;;  %v16295_v5 = vand.u32 2147483647, %v13407_v16  ;;  %v5698_v41 = vand.u32 2147483647, %v5697_v9  ;;  %v5996_v38 = vsub.s32 0, %v13728_v58 }
 0x696   : > { %v5863_v42 = vsel %vm5861_vm4, %v5851_v30, 2102212464  ;;  %v5866_v37 = vsel %vm5858_vm3, %v5845_v22, %v5848_v50  ;;  %v5867_v46 = vsel %vm5861_vm4, %v5854_v26, 920167782  ;;  %v5870_v18 = vsel %vm5858_vm3, %v5848_v50, %v5851_v30 }
 0x697   : > { %vm13738_vm2 = vcmp.le.f32.partialorder %v16295_v5, 0.7853982  ;;  %v5864_v17 = vsel %vm5860_vm12, %v5848_v50, %v5863_v42  ;;  %v5871_v23 = vsel %vm5861_vm4, %v5857_v12, 1326507024  ;;  %v13745_v55 = vpop.eup %9071  ;;  %v5701_v0 = vmul.f32 %v5700_v54, %v5698_v41 }
 0x698   : > { %v8329_v62 = vmin.u32 %v5996_v38, %v13728_v58  ;;  %vm5859_vm14 = vcmp.lt.s32.totalorder %v13705_v10, 2  ;;  %v5868_v9 = vsel %vm5860_vm12, %v5851_v30, %v5867_v46  ;;  %v5872_v22 = vsel %vm5860_vm12, %v5854_v26, %v5871_v23 }
 0x699   : > { %v5865_v5 = vsel %vm5859_vm14, %v5862_v39, %v5864_v17  ;;  %v5869_v19 = vsel %vm5859_vm14, %v5866_v37, %v5868_v9  ;;  %v4468_v50 = vsel %vm4466_vm1, %v12939_v6, %v4467_v47  ;;  %v5702_v12 = vxor.u32 2147483648, %v5701_v0 }
 0x69a   : > { %v5998_v54 = vclz %v8329_v62  ;;  %v5873_v41 = vsel %vm5859_vm14, %v5870_v18, %v5872_v22  ;;  %v16298_v38 = vxor.u32 2147483648, %v12939_v6  ;;  %vm16299_vm4 = vcmp.eq.s32.totalorder %v13702_v3, 2 }
 0x69b   : > { %v13764_v39 = vmul.u32.u64.low %v13697_v15, %v5873_v41  ;;  %v13765_v42 = vmul.u32.u64.high %v13697_v15, %v5873_v41, %v13764_v39  ;;  %v13768_v10 = vmul.u32.u64.low %v13697_v15, %v5869_v19  ;;  %v13769_v26 = vmul.u32.u64.high %v13697_v15, %v5869_v19, %v13768_v10 }
 0x69c   : > { %v4471_v30 = vsel %vm16299_vm4, %v16298_v38, %v12948_v11  ;;  %vm16300_vm1 = vcmp.lt.s32.totalorder %v13407_v16, 0  ;;  %v8330_v37 = vadd.s32 4294967294, %v5998_v54  ;;  %vm16301_vm14 = vcmp.lt.s32.totalorder %v13702_v3, 2 }
 0x69d   : > { %v5703_v47 = vsel %vm16300_vm1, %v5702_v12, %v5701_v0  ;;  %v4472_v17 = vsel %vm16301_vm14, %v4468_v50, %v4471_v30  ;;  %v4568_v6 = vand.u32 3, %v13674_v21  ;;  %9073 = vsinq.f32 %v13686_v45 }
 0x69e   : > { %vm16302_vm12 = vweird.f32 %v12518_v59  ;;  %v4571_v19 = vxor.u32 2147483648, %v12927_v60  ;;  %v5986_v46 = vadd.s32 %v13652_v31, %v13668_v63  ;;  %vm8331_vm4 = vcmp.lt.s32.totalorder %v8330_v37, 0 }
 0x69f   : > { %v4473_v11 = vsel %vm16302_vm12, nan, %v4472_v17  ;;  %v5881_v18 = vmul.u32 %v13697_v15, %v5865_v5  ;;  %vm16303_vm1 = vcmask 261120   ;;  %v4574_v3 = vxor.u32 2147483648, %v12847_v2 }
 0x6a0   : > { %8601 = vmatprep.mubr.msk.f32.mxu1 %vm16303_vm1, %v4473_v11  ;;  %v5706_v21 = vsel %vm13738_vm2, %v13407_v16, %v5703_v47  ;;  %v6001_v59 = vsel %vm8331_vm4, 0, %v8330_v37  ;;  %vm5883_vm14 = vc.u32 %v13765_v42, %v13768_v10  ;;  %vm4569_vm12 = vcmp.lt.s32.totalorder %v4568_v6, 2 }
 0x6a1   : > { %v6002_v45 = vsub.s32 32, %v6001_v59  ;;  %v6006_v23 = vsub.s32 4294967266, %v6001_v59  ;;  %v5884_v31 = vadd.s32 1, %v13769_v26  ;;  %vm4570_vm3 = vcmp.eq.s32.totalorder %v4568_v6, 0 }
 0x6a2   : > { %v6003_v63 = vshll.u32 %v13728_v58, %v6001_v59  ;;  %v4572_v15 = vsel %vm4570_vm3, %v12847_v2, %v4571_v19  ;;  %vm4573_vm1 = vcmp.eq.s32.totalorder %v4568_v6, 2  ;;  %v4664_v0 = vsub.s32 4, %v12755_v56  ;;  %v16308_v19 = vld [vmem:[#allocation7_spill] sm:$0xff] }
 0x6a3   : > { %v6004_v62 = vshrl.u32 %v5986_v46, %v6002_v45  ;;  %v6007_v9 = vadd.s32 127, %v6006_v23  ;;  %v5885_v5 = vsel %vm5883_vm14, %v5884_v31, %v13769_v26  ;;  %v4575_v22 = vsel %vm4573_vm1, %v4574_v3, %v12927_v60 }
 0x6a4   : > { %9075 = vcosq.f32 %v5706_v21  ;;  %v5886_v50 = vadd.s32 %v5885_v5, %v5881_v18  ;;  %v4576_v12 = vsel %vm4569_vm12, %v4572_v15, %v4575_v22  ;;  %vm16304_vm4 = vcmp.lt.s32.totalorder %v12600_v13, 0  ;;  %v16309_v18 = vld [vmem:[#allocation5_spill] sm:$0xff]  ;;  %v16314_v5 = vld [vmem:[#allocation22_spill] sm:$0xff] }
 0x6a5   : > { %v4665_v54 = vsel %vm16304_vm4, %v4664_v0, %v12755_v56  ;;  %v6005_v41 = vor.u32 %v6004_v62, %v6003_v63  ;;  %v6008_v58 = vshll.u32 %v6007_v9, 23  ;;  %vm16305_vm3 = vweird.f32 %v12513_v44  ;;  %v16313_v62 = vld [vmem:[#allocation4_spill] sm:$0xff] }
 0x6a6   : > { %v4577_v2 = vsel %vm16305_vm3, nan, %v4576_v12  ;;  %v4667_v38 = vsel %vm12943_vm13, 0, %v4665_v54  ;;  %9077 = vsinq.f32 %v5706_v21  ;;  %v5887_v30 = vadd.s32 536870912, %v5886_v50 }
 0x6a7   : > { %vm16306_vm14 = vcmask 261120   ;;  %v4671_v60 = vadd.s32 3, %v4667_v38  ;;  %v4768_v39 = vsub.s32 4, %v12701_v34  ;;  %v6009_v26 = vor.u32 4788187, %v6008_v58  ;;  %v16318_v38 = vld [vmem:[#allocation3_spill] sm:$0xff] }
 0x6a8   : > { %8602 = vmatmul.mubr.msk.f32.vlgmr.msra.gmra.mxu1 %vm16306_vm14, %v4577_v2  ;;  %vm4670_vm12 = vweird.f32 %v12600_v13  ;;  %v4675_v56 = vxor.u32 2147483648, %v13081_v32  ;;  %v4678_v47 = vxor.u32 2147483648, %v13075_v7  ;;  %v6012_v37 = vcvt.s32.f32 %v6005_v41 }
 0x6a9   : > { %v13810_v44 = vshrl.u32 %v5887_v30, 30  ;;  %v4672_v17 = vand.u32 3, %v4671_v60  ;;  %vm16307_vm13 = vcmp.lt.s32.totalorder %v12549_v61, 0  ;;  %vm5932_vm1 = vcmp.lt.s32.totalorder %v13430_v51, 0  ;;  %v16319_v60 = vld [vmem:[#allocation35_spill] sm:$0xff] }
 0x6aa   : > { %v4769_v43 = vsel %vm16307_vm13, %v4768_v39, %v12701_v34  ;;  %v6010_v6 = vand.u32 2147483647, %v6009_v26  ;;  %v4779_v46 = vxor.u32 2147483648, %v16308_v19  ;;  %v4872_v3 = vsub.s32 4, %v16309_v18  ;;  %v13821_v59 = vpop.eup %9073 }
 0x6ab   : > { %v4771_v11 = vsel %vm12851_vm11, 0, %v4769_v43  ;;  %v5889_v21 = vshll.u32 %v13810_v44, 30  ;;  %vm4673_vm4 = vcmp.lt.s32.totalorder %v4672_v17, 2  ;;  %vm4674_vm3 = vcmp.eq.s32.totalorder %v4672_v17, 0  ;;  %v16321_v43 = vld [vmem:[#allocation12_spill] sm:$0xff] }
 0x6ac   : > { %vm4677_vm14 = vcmp.eq.s32.totalorder %v4672_v17, 2  ;;  %v6013_v45 = vmul.f32 %v6012_v37, %v6010_v6  ;;  %v4676_v34 = vsel %vm4674_vm3, %v13075_v7, %v4675_v56  ;;  %v4775_v31 = vadd.s32 3, %v4771_v11 }
 0x6ad   : > { %v4679_v23 = vsel %vm4677_vm14, %v4678_v47, %v13081_v32  ;;  %v16310_v33 = vand.u32 2147483647, %v13430_v51  ;;  %v13831_v15 = vsub.s32 %v5886_v50, %v5889_v21  ;;  %v4782_v9 = vxor.u32 2147483648, %v16313_v62 }
 0x6ae   : > { %v4680_v0 = vsel %vm4673_vm4, %v4676_v34, %v4679_v23  ;;  %vm16315_vm13 = vcmp.lt.s32.totalorder %v16314_v5, 0  ;;  %v5882_v7 = vadd.s32 %v13768_v10, %v13765_v42  ;;  %v4776_v12 = vand.u32 3, %v4775_v31  ;;  %v16320_v42 = vld [vmem:[#allocation18_spill] sm:$0xff] }
 0x6af   : > { %vm13827_vm11 = vcmp.le.f32.partialorder %v16310_v33, 0.7853982  ;;  %v4873_v22 = vsel %vm16315_vm13, %v4872_v3, %v16309_v18  ;;  %v4681_v32 = vsel %vm4670_vm12, nan, %v4680_v0  ;;  %v6014_v58 = vxor.u32 2147483648, %v6013_v45  ;;  %v16324_v0 = vld [vmem:[#allocation38_spill] sm:$0xff] }
 0x6b0   : > { %v4875_v41 = vsel %vm13163_vm0, 0, %v4873_v22  ;;  %v5892_v50 = vsub.s32 0, %v13831_v15  ;;  %vm16317_vm4 = vcmask 261120   ;;  %v4976_v30 = vsub.s32 4, %v16318_v38 }
 0x6b1   : > { %8604 = vmatprep.mubr.msk.f32.mxu1 %vm16317_vm4, %v4681_v32  ;;  %v4879_v2 = vadd.s32 3, %v4875_v41  ;;  %vm4778_vm3 = vcmp.eq.s32.totalorder %v4776_v12, 0  ;;  %vm4781_vm14 = vcmp.eq.s32.totalorder %v4776_v12, 2  ;;  %v4883_v39 = vxor.u32 2147483648, %v16319_v60  ;;  %v13851_v47 = vpop.eup %9075 }
 0x6b2   : > { %v4886_v10 = vxor.u32 2147483648, %v16320_v42  ;;  %v8325_v13 = vmin.u32 %v5892_v50, %v13831_v15  ;;  %vm4777_vm12 = vcmp.lt.s32.totalorder %v4776_v12, 2  ;;  %v4780_v26 = vsel %vm4778_vm3, %v16313_v62, %v4779_v46  ;;  %v16326_v12 = vld [vmem:[#allocation34_spill] sm:$0xff] }
 0x6b3   : > { %v4783_v56 = vsel %vm4781_vm14, %v4782_v9, %v16308_v19  ;;  %vm4774_vm0 = vweird.f32 %v12549_v61  ;;  %v4880_v17 = vand.u32 3, %v4879_v2  ;;  %vm16322_vm13 = vcmp.lt.s32.totalorder %v16321_v43, 0  ;;  %v13861_v34 = vpop.eup %9077  ;;  %v16325_v9 = vld [vmem:[#allocation16_spill] sm:$0xff] }
 0x6b4   : > { %v4784_v37 = vsel %vm4777_vm12, %v4780_v26, %v4783_v56  ;;  %v4977_v6 = vsel %vm16322_vm13, %v4976_v30, %v16318_v38  ;;  %v6015_v11 = vsel %vm5932_vm1, %v6014_v58, %v6013_v45  ;;  %v5894_v18 = vclz %v8325_v13  ;;  %v16328_v58 = vld [vmem:[#allocation28_spill] sm:$0xff] }
 0x6b5   : > { %v4785_v3 = vsel %vm4774_vm0, nan, %v4784_v37  ;;  %v4979_v46 = vsel %vm13069_vm9, 0, %v4977_v6  ;;  %vm4878_vm3 = vweird.f32 %v16314_v5  ;;  %vm4881_vm14 = vcmp.lt.s32.totalorder %v4880_v17, 2  ;;  %vm16327_vm0 = vmmov %vm16317_vm4 }
 0x6b6   : > { %8605 = vmatmul.mubr.msk.f32.gmra.mxu1 %vm16317_vm4, %v4785_v3  ;;  %vm4882_vm12 = vcmp.eq.s32.totalorder %v4880_v17, 0  ;;  %vm4885_vm15 = vcmp.eq.s32.totalorder %v4880_v17, 2  ;;  %v8326_v61 = vadd.s32 4294967294, %v5894_v18  ;;  %v4983_v45 = vadd.s32 3, %v4979_v46 }
 0x6b7   : > { %v4884_v19 = vsel %vm4882_vm12, %v16320_v42, %v4883_v39  ;;  %v4887_v23 = vsel %vm4885_vm15, %v4886_v10, %v16319_v60  ;;  %v13870_v31 = vsel %vm13827_vm11, %v13430_v51, %v6015_v11  ;;  %v4987_v62 = vxor.u32 2147483648, %v16324_v0  ;;  %v16331_v10 = vld [vmem:[#allocation23_spill] sm:$0xff] }
 0x6b8   : > { %v4888_v33 = vsel %vm4881_vm14, %v4884_v19, %v4887_v23  ;;  %v5080_v22 = vsub.s32 4, %v16325_v9  ;;  %vm8327_vm9 = vcmp.lt.s32.totalorder %v8326_v61, 0  ;;  %v4984_v32 = vand.u32 3, %v4983_v45 }
 0x6b9   : > { %v4889_v5 = vsel %vm4878_vm3, nan, %v4888_v33  ;;  %v4990_v54 = vxor.u32 2147483648, %v16326_v12  ;;  %v5897_v41 = vsel %vm8327_vm9, 0, %v8326_v61  ;;  %vm4982_vm15 = vweird.f32 %v16321_v43  ;;  %vm16335_vm9 = vmmov %vm16327_vm0  ;;  %v16336_v33 = vld [vmem:[#allocation48_spill] sm:$0xff] }
 0x6ba   : > { %8607 = vmatprep.mubr.msk.f32.mxu1 %vm16327_vm0, %v4889_v5  ;;  %vm16329_vm13 = vcmp.lt.s32.totalorder %v16328_v58, 0  ;;  %v5091_v2 = vxor.u32 2147483648, %v13457_v20  ;;  %v5898_v38 = vsub.s32 32, %v5897_v41  ;;  %v5899_v30 = vshll.u32 %v13831_v15, %v5897_v41  ;;  %v16332_v15 = vld [vmem:[#allocation10_spill] sm:$0xff]  ;;  %v16340_v5 = vld [vmem:[#allocation43_spill] sm:$0xff] }
 0x6bb   : > { %v5081_v50 = vsel %vm16329_vm13, %v5080_v22, %v16325_v9  ;;  %v5902_v60 = vsub.s32 4294967266, %v5897_v41  ;;  %vm4985_vm4 = vcmp.lt.s32.totalorder %v4984_v32, 2  ;;  %vm4986_vm3 = vcmp.eq.s32.totalorder %v4984_v32, 0 }
 0x6bc   : > { %vm4989_vm14 = vcmp.eq.s32.totalorder %v4984_v32, 2  ;;  %v5083_v42 = vsel %vm13234_vm8, 0, %v5081_v50  ;;  %v5184_v13 = vsub.s32 4, %v16331_v10  ;;  %v5900_v26 = vshrl.u32 %v5882_v7, %v5898_v38 }
 0x6bd   : > { %v5903_v56 = vadd.s32 127, %v5902_v60  ;;  %v4988_v37 = vsel %vm4986_vm3, %v16326_v12, %v4987_v62  ;;  %v4991_v17 = vsel %vm4989_vm14, %v4990_v54, %v16324_v0  ;;  %v5087_v11 = vadd.s32 3, %v5083_v42  ;;  %v16341_v12 = vld [vmem:[#allocation25_spill] sm:$0xff]  ;;  %v16342_v60 = vld [vmem:[#allocation27_spill] sm:$0xff] }
 0x6be   : > { %v4992_v6 = vsel %vm4985_vm4, %v4988_v37, %v4991_v17  ;;  %v5094_v18 = vxor.u32 2147483648, %v13453_v14  ;;  %vm16333_vm12 = vcmp.lt.s32.totalorder %v16332_v15, 0  ;;  %v5901_v21 = vor.u32 %v5900_v26, %v5899_v30 }
 0x6bf   : > { %v5185_v3 = vsel %vm16333_vm12, %v5184_v13, %v16331_v10  ;;  %v5904_v46 = vshll.u32 %v5903_v56, 23  ;;  %v4993_v61 = vsel %vm4982_vm15, nan, %v4992_v6  ;;  %vm5828_vm8 = vcmp.lt.s32.totalorder %v13516_v52, 0 }
 0x6c0   : > { %v5187_v7 = vsel %vm13182_vm7, 0, %v5185_v3  ;;  %8608 = vmatmul.mubr.msk.f32.gmra.mxu1 %vm16335_vm9, %v4993_v61  ;;  %vm5086_vm0 = vweird.f32 %v16328_v58  ;;  %v5088_v23 = vand.u32 3, %v5087_v11  ;;  %v5195_v0 = vxor.u32 2147483648, %v16336_v33  ;;  %v16346_v11 = vld [vmem:[#allocation14_spill] sm:$0xff]  ;;  %v16348_v3 = vld [vmem:[#allocation53_spill] sm:$0xff] }
 0x6c1   : > { %v5191_v45 = vadd.s32 3, %v5187_v7  ;;  %v16337_v62 = vand.u32 2147483647, %v13516_v52  ;;  %v5905_v43 = vor.u32 4788187, %v5904_v46  ;;  %v5908_v22 = vcvt.s32.f32 %v5901_v21  ;;  %v16349_v46 = vld [vmem:[#allocation47_spill] sm:$0xff] }
 0x6c2   : > { %v5198_v32 = vxor.u32 2147483648, %v16340_v5  ;;  %v5288_v54 = vsub.s32 4, %v16341_v12  ;;  %vm5089_vm7 = vcmp.lt.s32.totalorder %v5088_v23, 2  ;;  %vm5090_vm15 = vcmp.eq.s32.totalorder %v5088_v23, 0  ;;  %v16350_v7 = vld [vmem:[#allocation15_spill] sm:$0xff] }
 0x6c3   : > { %vm13901_vm13 = vcmp.le.f32.partialorder %v16337_v62, 0.7853982  ;;  %vm5093_vm4 = vcmp.eq.s32.totalorder %v5088_v23, 2  ;;  %v5192_v41 = vand.u32 3, %v5191_v45  ;;  %v5906_v50 = vand.u32 2147483647, %v5905_v43 }
 0x6c4   : > { %v5092_v38 = vsel %vm5090_vm15, %v13453_v14, %v5091_v2  ;;  %v5095_v30 = vsel %vm5093_vm4, %v5094_v18, %v13457_v20  ;;  %vm16343_vm3 = vcmp.lt.s32.totalorder %v16342_v60, 0  ;;  %9079 = vcosq.f32 %v13870_v31  ;;  %v16355_v43 = vld [vmem:[#allocation52_spill] sm:$0xff] }
 0x6c5   : > { %v5289_v39 = vsel %vm16343_vm3, %v5288_v54, %v16341_v12  ;;  %v5096_v42 = vsel %vm5089_vm7, %v5092_v38, %v5095_v30  ;;  %vm5193_vm14 = vcmp.lt.s32.totalorder %v5192_v41, 2  ;;  %vm5194_vm12 = vcmp.eq.s32.totalorder %v5192_v41, 0 }
 0x6c6   : > { %vm5197_vm9 = vcmp.eq.s32.totalorder %v5192_v41, 2  ;;  %v5909_v10 = vmul.f32 %v5908_v22, %v5906_v50  ;;  %v5097_v13 = vsel %vm5086_vm0, nan, %v5096_v42  ;;  %v5196_v26 = vsel %vm5194_vm12, %v16340_v5, %v5195_v0  ;;  %v16353_v0 = vld [vmem:[#allocation17_spill] sm:$0xff] }
 0x6c7   : > { %v5199_v56 = vsel %vm5197_vm9, %v5198_v32, %v16336_v33  ;;  %vm16344_vm15 = vcmask 261120   ;;  %vm5190_vm4 = vweird.f32 %v16332_v15  ;;  %v5291_v2 = vsel %vm13392_vm10, 0, %v5289_v39  ;;  %v16356_v5 = vld [vmem:[#allocation49_spill] sm:$0xff] }
 0x6c8   : > { %8610 = vmatprep.mubr.msk.f32.mxu1 %vm16344_vm15, %v5097_v13  ;;  %v5200_v14 = vsel %vm5193_vm14, %v5196_v26, %v5199_v56  ;;  %v5910_v37 = vxor.u32 2147483648, %v5909_v10  ;;  %v5295_v6 = vadd.s32 3, %v5291_v2  ;;  %v5392_v58 = vsub.s32 4, %v16346_v11  ;;  %vm16347_vm0 = vmmov %vm16344_vm15  ;;  %v16358_v39 = vld [vmem:[#allocation45_spill] sm:$0xff] }
 0x6c9   : > { %v5201_v17 = vsel %vm5190_vm4, nan, %v5200_v14  ;;  %9081 = vsinq.f32 %v13870_v31  ;;  %v5299_v18 = vxor.u32 2147483648, %v13564_v36  ;;  %v5302_v21 = vxor.u32 2147483648, %v16348_v3  ;;  %vm16359_vm4 = vmmov %vm16347_vm0  ;;  %v16360_v14 = vld [vmem:[#allocation19_spill] sm:$0xff] }
 0x6ca   : > { %8611 = vmatmul.mubr.msk.f32.gmra.mxu1 %vm16347_vm0, %v5201_v17  ;;  %v5496_v61 = vsub.s32 4, %v16349_v46  ;;  %v5911_v15 = vsel %vm5828_vm8, %v5910_v37, %v5909_v10  ;;  %vm5294_vm10 = vweird.f32 %v16342_v60  ;;  %v5296_v19 = vand.u32 3, %v5295_v6  ;;  %v16362_v6 = vld [vmem:[#allocation50_spill] sm:$0xff] }
 0x6cb   : > { %vm16351_vm7 = vcmp.lt.s32.totalorder %v16350_v7, 0  ;;  %v5914_v31 = vsel %vm13901_vm13, %v13516_v52, %v5911_v15  ;;  %vm5398_vm3 = vweird.f32 %v16350_v7  ;;  %vm16354_vm14 = vcmp.lt.s32.totalorder %v16353_v0, 0 }
 0x6cc   : > { %v5393_v23 = vsel %vm16351_vm7, %v5392_v58, %v16346_v11  ;;  %v5497_v62 = vsel %vm16354_vm14, %v5496_v61, %v16349_v46  ;;  %vm5298_vm12 = vcmp.eq.s32.totalorder %v5296_v19, 0  ;;  %vm5301_vm9 = vcmp.eq.s32.totalorder %v5296_v19, 2 }
 0x6cd   : > { %v5395_v33 = vsel %vm13354_vm6, 0, %v5393_v23  ;;  %v5403_v22 = vxor.u32 2147483648, %v16355_v43  ;;  %v5406_v32 = vxor.u32 2147483648, %v16356_v5  ;;  %vm5297_vm15 = vcmp.lt.s32.totalorder %v5296_v19, 2 }
 0x6ce   : > { %v5300_v12 = vsel %vm5298_vm12, %v16348_v3, %v5299_v18  ;;  %v5303_v54 = vsel %vm5301_vm9, %v5302_v21, %v13564_v36  ;;  %v5399_v41 = vadd.s32 3, %v5395_v33  ;;  %vm5502_vm6 = vweird.f32 %v16353_v0 }
 0x6cf   : > { %9083 = vcosq.f32 %v5914_v31  ;;  %v5304_v50 = vsel %vm5297_vm15, %v5300_v12, %v5303_v54  ;;  %v5499_v30 = vsel %vm13555_vm5, 0, %v5497_v62  ;;  %v5600_v42 = vsub.s32 4, %v16358_v39 }
 0x6d0   : > { %9085 = vsinq.f32 %v5914_v31  ;;  %v5305_v10 = vsel %vm5294_vm10, nan, %v5304_v50  ;;  %v5400_v13 = vand.u32 3, %v5399_v41  ;;  %v5503_v26 = vadd.s32 3, %v5499_v30 }
 0x6d1   : > { %8613 = vmatprep.mubr.msk.f32.mxu1 %vm16359_vm4, %v5305_v10  ;;  %v5507_v36 = vxor.u32 2147483648, %v13734_v35  ;;  %v5510_v56 = vxor.u32 2147483648, %v13726_v27  ;;  %vm16361_vm0 = vcmp.lt.s32.totalorder %v16360_v14, 0  ;;  %v5704_v2 = vsub.s32 4, %v13629_v48  ;;  %v13966_v3 = vpop.eup %9079 }
 0x6d2   : > { %v5601_v20 = vsel %vm16361_vm0, %v5600_v42, %v16358_v39  ;;  %vm5401_vm5 = vcmp.lt.s32.totalorder %v5400_v13, 2  ;;  %vm5402_vm7 = vcmp.eq.s32.totalorder %v5400_v13, 0  ;;  %vm5405_vm14 = vcmp.eq.s32.totalorder %v5400_v13, 2 }
 0x6d3   : > { %v5504_v37 = vand.u32 3, %v5503_v26  ;;  %v5404_v60 = vsel %vm5402_vm7, %v16356_v5, %v5403_v22  ;;  %v5407_v17 = vsel %vm5405_vm14, %v5406_v32, %v16355_v43  ;;  %vm16363_vm10 = vnez %v16362_v6  ;;  %v16368_v22 = vld [vmem:[#allocation51_spill] sm:$0xff] }
 0x6d4   : > { %v5603_v11 = vsel %vm16363_vm10, 0, %v5601_v20  ;;  %vm16364_vm12 = vcmp.lt.s32.totalorder %v13407_v16, 0  ;;  %v5408_v18 = vsel %vm5401_vm5, %v5404_v60, %v5407_v17  ;;  %vm16365_vm0 = vcmask 261120  }
 0x6d5   : > { %v5705_v58 = vsel %vm16364_vm12, %v5704_v2, %v13629_v48  ;;  %vm5505_vm9 = vcmp.lt.s32.totalorder %v5504_v37, 2  ;;  %vm5506_vm15 = vcmp.eq.s32.totalorder %v5504_v37, 0  ;;  %vm5509_vm4 = vcmp.eq.s32.totalorder %v5504_v37, 2  ;;  %v16366_v48 = vld [vmem:[#allocation55_spill] sm:$0xff] }
 0x6d6   : > { %v5409_v21 = vsel %vm5398_vm3, nan, %v5408_v18  ;;  %v5508_v46 = vsel %vm5506_vm15, %v13726_v27, %v5507_v36  ;;  %v5511_v61 = vsel %vm5509_vm4, %v5510_v56, %v13734_v35  ;;  %v5607_v15 = vadd.s32 3, %v5603_v11  ;;  %v13977_v33 = vpop.eup %9081  ;;  %vm16367_vm3 = vmmov %vm16365_vm0 }
 0x6d7   : > { %8614 = vmatmul.mubr.msk.f32.gmra.mxu1 %vm16365_vm0, %v5409_v21  ;;  %v5512_v19 = vsel %vm5505_vm9, %v5508_v46, %v5511_v61  ;;  %v5611_v23 = vxor.u32 2147483648, %v13639_v4  ;;  %v5614_v31 = vxor.u32 2147483648, %v16366_v48  ;;  %v5707_v45 = vsel %vm13738_vm2, 0, %v5705_v58  ;;  %vm16371_vm4 = vmmov %vm16365_vm0 }
 0x6d8   : > { %v5513_v7 = vsel %vm5502_vm6, nan, %v5512_v19  ;;  %v5608_v62 = vand.u32 3, %v5607_v15  ;;  %v5711_v27 = vadd.s32 3, %v5707_v45  ;;  %vm5606_vm5 = vweird.f32 %v16360_v14  ;;  %v14029_v19 = vld [vmem:[%s15565_s8] ss:$0 sm:$0xff] }
 0x6d9   : > { %8616 = vmatprep.mubr.msk.f32.mxu1 %vm16367_vm3, %v5513_v7  ;;  %v5715_v35 = vxor.u32 2147483648, %v13861_v34  ;;  %v5718_v43 = vxor.u32 2147483648, %v13851_v47  ;;  %v5808_v5 = vsub.s32 4, %v16368_v22  ;;  %vm16369_vm6 = vcmp.lt.s32.totalorder %v13266_v1, 0 }
 0x6da   : > { %vm5609_vm7 = vcmp.lt.s32.totalorder %v5608_v62, 2  ;;  %vm5610_vm14 = vcmp.eq.s32.totalorder %v5608_v62, 0  ;;  %vm5613_vm2 = vcmp.eq.s32.totalorder %v5608_v62, 2  ;;  %v5712_v49 = vand.u32 3, %v5711_v27 }
 0x6db   : > { %v5612_v32 = vsel %vm5610_vm14, %v16366_v48, %v5611_v23  ;;  %v5615_v0 = vsel %vm5613_vm2, %v5614_v31, %v13639_v4  ;;  %v5809_v12 = vsel %vm16369_vm6, %v5808_v5, %v16368_v22  ;;  %v5912_v54 = vsub.s32 4, %v13810_v44 }
 0x6dc   : > { %v5616_v41 = vsel %vm5609_vm7, %v5612_v32, %v5615_v0  ;;  %vm5713_vm10 = vcmp.lt.s32.totalorder %v5712_v49, 2  ;;  %vm5714_vm12 = vcmp.eq.s32.totalorder %v5712_v49, 0  ;;  %vm5717_vm9 = vcmp.eq.s32.totalorder %v5712_v49, 2  ;;  %v9084_v50 = vpop.eup %9083 }
 0x6dd   : > { %v5617_v38 = vsel %vm5606_vm5, nan, %v5616_v41  ;;  %v5716_v30 = vsel %vm5714_vm12, %v13851_v47, %v5715_v35  ;;  %v5719_v39 = vsel %vm5717_vm9, %v5718_v43, %v13861_v34  ;;  %vm16370_vm15 = vnez %v16293_v8  ;;  %v9086_v42 = vpop.eup %9085 }
 0x6de   : > { %v5811_v4 = vsel %vm16370_vm15, 0, %v5809_v12  ;;  %8617 = vmatmul.mubr.msk.f32.gmra.mxu1 %vm16371_vm4, %v5617_v38  ;;  %vm5710_vm0 = vweird.f32 %v13407_v16  ;;  %v5720_v10 = vsel %vm5713_vm10, %v5716_v30, %v5719_v39  ;;  %v5913_v26 = vsel %vm5828_vm8, %v5912_v54, %v13810_v44  ;;  %vm16372_vm10 = vmmov %vm16367_vm3 }
 0x6df   : > { %v5815_v13 = vadd.s32 3, %v5811_v4  ;;  %v5721_v36 = vsel %vm5710_vm0, nan, %v5720_v10  ;;  %v5819_v56 = vxor.u32 2147483648, %v13821_v59  ;;  %v5822_v47 = vxor.u32 2147483648, %v13745_v55 }
 0x6e0   : > { %v5915_v8 = vsel %vm13901_vm13, 0, %v5913_v26  ;;  %8619 = vmatprep.mubr.msk.f32.mxu1 %vm16367_vm3, %v5721_v36  ;;  %v6016_v16 = vsub.s32 4, %v13713_v53  ;;  %v5923_v20 = vxor.u32 2147483648, %v9086_v42  ;;  %v5926_v2 = vxor.u32 2147483648, %v9084_v50 }
 0x6e1   : > { %v5816_v34 = vand.u32 3, %v5815_v13  ;;  %v5919_v14 = vadd.s32 3, %v5915_v8  ;;  %vm5814_vm5 = vweird.f32 %v13266_v1  ;;  %vm5918_vm12 = vweird.f32 %v13516_v52 }
 0x6e2   : > { %v6017_v9 = vsel %vm5932_vm1, %v6016_v16, %v13713_v53  ;;  %v6027_v21 = vxor.u32 2147483648, %v13977_v33  ;;  %v6030_v53 = vxor.u32 2147483648, %v13966_v3  ;;  %vm16373_vm1 = vmmov %vm16367_vm3 }
 0x6e3   : > { %vm5818_vm7 = vcmp.eq.s32.totalorder %v5816_v34, 0  ;;  %vm5821_vm8 = vcmp.eq.s32.totalorder %v5816_v34, 2  ;;  %v5920_v44 = vand.u32 3, %v5919_v14  ;;  %vm5817_vm14 = vcmp.lt.s32.totalorder %v5816_v34, 2  ;;  %vm16374_vm0 = vmmov %vm16373_vm1 }
 0x6e4   : > { %v5820_v37 = vsel %vm5818_vm7, %v13745_v55, %v5819_v56  ;;  %v5823_v60 = vsel %vm5821_vm8, %v5822_v47, %v13821_v59  ;;  %v6019_v1 = vsel %vm13827_vm11, 0, %v6017_v9  ;;  %vm6022_vm11 = vweird.f32 %v13430_v51 }
 0x6e5   : > { %v5824_v17 = vsel %vm5817_vm14, %v5820_v37, %v5823_v60  ;;  %vm5921_vm13 = vcmp.lt.s32.totalorder %v5920_v44, 2  ;;  %vm5922_vm2 = vcmp.eq.s32.totalorder %v5920_v44, 0  ;;  %vm5925_vm6 = vcmp.eq.s32.totalorder %v5920_v44, 2 }
 0x6e6   : > { %v5825_v6 = vsel %vm5814_vm5, nan, %v5824_v17  ;;  %v5924_v11 = vsel %vm5922_vm2, %v9084_v50, %v5923_v20  ;;  %v5927_v58 = vsel %vm5925_vm6, %v5926_v2, %v9086_v42  ;;  %v6023_v59 = vadd.s32 3, %v6019_v1 }
 0x6e7   : > { %8620 = vmatmul.mubr.msk.f32.gmra.mxu1 %vm16372_vm10, %v5825_v6  ;;  %v5928_v55 = vsel %vm5921_vm13, %v5924_v11, %v5927_v58 }
 0x6e8   : > { %v5929_v18 = vsel %vm5918_vm12, nan, %v5928_v55  ;;  %v6024_v46 = vand.u32 3, %v6023_v59 }
 0x6e9   : > { %8622 = vmatprep.mubr.msk.f32.mxu1 %vm16373_vm1, %v5929_v18 }
 0x6ea   : > { %vm6026_vm9 = vcmp.eq.s32.totalorder %v6024_v46, 0  ;;  %vm6029_vm15 = vcmp.eq.s32.totalorder %v6024_v46, 2  ;;  %vm6025_vm4 = vcmp.lt.s32.totalorder %v6024_v46, 2 }
 0x6eb   : > { %v6028_v63 = vsel %vm6026_vm9, %v13966_v3, %v6027_v21  ;;  %v6031_v61 = vsel %vm6029_vm15, %v6030_v53, %v13977_v33 }
 0x6ec   : > { %v6032_v52 = vsel %vm6025_vm4, %v6028_v63, %v6031_v61 }
 0x6ed   : > { %v6033_v15 = vsel %vm6022_vm11, nan, %v6032_v52 }
 0x6ee   : > { %8623 = vmatmul.mubr.msk.f32.gmra.mxu1 %vm16374_vm0, %v6033_v15 }
 0x768   : > { %v8603_v23 = vpop.f32.mrf.mxu1 }
 0x769   : > { %v14032_v48 = vadd.f32 %v8603_v23, %v14029_v19 }
 0x76a   : > { %v6154_v31 = vpop.f32.mrf.mxu1 }
 0x76b   : > { %v6337_v3 = vand.u32 2147483647, %v14032_v48  ;;  %v6340_v45 = vand.u32 2139095040, %v14032_v48  ;;  %v14037_v51 = vadd.f32 %v14029_v19, %v6154_v31 }
 0x76d   : > { %v6341_v33 = vshrl.u32 %v6340_v45, 23  ;;  %v6344_v7 = vand.u32 8388607, %v6337_v3  ;;  %v6233_v62 = vand.u32 2147483647, %v14037_v51  ;;  %v6236_v27 = vand.u32 2139095040, %v14037_v51 }
 0x76f   : > { %v8353_v35 = vadd.s32 4294967169, %v6341_v33  ;;  %v6237_v43 = vshrl.u32 %v6236_v27, 23  ;;  %v6240_v22 = vand.u32 8388607, %v6233_v62  ;;  %v6345_v49 = vor.u32 8388608, %v6344_v7 }
 0x771   : > { %v6347_v5 = vadd.s32 1, %v8353_v35  ;;  %v8349_v32 = vadd.s32 4294967169, %v6237_v43  ;;  %v6241_v0 = vor.u32 8388608, %v6240_v22  ;;  %v14045_v38 = vshll.u32 %v6345_v49, 8 }
 0x773   : > { %vm6348_vm3 = vcmp.gt.s32.totalorder %v6347_v5, 0  ;;  %v6243_v54 = vadd.s32 1, %v8349_v32  ;;  %v14048_v4 = vshll.u32 %v6241_v0, 8 }
 0x774   : > { %v6349_v12 = vsel %vm6348_vm3, %v6347_v5, 0 }
 0x775   : > { %v6350_v41 = vshrl.u32 %v6349_v12, 5  ;;  %v6351_v50 = vand.u32 31, %v6349_v12  ;;  %vm6244_vm5 = vcmp.gt.s32.totalorder %v6243_v54, 0 }
 0x776   : > { %v6245_v44 = vsel %vm6244_vm5, %v6243_v54, 0  ;;  %v8606_v17 = vpop.f32.mrf.mxu1 }
 0x777   : > { %v6352_v30 = vsub.s32 32, %v6351_v50  ;;  %v6354_v39 = vshll.u32 %v16071_v29, %v6351_v50  ;;  %v6357_v42 = vshll.u32 %v16072_v25, %v6351_v50  ;;  %v6360_v10 = vshll.u32 %v16073_v40, %v6351_v50 }
 0x778   : > { %v6363_v13 = vshll.u32 %v16074_v57, %v6351_v50  ;;  %v6366_v26 = vshll.u32 %v16075_v24, %v6351_v50  ;;  %vm6369_vm7 = vcmp.lt.s32.totalorder %v6350_v41, 1  ;;  %vm6371_vm8 = vcmp.lt.s32.totalorder %v6350_v41, 3 }
 0x779   : > { %v6355_v36 = vshrl.u32 %v16072_v25, %v6352_v30  ;;  %v6358_v56 = vshrl.u32 %v16073_v40, %v6352_v30  ;;  %v6361_v47 = vshrl.u32 %v16074_v57, %v6352_v30  ;;  %v6353_v8 = vshrl.u32 %v16071_v29, %v6352_v30 }
 0x77a   : > { %v6364_v34 = vshrl.u32 %v16075_v24, %v6352_v30  ;;  %v6367_v14 = vshrl.u32 %v16076_v28, %v6352_v30  ;;  %vm6372_vm14 = vcmp.lt.s32.totalorder %v6350_v41, 4  ;;  %v6247_v9 = vand.u32 31, %v6245_v44 }
 0x77b   : > { %v6356_v16 = vor.u32 %v6355_v36, %v6354_v39  ;;  %v6359_v20 = vor.u32 %v6358_v56, %v6357_v42  ;;  %v6362_v2 = vor.u32 %v6361_v47, %v6360_v10  ;;  %vm6370_vm13 = vcmp.lt.s32.totalorder %v6350_v41, 2 }
 0x77c   : > { %v6365_v37 = vor.u32 %v6364_v34, %v6363_v13  ;;  %v6368_v60 = vor.u32 %v6367_v14, %v6366_v26  ;;  %v6248_v21 = vsub.s32 32, %v6247_v9  ;;  %v14068_v63 = vadd.f32 %v8606_v17, %v14029_v19 }
 0x77d   : > { %v6373_v6 = vsel %vm6369_vm7, %v6353_v8, %v6356_v16  ;;  %v6374_v11 = vsel %vm6372_vm14, %v6362_v2, 2102212464  ;;  %v6377_v58 = vsel %vm6369_vm7, %v6356_v16, %v6359_v20  ;;  %v6381_v1 = vsel %vm6369_vm7, %v6359_v20, %v6362_v2 }
 0x77e   : > { %v6375_v55 = vsel %vm6371_vm8, %v6359_v20, %v6374_v11  ;;  %v6378_v59 = vsel %vm6372_vm14, %v6365_v37, 920167782  ;;  %v6382_v18 = vsel %vm6372_vm14, %v6368_v60, 1326507024  ;;  %v6246_v23 = vshrl.u32 %v6245_v44, 5  ;;  %v6164_v11 = vpop.f32.mrf.mxu1 }
 0x77f   : > { %v6379_v53 = vsel %vm6371_vm8, %v6362_v2, %v6378_v59  ;;  %v6383_v46 = vsel %vm6371_vm8, %v6365_v37, %v6382_v18  ;;  %v6376_v61 = vsel %vm6370_vm13, %v6373_v6, %v6375_v55  ;;  %v6250_v27 = vshll.u32 %v16071_v29, %v6247_v9 }
 0x780   : > { %v6380_v52 = vsel %vm6370_vm13, %v6377_v58, %v6379_v53  ;;  %v6384_v15 = vsel %vm6370_vm13, %v6381_v1, %v6383_v46  ;;  %v6251_v35 = vshrl.u32 %v16072_v25, %v6248_v21  ;;  %v6253_v43 = vshll.u32 %v16072_v25, %v6247_v9 }
 0x781   : > { %v14071_v31 = vmul.u32.u64.low %v14045_v38, %v6384_v15  ;;  %v14072_v45 = vmul.u32.u64.high %v14045_v38, %v6384_v15, %v14071_v31  ;;  %v14075_v33 = vmul.u32.u64.low %v14045_v38, %v6380_v52  ;;  %v14076_v7 = vmul.u32.u64.high %v14045_v38, %v6380_v52, %v14075_v33 }
 0x782   : > { %v6254_v22 = vshrl.u32 %v16073_v40, %v6248_v21  ;;  %v6256_v5 = vshll.u32 %v16073_v40, %v6247_v9  ;;  %v6257_v49 = vshrl.u32 %v16074_v57, %v6248_v21  ;;  %v6259_v32 = vshll.u32 %v16074_v57, %v6247_v9 }
 0x783   : > { %v6260_v0 = vshrl.u32 %v16075_v24, %v6248_v21  ;;  %v6252_v12 = vor.u32 %v6251_v35, %v6250_v27  ;;  %v6262_v41 = vshll.u32 %v16075_v24, %v6247_v9  ;;  %v6263_v50 = vshrl.u32 %v16076_v28, %v6248_v21 }
 0x784   : > { %v6255_v54 = vor.u32 %v6254_v22, %v6253_v43  ;;  %v6392_v30 = vmul.u32 %v14045_v38, %v6376_v61  ;;  %vm6394_vm2 = vc.u32 %v14072_v45, %v14075_v33  ;;  %v6395_v39 = vadd.s32 1, %v14076_v7 }
 0x785   : > { %v6258_v42 = vor.u32 %v6257_v49, %v6256_v5  ;;  %v6249_v10 = vshrl.u32 %v16071_v29, %v6248_v21  ;;  %v6261_v13 = vor.u32 %v6260_v0, %v6259_v32  ;;  %v6264_v26 = vor.u32 %v6263_v50, %v6262_v41 }
 0x786   : > { %vm6265_vm6 = vcmp.lt.s32.totalorder %v6246_v23, 1  ;;  %v6396_v36 = vsel %vm6394_vm2, %v6395_v39, %v14076_v7  ;;  %vm6267_vm10 = vcmp.lt.s32.totalorder %v6246_v23, 3  ;;  %vm6268_vm12 = vcmp.lt.s32.totalorder %v6246_v23, 4 }
 0x787   : > { %v6273_v56 = vsel %vm6265_vm6, %v6252_v12, %v6255_v54  ;;  %v6397_v47 = vadd.s32 %v6396_v36, %v6392_v30  ;;  %v6270_v8 = vsel %vm6268_vm12, %v6258_v42, 2102212464  ;;  %v6274_v34 = vsel %vm6268_vm12, %v6261_v13, 920167782 }
 0x788   : > { %v6277_v38 = vsel %vm6265_vm6, %v6255_v54, %v6258_v42  ;;  %vm6266_vm1 = vcmp.lt.s32.totalorder %v6246_v23, 2  ;;  %v6269_v14 = vsel %vm6265_vm6, %v6249_v10, %v6252_v12  ;;  %v6275_v16 = vsel %vm6267_vm10, %v6258_v42, %v6274_v34 }
 0x789   : > { %v6278_v20 = vsel %vm6268_vm12, %v6264_v26, 1326507024  ;;  %v6398_v2 = vadd.s32 536870912, %v6397_v47  ;;  %v6271_v44 = vsel %vm6267_vm10, %v6255_v54, %v6270_v8  ;;  %v6276_v37 = vsel %vm6266_vm1, %v6273_v56, %v6275_v16  ;;  %v8609_v54 = vpop.f32.mrf.mxu1 }
 0x78a   : > { %v6279_v60 = vsel %vm6267_vm10, %v6261_v13, %v6278_v20  ;;  %v14096_v17 = vmul.u32.u64.low %v14048_v4, %v6276_v37  ;;  %v14097_v6 = vmul.u32.u64.high %v14048_v4, %v6276_v37, %v14096_v17  ;;  %v6272_v59 = vsel %vm6266_vm1, %v6269_v14, %v6271_v44 }
 0x78b   : > { %v6280_v9 = vsel %vm6266_vm1, %v6277_v38, %v6279_v60  ;;  %v14100_v58 = vshrl.u32 %v6398_v2, 30  ;;  %v6545_v18 = vand.u32 2147483647, %v14068_v63  ;;  %v6548_v21 = vand.u32 2139095040, %v14068_v63 }
 0x78c   : > { %v14103_v1 = vmul.u32.u64.low %v14048_v4, %v6280_v9  ;;  %v14104_v55 = vmul.u32.u64.high %v14048_v4, %v6280_v9, %v14103_v1  ;;  %v14110_v46 = vadd.f32 %v14029_v19, %v6164_v11  ;;  %v6291_v61 = vadd.s32 1, %v14097_v6 }
 0x78d   : > { %v6400_v53 = vshll.u32 %v14100_v58, 30  ;;  %v6549_v52 = vshrl.u32 %v6548_v21, 23  ;;  %v6288_v23 = vmul.u32 %v14048_v4, %v6272_v59  ;;  %v6552_v27 = vand.u32 8388607, %v6545_v18 }
 0x78e   : > { %16375 = vst [vmem:[#allocation7_spill] sm:$0xff] %v14110_v46  ;;  %vm6290_vm9 = vc.u32 %v14104_v55, %v14096_v17  ;;  %v6444_v22 = vand.u32 2139095040, %v14110_v46  ;;  %v6441_v4 = vand.u32 2147483647, %v14110_v46  ;;  %v6393_v42 = vadd.s32 %v14075_v33, %v14072_v45 }
 0x78f   : > { %v14113_v15 = vsub.s32 %v6397_v47, %v6400_v53  ;;  %v6292_v31 = vsel %vm6290_vm9, %v6291_v61, %v14097_v6  ;;  %v8361_v7 = vadd.s32 4294967169, %v6549_v52  ;;  %v6553_v0 = vor.u32 8388608, %v6552_v27 }
 0x790   : > { %v6293_v43 = vadd.s32 %v6292_v31, %v6288_v23  ;;  %v6445_v12 = vshrl.u32 %v6444_v22, 23  ;;  %v14131_v26 = vadd.f32 %v8609_v54, %v14029_v19  ;;  %v14137_v8 = vand.u32 8388607, %v6441_v4 }
 0x791   : > { %v6403_v35 = vsub.s32 0, %v14113_v15  ;;  %v6555_v5 = vadd.s32 1, %v8361_v7  ;;  %v14133_v56 = vshll.u32 %v6553_v0, 8 }
 0x792   : > { %v6294_v32 = vadd.s32 536870912, %v6293_v43  ;;  %16376 = vst [vmem:[#allocation5_spill] sm:$0xff] %v14131_v26  ;;  %v8357_v47 = vadd.s32 4294967169, %v6445_v12  ;;  %v6753_v31 = vand.u32 2147483647, %v14131_v26  ;;  %v6756_v7 = vand.u32 2139095040, %v14131_v26 }
 0x793   : > { %v8354_v49 = vmin.u32 %v6403_v35, %v14113_v15  ;;  %vm6556_vm15 = vcmp.gt.s32.totalorder %v6555_v5, 0 }
 0x794   : > { %v14125_v50 = vshrl.u32 %v6294_v32, 30  ;;  %v6557_v30 = vsel %vm6556_vm15, %v6555_v5, 0  ;;  %v6451_v22 = vadd.s32 1, %v8357_v47  ;;  %vm15856_vm15 = vcmp.lt.s32.totalorder %v14032_v48, 0 }
 0x795   : > { %v6405_v41 = vclz %v8354_v49  ;;  %v6559_v39 = vand.u32 31, %v6557_v30  ;;  %v6558_v38 = vshrl.u32 %v6557_v30, 5 }
 0x796   : > { %v6296_v13 = vshll.u32 %v14125_v50, 30  ;;  %vm6452_vm8 = vcmp.gt.s32.totalorder %v6451_v22, 0 }
 0x797   : > { %v8355_v10 = vadd.s32 4294967294, %v6405_v41  ;;  %v6560_v36 = vsub.s32 32, %v6559_v39  ;;  %v6562_v45 = vshll.u32 %v16071_v29, %v6559_v39  ;;  %v6565_v16 = vshll.u32 %v16072_v25, %v6559_v39 }
 0x798   : > { %v14139_v34 = vsub.s32 %v6293_v43, %v6296_v13  ;;  %v6568_v44 = vshll.u32 %v16073_v40, %v6559_v39  ;;  %v6571_v37 = vshll.u32 %v16074_v57, %v6559_v39  ;;  %v6574_v60 = vshll.u32 %v16075_v24, %v6559_v39 }
 0x799   : > { %vm8356_vm4 = vcmp.lt.s32.totalorder %v8355_v10, 0  ;;  %v6563_v14 = vshrl.u32 %v16072_v25, %v6560_v36  ;;  %v6566_v20 = vshrl.u32 %v16073_v40, %v6560_v36  ;;  %v6569_v11 = vshrl.u32 %v16074_v57, %v6560_v36 }
 0x79a   : > { %v6408_v33 = vsel %vm8356_vm4, 0, %v8355_v10  ;;  %v6299_v2 = vsub.s32 0, %v14139_v34  ;;  %v6572_v1 = vshrl.u32 %v16075_v24, %v6560_v36  ;;  %v6575_v61 = vshrl.u32 %v16076_v28, %v6560_v36 }
 0x79b   : > { %v6409_v9 = vsub.s32 32, %v6408_v33  ;;  %v6413_v6 = vsub.s32 4294967266, %v6408_v33  ;;  %v6564_v21 = vor.u32 %v6563_v14, %v6562_v45  ;;  %v6567_v53 = vor.u32 %v6566_v20, %v6565_v16 }
 0x79c   : > { %v8350_v59 = vmin.u32 %v6299_v2, %v14139_v34  ;;  %v6570_v52 = vor.u32 %v6569_v11, %v6568_v44  ;;  %v6573_v23 = vor.u32 %v6572_v1, %v6571_v37  ;;  %v6576_v35 = vor.u32 %v6575_v61, %v6574_v60  ;;  %v6174_v60 = vpop.f32.mrf.mxu1 }
 0x79d   : > { %v6449_v43 = vor.u32 8388608, %v14137_v8  ;;  %v6411_v5 = vshrl.u32 %v6393_v42, %v6409_v9  ;;  %v6561_v49 = vshrl.u32 %v16071_v29, %v6560_v36  ;;  %vm6577_vm11 = vcmp.lt.s32.totalorder %v6558_v38, 1 }
 0x79e   : > { %v6301_v27 = vclz %v8350_v59  ;;  %vm6580_vm0 = vcmp.lt.s32.totalorder %v6558_v38, 4  ;;  %v6414_v32 = vadd.s32 127, %v6413_v6  ;;  %v6585_v54 = vsel %vm6577_vm11, %v6564_v21, %v6567_v53 }
 0x79f   : > { %v6582_v12 = vsel %vm6580_vm0, %v6570_v52, 2102212464  ;;  %vm6578_vm3 = vcmp.lt.s32.totalorder %v6558_v38, 2  ;;  %vm6579_vm5 = vcmp.lt.s32.totalorder %v6558_v38, 3  ;;  %v6586_v41 = vsel %vm6580_vm0, %v6573_v23, 920167782 }
 0x7a0   : > { %v8351_v0 = vadd.s32 4294967294, %v6301_v27  ;;  %v6590_v30 = vsel %vm6580_vm0, %v6576_v35, 1326507024  ;;  %v6581_v39 = vsel %vm6577_vm11, %v6561_v49, %v6564_v21  ;;  %v6587_v10 = vsel %vm6579_vm5, %v6570_v52, %v6586_v41 }
 0x7a1   : > { %v6589_v13 = vsel %vm6577_vm11, %v6567_v53, %v6570_v52  ;;  %v6583_v8 = vsel %vm6579_vm5, %v6567_v53, %v6582_v12  ;;  %v6588_v42 = vsel %vm6578_vm3, %v6585_v54, %v6587_v10  ;;  %v6591_v47 = vsel %vm6579_vm5, %v6573_v23, %v6590_v30 }
 0x7a2   : > { %vm8352_vm7 = vcmp.lt.s32.totalorder %v8351_v0, 0  ;;  %v6410_v36 = vshll.u32 %v14113_v15, %v6408_v33  ;;  %v6757_v16 = vshrl.u32 %v6756_v7, 23  ;;  %v14161_v20 = vand.u32 8388607, %v6753_v31 }
 0x7a3   : > { %v6304_v45 = vsel %vm8352_vm7, 0, %v8351_v0  ;;  %v6592_v2 = vsel %vm6578_vm3, %v6589_v13, %v6591_v47  ;;  %v14165_v44 = vmul.u32.u64.low %v14133_v56, %v6588_v42  ;;  %v14166_v37 = vmul.u32.u64.high %v14133_v56, %v6588_v42, %v14165_v44 }
 0x7a4   : > { %v6309_v14 = vsub.s32 4294967266, %v6304_v45  ;;  %v6412_v9 = vor.u32 %v6411_v5, %v6410_v36  ;;  %v6415_v6 = vshll.u32 %v6414_v32, 23  ;;  %v6584_v11 = vsel %vm6578_vm3, %v6581_v39, %v6583_v8 }
 0x7a5   : > { %v6453_v15 = vsel %vm6452_vm8, %v6451_v22, 0  ;;  %v6305_v33 = vsub.s32 32, %v6304_v45  ;;  %v14171_v1 = vmul.u32.u64.low %v14133_v56, %v6592_v2  ;;  %v14172_v59 = vmul.u32.u64.high %v14133_v56, %v6592_v2, %v14171_v1 }
 0x7a6   : > { %v6455_v21 = vand.u32 31, %v6453_v15  ;;  %v6289_v53 = vadd.s32 %v14096_v17, %v14104_v55  ;;  %v14176_v61 = vshll.u32 %v6449_v43, 8  ;;  %v8369_v52 = vadd.s32 4294967169, %v6757_v16 }
 0x7a7   : > { %v14179_v23 = vadd.f32 %v14029_v19, %v6174_v60  ;;  %v6310_v7 = vadd.s32 127, %v6309_v14  ;;  %v6603_v38 = vadd.s32 1, %v14166_v37  ;;  %v6761_v35 = vor.u32 8388608, %v14161_v20 }
 0x7a8   : > { %v6456_v27 = vsub.s32 32, %v6455_v21  ;;  %v6416_v22 = vor.u32 4788187, %v6415_v6  ;;  %v6419_v5 = vcvt.s32.f32 %v6412_v9  ;;  %v6306_v49 = vshll.u32 %v14139_v34, %v6304_v45 }
 0x7a9   : > { %16377 = vst [vmem:[#allocation4_spill] sm:$0xff] %v14179_v23  ;;  %v6600_v32 = vmul.u32 %v14133_v56, %v6584_v11  ;;  %v6307_v0 = vshrl.u32 %v6289_v53, %v6305_v33  ;;  %vm6602_vm14 = vc.u32 %v14172_v59, %v14165_v44  ;;  %v6454_v17 = vshrl.u32 %v6453_v15, 5 }
 0x7aa   : > { %v6458_v55 = vshll.u32 %v16071_v29, %v6455_v21  ;;  %v6604_v43 = vsel %vm6602_vm14, %v6603_v38, %v14166_v37  ;;  %v6459_v12 = vshrl.u32 %v16072_v25, %v6456_v27  ;;  %v6461_v54 = vshll.u32 %v16072_v25, %v6455_v21 }
 0x7ab   : > { %v6462_v41 = vshrl.u32 %v16073_v40, %v6456_v27  ;;  %v6311_v30 = vshll.u32 %v6310_v7, 23  ;;  %v6605_v39 = vadd.s32 %v6604_v43, %v6600_v32  ;;  %v6464_v34 = vshll.u32 %v16073_v40, %v6455_v21 }
 0x7ac   : > { %v6465_v56 = vshrl.u32 %v16074_v57, %v6456_v27  ;;  %v6460_v10 = vor.u32 %v6459_v12, %v6458_v55  ;;  %v6467_v45 = vshll.u32 %v16074_v57, %v6455_v21  ;;  %v6468_v8 = vshrl.u32 %v16075_v24, %v6456_v27 }
 0x7ad   : > { %v6463_v13 = vor.u32 %v6462_v41, %v6461_v54  ;;  %v6606_v42 = vadd.s32 536870912, %v6605_v39  ;;  %v6470_v36 = vshll.u32 %v16075_v24, %v6455_v21  ;;  %v6471_v14 = vshrl.u32 %v16076_v28, %v6456_v27 }
 0x7ae   : > { %v6466_v47 = vor.u32 %v6465_v56, %v6464_v34  ;;  %v6417_v16 = vand.u32 2147483647, %v6416_v22  ;;  %v6308_v2 = vor.u32 %v6307_v0, %v6306_v49  ;;  %v6469_v37 = vor.u32 %v6468_v8, %v6467_v45 }
 0x7af   : > { %v6763_v60 = vadd.s32 1, %v8369_v52  ;;  %v14198_v9 = vshrl.u32 %v6606_v42, 30  ;;  %v6472_v6 = vor.u32 %v6471_v14, %v6470_v36  ;;  %vm6473_vm13 = vcmp.lt.s32.totalorder %v6454_v17, 1 }
 0x7b0   : > { %vm6476_vm2 = vcmp.lt.s32.totalorder %v6454_v17, 4  ;;  %v6312_v11 = vor.u32 4788187, %v6311_v30  ;;  %v6457_v15 = vshrl.u32 %v16071_v29, %v6456_v27  ;;  %v6481_v1 = vsel %vm6473_vm13, %v6460_v10, %v6463_v13 }
 0x7b1   : > { %v6478_v33 = vsel %vm6476_vm2, %v6466_v47, 2102212464  ;;  %v6608_v53 = vshll.u32 %v14198_v9, 30  ;;  %vm6474_vm6 = vcmp.lt.s32.totalorder %v6454_v17, 2  ;;  %vm6475_vm10 = vcmp.lt.s32.totalorder %v6454_v17, 3 }
 0x7b2   : > { %v6482_v21 = vsel %vm6476_vm2, %v6469_v37, 920167782  ;;  %v6477_v7 = vsel %vm6473_vm13, %v6457_v15, %v6460_v10  ;;  %v6479_v38 = vsel %vm6475_vm10, %v6463_v13, %v6478_v33  ;;  %v6485_v22 = vsel %vm6473_vm13, %v6463_v13, %v6466_v47 }
 0x7b3   : > { %v6483_v52 = vsel %vm6475_vm10, %v6466_v47, %v6482_v21  ;;  %v14204_v49 = vmul.f32 %v6419_v5, %v6417_v16  ;;  %v14206_v32 = vsub.s32 %v6605_v39, %v6608_v53  ;;  %v6486_v27 = vsel %vm6476_vm2, %v6472_v6, 1326507024 }
 0x7b4   : > { %v6484_v0 = vsel %vm6474_vm6, %v6481_v1, %v6483_v52  ;;  %v6313_v55 = vand.u32 2147483647, %v6312_v11  ;;  %v6487_v43 = vsel %vm6475_vm10, %v6469_v37, %v6486_v27  ;;  %v6480_v30 = vsel %vm6474_vm6, %v6477_v7, %v6479_v38 }
 0x7b5   : > { %v14211_v12 = vmul.u32.u64.low %v14176_v61, %v6484_v0  ;;  %v14212_v54 = vmul.u32.u64.high %v14176_v61, %v6484_v0, %v14211_v12  ;;  %v6611_v41 = vsub.s32 0, %v14206_v32  ;;  %v6488_v5 = vsel %vm6474_vm6, %v6485_v22, %v6487_v43 }
 0x7b6   : > { %vm6764_vm12 = vcmp.gt.s32.totalorder %v6763_v60, 0  ;;  %v6315_v39 = vcvt.s32.f32 %v6308_v2  ;;  %v14219_v34 = vmul.u32.u64.low %v14176_v61, %v6488_v5  ;;  %v14220_v56 = vmul.u32.u64.high %v14176_v61, %v6488_v5, %v14219_v34 }
 0x7b7   : > { %v6765_v10 = vsel %vm6764_vm12, %v6763_v60, 0  ;;  %v6421_v13 = vxor.u32 2147483648, %v14204_v49  ;;  %v8362_v45 = vmin.u32 %v6611_v41, %v14206_v32  ;;  %v6601_v47 = vadd.s32 %v14165_v44, %v14172_v59 }
 0x7b8   : > { %v6767_v8 = vand.u32 31, %v6765_v10  ;;  %v14224_v42 = vmul.f32 %v6315_v39, %v6313_v55  ;;  %v6496_v17 = vmul.u32 %v14176_v61, %v6480_v30  ;;  %v6499_v36 = vadd.s32 1, %v14212_v54 }
 0x7b9   : > { %v6613_v14 = vclz %v8362_v45  ;;  %v14232_v2 = vshll.u32 %v6761_v35, 8  ;;  %v15808_v37 = vand.u32 2147483647, %v14179_v23  ;;  %vm6498_vm1 = vc.u32 %v14220_v56, %v14211_v12 }
 0x7ba   : > { %v6768_v16 = vsub.s32 32, %v6767_v8  ;;  %v14237_v60 = vshrl.u32 %v6765_v10, 5  ;;  %v6770_v6 = vshll.u32 %v16071_v29, %v6767_v8  ;;  %v6773_v44 = vshll.u32 %v16072_v25, %v6767_v8 }
 0x7bb   : > { %v8363_v59 = vadd.s32 4294967294, %v6613_v14  ;;  %v6500_v61 = vsel %vm6498_vm1, %v6499_v36, %v14212_v54  ;;  %v6776_v20 = vshll.u32 %v16073_v40, %v6767_v8  ;;  %v6779_v21 = vshll.u32 %v16074_v57, %v6767_v8 }
 0x7bc   : > { %v6771_v11 = vshrl.u32 %v16072_v25, %v6768_v16  ;;  %v6501_v35 = vadd.s32 %v6500_v61, %v6496_v17  ;;  %v6774_v15 = vshrl.u32 %v16073_v40, %v6768_v16  ;;  %v6777_v33 = vshrl.u32 %v16074_v57, %v6768_v16 }
 0x7bd   : > { %v6780_v1 = vshrl.u32 %v16075_v24, %v6768_v16  ;;  %vm8364_vm9 = vcmp.lt.s32.totalorder %v8363_v59, 0  ;;  %v6783_v7 = vshrl.u32 %v16076_v28, %v6768_v16  ;;  %v6782_v54 = vshll.u32 %v16075_v24, %v6767_v8 }
 0x7be   : > { %v6772_v53 = vor.u32 %v6771_v11, %v6770_v6  ;;  %v6616_v38 = vsel %vm8364_vm9, 0, %v8363_v59  ;;  %v6502_v52 = vadd.s32 536870912, %v6501_v35  ;;  %v6775_v22 = vor.u32 %v6774_v15, %v6773_v44 }
 0x7bf   : > { %v6778_v0 = vor.u32 %v6777_v33, %v6776_v20  ;;  %v6617_v27 = vsub.s32 32, %v6616_v38  ;;  %v6621_v55 = vsub.s32 4294967266, %v6616_v38  ;;  %v6781_v43 = vor.u32 %v6780_v1, %v6779_v21 }
 0x7c0   : > { %v6618_v41 = vshll.u32 %v14206_v32, %v6616_v38  ;;  %v14252_v30 = vshrl.u32 %v6502_v52, 30  ;;  %v6769_v5 = vshrl.u32 %v16071_v29, %v6768_v16  ;;  %v6652_v39 = vand.u32 2139095040, %v14179_v23 }
 0x7c1   : > { %v6622_v34 = vadd.s32 127, %v6621_v55  ;;  %v6784_v10 = vor.u32 %v6783_v7, %v6782_v54  ;;  %vm6785_vm4 = vcmp.lt.s32.totalorder %v14237_v60, 1  ;;  %vm6788_vm11 = vcmp.lt.s32.totalorder %v14237_v60, 4  ;;  %v8612_v55 = vpop.f32.mrf.mxu1 }
 0x7c2   : > { %v6504_v45 = vshll.u32 %v14252_v30, 30  ;;  %vm6786_vm0 = vcmp.lt.s32.totalorder %v14237_v60, 2  ;;  %v6790_v8 = vsel %vm6788_vm11, %v6778_v0, 2102212464  ;;  %v6793_v32 = vsel %vm6785_vm4, %v6772_v53, %v6775_v22 }
 0x7c3   : > { %v6619_v17 = vshrl.u32 %v6601_v47, %v6617_v27  ;;  %v6623_v36 = vshll.u32 %v6622_v34, 23  ;;  %vm6787_vm3 = vcmp.lt.s32.totalorder %v14237_v60, 3  ;;  %v6794_v14 = vsel %vm6788_vm11, %v6781_v43, 920167782 }
 0x7c4   : > { %v14265_v16 = vsub.s32 %v6501_v35, %v6504_v45  ;;  %v6789_v6 = vsel %vm6785_vm4, %v6769_v5, %v6772_v53  ;;  %v6795_v44 = vsel %vm6787_vm3, %v6778_v0, %v6794_v14  ;;  %v6797_v59 = vsel %vm6785_vm4, %v6775_v22, %v6778_v0 }
 0x7c5   : > { %v6624_v61 = vor.u32 4788187, %v6623_v36  ;;  %v6791_v11 = vsel %vm6787_vm3, %v6775_v22, %v6790_v8  ;;  %v6796_v20 = vsel %vm6786_vm0, %v6793_v32, %v6795_v44  ;;  %v6798_v15 = vsel %vm6788_vm11, %v6784_v10, 1326507024 }
 0x7c6   : > { %v6507_v47 = vsub.s32 0, %v14265_v16  ;;  %v6799_v33 = vsel %vm6787_vm3, %v6781_v43, %v6798_v15  ;;  %v14273_v1 = vmul.u32.u64.low %v14232_v2, %v6796_v20  ;;  %v14274_v21 = vmul.u32.u64.high %v14232_v2, %v6796_v20, %v14273_v1 }
 0x7c7   : > { %v6422_v35 = vsel %vm15856_vm15, %v6421_v13, %v14204_v49  ;;  %v6800_v53 = vsel %vm6786_vm0, %v6797_v59, %v6799_v33  ;;  %v6653_v7 = vshrl.u32 %v6652_v39, 23  ;;  %v6656_v38 = vand.u32 8388607, %v15808_v37 }
 0x7c8   : > { %v6620_v52 = vor.u32 %v6619_v17, %v6618_v41  ;;  %v8358_v22 = vmin.u32 %v6507_v47, %v14265_v16  ;;  %v14288_v0 = vmul.u32.u64.low %v14232_v2, %v6800_v53  ;;  %v14289_v27 = vmul.u32.u64.high %v14232_v2, %v6800_v53, %v14288_v0 }
 0x7c9   : > { %vm14293_vm5 = vcmp.le.f32.partialorder %v6337_v3, 0.7853982  ;;  %v6317_v49 = vxor.u32 2147483648, %v14224_v42  ;;  %v6792_v13 = vsel %vm6786_vm0, %v6789_v6, %v6791_v11  ;;  %v8365_v54 = vadd.s32 4294967169, %v6653_v7 }
 0x7ca   : > { %vm15850_vm7 = vcmp.lt.s32.totalorder %v14037_v51, 0  ;;  %v6625_v41 = vand.u32 2147483647, %v6624_v61  ;;  %v6509_v5 = vclz %v8358_v22  ;;  %v6811_v39 = vadd.s32 1, %v14274_v21 }
 0x7cb   : > { %v14305_v34 = vsel %vm14293_vm5, %v14032_v48, %v6422_v35  ;;  %v6657_v3 = vor.u32 8388608, %v6656_v38  ;;  %v6659_v10 = vadd.s32 1, %v8365_v54  ;;  %v14308_v45 = vadd.f32 %v8612_v55, %v14029_v19 }
 0x7cc   : > { %v6627_v8 = vcvt.s32.f32 %v6620_v52  ;;  %v8359_v60 = vadd.s32 4294967294, %v6509_v5  ;;  %v6808_v32 = vmul.u32 %v14232_v2, %v6792_v13  ;;  %vm6810_vm8 = vc.u32 %v14289_v27, %v14273_v1 }
 0x7cd   : > { %16380 = vst [vmem:[#allocation22_spill] sm:$0xff] %v14308_v45  ;;  %v14316_v17 = vsel %vm15850_vm7, %v6317_v49, %v14224_v42  ;;  %v6497_v36 = vadd.s32 %v14211_v12, %v14220_v56  ;;  %v6812_v14 = vsel %vm6810_vm8, %v6811_v39, %v14274_v21  ;;  %vm6660_vm14 = vcmp.gt.s32.totalorder %v6659_v10, 0 }
 0x7ce   : > { %v14321_v6 = vmul.f32 %v6627_v8, %v6625_v41  ;;  %vm8360_vm13 = vcmp.lt.s32.totalorder %v8359_v60, 0  ;;  %v6813_v44 = vadd.s32 %v6812_v14, %v6808_v32  ;;  %v6661_v59 = vsel %vm6660_vm14, %v6659_v10, 0 }
 0x7cf   : > { %v6512_v2 = vsel %vm8360_vm13, 0, %v8359_v60  ;;  %v6663_v61 = vand.u32 31, %v6661_v59  ;;  %v14323_v11 = vshll.u32 %v6657_v3, 8  ;;  %v15807_v20 = vand.u32 2147483647, %v14308_v45 }
 0x7d0   : > { %v6513_v15 = vsub.s32 32, %v6512_v2  ;;  %v6517_v42 = vsub.s32 4294967266, %v6512_v2  ;;  %v6662_v47 = vshrl.u32 %v6661_v59, 5  ;;  %v6964_v33 = vand.u32 2139095040, %v14308_v45 }
 0x7d1   : > { %v6514_v12 = vshll.u32 %v14265_v16, %v6512_v2  ;;  %v6814_v56 = vadd.s32 536870912, %v6813_v44  ;;  %v6664_v21 = vsub.s32 32, %v6663_v61  ;;  %v6666_v35 = vshll.u32 %v16071_v29, %v6663_v61 }
 0x7d2   : > { %v6515_v53 = vshrl.u32 %v6497_v36, %v6513_v15  ;;  %v6518_v7 = vadd.s32 127, %v6517_v42  ;;  %v6669_v38 = vshll.u32 %v16072_v25, %v6663_v61  ;;  %v6672_v52 = vshll.u32 %v16073_v40, %v6663_v61 }
 0x7d3   : > { %v14331_v22 = vshrl.u32 %v6814_v56, 30  ;;  %v6667_v0 = vshrl.u32 %v16072_v25, %v6664_v21  ;;  %v6670_v55 = vshrl.u32 %v16073_v40, %v6664_v21  ;;  %v6675_v49 = vshll.u32 %v16074_v57, %v6663_v61 }
 0x7d4   : > { %v6516_v13 = vor.u32 %v6515_v53, %v6514_v12  ;;  %v6519_v16 = vshll.u32 %v6518_v7, 23  ;;  %v6673_v54 = vshrl.u32 %v16074_v57, %v6664_v21  ;;  %v6676_v41 = vshrl.u32 %v16075_v24, %v6664_v21 }
 0x7d5   : > { %16381 = vst [vmem:[#allocation29_spill] sm:$0xff] %v14331_v22  ;;  %v6629_v5 = vxor.u32 2147483648, %v14321_v6  ;;  %v6816_v39 = vshll.u32 %v14331_v22, 30  ;;  %v6668_v3 = vor.u32 %v6667_v0, %v6666_v35  ;;  %v6671_v10 = vor.u32 %v6670_v55, %v6669_v38 }
 0x7d6   : > { %v6520_v8 = vor.u32 4788187, %v6519_v16  ;;  %v6674_v60 = vor.u32 %v6673_v54, %v6672_v52  ;;  %v6677_v32 = vor.u32 %v6676_v41, %v6675_v49  ;;  %v6965_v36 = vshrl.u32 %v6964_v33, 23 }
 0x7d7   : > { %vm14342_vm2 = vcmp.le.f32.partialorder %v6233_v62, 0.7853982  ;;  %v14346_v59 = vsub.s32 %v6813_v44, %v6816_v39  ;;  %v6665_v2 = vshrl.u32 %v16071_v29, %v6664_v21  ;;  %v6678_v15 = vshll.u32 %v16075_v24, %v6663_v61 }
 0x7d8   : > { %v6679_v42 = vshrl.u32 %v16076_v28, %v6664_v21  ;;  %v6521_v12 = vand.u32 2147483647, %v6520_v8  ;;  %v6523_v56 = vcvt.s32.f32 %v6516_v13  ;;  %vm6681_vm6 = vcmp.lt.s32.totalorder %v6662_v47, 1 }
 0x7d9   : > { %vm6684_vm10 = vcmp.lt.s32.totalorder %v6662_v47, 4  ;;  %v6819_v33 = vsub.s32 0, %v14346_v59  ;;  %v6689_v62 = vsel %vm6681_vm6, %v6668_v3, %v6671_v10  ;;  %vm6682_vm12 = vcmp.lt.s32.totalorder %v6662_v47, 2 }
 0x7da   : > { %v6680_v35 = vor.u32 %v6679_v42, %v6678_v15  ;;  %v6686_v53 = vsel %vm6684_vm10, %v6674_v60, 2102212464  ;;  %vm6683_vm1 = vcmp.lt.s32.totalorder %v6662_v47, 3  ;;  %v6690_v7 = vsel %vm6684_vm10, %v6677_v32, 920167782 }
 0x7db   : > { %v6693_v44 = vsel %vm6681_vm6, %v6671_v10, %v6674_v60  ;;  %v8370_v38 = vmin.u32 %v6819_v33, %v14346_v59  ;;  %v6685_v52 = vsel %vm6681_vm6, %v6665_v2, %v6668_v3  ;;  %v6691_v0 = vsel %vm6683_vm1, %v6674_v60, %v6690_v7 }
 0x7dc   : > { %v6694_v61 = vsel %vm6684_vm10, %v6680_v35, 1326507024  ;;  %v6524_v55 = vmul.f32 %v6523_v56, %v6521_v12  ;;  %v6687_v21 = vsel %vm6683_vm1, %v6671_v10, %v6686_v53  ;;  %v6692_v49 = vsel %vm6682_vm12, %v6689_v62, %v6691_v0  ;;  %v6184_v0 = vpop.f32.mrf.mxu1 }
 0x7dd   : > { %v6695_v13 = vsel %vm6683_vm1, %v6677_v32, %v6694_v61  ;;  %vm14356_vm9 = vcmp.le.f32.partialorder %v6545_v18, 0.7853982  ;;  %v6821_v54 = vclz %v8370_v38  ;;  %vm15851_vm4 = vcmp.lt.s32.totalorder %v14068_v63, 0 }
 0x7de   : > { %v6696_v41 = vsel %vm6682_vm12, %v6693_v44, %v6695_v13  ;;  %v14362_v39 = vmul.u32.u64.low %v14323_v11, %v6692_v49  ;;  %v14363_v8 = vmul.u32.u64.high %v14323_v11, %v6692_v49, %v14362_v39  ;;  %v8377_v60 = vadd.s32 4294967169, %v6965_v36 }
 0x7df   : > { %v14368_v3 = vmul.u32.u64.low %v14323_v11, %v6696_v41  ;;  %v14369_v10 = vmul.u32.u64.high %v14323_v11, %v6696_v41, %v14368_v3  ;;  %9087 = vcosq.f32 %v14305_v34  ;;  %v8371_v18 = vadd.s32 4294967294, %v6821_v54 }
 0x7e0   : > { %v6688_v32 = vsel %vm6682_vm12, %v6685_v52, %v6687_v21  ;;  %v6968_v2 = vand.u32 8388607, %v15807_v20  ;;  %9089 = vsinq.f32 %v14305_v34  ;;  %v6321_v15 = vsel %vm14342_vm2, %v14037_v51, %v14316_v17 }
 0x7e1   : > { %v6809_v42 = vadd.s32 %v14273_v1, %v14289_v27  ;;  %v6971_v12 = vadd.s32 1, %v8377_v60  ;;  %v6630_v36 = vsel %vm15851_vm4, %v6629_v5, %v14321_v6  ;;  %v6525_v47 = vxor.u32 2147483648, %v6524_v55 }
 0x7e2   : > { %vm8372_vm11 = vcmp.lt.s32.totalorder %v8371_v18, 0  ;;  %v6707_v56 = vadd.s32 1, %v14363_v8  ;;  %v6704_v34 = vmul.u32 %v14323_v11, %v6688_v32  ;;  %vm6706_vm0 = vc.u32 %v14369_v10, %v14362_v39 }
 0x7e3   : > { %v6824_v33 = vsel %vm8372_vm11, 0, %v8371_v18  ;;  %vm6972_vm3 = vcmp.gt.s32.totalorder %v6971_v12, 0  ;;  %v6969_v27 = vor.u32 8388608, %v6968_v2  ;;  %9091 = vcosq.f32 %v6321_v15 }
 0x7e4   : > { %v6825_v17 = vsub.s32 32, %v6824_v33  ;;  %v6829_v35 = vsub.s32 4294967266, %v6824_v33  ;;  %v6708_v1 = vsel %vm6706_vm0, %v6707_v56, %v14363_v8  ;;  %vm15844_vm8 = vcmp.lt.s32.totalorder %v14110_v46, 0 }
 0x7e5   : > { %v6709_v6 = vadd.s32 %v6708_v1, %v6704_v34  ;;  %v6973_v5 = vsel %vm6972_vm3, %v6971_v12, 0  ;;  %9093 = vsinq.f32 %v6321_v15  ;;  %v14394_v11 = vsel %vm14356_vm9, %v14068_v63, %v6630_v36  ;;  %v8615_v12 = vpop.f32.mrf.mxu1 }
 0x7e6   : > { %v6827_v53 = vshrl.u32 %v6809_v42, %v6825_v17  ;;  %v6830_v62 = vadd.s32 127, %v6829_v35  ;;  %v6975_v7 = vand.u32 31, %v6973_v5  ;;  %v14398_v44 = vsel %vm15844_vm8, %v6525_v47, %v6524_v55 }
 0x7e7   : > { %v6826_v38 = vshll.u32 %v14346_v59, %v6824_v33  ;;  %v6710_v52 = vadd.s32 536870912, %v6709_v6  ;;  %v14401_v21 = vshrl.u32 %v6973_v5, 5  ;;  %v14403_v13 = vshll.u32 %v6969_v27, 8 }
 0x7e8   : > { %v6831_v61 = vshll.u32 %v6830_v62, 23  ;;  %v6976_v49 = vsub.s32 32, %v6975_v7  ;;  %v6978_v8 = vshll.u32 %v16071_v29, %v6975_v7  ;;  %v6981_v3 = vshll.u32 %v16072_v25, %v6975_v7 }
 0x7e9   : > { %v6828_v54 = vor.u32 %v6827_v53, %v6826_v38  ;;  %v14405_v41 = vshrl.u32 %v6710_v52, 30  ;;  %v6984_v59 = vshll.u32 %v16073_v40, %v6975_v7  ;;  %v6987_v18 = vshll.u32 %v16074_v57, %v6975_v7 }
 0x7ea   : > { %v6832_v60 = vor.u32 4788187, %v6831_v61  ;;  %v6979_v55 = vshrl.u32 %v16072_v25, %v6976_v49  ;;  %v6982_v2 = vshrl.u32 %v16073_v40, %v6976_v49  ;;  %v6985_v15 = vshrl.u32 %v16074_v57, %v6976_v49 }
 0x7eb   : > { %16386 = vst [vmem:[#allocation3_spill] sm:$0xff] %v14405_v41  ;;  %v6712_v32 = vshll.u32 %v14405_v41, 30  ;;  %v6988_v42 = vshrl.u32 %v16075_v24, %v6976_v49  ;;  %v6990_v47 = vshll.u32 %v16075_v24, %v6975_v7  ;;  %v6991_v56 = vshrl.u32 %v16076_v28, %v6976_v49 }
 0x7ec   : > { %v6980_v36 = vor.u32 %v6979_v55, %v6978_v8  ;;  %v14419_v33 = vadd.f32 %v14029_v19, %v6184_v0  ;;  %v14421_v34 = vpop.eup %9087  ;;  %vm14425_vm14 = vcmp.le.f32.partialorder %v6441_v4, 0.7853982  ;;  %v16388_v17 = vmov 0 }
 0x7ed   : > { %v16389_v17 = vsel %vm14425_vm14, 4294967295, %v16388_v17  ;;  %v14429_v35 = vsub.s32 %v6709_v6, %v6712_v32  ;;  %v6983_v1 = vor.u32 %v6982_v2, %v6981_v3  ;;  %v6986_v27 = vor.u32 %v6985_v15, %v6984_v59  ;;  %v14431_v53 = vpop.eup %9089 }
 0x7ee   : > { %16387 = vst [vmem:[#allocation35_spill] sm:$0xff] %v14419_v33  ;;  %16390 = vst [vmem:[#allocation18_spill] sm:$0xff] %v16389_v17  ;;  %v6989_v5 = vor.u32 %v6988_v42, %v6987_v18  ;;  %v6835_v62 = vcvt.s32.f32 %v6828_v54  ;;  %v6977_v7 = vshrl.u32 %v16071_v29, %v6976_v49  ;;  %v6992_v38 = vor.u32 %v6991_v56, %v6990_v47 }
 0x7ef   : > { %v14435_v52 = vadd.f32 %v8615_v12, %v14029_v19  ;;  %v6833_v0 = vand.u32 2147483647, %v6832_v60  ;;  %v6715_v4 = vsub.s32 0, %v14429_v35  ;;  %vm6993_vm13 = vcmp.lt.s32.totalorder %v14401_v21, 1 }
 0x7f0   : > { %vm6996_vm6 = vcmp.lt.s32.totalorder %v14401_v21, 4  ;;  %vm6994_vm10 = vcmp.lt.s32.totalorder %v14401_v21, 2  ;;  %vm6995_vm12 = vcmp.lt.s32.totalorder %v14401_v21, 3  ;;  %v7001_v6 = vsel %vm6993_vm13, %v6980_v36, %v6983_v1  ;;  %v14449_v3 = vpop.eup %9091 }
 0x7f1   : > { %16391 = vst [vmem:[#allocation12_spill] sm:$0xff] %v14435_v52  ;;  %v7002_v61 = vsel %vm6996_vm6, %v6989_v5, 920167782  ;;  %v8366_v49 = vmin.u32 %v6715_v4, %v14429_v35  ;;  %v6998_v54 = vsel %vm6996_vm6, %v6986_v27, 2102212464  ;;  %v7005_v8 = vsel %vm6993_vm13, %v6983_v1, %v6986_v27 }
 0x7f2   : > { %v7003_v19 = vsel %vm6995_vm12, %v6986_v27, %v7002_v61  ;;  %vm15829_vm1 = vcmp.lt.s32.totalorder %v14131_v26, 0  ;;  %v7006_v55 = vsel %vm6996_vm6, %v6992_v38, 1326507024  ;;  %v15805_v59 = vand.u32 2147483647, %v14419_v33  ;;  %v14456_v32 = vpop.eup %9093 }
 0x7f3   : > { %v7004_v60 = vsel %vm6994_vm10, %v7001_v6, %v7003_v19  ;;  %v6860_v18 = vand.u32 2139095040, %v14419_v33  ;;  %v6836_v2 = vmul.f32 %v6835_v62, %v6833_v0  ;;  %v6717_v15 = vclz %v8366_v49 }
 0x7f4   : > { %v6997_v42 = vsel %vm6993_vm13, %v6977_v7, %v6980_v36  ;;  %v7007_v12 = vsel %vm6995_vm12, %v6989_v5, %v7006_v55  ;;  %v6999_v47 = vsel %vm6995_vm12, %v6983_v1, %v6998_v54  ;;  %9095 = vcosq.f32 %v14394_v11  ;;  %v6194_v1 = vpop.f32.mrf.mxu1 }
 0x7f5   : > { %v7008_v56 = vsel %vm6994_vm10, %v7005_v8, %v7007_v12  ;;  %v14467_v27 = vmul.u32.u64.low %v14403_v13, %v7004_v60  ;;  %v14468_v38 = vmul.u32.u64.high %v14403_v13, %v7004_v60, %v14467_v27  ;;  %vm14473_vm11 = vcmp.le.f32.partialorder %v6753_v31, 0.7853982  ;;  %v14495_v8 = vld [vmem:[%s15565_s8] ss:$0 sm:$0xff] }
 0x7f6   : > { %v16392_v62 = vmov 0  ;;  %v8367_v36 = vadd.s32 4294967294, %v6717_v15  ;;  %v14478_v5 = vmul.u32.u64.low %v14403_v13, %v7008_v56  ;;  %v14479_v7 = vmul.u32.u64.high %v14403_v13, %v7008_v56, %v14478_v5 }
 0x7f7   : > { %v16393_v62 = vsel %vm14473_vm11, 4294967295, %v16392_v62  ;;  %9097 = vsinq.f32 %v14394_v11  ;;  %v6529_v0 = vsel %vm14425_vm14, %v14110_v46, %v14398_v44  ;;  %v6861_v4 = vshrl.u32 %v6860_v18, 23 }
 0x7f8   : > { %16394 = vst [vmem:[#allocation20_spill] sm:$0xff] %v16393_v62  ;;  %v6864_v31 = vand.u32 8388607, %v15805_v59  ;;  %v6837_v6 = vxor.u32 2147483648, %v6836_v2  ;;  %vm8368_vm0 = vcmp.lt.s32.totalorder %v8367_v36, 0  ;;  %v7000_v61 = vsel %vm6994_vm10, %v6997_v42, %v6999_v47 }
 0x7f9   : > { %v7172_v49 = vand.u32 2139095040, %v14435_v52  ;;  %v6720_v54 = vsel %vm8368_vm0, 0, %v8367_v36  ;;  %v7019_v19 = vadd.s32 1, %v14468_v38  ;;  %v8373_v11 = vadd.s32 4294967169, %v6861_v4 }
 0x7fa   : > { %v14498_v44 = vadd.f32 %v14495_v8, %v6194_v1  ;;  %v6705_v60 = vadd.s32 %v14362_v39, %v14369_v10  ;;  %v6721_v55 = vsub.s32 32, %v6720_v54  ;;  %v6725_v21 = vsub.s32 4294967266, %v6720_v54 }
 0x7fb   : > { %v15806_v18 = vand.u32 2147483647, %v14435_v52  ;;  %v7016_v15 = vmul.u32 %v14403_v13, %v7000_v61  ;;  %vm7018_vm3 = vc.u32 %v14479_v7, %v14467_v27  ;;  %v6867_v42 = vadd.s32 1, %v8373_v11 }
 0x7fc   : > { %v7173_v12 = vshrl.u32 %v7172_v49, 23  ;;  %v6838_v47 = vsel %vm15829_vm1, %v6837_v6, %v6836_v2  ;;  %v6726_v56 = vadd.s32 127, %v6725_v21  ;;  %v7020_v36 = vsel %vm7018_vm3, %v7019_v19, %v14468_v38 }
 0x7fd   : > { %v6865_v5 = vor.u32 8388608, %v6864_v31  ;;  %9099 = vcosq.f32 %v6529_v0  ;;  %v6723_v1 = vshrl.u32 %v6705_v60, %v6721_v55  ;;  %v7021_v39 = vadd.s32 %v7020_v36, %v7016_v15 }
 0x7fe   : > { %vm6868_vm13 = vcmp.gt.s32.totalorder %v6867_v42, 0  ;;  %9101 = vsinq.f32 %v6529_v0  ;;  %v6727_v10 = vshll.u32 %v6726_v56, 23  ;;  %v8385_v59 = vadd.s32 4294967169, %v7173_v12 }
 0x7ff   : > { %v6869_v4 = vsel %vm6868_vm13, %v6867_v42, 0  ;;  %v14511_v13 = vsel %vm14473_vm11, %v14131_v26, %v6838_v47  ;;  %v6722_v61 = vshll.u32 %v14429_v35, %v6720_v54  ;;  %v7022_v2 = vadd.s32 536870912, %v7021_v39 }
 0x800   : > { %v6871_v6 = vand.u32 31, %v6869_v4  ;;  %v14515_v38 = vadd.s32 %v14467_v27, %v14479_v7  ;;  %v14517_v31 = vshll.u32 %v6865_v5, 8  ;;  %v14521_v0 = vand.u32 8388607, %v15806_v18 }
 0x801   : > { %v6724_v19 = vor.u32 %v6723_v1, %v6722_v61  ;;  %v14524_v11 = vshrl.u32 %v7022_v2, 30  ;;  %v6870_v60 = vshrl.u32 %v6869_v4, 5  ;;  %v6728_v21 = vor.u32 4788187, %v6727_v10  ;;  %v14528_v7 = vpop.eup %9095 }
 0x802   : > { %v6872_v55 = vsub.s32 32, %v6871_v6  ;;  %v6874_v35 = vshll.u32 %v16071_v29, %v6871_v6  ;;  %v6877_v54 = vshll.u32 %v16072_v25, %v6871_v6  ;;  %v7179_v27 = vadd.s32 1, %v8385_v59 }
 0x803   : > { %16395 = vst [vmem:[#allocation38_spill] sm:$0xff] %v14524_v11  ;;  %v7024_v15 = vshll.u32 %v14524_v11, 30  ;;  %v6880_v47 = vshll.u32 %v16073_v40, %v6871_v6  ;;  %v6883_v5 = vshll.u32 %v16074_v57, %v6871_v6  ;;  %v6886_v2 = vshll.u32 %v16075_v24, %v6871_v6 }
 0x804   : > { %v6875_v42 = vshrl.u32 %v16072_v25, %v6872_v55  ;;  %v6878_v12 = vshrl.u32 %v16073_v40, %v6872_v55  ;;  %v14534_v56 = vpop.eup %9097  ;;  %v6881_v36 = vshrl.u32 %v16074_v57, %v6872_v55  ;;  %v6884_v1 = vshrl.u32 %v16075_v24, %v6872_v55 }
 0x805   : > { %v6887_v59 = vshrl.u32 %v16076_v28, %v6872_v55  ;;  %v14540_v10 = vsub.s32 %v7021_v39, %v7024_v15  ;;  %v6731_v18 = vcvt.s32.f32 %v6724_v19  ;;  %v7068_v49 = vand.u32 2139095040, %v14498_v44 }
 0x806   : > { %v6876_v4 = vor.u32 %v6875_v42, %v6874_v35  ;;  %v6879_v61 = vor.u32 %v6878_v12, %v6877_v54  ;;  %v6882_v20 = vor.u32 %v6881_v36, %v6880_v47  ;;  %v6885_v37 = vor.u32 %v6884_v1, %v6883_v5 }
 0x807   : > { %v7027_v11 = vsub.s32 0, %v14540_v10  ;;  %v6888_v62 = vor.u32 %v6887_v59, %v6886_v2  ;;  %vm6889_vm6 = vcmp.lt.s32.totalorder %v6870_v60, 1  ;;  %vm6892_vm10 = vcmp.lt.s32.totalorder %v6870_v60, 4 }
 0x808   : > { %v6729_v26 = vand.u32 2147483647, %v6728_v21  ;;  %v6873_v22 = vshrl.u32 %v16071_v29, %v6872_v55  ;;  %v6894_v39 = vsel %vm6892_vm10, %v6882_v20, 2102212464  ;;  %v6897_v15 = vsel %vm6889_vm6, %v6876_v4, %v6879_v61 }
 0x809   : > { %v8378_v35 = vmin.u32 %v7027_v11, %v14540_v10  ;;  %vm6890_vm12 = vcmp.lt.s32.totalorder %v6870_v60, 2  ;;  %vm6891_vm0 = vcmp.lt.s32.totalorder %v6870_v60, 3  ;;  %v6898_v6 = vsel %vm6892_vm10, %v6885_v37, 920167782 }
 0x80a   : > { %v14549_v19 = vpop.eup %9099  ;;  %v6893_v54 = vsel %vm6889_vm6, %v6873_v22, %v6876_v4  ;;  %v6895_v42 = vsel %vm6891_vm0, %v6879_v61, %v6894_v39  ;;  %v6899_v12 = vsel %vm6891_vm0, %v6882_v20, %v6898_v6  ;;  %v6901_v47 = vsel %vm6889_vm6, %v6879_v61, %v6882_v20 }
 0x80b   : > { %16396 = vst [vmem:[#allocation16_spill] sm:$0xff] %v14549_v19  ;;  %v14551_v36 = vpop.eup %9101  ;;  %v7029_v21 = vclz %v8378_v35  ;;  %v6900_v55 = vsel %vm6890_vm12, %v6897_v15, %v6899_v12  ;;  %v6902_v5 = vsel %vm6892_vm10, %v6888_v62, 1326507024  ;;  %v7177_v1 = vor.u32 8388608, %v14521_v0 }
 0x80c   : > { %16397 = vst [vmem:[#allocation34_spill] sm:$0xff] %v14551_v36  ;;  %v14556_v11 = vmul.f32 %v6731_v18, %v6729_v26  ;;  %v6903_v59 = vsel %vm6891_vm0, %v6885_v37, %v6902_v5  ;;  %v14559_v2 = vmul.u32.u64.low %v14517_v31, %v6900_v55  ;;  %v14560_v41 = vmul.u32.u64.high %v14517_v31, %v6900_v55, %v14559_v2 }
 0x80d   : > { %v8379_v22 = vadd.s32 4294967294, %v7029_v21  ;;  %v6896_v20 = vsel %vm6890_vm12, %v6893_v54, %v6895_v42  ;;  %v6904_v4 = vsel %vm6890_vm12, %v6901_v47, %v6903_v59  ;;  %vm7180_vm3 = vcmp.gt.s32.totalorder %v7179_v27, 0 }
 0x80e   : > { %v14566_v61 = vmul.u32.u64.low %v14517_v31, %v6904_v4  ;;  %v14567_v39 = vmul.u32.u64.high %v14517_v31, %v6904_v4, %v14566_v61  ;;  %v7181_v62 = vsel %vm7180_vm3, %v7179_v27, 0  ;;  %v7069_v0 = vshrl.u32 %v7068_v49, 23 }
 0x80f   : > { %vm8380_vm13 = vcmp.lt.s32.totalorder %v8379_v22, 0  ;;  %v7183_v26 = vand.u32 31, %v7181_v62  ;;  %v14569_v37 = vshll.u32 %v7177_v1, 8  ;;  %v16398_v18 = vand.u32 2147483647, %v14498_v44 }
 0x810   : > { %v6733_v35 = vxor.u32 2147483648, %v14556_v11  ;;  %v7032_v6 = vsel %vm8380_vm13, 0, %v8379_v22  ;;  %v6912_v60 = vmul.u32 %v14517_v31, %v6896_v20  ;;  %v6915_v54 = vadd.s32 1, %v14560_v41 }
 0x811   : > { %v14573_v15 = vand.u32 8388607, %v16398_v18  ;;  %v7033_v42 = vsub.s32 32, %v7032_v6  ;;  %v7037_v12 = vsub.s32 4294967266, %v7032_v6  ;;  %v7182_v47 = vshrl.u32 %v7181_v62, 5 }
 0x812   : > { %v7184_v27 = vsub.s32 32, %v7183_v26  ;;  %v7034_v49 = vshll.u32 %v14540_v10, %v7032_v6  ;;  %vm6914_vm6 = vc.u32 %v14567_v39, %v14559_v2  ;;  %v7186_v21 = vshll.u32 %v16071_v29, %v7183_v26 }
 0x813   : > { %v8381_v55 = vadd.s32 4294967169, %v7069_v0  ;;  %v7035_v5 = vshrl.u32 %v14515_v38, %v7033_v42  ;;  %v7038_v1 = vadd.s32 127, %v7037_v12  ;;  %v6916_v59 = vsel %vm6914_vm6, %v6915_v54, %v14560_v41 }
 0x814   : > { %v7189_v31 = vshll.u32 %v16072_v25, %v7183_v26  ;;  %vm15830_vm10 = vcmp.lt.s32.totalorder %v14179_v23, 0  ;;  %v6917_v22 = vadd.s32 %v6916_v59, %v6912_v60  ;;  %v7185_v20 = vshrl.u32 %v16071_v29, %v7184_v27 }
 0x815   : > { %v7187_v10 = vshrl.u32 %v16072_v25, %v7184_v27  ;;  %v7190_v4 = vshrl.u32 %v16073_v40, %v7184_v27  ;;  %v7036_v61 = vor.u32 %v7035_v5, %v7034_v49  ;;  %v7039_v62 = vshll.u32 %v7038_v1, 23 }
 0x816   : > { %v7192_v0 = vshll.u32 %v16073_v40, %v7183_v26  ;;  %v7193_v38 = vshrl.u32 %v16074_v57, %v7184_v27  ;;  %v6918_v18 = vadd.s32 536870912, %v6917_v22  ;;  %v7195_v41 = vshll.u32 %v16074_v57, %v7183_v26 }
 0x817   : > { %v7188_v6 = vor.u32 %v7187_v10, %v7186_v21  ;;  %v7196_v54 = vshrl.u32 %v16075_v24, %v7184_v27  ;;  %v7040_v42 = vor.u32 4788187, %v7039_v62  ;;  %v7043_v60 = vcvt.s32.f32 %v7036_v61 }
 0x818   : > { %v7191_v12 = vor.u32 %v7190_v4, %v7189_v31  ;;  %v7194_v59 = vor.u32 %v7193_v38, %v7192_v0  ;;  %v14593_v19 = vshrl.u32 %v6918_v18, 30  ;;  %v7198_v49 = vshll.u32 %v16075_v24, %v7183_v26 }
 0x819   : > { %v7197_v36 = vor.u32 %v7196_v54, %v7195_v41  ;;  %v7199_v5 = vshrl.u32 %v16076_v28, %v7184_v27  ;;  %v7041_v1 = vand.u32 2147483647, %v7040_v42  ;;  %vm7201_vm12 = vcmp.lt.s32.totalorder %v7182_v47, 1  ;;  %v8618_v41 = vpop.f32.mrf.mxu1 }
 0x81a   : > { %16399 = vst [vmem:[#allocation28_spill] sm:$0xff] %v14593_v19  ;;  %vm7202_vm0 = vcmp.lt.s32.totalorder %v7182_v47, 2  ;;  %vm7204_vm3 = vcmp.lt.s32.totalorder %v7182_v47, 4  ;;  %v6920_v21 = vshll.u32 %v14593_v19, 30  ;;  %vm7203_vm13 = vcmp.lt.s32.totalorder %v7182_v47, 3 }
 0x81b   : > { %v7200_v10 = vor.u32 %v7199_v5, %v7198_v49  ;;  %v7206_v62 = vsel %vm7204_vm3, %v7194_v59, 2102212464  ;;  %v7044_v61 = vmul.f32 %v7043_v60, %v7041_v1  ;;  %v7205_v31 = vsel %vm7201_vm12, %v7185_v20, %v7188_v6 }
 0x81c   : > { %v7209_v4 = vsel %vm7201_vm12, %v7188_v6, %v7191_v12  ;;  %v7210_v0 = vsel %vm7204_vm3, %v7197_v36, 920167782  ;;  %v14600_v38 = vsub.s32 %v6917_v22, %v6920_v21  ;;  %v7207_v26 = vsel %vm7203_vm13, %v7191_v12, %v7206_v62 }
 0x81d   : > { %v7211_v27 = vsel %vm7203_vm13, %v7194_v59, %v7210_v0  ;;  %v7213_v18 = vsel %vm7201_vm12, %v7191_v12, %v7194_v59  ;;  %v6734_v54 = vsel %vm15830_vm10, %v6733_v35, %v14556_v11  ;;  %v7214_v60 = vsel %vm7204_vm3, %v7200_v10, 1326507024 }
 0x81e   : > { %v7212_v42 = vsel %vm7202_vm0, %v7209_v4, %v7211_v27  ;;  %v7073_v20 = vor.u32 8388608, %v14573_v15  ;;  %v6923_v6 = vsub.s32 0, %v14600_v38  ;;  %v7215_v22 = vsel %vm7203_vm13, %v7197_v36, %v7214_v60 }
 0x81f   : > { %v14613_v49 = vmul.u32.u64.low %v14569_v37, %v7212_v42  ;;  %v14614_v5 = vmul.u32.u64.high %v14569_v37, %v7212_v42, %v14613_v49  ;;  %v7208_v12 = vsel %vm7202_vm0, %v7205_v31, %v7207_v26  ;;  %v7216_v59 = vsel %vm7202_vm0, %v7213_v18, %v7215_v22 }
 0x820   : > { %v7075_v11 = vadd.s32 1, %v8381_v55  ;;  %v14620_v35 = vadd.f32 %v14495_v8, %v8618_v41  ;;  %v7045_v1 = vxor.u32 2147483648, %v7044_v61  ;;  %v8374_v15 = vmin.u32 %v6923_v6, %v14600_v38 }
 0x821   : > { %v14624_v21 = vmul.u32.u64.low %v14569_v37, %v7216_v59  ;;  %v14625_v10 = vmul.u32.u64.high %v14569_v37, %v7216_v59, %v14624_v21  ;;  %9103 = vcosq.f32 %v14511_v13  ;;  %v16401_v36 = vand.u32 2147483647, %v14179_v23 }
 0x822   : > { %16400 = vst [vmem:[#allocation11_spill] sm:$0xff] %v14620_v35  ;;  %v16402_v62 = vmov 0  ;;  %vm15828_vm12 = vcmp.lt.s32.totalorder %v14308_v45, 0  ;;  %vm7076_vm0 = vcmp.gt.s32.totalorder %v7075_v11, 0  ;;  %v6925_v55 = vclz %v8374_v15 }
 0x823   : > { %vm14630_vm6 = vcmp.le.f32.partialorder %v16401_v36, 0.7853982  ;;  %v7227_v31 = vadd.s32 1, %v14614_v5  ;;  %v7077_v4 = vsel %vm7076_vm0, %v7075_v11, 0  ;;  %v6913_v0 = vadd.s32 %v14559_v2, %v14567_v39 }
 0x824   : > { %v16403_v62 = vsel %vm14630_vm6, 4294967295, %v16402_v62  ;;  %v14638_v47 = vsel %vm14630_vm6, %v14179_v23, %v6734_v54  ;;  %v7224_v26 = vmul.u32 %v14569_v37, %v7208_v12  ;;  %v7079_v27 = vand.u32 31, %v7077_v4 }
 0x825   : > { %16404 = vst [vmem:[#allocation23_spill] sm:$0xff] %v16403_v62  ;;  %v14644_v18 = vshll.u32 %v7073_v20, 8  ;;  %v14648_v41 = vsel %vm15828_vm12, %v7045_v1, %v7044_v61  ;;  %v8375_v42 = vadd.s32 4294967294, %v6925_v55  ;;  %vm7226_vm3 = vc.u32 %v14625_v10, %v14613_v49 }
 0x826   : > { %v7228_v60 = vsel %vm7226_vm3, %v7227_v31, %v14614_v5  ;;  %v14654_v6 = vshrl.u32 %v7077_v4, 5  ;;  %v7080_v2 = vsub.s32 32, %v7079_v27  ;;  %v7380_v39 = vand.u32 2139095040, %v14620_v35 }
 0x827   : > { %vm8376_vm13 = vcmp.lt.s32.totalorder %v8375_v42, 0  ;;  %v7229_v37 = vadd.s32 %v7228_v60, %v7224_v26  ;;  %v7082_v20 = vshll.u32 %v16071_v29, %v7079_v27  ;;  %v7085_v61 = vshll.u32 %v16072_v25, %v7079_v27 }
 0x828   : > { %v6928_v22 = vsel %vm8376_vm13, 0, %v8375_v42  ;;  %v7083_v12 = vshrl.u32 %v16072_v25, %v7080_v2  ;;  %v7086_v59 = vshrl.u32 %v16073_v40, %v7080_v2  ;;  %v7088_v11 = vshll.u32 %v16073_v40, %v7079_v27 }
 0x829   : > { %v6929_v1 = vsub.s32 32, %v6928_v22  ;;  %v6933_v5 = vsub.s32 4294967266, %v6928_v22  ;;  %v7230_v15 = vadd.s32 536870912, %v7229_v37  ;;  %v7091_v21 = vshll.u32 %v16074_v57, %v7079_v27 }
 0x82a   : > { %v6930_v36 = vshll.u32 %v14600_v38, %v6928_v22  ;;  %v7084_v55 = vor.u32 %v7083_v12, %v7082_v20  ;;  %v7089_v31 = vshrl.u32 %v16074_v57, %v7080_v2  ;;  %v7092_v4 = vshrl.u32 %v16075_v24, %v7080_v2 }
 0x82b   : > { %v6931_v26 = vshrl.u32 %v6913_v0, %v6929_v1  ;;  %v6934_v42 = vadd.s32 127, %v6933_v5  ;;  %v14666_v60 = vshrl.u32 %v7230_v15, 30  ;;  %v7087_v54 = vor.u32 %v7086_v59, %v7085_v61 }
 0x82c   : > { %v7090_v19 = vor.u32 %v7089_v31, %v7088_v11  ;;  %v7093_v62 = vor.u32 %v7092_v4, %v7091_v21  ;;  %v7094_v23 = vshll.u32 %v16075_v24, %v7079_v27  ;;  %v7095_v17 = vshrl.u32 %v16076_v28, %v7080_v2 }
 0x82d   : > { %16405 = vst [vmem:[#allocation10_spill] sm:$0xff] %v14666_v60  ;;  %v16406_v46 = vand.u32 2147483647, %v14308_v45  ;;  %v16407_v38 = vmov 0  ;;  %v6932_v20 = vor.u32 %v6931_v26, %v6930_v36  ;;  %v6935_v22 = vshll.u32 %v6934_v42, 23 }
 0x82e   : > { %v7232_v0 = vshll.u32 %v14666_v60, 30  ;;  %v16410_v12 = vand.u32 2147483647, %v14620_v35  ;;  %v7081_v61 = vshrl.u32 %v16071_v29, %v7080_v2  ;;  %v7096_v59 = vor.u32 %v7095_v17, %v7094_v23  ;;  %v14684_v27 = vpop.eup %9103 }
 0x82f   : > { %vm14672_vm0 = vcmp.le.f32.partialorder %v16406_v46, 0.7853982  ;;  %vm7097_vm3 = vcmp.lt.s32.totalorder %v14654_v6, 1  ;;  %vm7098_vm13 = vcmp.lt.s32.totalorder %v14654_v6, 2  ;;  %16411 = vst [vmem:[#allocation48_spill] sm:$0xff] %v14684_v27  ;;  %vm7099_vm12 = vcmp.lt.s32.totalorder %v14654_v6, 3 }
 0x830   : > { %v16408_v38 = vsel %vm14672_vm0, 4294967295, %v16407_v38  ;;  %v14679_v1 = vand.u32 8388607, %v16410_v12  ;;  %v6936_v46 = vor.u32 4788187, %v6935_v22  ;;  %v14686_v11 = vsub.s32 %v7229_v37, %v7232_v0 }
 0x831   : > { %16409 = vst [vmem:[#allocation8_spill] sm:$0xff] %v16408_v38  ;;  %vm7100_vm1 = vcmp.lt.s32.totalorder %v14654_v6, 4  ;;  %v6939_v5 = vcvt.s32.f32 %v6932_v20  ;;  %v7105_v21 = vsel %vm7097_vm3, %v7084_v55, %v7087_v54  ;;  %v7109_v2 = vsel %vm7097_vm3, %v7087_v54, %v7090_v19 }
 0x832   : > { %v7102_v15 = vsel %vm7100_vm1, %v7090_v19, 2102212464  ;;  %v7106_v36 = vsel %vm7100_vm1, %v7093_v62, 920167782  ;;  %v6937_v31 = vand.u32 2147483647, %v6936_v46  ;;  %v7101_v4 = vsel %vm7097_vm3, %v7081_v61, %v7084_v55 }
 0x833   : > { %v7235_v23 = vsub.s32 0, %v14686_v11  ;;  %v7107_v17 = vsel %vm7099_vm12, %v7090_v19, %v7106_v36  ;;  %v7110_v26 = vsel %vm7100_vm1, %v7096_v59, 1326507024  ;;  %v7381_v42 = vshrl.u32 %v7380_v39, 23 }
 0x834   : > { %v7108_v37 = vsel %vm7098_vm13, %v7105_v21, %v7107_v17  ;;  %v6940_v22 = vmul.f32 %v6939_v5, %v6937_v31  ;;  %v7103_v20 = vsel %vm7099_vm12, %v7087_v54, %v7102_v15  ;;  %v7111_v12 = vsel %vm7099_vm12, %v7093_v62, %v7110_v26  ;;  %v6204_v15 = vpop.f32.mrf.mxu1 }
 0x835   : > { %v8386_v0 = vmin.u32 %v7235_v23, %v14686_v11  ;;  %v7112_v46 = vsel %vm7098_vm13, %v7109_v2, %v7111_v12  ;;  %v14703_v19 = vmul.u32.u64.low %v14644_v18, %v7108_v37  ;;  %v14704_v55 = vmul.u32.u64.high %v14644_v18, %v7108_v37, %v14703_v19 }
 0x836   : > { %v8393_v61 = vadd.s32 4294967169, %v7381_v42  ;;  %9105 = vsinq.f32 %v14511_v13  ;;  %v16412_v39 = vand.u32 2147483647, %v14419_v33  ;;  %v16413_v59 = vmov 0  ;;  %v8621_v26 = vpop.f32.mrf.mxu1 }
 0x837   : > { %v7237_v54 = vclz %v8386_v0  ;;  %v14715_v62 = vmul.u32.u64.low %v14644_v18, %v7112_v46  ;;  %v14716_v5 = vmul.u32.u64.high %v14644_v18, %v7112_v46, %v14715_v62  ;;  %9107 = vcosq.f32 %v14638_v47 }
 0x838   : > { %vm14710_vm1 = vcmp.le.f32.partialorder %v16412_v39, 0.7853982  ;;  %v7049_v21 = vsel %vm14672_vm0, %v14308_v45, %v14648_v41  ;;  %v7104_v13 = vsel %vm7098_vm13, %v7101_v4, %v7103_v20  ;;  %v7387_v36 = vadd.s32 1, %v8393_v61 }
 0x839   : > { %v16414_v59 = vsel %vm14710_vm1, 4294967295, %v16413_v59  ;;  %9109 = vsinq.f32 %v14638_v47  ;;  %vm15843_vm12 = vcmp.lt.s32.totalorder %v14419_v33, 0  ;;  %v6941_v31 = vxor.u32 2147483648, %v6940_v22 }
 0x83a   : > { %16415 = vst [vmem:[#allocation43_spill] sm:$0xff] %v16414_v59  ;;  %v8387_v23 = vadd.s32 4294967294, %v7237_v54  ;;  %v7123_v17 = vadd.s32 1, %v14704_v55  ;;  %v7385_v2 = vor.u32 8388608, %v14679_v1  ;;  %vm7388_vm3 = vcmp.gt.s32.totalorder %v7387_v36, 0 }
 0x83b   : > { %v14730_v37 = vadd.f32 %v14495_v8, %v6204_v15  ;;  %9111 = vcosq.f32 %v7049_v21  ;;  %v7120_v41 = vmul.u32 %v14644_v18, %v7104_v13  ;;  %vm7122_vm13 = vc.u32 %v14716_v5, %v14703_v19 }
 0x83c   : > { %vm8388_vm10 = vcmp.lt.s32.totalorder %v8387_v23, 0  ;;  %9113 = vsinq.f32 %v7049_v21  ;;  %v7124_v6 = vsel %vm7122_vm13, %v7123_v17, %v14704_v55  ;;  %v7389_v4 = vsel %vm7388_vm3, %v7387_v36, 0 }
 0x83d   : > { %16416 = vst [vmem:[#allocation25_spill] sm:$0xff] %v14730_v37  ;;  %v7240_v47 = vsel %vm8388_vm10, 0, %v8387_v23  ;;  %v6942_v1 = vsel %vm15843_vm12, %v6941_v31, %v6940_v22  ;;  %v7125_v20 = vadd.s32 %v7124_v6, %v7120_v41  ;;  %v7225_v12 = vadd.s32 %v14613_v49, %v14625_v10 }
 0x83e   : > { %v7241_v42 = vsub.s32 32, %v7240_v47  ;;  %v7245_v0 = vsub.s32 4294967266, %v7240_v47  ;;  %v7391_v46 = vand.u32 31, %v7389_v4  ;;  %v14740_v18 = vshll.u32 %v7385_v2, 8 }
 0x83f   : > { %v7126_v54 = vadd.s32 536870912, %v7125_v20  ;;  %v7276_v55 = vand.u32 2139095040, %v14730_v37  ;;  %v14745_v62 = vadd.f32 %v14495_v8, %v8621_v26  ;;  %v14750_v22 = vsel %vm14710_vm1, %v14419_v33, %v6942_v1 }
 0x840   : > { %v7246_v39 = vadd.s32 127, %v7245_v0  ;;  %v7243_v15 = vshrl.u32 %v7225_v12, %v7241_v42  ;;  %v7390_v21 = vshrl.u32 %v7389_v4, 5  ;;  %v7392_v49 = vsub.s32 32, %v7391_v46 }
 0x841   : > { %v14752_v13 = vshrl.u32 %v7126_v54, 30  ;;  %v7394_v36 = vshll.u32 %v16071_v29, %v7391_v46  ;;  %v7397_v31 = vshll.u32 %v16072_v25, %v7391_v46  ;;  %v7400_v2 = vshll.u32 %v16073_v40, %v7391_v46 }
 0x842   : > { %v7247_v10 = vshll.u32 %v7246_v39, 23  ;;  %v7395_v23 = vshrl.u32 %v16072_v25, %v7392_v49  ;;  %v7398_v17 = vshrl.u32 %v16073_v40, %v7392_v49  ;;  %v7401_v41 = vshrl.u32 %v16074_v57, %v7392_v49 }
 0x843   : > { %16417 = vst [vmem:[#allocation27_spill] sm:$0xff] %v14752_v13  ;;  %v7128_v26 = vshll.u32 %v14752_v13, 30  ;;  %v7403_v4 = vshll.u32 %v16074_v57, %v7391_v46  ;;  %v7404_v1 = vshrl.u32 %v16075_v24, %v7392_v49  ;;  %v14763_v42 = vpop.eup %9105  ;;  %v7242_v0 = vshll.u32 %v14686_v11, %v7240_v47 }
 0x844   : > { %v7248_v6 = vor.u32 4788187, %v7247_v10  ;;  %16418 = vst [vmem:[#allocation46_spill] sm:$0xff] %v14763_v42  ;;  %v7396_v12 = vor.u32 %v7395_v23, %v7394_v36  ;;  %v7399_v39 = vor.u32 %v7398_v17, %v7397_v31  ;;  %v7402_v54 = vor.u32 %v7401_v41, %v7400_v2  ;;  %v14766_v61 = vpop.eup %9107 }
 0x845   : > { %16419 = vst [vmem:[#allocation14_spill] sm:$0xff] %v14766_v61  ;;  %v14768_v60 = vsub.s32 %v7125_v20, %v7128_v26  ;;  %v7405_v38 = vor.u32 %v7404_v1, %v7403_v4  ;;  %v7406_v10 = vshll.u32 %v16075_v24, %v7391_v46  ;;  %v7407_v13 = vshrl.u32 %v16076_v28, %v7392_v49 }
 0x846   : > { %v14772_v45 = vpop.eup %9109  ;;  %v7244_v59 = vor.u32 %v7243_v15, %v7242_v0  ;;  %v7249_v33 = vand.u32 2147483647, %v7248_v6  ;;  %v7393_v27 = vshrl.u32 %v16071_v29, %v7392_v49  ;;  %v7277_v42 = vshrl.u32 %v7276_v55, 23 }
 0x847   : > { %v7131_v11 = vsub.s32 0, %v14768_v60  ;;  %v7408_v47 = vor.u32 %v7407_v13, %v7406_v10  ;;  %vm7409_vm10 = vcmp.lt.s32.totalorder %v7390_v21, 1  ;;  %vm7412_vm3 = vcmp.lt.s32.totalorder %v7390_v21, 4 }
 0x848   : > { %v14776_v36 = vpop.eup %9111  ;;  %vm7411_vm13 = vcmp.lt.s32.totalorder %v7390_v21, 3  ;;  %v7414_v20 = vsel %vm7412_vm3, %v7402_v54, 2102212464  ;;  %v7417_v46 = vsel %vm7409_vm10, %v7396_v12, %v7399_v39  ;;  %v7418_v31 = vsel %vm7412_vm3, %v7405_v38, 920167782 }
 0x849   : > { %16420 = vst [vmem:[#allocation53_spill] sm:$0xff] %v14776_v36  ;;  %v14779_v23 = vpop.eup %9113  ;;  %v8382_v15 = vmin.u32 %v7131_v11, %v14768_v60  ;;  %vm7410_vm12 = vcmp.lt.s32.totalorder %v7390_v21, 2  ;;  %v7419_v49 = vsel %vm7411_vm13, %v7402_v54, %v7418_v31  ;;  %v7421_v55 = vsel %vm7409_vm10, %v7399_v39, %v7402_v54 }
 0x84a   : > { %16421 = vst [vmem:[#allocation47_spill] sm:$0xff] %v14779_v23  ;;  %v7251_v17 = vcvt.s32.f32 %v7244_v59  ;;  %v7420_v13 = vsel %vm7410_vm12, %v7417_v46, %v7419_v49  ;;  %v7422_v2 = vsel %vm7412_vm3, %v7408_v47, 1326507024  ;;  %v8389_v41 = vadd.s32 4294967169, %v7277_v42 }
 0x84b   : > { %vm15849_vm8 = vcmp.lt.s32.totalorder %v14435_v52, 0  ;;  %v7133_v6 = vclz %v8382_v15  ;;  %v7413_v26 = vsel %vm7409_vm10, %v7393_v27, %v7396_v12  ;;  %v7415_v4 = vsel %vm7411_vm13, %v7399_v39, %v7414_v20 }
 0x84c   : > { %v7423_v1 = vsel %vm7411_vm13, %v7405_v38, %v7422_v2  ;;  %v7252_v0 = vmul.f32 %v7251_v17, %v7249_v33  ;;  %v14791_v11 = vmul.u32.u64.low %v14740_v18, %v7420_v13  ;;  %v14792_v54 = vmul.u32.u64.high %v14740_v18, %v7420_v13, %v14791_v11 }
 0x84d   : > { %v7424_v10 = vsel %vm7410_vm12, %v7421_v55, %v7423_v1  ;;  %v8383_v59 = vadd.s32 4294967294, %v7133_v6  ;;  %v16422_v46 = vand.u32 2147483647, %v14730_v37  ;;  %9115 = vcosq.f32 %v14750_v22 }
 0x84e   : > { %v14796_v42 = vmul.u32.u64.low %v14740_v18, %v7424_v10  ;;  %v14797_v47 = vmul.u32.u64.high %v14740_v18, %v7424_v10, %v14796_v42  ;;  %v7121_v33 = vadd.s32 %v14703_v19, %v14716_v5  ;;  %v7416_v38 = vsel %vm7410_vm12, %v7413_v26, %v7415_v4 }
 0x84f   : > { %v7280_v27 = vand.u32 8388607, %v16422_v46  ;;  %v7283_v12 = vadd.s32 1, %v8389_v41  ;;  %9117 = vsinq.f32 %v14750_v22  ;;  %vm8384_vm10 = vcmp.lt.s32.totalorder %v8383_v59, 0 }
 0x850   : > { %v15845_v39 = vand.u32 2147483647, %v14745_v62  ;;  %v7588_v20 = vand.u32 2139095040, %v14745_v62  ;;  %v7253_v31 = vxor.u32 2147483648, %v7252_v0  ;;  %v7136_v15 = vsel %vm8384_vm10, 0, %v8383_v59 }
 0x851   : > { %v7435_v49 = vadd.s32 1, %v14792_v54  ;;  %vm7284_vm3 = vcmp.gt.s32.totalorder %v7283_v12, 0  ;;  %v7137_v55 = vsub.s32 32, %v7136_v15  ;;  %v7141_v17 = vsub.s32 4294967266, %v7136_v15 }
 0x852   : > { %v7432_v13 = vmul.u32 %v14740_v18, %v7416_v38  ;;  %v7281_v19 = vor.u32 8388608, %v7280_v27  ;;  %v7138_v5 = vshll.u32 %v14768_v60, %v7136_v15  ;;  %vm7434_vm12 = vc.u32 %v14797_v47, %v14791_v11 }
 0x853   : > { %v7285_v22 = vsel %vm7284_vm3, %v7283_v12, 0  ;;  %v7589_v21 = vshrl.u32 %v7588_v20, 23  ;;  %v7139_v2 = vshrl.u32 %v7121_v33, %v7137_v55  ;;  %v7142_v41 = vadd.s32 127, %v7141_v17 }
 0x854   : > { %v7436_v6 = vsel %vm7434_vm12, %v7435_v49, %v14792_v54  ;;  %v14814_v26 = vshrl.u32 %v7285_v22, 5  ;;  %v7254_v4 = vsel %vm15849_vm8, %v7253_v31, %v7252_v0  ;;  %v7287_v10 = vand.u32 31, %v7285_v22 }
 0x855   : > { %v7437_v1 = vadd.s32 %v7436_v6, %v7432_v13  ;;  %v14820_v18 = vand.u32 8388607, %v15845_v39  ;;  %v7140_v60 = vor.u32 %v7139_v2, %v7138_v5  ;;  %v7143_v59 = vshll.u32 %v7142_v41, 23 }
 0x856   : > { %v14822_v42 = vshll.u32 %v7281_v19, 8  ;;  %v8401_v46 = vadd.s32 4294967169, %v7589_v21  ;;  %v7288_v33 = vsub.s32 32, %v7287_v10  ;;  %v7290_v54 = vshll.u32 %v16071_v29, %v7287_v10 }
 0x857   : > { %v7438_v27 = vadd.s32 536870912, %v7437_v1  ;;  %vm7305_vm13 = vcmp.lt.s32.totalorder %v14814_v26, 1  ;;  %v16423_v38 = vand.u32 2147483647, %v14435_v52  ;;  %v16424_v0 = vmov 0 }
 0x858   : > { %vm15855_vm3 = vcmp.lt.s32.totalorder %v14498_v44, 0  ;;  %v7144_v12 = vor.u32 4788187, %v7143_v59  ;;  %v7147_v20 = vcvt.s32.f32 %v7140_v60  ;;  %v7293_v31 = vshll.u32 %v16072_v25, %v7287_v10 }
 0x859   : > { %vm14828_vm10 = vcmp.le.f32.partialorder %v16423_v38, 0.7853982  ;;  %v7296_v15 = vshll.u32 %v16073_v40, %v7287_v10  ;;  %v14835_v49 = vshrl.u32 %v7438_v27, 30  ;;  %v7291_v55 = vshrl.u32 %v16072_v25, %v7288_v33 }
 0x85a   : > { %v16425_v0 = vsel %vm14828_vm10, 4294967295, %v16424_v0  ;;  %v7294_v17 = vshrl.u32 %v16073_v40, %v7288_v33  ;;  %v7299_v13 = vshll.u32 %v16074_v57, %v7287_v10  ;;  %v7145_v19 = vand.u32 2147483647, %v7144_v12  ;;  %v14851_v38 = vpop.eup %9115 }
 0x85b   : > { %16426 = vst [vmem:[#allocation15_spill] sm:$0xff] %v16425_v0  ;;  %16427 = vst [vmem:[#allocation44_spill] sm:$0xff] %v14835_v49  ;;  %v7297_v5 = vshrl.u32 %v16074_v57, %v7288_v33  ;;  %v7300_v22 = vshrl.u32 %v16075_v24, %v7288_v33  ;;  %v7302_v21 = vshll.u32 %v16075_v24, %v7287_v10  ;;  %v16428_v2 = vand.u32 2147483647, %v14498_v44 }
 0x85c   : > { %v16429_v41 = vmov 0  ;;  %v7440_v6 = vshll.u32 %v14835_v49, 30  ;;  %v7292_v60 = vor.u32 %v7291_v55, %v7290_v54  ;;  %v7295_v59 = vor.u32 %v7294_v17, %v7293_v31  ;;  %v14854_v10 = vpop.eup %9117 }
 0x85d   : > { %vm14845_vm12 = vcmp.le.f32.partialorder %v16428_v2, 0.7853982  ;;  %v7303_v27 = vshrl.u32 %v16076_v28, %v7288_v33  ;;  %v7148_v12 = vmul.f32 %v7147_v20, %v7145_v19  ;;  %v7289_v39 = vshrl.u32 %v16071_v29, %v7288_v33 }
 0x85e   : > { %v16430_v41 = vsel %vm14845_vm12, 4294967295, %v16429_v41  ;;  %v7298_v36 = vor.u32 %v7297_v5, %v7296_v15  ;;  %v7301_v23 = vor.u32 %v7300_v22, %v7299_v13  ;;  %v14856_v61 = vsub.s32 %v7437_v1, %v7440_v6 }
 0x85f   : > { %16431 = vst [vmem:[#allocation17_spill] sm:$0xff] %v16430_v41  ;;  %v7304_v2 = vor.u32 %v7303_v27, %v7302_v21  ;;  %vm7307_vm8 = vcmp.lt.s32.totalorder %v14814_v26, 3  ;;  %vm7308_vm7 = vcmp.lt.s32.totalorder %v14814_v26, 4  ;;  %v7149_v54 = vxor.u32 2147483648, %v7148_v12 }
 0x860   : > { %v7310_v31 = vsel %vm7308_vm7, %v7298_v36, 2102212464  ;;  %v7313_v55 = vsel %vm7305_vm13, %v7292_v60, %v7295_v59  ;;  %v7314_v17 = vsel %vm7308_vm7, %v7301_v23, 920167782  ;;  %v7443_v20 = vsub.s32 0, %v14856_v61 }
 0x861   : > { %vm7306_vm4 = vcmp.lt.s32.totalorder %v14814_v26, 2  ;;  %v7315_v33 = vsel %vm7307_vm8, %v7298_v36, %v7314_v17  ;;  %v7317_v1 = vsel %vm7305_vm13, %v7295_v59, %v7298_v36  ;;  %v7309_v15 = vsel %vm7305_vm13, %v7289_v39, %v7292_v60  ;;  %v6214_v17 = vpop.f32.mrf.mxu1 }
 0x862   : > { %v7311_v13 = vsel %vm7307_vm8, %v7295_v59, %v7310_v31  ;;  %v7316_v19 = vsel %vm7306_vm4, %v7313_v55, %v7315_v33  ;;  %v7318_v5 = vsel %vm7308_vm7, %v7304_v2, 1326507024  ;;  %v7257_v22 = vsel %vm14828_vm10, %v14435_v52, %v7254_v4 }
 0x863   : > { %v7150_v21 = vsel %vm15855_vm3, %v7149_v54, %v7148_v12  ;;  %v8394_v6 = vmin.u32 %v7443_v20, %v14856_v61  ;;  %v7319_v36 = vsel %vm7307_vm8, %v7301_v23, %v7318_v5  ;;  %v7593_v59 = vor.u32 8388608, %v14820_v18 }
 0x864   : > { %v7320_v27 = vsel %vm7306_vm4, %v7317_v1, %v7319_v36  ;;  %v14881_v39 = vmul.u32.u64.low %v14822_v42, %v7316_v19  ;;  %v14882_v60 = vmul.u32.u64.high %v14822_v42, %v7316_v19, %v14881_v39  ;;  %v7312_v31 = vsel %vm7306_vm4, %v7309_v15, %v7311_v13 }
 0x865   : > { %v7445_v2 = vclz %v8394_v6  ;;  %v14887_v4 = vmul.u32.u64.low %v14822_v42, %v7320_v27  ;;  %v14888_v55 = vmul.u32.u64.high %v14822_v42, %v7320_v27, %v14887_v4  ;;  %9119 = vcosq.f32 %v7257_v22 }
 0x866   : > { %v14893_v26 = vsel %vm14845_vm12, %v14498_v44, %v7150_v21  ;;  %v7595_v23 = vadd.s32 1, %v8401_v46  ;;  %9121 = vsinq.f32 %v7257_v22  ;;  %v7433_v12 = vadd.s32 %v14791_v11, %v14797_v47 }
 0x867   : > { %v8395_v54 = vadd.s32 4294967294, %v7445_v2  ;;  %v7328_v18 = vmul.u32 %v14822_v42, %v7312_v31  ;;  %v7331_v20 = vadd.s32 1, %v14882_v60  ;;  %v14899_v33 = vshll.u32 %v7593_v59, 8 }
 0x868   : > { %vm7596_vm7 = vcmp.gt.s32.totalorder %v7595_v23, 0  ;;  %9123 = vcosq.f32 %v14893_v26  ;;  %vm7330_vm8 = vc.u32 %v14888_v55, %v14881_v39  ;;  %v14906_v47 = vadd.f32 %v14495_v8, %v6214_v17 }
 0x869   : > { %vm8396_vm4 = vcmp.lt.s32.totalorder %v8395_v54, 0  ;;  %v7597_v46 = vsel %vm7596_vm7, %v7595_v23, 0  ;;  %v7332_v15 = vsel %vm7330_vm8, %v7331_v20, %v14882_v60  ;;  %vm15869_vm13 = vcmp.lt.s32.totalorder %v14620_v35, 0 }
 0x86a   : > { %v7448_v1 = vsel %vm8396_vm4, 0, %v8395_v54  ;;  %v7599_v11 = vand.u32 31, %v7597_v46  ;;  %v7333_v19 = vadd.s32 %v7332_v15, %v7328_v18  ;;  %v14908_v5 = vshrl.u32 %v7597_v46, 5 }
 0x86b   : > { %v7449_v42 = vsub.s32 32, %v7448_v1  ;;  %v7453_v13 = vsub.s32 4294967266, %v7448_v1  ;;  %v7450_v22 = vshll.u32 %v14856_v61, %v7448_v1  ;;  %9125 = vsinq.f32 %v14893_v26 }
 0x86c   : > { %v7600_v21 = vsub.s32 32, %v7599_v11  ;;  %v7602_v6 = vshll.u32 %v16071_v29, %v7599_v11  ;;  %v7605_v36 = vshll.u32 %v16072_v25, %v7599_v11  ;;  %v7334_v2 = vadd.s32 536870912, %v7333_v19 }
 0x86d   : > { %v7451_v27 = vshrl.u32 %v7433_v12, %v7449_v42  ;;  %v7454_v59 = vadd.s32 127, %v7453_v13  ;;  %v7608_v60 = vshll.u32 %v16073_v40, %v7599_v11  ;;  %v7611_v54 = vshll.u32 %v16074_v57, %v7599_v11 }
 0x86e   : > { %v7603_v31 = vshrl.u32 %v16072_v25, %v7600_v21  ;;  %v7606_v4 = vshrl.u32 %v16073_v40, %v7600_v21  ;;  %v7609_v23 = vshrl.u32 %v16074_v57, %v7600_v21  ;;  %v14918_v18 = vshrl.u32 %v7334_v2, 30 }
 0x86f   : > { %v7452_v17 = vor.u32 %v7451_v27, %v7450_v22  ;;  %v7455_v61 = vshll.u32 %v7454_v59, 23  ;;  %v7612_v20 = vshrl.u32 %v16075_v24, %v7600_v21  ;;  %v7601_v49 = vshrl.u32 %v16071_v29, %v7600_v21 }
 0x870   : > { %16432 = vst [vmem:[#allocation52_spill] sm:$0xff] %v14918_v18  ;;  %v7604_v12 = vor.u32 %v7603_v31, %v7602_v6  ;;  %v7607_v46 = vor.u32 %v7606_v4, %v7605_v36  ;;  %v7610_v1 = vor.u32 %v7609_v23, %v7608_v60  ;;  %v7336_v13 = vshll.u32 %v14918_v18, 30  ;;  %v8624_v4 = vpop.f32.mrf.mxu1 }
 0x871   : > { %v7456_v42 = vor.u32 4788187, %v7455_v61  ;;  %v7613_v0 = vor.u32 %v7612_v20, %v7611_v54  ;;  %v16433_v22 = vand.u32 2147483647, %v14620_v35  ;;  %v16434_v27 = vmov 0 }
 0x872   : > { %v7459_v59 = vcvt.s32.f32 %v7452_v17  ;;  %v7614_v2 = vshll.u32 %v16075_v24, %v7599_v11  ;;  %v7615_v6 = vshrl.u32 %v16076_v28, %v7600_v21  ;;  %vm7617_vm4 = vcmp.lt.s32.totalorder %v14908_v5, 1  ;;  %v14934_v36 = vpop.eup %9119 }
 0x873   : > { %vm14927_vm7 = vcmp.le.f32.partialorder %v16433_v22, 0.7853982  ;;  %16437 = vst [vmem:[#allocation54_spill] sm:$0xff] %v14934_v36  ;;  %v7457_v60 = vand.u32 2147483647, %v7456_v42  ;;  %v14936_v31 = vsub.s32 %v7333_v19, %v7336_v13  ;;  %vm7619_vm8 = vcmp.lt.s32.totalorder %v14908_v5, 3  ;;  %v14940_v23 = vpop.eup %9121  ;;  %v6224_v36 = vpop.f32.mrf.mxu1 }
 0x874   : > { %v16435_v27 = vsel %vm14927_vm7, 4294967295, %v16434_v27  ;;  %vm7620_vm3 = vcmp.lt.s32.totalorder %v14908_v5, 4  ;;  %16438 = vst [vmem:[#allocation45_spill] sm:$0xff] %v14940_v23  ;;  %v7616_v54 = vor.u32 %v7615_v6, %v7614_v2  ;;  %v7625_v11 = vsel %vm7617_vm4, %v7604_v12, %v7607_v46 }
 0x875   : > { %16436 = vst [vmem:[#allocation49_spill] sm:$0xff] %v16435_v27  ;;  %v7622_v17 = vsel %vm7620_vm3, %v7610_v1, 2102212464  ;;  %v7626_v21 = vsel %vm7620_vm3, %v7613_v0, 920167782  ;;  %v7460_v61 = vmul.f32 %v7459_v59, %v7457_v60  ;;  %v7339_v20 = vsub.s32 0, %v14936_v31  ;;  %v14948_v42 = vpop.eup %9123 }
 0x876   : > { %vm7618_vm15 = vcmp.lt.s32.totalorder %v14908_v5, 2  ;;  %v7627_v19 = vsel %vm7619_vm8, %v7610_v1, %v7626_v21  ;;  %16439 = vst [vmem:[#allocation19_spill] sm:$0xff] %v14948_v42  ;;  %v7621_v13 = vsel %vm7617_vm4, %v7601_v49, %v7604_v12  ;;  %v7629_v2 = vsel %vm7617_vm4, %v7607_v46, %v7610_v1 }
 0x877   : > { %v7628_v22 = vsel %vm7618_vm15, %v7625_v11, %v7627_v19  ;;  %v7630_v6 = vsel %vm7620_vm3, %v7616_v54, 1326507024  ;;  %v7461_v59 = vxor.u32 2147483648, %v7460_v61  ;;  %v8390_v60 = vmin.u32 %v7339_v20, %v14936_v31 }
 0x878   : > { %v7623_v15 = vsel %vm7619_vm8, %v7607_v46, %v7622_v17  ;;  %v7631_v21 = vsel %vm7619_vm8, %v7613_v0, %v7630_v6  ;;  %v14964_v12 = vmul.u32.u64.low %v14899_v33, %v7628_v22  ;;  %v14965_v11 = vmul.u32.u64.high %v14899_v33, %v7628_v22, %v14964_v12 }
 0x879   : > { %v7632_v49 = vsel %vm7618_vm15, %v7629_v2, %v7631_v21  ;;  %v14968_v1 = vadd.f32 %v14495_v8, %v8624_v4  ;;  %v7462_v54 = vsel %vm15869_vm13, %v7461_v59, %v7460_v61  ;;  %v7341_v20 = vclz %v8390_v60  ;;  %v9173_v8 = vld [vmem:[%s15565_s8] ss:$0 sm:$0xff] }
 0x87a   : > { %v14973_v46 = vmul.u32.u64.low %v14899_v33, %v7632_v49  ;;  %v14974_v17 = vmul.u32.u64.high %v14899_v33, %v7632_v49, %v14973_v46  ;;  %v7624_v0 = vsel %vm7618_vm15, %v7621_v13, %v7623_v15  ;;  %v7484_v19 = vand.u32 2139095040, %v14906_v47 }
 0x87b   : > { %v14983_v4 = vadd.f32 %v9173_v8, %v6224_v36  ;;  %v7465_v61 = vsel %vm14927_vm7, %v14620_v35, %v7462_v54  ;;  %v8391_v22 = vadd.s32 4294967294, %v7341_v20  ;;  %v16440_v2 = vand.u32 2147483647, %v14906_v47 }
 0x87c   : > { %v7643_v5 = vadd.s32 1, %v14965_v11  ;;  %v7485_v15 = vshrl.u32 %v7484_v19, 23  ;;  %v7796_v59 = vand.u32 2139095040, %v14968_v1  ;;  %v7640_v36 = vmul.u32 %v14899_v33, %v7624_v0 }
 0x87d   : > { %v7488_v6 = vand.u32 8388607, %v16440_v2  ;;  %vm8392_vm15 = vcmp.lt.s32.totalorder %v8391_v22, 0  ;;  %vm7642_vm3 = vc.u32 %v14974_v17, %v14964_v12  ;;  %v7329_v21 = vadd.s32 %v14881_v39, %v14888_v55 }
 0x87e   : > { %v7344_v49 = vsel %vm8392_vm15, 0, %v8391_v22  ;;  %v7644_v54 = vsel %vm7642_vm3, %v7643_v5, %v14965_v11  ;;  %v8397_v20 = vadd.s32 4294967169, %v7485_v15  ;;  %9127 = vcosq.f32 %v7465_v61 }
 0x87f   : > { %v7345_v46 = vsub.s32 32, %v7344_v49  ;;  %v7349_v19 = vsub.s32 4294967266, %v7344_v49  ;;  %v7645_v8 = vadd.s32 %v7644_v54, %v7640_v36  ;;  %v7489_v2 = vor.u32 8388608, %v7488_v6 }
 0x880   : > { %v7491_v26 = vadd.s32 1, %v8397_v20  ;;  %v7797_v13 = vshrl.u32 %v7796_v59, 23  ;;  %v16441_v33 = vand.u32 2147483647, %v14968_v1  ;;  %v7346_v27 = vshll.u32 %v14936_v31, %v7344_v49 }
 0x881   : > { %v7347_v60 = vshrl.u32 %v7329_v21, %v7345_v46  ;;  %v7350_v35 = vadd.s32 127, %v7349_v19  ;;  %v7646_v23 = vadd.s32 536870912, %v7645_v8  ;;  %9129 = vsinq.f32 %v7465_v61 }
 0x882   : > { %v7800_v0 = vand.u32 8388607, %v16441_v33  ;;  %v15004_v39 = vadd.s32 %v14964_v12, %v14974_v17  ;;  %vm7492_vm4 = vcmp.gt.s32.totalorder %v7491_v26, 0  ;;  %v8409_v55 = vadd.s32 4294967169, %v7797_v13 }
 0x883   : > { %v7348_v11 = vor.u32 %v7347_v60, %v7346_v27  ;;  %v7351_v22 = vshll.u32 %v7350_v35, 23  ;;  %v15006_v5 = vshrl.u32 %v7646_v23, 30  ;;  %v7493_v6 = vsel %vm7492_vm4, %v7491_v26, 0  ;;  %v15015_v23 = vpop.eup %9125 }
 0x884   : > { %vm15872_vm8 = vcmp.lt.s32.totalorder %v14730_v37, 0  ;;  %v7495_v15 = vand.u32 31, %v7493_v6  ;;  %v15009_v59 = vshll.u32 %v7489_v2, 8  ;;  %v7801_v31 = vor.u32 8388608, %v7800_v0  ;;  %16443 = vst [vmem:[#allocation55_spill] sm:$0xff] %v15015_v23 }
 0x885   : > { %16442 = vst [vmem:[#allocation50_spill] sm:$0xff] %v15006_v5  ;;  %v7352_v21 = vor.u32 4788187, %v7351_v22  ;;  %v7648_v61 = vshll.u32 %v15006_v5, 30  ;;  %v7494_v12 = vshrl.u32 %v7493_v6, 5  ;;  %v7803_v17 = vadd.s32 1, %v8409_v55 }
 0x886   : > { %v7355_v49 = vcvt.s32.f32 %v7348_v11  ;;  %v7496_v13 = vsub.s32 32, %v7495_v15  ;;  %v7498_v35 = vshll.u32 %v16071_v29, %v7495_v15  ;;  %v7501_v27 = vshll.u32 %v16072_v25, %v7495_v15 }
 0x887   : > { %v16444_v26 = vand.u32 2147483647, %v14730_v37  ;;  %v16445_v60 = vmov 0  ;;  %v7353_v54 = vand.u32 2147483647, %v7352_v21  ;;  %v15023_v20 = vsub.s32 %v7645_v8, %v7648_v61 }
 0x888   : > { %v7504_v46 = vshll.u32 %v16073_v40, %v7495_v15  ;;  %v7507_v19 = vshll.u32 %v16074_v57, %v7495_v15  ;;  %v7499_v2 = vshrl.u32 %v16072_v25, %v7496_v13  ;;  %v7502_v33 = vshrl.u32 %v16073_v40, %v7496_v13 }
 0x889   : > { %vm15019_vm15 = vcmp.le.f32.partialorder %v16444_v26, 0.7853982  ;;  %v7505_v0 = vshrl.u32 %v16074_v57, %v7496_v13  ;;  %v7510_v55 = vshll.u32 %v16075_v24, %v7495_v15  ;;  %v7356_v11 = vmul.f32 %v7355_v49, %v7353_v54 }
 0x88a   : > { %v16446_v60 = vsel %vm15019_vm15, 4294967295, %v16445_v60  ;;  %v7651_v22 = vsub.s32 0, %v15023_v20  ;;  %v7508_v6 = vshrl.u32 %v16075_v24, %v7496_v13  ;;  %v7511_v8 = vshrl.u32 %v16076_v28, %v7496_v13 }
 0x88b   : > { %16447 = vst [vmem:[#allocation51_spill] sm:$0xff] %v16446_v60  ;;  %v7497_v21 = vshrl.u32 %v16071_v29, %v7496_v13  ;;  %v7500_v61 = vor.u32 %v7499_v2, %v7498_v35  ;;  %v7503_v26 = vor.u32 %v7502_v33, %v7501_v27  ;;  %v7506_v36 = vor.u32 %v7505_v0, %v7504_v46  ;;  %v15036_v52 = vpop.eup %9127 }
 0x88c   : > { %v7357_v5 = vxor.u32 2147483648, %v7356_v11  ;;  %v8402_v18 = vmin.u32 %v7651_v22, %v15023_v20  ;;  %v7509_v42 = vor.u32 %v7508_v6, %v7507_v19  ;;  %vm7513_vm3 = vcmp.lt.s32.totalorder %v7494_v12, 1  ;;  %16448 = vst [vmem:[#allocation56_spill] sm:$0xff] %v15036_v52 }
 0x88d   : > { %v7512_v15 = vor.u32 %v7511_v8, %v7510_v55  ;;  %vm7515_vm4 = vcmp.lt.s32.totalorder %v7494_v12, 3  ;;  %vm7516_vm13 = vcmp.lt.s32.totalorder %v7494_v12, 4  ;;  %v7517_v49 = vsel %vm7513_vm3, %v7497_v21, %v7500_v61 }
 0x88e   : > { %v7358_v54 = vsel %vm15872_vm8, %v7357_v5, %v7356_v11  ;;  %v7653_v23 = vclz %v8402_v18  ;;  %v7518_v13 = vsel %vm7516_vm13, %v7506_v36, 2102212464  ;;  %v7521_v35 = vsel %vm7513_vm3, %v7500_v61, %v7503_v26  ;;  %v15048_v33 = vpop.eup %9129 }
 0x88f   : > { %v7519_v27 = vsel %vm7515_vm4, %v7503_v26, %v7518_v13  ;;  %v7522_v46 = vsel %vm7516_vm13, %v7509_v42, 920167782  ;;  %v15045_v19 = vshll.u32 %v7801_v31, 8  ;;  %v7692_v2 = vand.u32 2139095040, %v14983_v4  ;;  %16449 = vst [vmem:[#allocation57_spill] sm:$0xff] %v15048_v33 }
 0x890   : > { %v8403_v0 = vadd.s32 4294967294, %v7653_v23  ;;  %vm7514_vm7 = vcmp.lt.s32.totalorder %v7494_v12, 2  ;;  %v7523_v55 = vsel %vm7515_vm4, %v7506_v36, %v7522_v46  ;;  %v7525_v18 = vsel %vm7513_vm3, %v7503_v26, %v7506_v36 }
 0x891   : > { %v15055_v5 = vsel %vm15019_vm15, %v14730_v37, %v7358_v54  ;;  %v7520_v11 = vsel %vm7514_vm7, %v7517_v49, %v7519_v27  ;;  %v7524_v22 = vsel %vm7514_vm7, %v7521_v35, %v7523_v55  ;;  %v7526_v31 = vsel %vm7516_vm13, %v7512_v15, 1326507024 }
 0x892   : > { %vm8404_vm8 = vcmp.lt.s32.totalorder %v8403_v0, 0  ;;  %v7527_v6 = vsel %vm7515_vm4, %v7509_v42, %v7526_v31  ;;  %v15060_v8 = vmul.u32.u64.low %v15009_v59, %v7524_v22  ;;  %v15061_v23 = vmul.u32.u64.high %v15009_v59, %v7524_v22, %v15060_v8 }
 0x893   : > { %v7656_v21 = vsel %vm8404_vm8, 0, %v8403_v0  ;;  %v7528_v61 = vsel %vm7514_vm7, %v7525_v18, %v7527_v6  ;;  %vm7804_vm3 = vcmp.gt.s32.totalorder %v7803_v17, 0  ;;  %v7693_v36 = vshrl.u32 %v7692_v2, 23 }
 0x894   : > { %9131 = vcosq.f32 %v15055_v5  ;;  %v7657_v26 = vsub.s32 32, %v7656_v21  ;;  %v7661_v54 = vsub.s32 4294967266, %v7656_v21  ;;  %v7805_v49 = vsel %vm7804_vm3, %v7803_v17, 0 }
 0x895   : > { %v15066_v13 = vmul.u32.u64.low %v15009_v59, %v7528_v61  ;;  %v15067_v15 = vmul.u32.u64.high %v15009_v59, %v7528_v61, %v15066_v13  ;;  %v7536_v42 = vmul.u32 %v15009_v59, %v7520_v11  ;;  %v7807_v12 = vand.u32 31, %v7805_v49 }
 0x896   : > { %v7658_v35 = vshll.u32 %v15023_v20, %v7656_v21  ;;  %v7659_v27 = vshrl.u32 %v15004_v39, %v7657_v26  ;;  %v7662_v46 = vadd.s32 127, %v7661_v54  ;;  %v7539_v0 = vadd.s32 1, %v15061_v23 }
 0x897   : > { %v7806_v2 = vshrl.u32 %v7805_v49, 5  ;;  %v7808_v55 = vsub.s32 32, %v7807_v12  ;;  %v7810_v18 = vshll.u32 %v16071_v29, %v7807_v12  ;;  %v8405_v22 = vadd.s32 4294967169, %v7693_v36 }
 0x898   : > { %v7660_v17 = vor.u32 %v7659_v27, %v7658_v35  ;;  %v7663_v31 = vshll.u32 %v7662_v46, 23  ;;  %v7813_v6 = vshll.u32 %v16072_v25, %v7807_v12  ;;  %v7816_v61 = vshll.u32 %v16073_v40, %v7807_v12 }
 0x899   : > { %vm7538_vm7 = vc.u32 %v15067_v15, %v15060_v8  ;;  %v7811_v39 = vshrl.u32 %v16072_v25, %v7808_v55  ;;  %v7819_v59 = vshll.u32 %v16074_v57, %v7807_v12  ;;  %v7822_v20 = vshll.u32 %v16075_v24, %v7807_v12 }
 0x89a   : > { %v7664_v11 = vor.u32 4788187, %v7663_v31  ;;  %v7540_v21 = vsel %vm7538_vm7, %v7539_v0, %v15061_v23  ;;  %v7809_v36 = vshrl.u32 %v16071_v29, %v7808_v55  ;;  %v7814_v26 = vshrl.u32 %v16073_v40, %v7808_v55 }
 0x89b   : > { %v16450_v54 = vand.u32 2147483647, %v14745_v62  ;;  %v16451_v49 = vmov 0  ;;  %v7541_v13 = vadd.s32 %v7540_v21, %v7536_v42  ;;  %v7812_v35 = vor.u32 %v7811_v39, %v7810_v18 }
 0x89c   : > { %v7817_v27 = vshrl.u32 %v16074_v57, %v7808_v55  ;;  %v7820_v46 = vshrl.u32 %v16075_v24, %v7808_v55  ;;  %v7665_v12 = vand.u32 2147483647, %v7664_v11  ;;  %v7667_v31 = vcvt.s32.f32 %v7660_v17 }
 0x89d   : > { %vm15087_vm8 = vcmp.le.f32.partialorder %v16450_v54, 0.7853982  ;;  %v7815_v52 = vor.u32 %v7814_v26, %v7813_v6  ;;  %v7823_v23 = vshrl.u32 %v16076_v28, %v7808_v55  ;;  %v7542_v0 = vadd.s32 536870912, %v7541_v13 }
 0x89e   : > { %v16452_v49 = vsel %vm15087_vm8, 4294967295, %v16451_v49  ;;  %v7818_v33 = vor.u32 %v7817_v27, %v7816_v61  ;;  %v7821_v60 = vor.u32 %v7820_v46, %v7819_v59  ;;  %vm7825_vm4 = vcmp.lt.s32.totalorder %v7806_v2, 1 }
 0x89f   : > { %v7668_v37 = vmul.f32 %v7667_v31, %v7665_v12  ;;  %v7824_v54 = vor.u32 %v7823_v23, %v7822_v20  ;;  %vm7827_vm3 = vcmp.lt.s32.totalorder %v7806_v2, 3  ;;  %vm7828_vm7 = vcmp.lt.s32.totalorder %v7806_v2, 4 }
 0x8a0   : > { %v15094_v41 = vshrl.u32 %v7542_v0, 30  ;;  %v7829_v42 = vsel %vm7825_vm4, %v7809_v36, %v7812_v35  ;;  %v7830_v18 = vsel %vm7828_vm7, %v7818_v33, 2102212464  ;;  %v7833_v39 = vsel %vm7825_vm4, %v7812_v35, %v7815_v52 }
 0x8a1   : > { %v7669_v21 = vxor.u32 2147483648, %v7668_v37  ;;  %v7831_v11 = vsel %vm7827_vm3, %v7815_v52, %v7830_v18  ;;  %v7834_v17 = vsel %vm7828_vm7, %v7821_v60, 920167782  ;;  %v7837_v6 = vsel %vm7825_vm4, %v7815_v52, %v7818_v33  ;;  %v15097_v26 = vpop.eup %9131 }
 0x8a2   : > { %v7544_v55 = vshll.u32 %v15094_v41, 30  ;;  %vm7826_vm13 = vcmp.lt.s32.totalorder %v7806_v2, 2  ;;  %v7835_v61 = vsel %vm7827_vm3, %v7818_v33, %v7834_v17  ;;  %v7838_v59 = vsel %vm7828_vm7, %v7824_v54, 1326507024 }
 0x8a3   : > { %9133 = vsinq.f32 %v15055_v5  ;;  %vm16453_vm15 = vcmp.lt.s32.totalorder %v14745_v62, 0  ;;  %v7836_v36 = vsel %vm7826_vm13, %v7833_v39, %v7835_v61  ;;  %v7839_v35 = vsel %vm7827_vm3, %v7821_v60, %v7838_v59 }
 0x8a4   : > { %v7670_v20 = vsel %vm16453_vm15, %v7669_v21, %v7668_v37  ;;  %v15105_v27 = vsub.s32 %v7541_v13, %v7544_v55  ;;  %v7832_v46 = vsel %vm7826_vm13, %v7829_v42, %v7831_v11  ;;  %v7840_v52 = vsel %vm7826_vm13, %v7837_v6, %v7839_v35 }
 0x8a5   : > { %v16454_v12 = vand.u32 2147483647, %v14983_v4  ;;  %v7673_v33 = vsel %vm15087_vm8, %v14745_v62, %v7670_v20  ;;  %v15113_v23 = vmul.u32.u64.low %v15045_v19, %v7840_v52  ;;  %v15114_v5 = vmul.u32.u64.high %v15045_v19, %v7840_v52, %v15113_v23 }
 0x8a6   : > { %v7699_v0 = vadd.s32 1, %v8405_v22  ;;  %v7537_v37 = vadd.s32 %v15060_v8, %v15067_v15  ;;  %v7547_v60 = vsub.s32 0, %v15105_v27  ;;  %v7848_v54 = vmul.u32 %v15045_v19, %v7832_v46 }
 0x8a7   : > { %v7696_v31 = vand.u32 8388607, %v16454_v12  ;;  %v15120_v2 = vmul.u32.u64.low %v15045_v19, %v7836_v36  ;;  %v15121_v13 = vmul.u32.u64.high %v15045_v19, %v7836_v36, %v15120_v2  ;;  %v16455_v18 = vsub.s32 4, %v14100_v58 }
 0x8a8   : > { %vm7700_vm15 = vcmp.gt.s32.totalorder %v7699_v0, 0  ;;  %vm16456_vm13 = vcmp.lt.s32.totalorder %v14032_v48, 0  ;;  %9135 = vcosq.f32 %v7673_v33  ;;  %v8398_v8 = vmin.u32 %v7547_v60, %v15105_v27 }
 0x8a9   : > { %v7697_v42 = vor.u32 8388608, %v7696_v31  ;;  %v6424_v22 = vsel %vm16456_vm13, %v16455_v18, %v14100_v58  ;;  %v7701_v15 = vsel %vm7700_vm15, %v7699_v0, 0  ;;  %9137 = vsinq.f32 %v7673_v33 }
 0x8aa   : > { %v6426_v39 = vsel %vm14293_vm5, 0, %v6424_v22  ;;  %vm7850_vm4 = vc.u32 %v15114_v5, %v15120_v2  ;;  %v7703_v19 = vand.u32 31, %v7701_v15  ;;  %v6437_v21 = vxor.u32 2147483648, %v14421_v34 }
 0x8ab   : > { %v7549_v11 = vclz %v8398_v8  ;;  %v7851_v17 = vadd.s32 1, %v15121_v13  ;;  %v15137_v6 = vshrl.u32 %v7701_v15, 5  ;;  %v6631_v58 = vsub.s32 4, %v14198_v9 }
 0x8ac   : > { %v7704_v55 = vsub.s32 32, %v7703_v19  ;;  %v7706_v61 = vshll.u32 %v16071_v29, %v7703_v19  ;;  %v15141_v59 = vshll.u32 %v7697_v42, 8  ;;  %v6430_v43 = vadd.s32 3, %v6426_v39 }
 0x8ad   : > { %v8399_v20 = vadd.s32 4294967294, %v7549_v11  ;;  %v7852_v36 = vsel %vm7850_vm4, %v7851_v17, %v15121_v13  ;;  %v7709_v35 = vshll.u32 %v16072_v25, %v7703_v19  ;;  %v7712_v46 = vshll.u32 %v16073_v40, %v7703_v19 }
 0x8ae   : > { %v7853_v52 = vadd.s32 %v7852_v36, %v7848_v54  ;;  %v7707_v12 = vshrl.u32 %v16072_v25, %v7704_v55  ;;  %v7710_v31 = vshrl.u32 %v16073_v40, %v7704_v55  ;;  %v7715_v33 = vshll.u32 %v16074_v57, %v7703_v19 }
 0x8af   : > { %vm8400_vm5 = vcmp.lt.s32.totalorder %v8399_v20, 0  ;;  %v7713_v23 = vshrl.u32 %v16074_v57, %v7704_v55  ;;  %v7716_v0 = vshrl.u32 %v16075_v24, %v7704_v55  ;;  %v7719_v60 = vshrl.u32 %v16076_v28, %v7704_v55 }
 0x8b0   : > { %v7552_v42 = vsel %vm8400_vm5, 0, %v8399_v20  ;;  %v7854_v13 = vadd.s32 536870912, %v7853_v52  ;;  %v7708_v18 = vor.u32 %v7707_v12, %v7706_v61  ;;  %v7711_v22 = vor.u32 %v7710_v31, %v7709_v35  ;;  %v15152_v8 = vpop.eup %9133 }
 0x8b1   : > { %v7553_v54 = vsub.s32 32, %v7552_v42  ;;  %v7557_v15 = vsub.s32 4294967266, %v7552_v42  ;;  %v7714_v25 = vor.u32 %v7713_v23, %v7712_v46  ;;  %v7718_v40 = vshll.u32 %v16075_v24, %v7703_v19 }
 0x8b2   : > { %v7554_v39 = vshll.u32 %v15105_v27, %v7552_v42  ;;  %v15156_v11 = vshrl.u32 %v7854_v13, 30  ;;  %v7705_v57 = vshrl.u32 %v16071_v29, %v7704_v55  ;;  %v7717_v17 = vor.u32 %v7716_v0, %v7715_v33 }
 0x8b3   : > { %v7555_v36 = vshrl.u32 %v7537_v37, %v7553_v54  ;;  %v7558_v28 = vadd.s32 127, %v7557_v15  ;;  %v7720_v20 = vor.u32 %v7719_v60, %v7718_v40  ;;  %vm7721_vm3 = vcmp.lt.s32.totalorder %v15137_v6, 1 }
 0x8b4   : > { %v7856_v61 = vshll.u32 %v15156_v11, 30  ;;  %vm7723_vm7 = vcmp.lt.s32.totalorder %v15137_v6, 3  ;;  %vm15880_vm15 = vcmp.lt.s32.totalorder %v15137_v6, 4  ;;  %v7729_v24 = vsel %vm7721_vm3, %v7708_v18, %v7711_v22 }
 0x8b5   : > { %v7556_v27 = vor.u32 %v7555_v36, %v7554_v39  ;;  %v7559_v19 = vshll.u32 %v7558_v28, 23  ;;  %v7726_v29 = vsel %vm15880_vm15, %v7714_v25, 2102212464  ;;  %v7730_v37 = vsel %vm15880_vm15, %v7717_v17, 920167782  ;;  %v15169_v55 = vpop.eup %9135 }
 0x8b6   : > { %v15172_v35 = vsub.s32 %v7853_v52, %v7856_v61  ;;  %vm7722_vm4 = vcmp.lt.s32.totalorder %v15137_v6, 2  ;;  %v7725_v46 = vsel %vm7721_vm3, %v7705_v57, %v7708_v18  ;;  %v7731_v12 = vsel %vm7723_vm7, %v7714_v25, %v7730_v37  ;;  %v15180_v31 = vpop.eup %9137 }
 0x8b7   : > { %v16457_v33 = vand.u32 2147483647, %v14906_v47  ;;  %v7560_v52 = vor.u32 4788187, %v7559_v19  ;;  %v7727_v0 = vsel %vm7723_vm7, %v7711_v22, %v7726_v29  ;;  %v7732_v60 = vsel %vm7722_vm4, %v7729_v24, %v7731_v12 }
 0x8b8   : > { %v7733_v42 = vsel %vm7721_vm3, %v7711_v22, %v7714_v25  ;;  %v7859_v13 = vsub.s32 0, %v15172_v35  ;;  %vm16460_vm5 = vcmp.lt.s32.totalorder %v15137_v6, 4  ;;  %v7563_v39 = vcvt.s32.f32 %v7556_v27 }
 0x8b9   : > { %vm15184_vm15 = vcmp.le.f32.partialorder %v16457_v33, 0.7853982  ;;  %v7734_v18 = vsel %vm16460_vm5, %v7720_v20, 1326507024  ;;  %v15198_v54 = vmul.u32.u64.low %v15141_v59, %v7732_v60  ;;  %v15199_v15 = vmul.u32.u64.high %v15141_v59, %v7732_v60, %v15198_v54 }
 0x8ba   : > { %v7561_v40 = vand.u32 2147483647, %v7560_v52  ;;  %v7735_v57 = vsel %vm7723_vm7, %v7717_v17, %v7734_v18  ;;  %v6431_v36 = vand.u32 3, %v6430_v43  ;;  %v8410_v28 = vmin.u32 %v7859_v13, %v15172_v35 }
 0x8bb   : > { %v7728_v22 = vsel %vm7722_vm4, %v7725_v46, %v7727_v0  ;;  %v7736_v25 = vsel %vm7722_vm4, %v7733_v42, %v7735_v57  ;;  %vm16461_vm3 = vcmp.lt.s32.totalorder %v14068_v63, 0  ;;  %v7747_v17 = vadd.s32 1, %v15199_v15 }
 0x8bc   : > { %v6632_v20 = vsel %vm16461_vm3, %v6631_v58, %v14198_v9  ;;  %v7564_v61 = vmul.f32 %v7563_v39, %v7561_v40  ;;  %v15214_v24 = vmul.u32.u64.low %v15141_v59, %v7736_v25  ;;  %v15215_v27 = vmul.u32.u64.high %v15141_v59, %v7736_v25, %v15214_v24 }
 0x8bd   : > { %vm6432_vm7 = vcmp.lt.s32.totalorder %v6431_v36, 2  ;;  %v7861_v43 = vclz %v8410_v28  ;;  %vm6433_vm5 = vcmp.eq.s32.totalorder %v6431_v36, 0  ;;  %vm6436_vm13 = vcmp.eq.s32.totalorder %v6431_v36, 2 }
 0x8be   : > { %v7565_v19 = vxor.u32 2147483648, %v7564_v61  ;;  %v16462_v6 = vxor.u32 2147483648, %v14431_v53  ;;  %v6438_v9 = vsel %vm6436_vm13, %v6437_v21, %v14431_v53  ;;  %v6634_v58 = vsel %vm14356_vm9, 0, %v6632_v20  ;;  %v16465_v53 = vld [vmem:[#allocation21_spill] sm:$0xff] }
 0x8bf   : > { %v8411_v37 = vadd.s32 4294967294, %v7861_v43  ;;  %v7744_v46 = vmul.u32 %v15141_v59, %v7728_v22  ;;  %v6638_v33 = vadd.s32 3, %v6634_v58  ;;  %vm16463_vm4 = vcmp.lt.s32.totalorder %v14906_v47, 0  ;;  %v15241_v59 = vld [vmem:[%s15566_s9] ss:$0 sm:$0xff] }
 0x8c0   : > { %v6435_v29 = vsel %vm6433_vm5, %v14421_v34, %v16462_v6  ;;  %v7566_v52 = vsel %vm16463_vm4, %v7565_v19, %v7564_v61  ;;  %vm7746_vm3 = vc.u32 %v15215_v27, %v15198_v54  ;;  %vm16464_vm8 = vweird.f32 %v14032_v48 }
 0x8c1   : > { %v6439_v12 = vsel %vm6432_vm7, %v6435_v29, %v6438_v9  ;;  %v6642_v60 = vxor.u32 2147483648, %v14534_v56  ;;  %v7569_v16 = vsel %vm15184_vm15, %v14906_v47, %v7566_v52  ;;  %vm8412_vm9 = vcmp.lt.s32.totalorder %v8411_v37, 0  ;;  %v16471_v52 = vld [vmem:[#allocation32_spill] sm:$0xff] }
 0x8c2   : > { %v6440_v0 = vsel %vm16464_vm8, nan, %v6439_v12  ;;  %v7748_v34 = vsel %vm7746_vm3, %v7747_v17, %v15199_v15  ;;  %v7849_v48 = vadd.s32 %v15120_v2, %v15114_v5  ;;  %v7864_v42 = vsel %vm8412_vm9, 0, %v8411_v37 }
 0x8c3   : > { %v7898_v21 = vadd.f32 %v6440_v0, %v16465_v53  ;;  %v7749_v13 = vadd.s32 %v7748_v34, %v7744_v46  ;;  %v6639_v18 = vand.u32 3, %v6638_v33  ;;  %v7865_v40 = vsub.s32 32, %v7864_v42  ;;  %v16472_v34 = vld [vmem:[#allocation7_spill] sm:$0xff] }
 0x8c4   : > { %v7869_v39 = vsub.s32 4294967266, %v7864_v42  ;;  %v15246_v57 = vadd.s32 %v15198_v54, %v15215_v27  ;;  %vm6637_vm8 = vweird.f32 %v14068_v63  ;;  %9139 = vcosq.f32 %v7569_v16 }
 0x8c5   : > { %v7750_v15 = vadd.s32 536870912, %v7749_v13  ;;  %v7921_v36 = vmul.f32 %v15241_v59, %v7898_v21  ;;  %vm6641_vm13 = vcmp.eq.s32.totalorder %v6639_v18, 0  ;;  %v7866_v28 = vshll.u32 %v15172_v35, %v7864_v42 }
 0x8c6   : > { %v7867_v22 = vshrl.u32 %v7849_v48, %v7865_v40  ;;  %v7870_v25 = vadd.s32 127, %v7869_v39  ;;  %v6643_v5 = vsel %vm6641_vm13, %v14528_v7, %v6642_v60  ;;  %vm16466_vm7 = vcmask 261120  }
 0x8c7   : > { %v15252_v2 = vshrl.u32 %v7750_v15, 30  ;;  %v7939_v20 = vsel %vm16466_vm7, %v7921_v36, 0.0  ;;  %v6645_v54 = vxor.u32 2147483648, %v14528_v7  ;;  %v6319_v61 = vsub.s32 4, %v14125_v50 }
 0x8c8   : > { %9141 = vsinq.f32 %v7569_v16  ;;  %v7868_v24 = vor.u32 %v7867_v22, %v7866_v28  ;;  %v7871_v27 = vshll.u32 %v7870_v25, 23  ;;  %7940 = vadd.xlane.f32.xlu0 %v7939_v20  ;;  %vm6644_vm5 = vcmp.eq.s32.totalorder %v6639_v18, 2 }
 0x8c9   : > { %vm7795_vm4 = vcmp.lt.s32.totalorder %v14968_v1, 0  ;;  %v7752_v35 = vshll.u32 %v15252_v2, 30  ;;  %vm6640_vm3 = vcmp.lt.s32.totalorder %v6639_v18, 2  ;;  %v6646_v43 = vsel %vm6644_vm5, %v6645_v54, %v14534_v56 }
 0x8ca   : > { %vm16467_vm9 = vcmp.lt.s32.totalorder %v14037_v51, 0  ;;  %v16468_v7 = vand.u32 2147483647, %v14968_v1  ;;  %v7872_v6 = vor.u32 4788187, %v7871_v27  ;;  %v6647_v29 = vsel %vm6640_vm3, %v6643_v5, %v6646_v43  ;;  %v16477_v5 = vld [vmem:[#allocation4_spill] sm:$0xff] }
 0x8cb   : > { %v6320_v17 = vsel %vm16467_vm9, %v6319_v61, %v14125_v50  ;;  %v6330_v58 = vxor.u32 2147483648, %v14456_v32  ;;  %v15272_v37 = vsub.s32 %v7749_v13, %v7752_v35  ;;  %v6648_v56 = vsel %vm6637_vm8, nan, %v6647_v29  ;;  %v16475_v13 = vld [vmem:[#allocation3_spill] sm:$0xff]  ;;  %v16480_v43 = vld [vmem:[#allocation33_spill] sm:$0xff] }
 0x8cc   : > { %vm15265_vm13 = vcmp.le.f32.partialorder %v16468_v7, 0.7853982  ;;  %v6322_v9 = vsel %vm14342_vm2, 0, %v6320_v17  ;;  %v6527_v50 = vsub.s32 4, %v14252_v30  ;;  %v7873_v12 = vand.u32 2147483647, %v7872_v6 }
 0x8cd   : > { %v6326_v46 = vadd.s32 3, %v6322_v9  ;;  %v7875_v33 = vcvt.s32.f32 %v7868_v24  ;;  %v7900_v0 = vadd.f32 %v6648_v56, %v16471_v52  ;;  %v6333_v60 = vxor.u32 2147483648, %v14449_v3  ;;  %v16481_v6 = vld [vmem:[#allocation34_spill] sm:$0xff]  ;;  %v16482_v9 = vld [vmem:[#allocation16_spill] sm:$0xff] }
 0x8ce   : > { %v7755_v16 = vsub.s32 0, %v15272_v37  ;;  %vm6325_vm2 = vweird.f32 %v14037_v51  ;;  %vm16473_vm7 = vcmp.lt.s32.totalorder %v16472_v34, 0  ;;  %v6735_v18 = vsub.s32 4, %v16475_v13 }
 0x8cf   : > { %v6327_v14 = vand.u32 3, %v6326_v46  ;;  %v6528_v53 = vsel %vm16473_vm7, %v6527_v50, %v14252_v30  ;;  %v7876_v63 = vmul.f32 %v7875_v33, %v7873_v12  ;;  %v7923_v21 = vmul.f32 %v15241_v59, %v7900_v0  ;;  %v16483_v12 = vld [vmem:[#allocation14_spill] sm:$0xff] }
 0x8d0   : > { %v6530_v42 = vsel %vm14425_vm14, 0, %v6528_v53  ;;  %v8406_v40 = vmin.u32 %v7755_v16, %v15272_v37  ;;  %vm16476_vm9 = vcmask 261120   ;;  %vm16478_vm14 = vcmp.lt.s32.totalorder %v16477_v5, 0 }
 0x8d1   : > { %vm6328_vm8 = vcmp.lt.s32.totalorder %v6327_v14, 2  ;;  %vm6329_vm5 = vcmp.eq.s32.totalorder %v6327_v14, 0  ;;  %vm6332_vm3 = vcmp.eq.s32.totalorder %v6327_v14, 2  ;;  %v7877_v39 = vxor.u32 2147483648, %v7876_v63  ;;  %v15295_v54 = vpop.eup %9139 }
 0x8d2   : > { %v7945_v15 = vsel %vm16476_vm9, %v7923_v21, 0.0  ;;  %v6331_v36 = vsel %vm6329_vm5, %v14449_v3, %v6330_v58  ;;  %v6334_v30 = vsel %vm6332_vm3, %v6333_v60, %v14456_v32  ;;  %v7757_v28 = vclz %v8406_v40  ;;  %vm16484_vm5 = vmmov %vm16476_vm9 }
 0x8d3   : > { %7946 = vadd.xlane.f32.xlu1 %v7945_v15  ;;  %v6335_v22 = vsel %vm6328_vm8, %v6331_v36, %v6334_v30  ;;  %v6534_v25 = vadd.s32 3, %v6530_v42  ;;  %v6736_v20 = vsel %vm16478_vm14, %v6735_v18, %v16475_v13  ;;  %v7878_v61 = vsel %vm7795_vm4, %v7877_v39, %v7876_v63  ;;  %v16485_v39 = vld [vmem:[#allocation29_spill] sm:$0xff]  ;;  %v16486_v30 = vld [vmem:[#allocation26_spill] sm:$0xff] }
 0x8d4   : > { %v6336_v24 = vsel %vm6325_vm2, nan, %v6335_v22  ;;  %vm6533_vm7 = vweird.f32 %v16472_v34  ;;  %v6738_v32 = vsel %vm14630_vm6, 0, %v6736_v20  ;;  %v7881_v27 = vsel %vm15265_vm13, %v14968_v1, %v7878_v61 }
 0x8d5   : > { %v8407_v35 = vadd.s32 4294967294, %v7757_v28  ;;  %v7897_v17 = vadd.f32 %v6336_v24, %v16480_v43  ;;  %v6535_v7 = vand.u32 3, %v6534_v25  ;;  %9143 = vcosq.f32 %v7881_v27  ;;  %v15310_v56 = vpop.eup %9141  ;;  %v16487_v25 = vld [vmem:[#allocation5_spill] sm:$0xff]  ;;  %v16494_v43 = vld [vmem:[#allocation46_spill] sm:$0xff] }
 0x8d6   : > { %v6538_v29 = vxor.u32 2147483648, %v16481_v6  ;;  %v6541_v58 = vxor.u32 2147483648, %v16482_v9  ;;  %v6742_v51 = vadd.s32 3, %v6738_v32  ;;  %v6746_v50 = vxor.u32 2147483648, %v14772_v45  ;;  %v16492_v32 = vld [vmem:[#allocation30_spill] sm:$0xff] }
 0x8d7   : > { %vm8408_vm2 = vcmp.lt.s32.totalorder %v8407_v35, 0  ;;  %v7920_v46 = vmul.f32 %v15241_v59, %v7897_v17  ;;  %v6749_v33 = vxor.u32 2147483648, %v16483_v12  ;;  %vm6536_vm6 = vcmp.lt.s32.totalorder %v6535_v7, 2 }
 0x8d8   : > { %v7760_v52 = vsel %vm8408_vm2, 0, %v8407_v35  ;;  %vm6537_vm8 = vcmp.eq.s32.totalorder %v6535_v7, 0  ;;  %v6743_v0 = vand.u32 3, %v6742_v51  ;;  %vm6540_vm3 = vcmp.eq.s32.totalorder %v6535_v7, 2  ;;  %v16495_v7 = vld [vmem:[#allocation28_spill] sm:$0xff] }
 0x8d9   : > { %v7761_v60 = vsub.s32 32, %v7760_v52  ;;  %v7765_v16 = vsub.s32 4294967266, %v7760_v52  ;;  %v7936_v14 = vsel %vm16484_vm5, %v7920_v46, 0.0  ;;  %v7762_v53 = vshll.u32 %v15272_v37, %v7760_v52 }
 0x8da   : > { %7937 = vadd.xlane.f32.xlu0 %v7936_v14  ;;  %v6539_v63 = vsel %vm6537_vm8, %v16482_v9, %v6538_v29  ;;  %v6542_v21 = vsel %vm6540_vm3, %v6541_v58, %v16481_v6  ;;  %vm6745_vm9 = vcmp.eq.s32.totalorder %v6743_v0, 0  ;;  %vm6744_vm14 = vcmp.lt.s32.totalorder %v6743_v0, 2 }
 0x8db   : > { %v7763_v48 = vshrl.u32 %v15246_v57, %v7761_v60  ;;  %v7766_v42 = vadd.s32 127, %v7765_v16  ;;  %v6543_v13 = vsel %vm6536_vm6, %v6539_v63, %v6542_v21  ;;  %v6747_v18 = vsel %vm6745_vm9, %v16483_v12, %v6746_v50  ;;  %v16497_v50 = vld [vmem:[#allocation48_spill] sm:$0xff] }
 0x8dc   : > { %v6544_v40 = vsel %vm6533_vm7, nan, %v6543_v13  ;;  %vm6748_vm2 = vcmp.eq.s32.totalorder %v6743_v0, 2  ;;  %v6839_v15 = vsub.s32 4, %v16485_v39  ;;  %9145 = vsinq.f32 %v7881_v27  ;;  %v16500_v0 = vld [vmem:[#allocation38_spill] sm:$0xff] }
 0x8dd   : > { %v7764_v37 = vor.u32 %v7763_v48, %v7762_v53  ;;  %v7767_v36 = vshll.u32 %v7766_v42, 23  ;;  %v7899_v28 = vadd.f32 %v6544_v40, %v16486_v30  ;;  %v6750_v22 = vsel %vm6748_vm2, %v6749_v33, %v14772_v45  ;;  %v16498_v33 = vld [vmem:[#allocation35_spill] sm:$0xff]  ;;  %v16503_v40 = vld [vmem:[#allocation22_spill] sm:$0xff] }
 0x8de   : > { %vm7691_vm8 = vcmp.lt.s32.totalorder %v14983_v4, 0  ;;  %vm6741_vm6 = vweird.f32 %v16477_v5  ;;  %v6751_v57 = vsel %vm6744_vm14, %v6747_v18, %v6750_v22  ;;  %vm16488_vm5 = vcmp.lt.s32.totalorder %v16487_v25, 0 }
 0x8df   : > { %v6840_v34 = vsel %vm16488_vm5, %v6839_v15, %v16485_v39  ;;  %v16489_v20 = vand.u32 2147483647, %v14983_v4  ;;  %v7768_v24 = vor.u32 4788187, %v7767_v36  ;;  %v7922_v3 = vmul.f32 %v15241_v59, %v7899_v28 }
 0x8e0   : > { %v6752_v45 = vsel %vm6741_vm6, nan, %v6751_v57  ;;  %vm6845_vm3 = vweird.f32 %v16487_v25  ;;  %v6842_v35 = vsel %vm14473_vm11, 0, %v6840_v34  ;;  %v6850_v17 = vxor.u32 2147483648, %v16494_v43 }
 0x8e1   : > { %vm15333_vm7 = vcmp.le.f32.partialorder %v16489_v20, 0.7853982  ;;  %v7901_v27 = vadd.f32 %v6752_v45, %v16492_v32  ;;  %v6943_v6 = vsub.s32 4, %v16495_v7  ;;  %v7769_v29 = vand.u32 2147483647, %v7768_v24  ;;  %v16506_v45 = vld [vmem:[#allocation47_spill] sm:$0xff] }
 0x8e2   : > { %v7771_v9 = vcvt.s32.f32 %v7764_v37  ;;  %vm16496_vm9 = vcmask 261120   ;;  %v6846_v51 = vadd.s32 3, %v6842_v35  ;;  %v6853_v12 = vxor.u32 2147483648, %v16497_v50  ;;  %v15351_v16 = vpop.eup %9143 }
 0x8e3   : > { %v7942_v58 = vsel %vm16496_vm9, %v7922_v3, 0.0  ;;  %v7924_v46 = vmul.f32 %v15241_v59, %v7901_v27  ;;  %vm16499_vm14 = vcmp.lt.s32.totalorder %v16498_v33, 0  ;;  %v7047_v60 = vsub.s32 4, %v16500_v0  ;;  %vm16502_vm11 = vmmov %vm16496_vm9  ;;  %v16507_v27 = vld [vmem:[#allocation24_spill] sm:$0xff] }
 0x8e4   : > { %7943 = vadd.xlane.f32.xlu1 %v7942_v58  ;;  %v6944_v52 = vsel %vm16499_vm14, %v6943_v6, %v16495_v7  ;;  %v7772_v14 = vmul.f32 %v7771_v9, %v7769_v29  ;;  %v6847_v53 = vand.u32 3, %v6846_v51  ;;  %v6954_v48 = vxor.u32 2147483648, %v14854_v10  ;;  %v16509_v29 = vld [vmem:[#allocation27_spill] sm:$0xff] }
 0x8e5   : > { %v6946_v21 = vsel %vm14710_vm1, 0, %v6944_v52  ;;  %v7948_v42 = vsel %vm16502_vm11, %v7924_v46, 0.0  ;;  %v6957_v18 = vxor.u32 2147483648, %v14851_v38  ;;  %vm16504_vm2 = vcmp.lt.s32.totalorder %v16503_v40, 0 }
 0x8e6   : > { %v6950_v13 = vadd.s32 3, %v6946_v21  ;;  %v7048_v39 = vsel %vm16504_vm2, %v7047_v60, %v16500_v0  ;;  %v7773_v15 = vxor.u32 2147483648, %v7772_v14  ;;  %7949 = vadd.xlane.f32.xlu0 %v7948_v42  ;;  %vm6848_vm6 = vcmp.lt.s32.totalorder %v6847_v53, 2  ;;  %v16515_v42 = vld [vmem:[#allocation41_spill] sm:$0xff] }
 0x8e7   : > { %vm6849_vm5 = vcmp.eq.s32.totalorder %v6847_v53, 0  ;;  %vm6852_vm9 = vcmp.eq.s32.totalorder %v6847_v53, 2  ;;  %v7050_v22 = vsel %vm14672_vm0, 0, %v7048_v39  ;;  %vm6949_vm1 = vweird.f32 %v16498_v33  ;;  %v16513_v33 = vld [vmem:[#allocation10_spill] sm:$0xff] }
 0x8e8   : > { %v6851_v37 = vsel %vm6849_vm5, %v16497_v50, %v6850_v17  ;;  %v6854_v36 = vsel %vm6852_vm9, %v6853_v12, %v16494_v43  ;;  %v6951_v30 = vand.u32 3, %v6950_v13  ;;  %v7774_v57 = vsel %vm7691_vm8, %v7773_v15, %v7772_v14  ;;  %v16508_v43 = vld [vmem:[#allocation53_spill] sm:$0xff]  ;;  %v16517_v15 = vld [vmem:[#allocation12_spill] sm:$0xff] }
 0x8e9   : > { %v6855_v34 = vsel %vm6848_vm6, %v6851_v37, %v6854_v36  ;;  %v7054_v20 = vadd.s32 3, %v7050_v22  ;;  %v7777_v24 = vsel %vm15333_vm7, %v14983_v4, %v7774_v57  ;;  %v7058_v32 = vxor.u32 2147483648, %v16506_v45  ;;  %v15379_v58 = vpop.eup %9145 }
 0x8ea   : > { %v6856_v3 = vsel %vm6845_vm3, nan, %v6855_v34  ;;  %vm6953_vm14 = vcmp.eq.s32.totalorder %v6951_v30, 0  ;;  %vm6956_vm0 = vcmp.eq.s32.totalorder %v6951_v30, 2  ;;  %v7061_v17 = vxor.u32 2147483648, %v16508_v43  ;;  %v16522_v34 = vld [vmem:[#allocation52_spill] sm:$0xff] }
 0x8eb   : > { %v7902_v5 = vadd.f32 %v6856_v3, %v16507_v27  ;;  %v6955_v35 = vsel %vm6953_vm14, %v14851_v38, %v6954_v48  ;;  %vm6952_vm11 = vcmp.lt.s32.totalorder %v6951_v30, 2  ;;  %v6958_v7 = vsel %vm6956_vm0, %v6957_v18, %v14854_v10  ;;  %v16511_v10 = vld [vmem:[#allocation42_spill] sm:$0xff]  ;;  %v16520_v30 = vld [vmem:[#allocation19_spill] sm:$0xff] }
 0x8ec   : > { %v7055_v6 = vand.u32 3, %v7054_v20  ;;  %v7151_v9 = vsub.s32 4, %v16509_v29  ;;  %9147 = vcosq.f32 %v7777_v24  ;;  %v6959_v51 = vsel %vm6952_vm11, %v6955_v35, %v6958_v7 }
 0x8ed   : > { %v7925_v25 = vmul.f32 %v15241_v59, %v7902_v5  ;;  %vm7053_vm3 = vweird.f32 %v16503_v40  ;;  %v6960_v38 = vsel %vm6949_vm1, nan, %v6959_v51  ;;  %vm16510_vm9 = vcmask 261120   ;;  %v16516_v40 = vld [vmem:[#allocation55_spill] sm:$0xff]  ;;  %v16524_v5 = vld [vmem:[#allocation54_spill] sm:$0xff] }
 0x8ee   : > { %vm7056_vm2 = vcmp.lt.s32.totalorder %v7055_v6, 2  ;;  %vm7057_vm6 = vcmp.eq.s32.totalorder %v7055_v6, 0  ;;  %vm7060_vm5 = vcmp.eq.s32.totalorder %v7055_v6, 2  ;;  %v7903_v50 = vadd.f32 %v6960_v38, %v16511_v10  ;;  %vm16519_vm11 = vmmov %vm16510_vm9  ;;  %v16527_v6 = vld [vmem:[#allocation44_spill] sm:$0xff] }
 0x8ef   : > { %v7951_v46 = vsel %vm16510_vm9, %v7925_v25, 0.0  ;;  %v7059_v12 = vsel %vm7057_vm6, %v16508_v43, %v7058_v32  ;;  %v7062_v52 = vsel %vm7060_vm5, %v7061_v17, %v16506_v45  ;;  %9149 = vsinq.f32 %v7777_v24  ;;  %v16523_v32 = vld [vmem:[#allocation45_spill] sm:$0xff] }
 0x8f0   : > { %7952 = vadd.xlane.f32.xlu1 %v7951_v46  ;;  %v7063_v0 = vsel %vm7056_vm2, %v7059_v12, %v7062_v52  ;;  %vm16512_vm14 = vcmp.lt.s32.totalorder %v14498_v44, 0  ;;  %v7255_v14 = vsub.s32 4, %v16513_v33  ;;  %v7926_v53 = vmul.f32 %v15241_v59, %v7903_v50  ;;  %v16525_v43 = vld [vmem:[#allocation25_spill] sm:$0xff]  ;;  %v16529_v46 = vld [vmem:[#allocation51_spill] sm:$0xff] }
 0x8f1   : > { %v7152_v60 = vsel %vm16512_vm14, %v7151_v9, %v16509_v29  ;;  %v7064_v63 = vsel %vm7053_vm3, nan, %v7063_v0  ;;  %vm7157_vm1 = vweird.f32 %v14498_v44  ;;  %v7162_v39 = vxor.u32 2147483648, %v16516_v40  ;;  %v16531_v0 = vld [vmem:[#allocation11_spill] sm:$0xff] }
 0x8f2   : > { %v7154_v48 = vsel %vm14845_vm12, 0, %v7152_v60  ;;  %v7904_v13 = vadd.f32 %v7064_v63, %v16515_v42  ;;  %vm16518_vm0 = vcmp.lt.s32.totalorder %v16517_v15, 0  ;;  %v7954_v36 = vsel %vm16519_vm11, %v7926_v53, 0.0  ;;  %v16533_v53 = vld [vmem:[#allocation36_spill] sm:$0xff] }
 0x8f3   : > { %v7158_v18 = vadd.s32 3, %v7154_v48  ;;  %v7256_v37 = vsel %vm16518_vm0, %v7255_v14, %v16513_v33  ;;  %v7165_v28 = vxor.u32 2147483648, %v16520_v30  ;;  %v7359_v20 = vsub.s32 4, %v16522_v34  ;;  %7955 = vadd.xlane.f32.xlu0 %v7954_v36 }
 0x8f4   : > { %v7258_v57 = vsel %vm14828_vm10, 0, %v7256_v37  ;;  %v7927_v24 = vmul.f32 %v15241_v59, %v7904_v13  ;;  %v7266_v27 = vxor.u32 2147483648, %v16523_v32  ;;  %v7269_v35 = vxor.u32 2147483648, %v16524_v5  ;;  %vm16528_vm10 = vmmov %vm16510_vm9  ;;  %v16536_v37 = vld [vmem:[#allocation57_spill] sm:$0xff] }
 0x8f5   : > { %v7159_v3 = vand.u32 3, %v7158_v18  ;;  %v7262_v45 = vadd.s32 3, %v7258_v57  ;;  %vm16526_vm12 = vcmp.lt.s32.totalorder %v16525_v43, 0  ;;  %v7370_v7 = vxor.u32 2147483648, %v15152_v8  ;;  %v16534_v18 = vld [vmem:[#allocation49_spill] sm:$0xff] }
 0x8f6   : > { %v7360_v17 = vsel %vm16526_vm12, %v7359_v20, %v16522_v34  ;;  %v7463_v29 = vsub.s32 4, %v16527_v6  ;;  %v7957_v9 = vsel %vm16528_vm10, %v7927_v24, 0.0  ;;  %vm16530_vm5 = vnez %v16529_v46 }
 0x8f7   : > { %vm7160_vm3 = vcmp.lt.s32.totalorder %v7159_v3, 2  ;;  %vm7161_vm2 = vcmp.eq.s32.totalorder %v7159_v3, 0  ;;  %vm7164_vm6 = vcmp.eq.s32.totalorder %v7159_v3, 2  ;;  %7958 = vadd.xlane.f32.xlu1 %v7957_v9  ;;  %v7263_v38 = vand.u32 3, %v7262_v45 }
 0x8f8   : > { %v7163_v25 = vsel %vm7161_vm2, %v16520_v30, %v7162_v39  ;;  %v7166_v51 = vsel %vm7164_vm6, %v7165_v28, %v16516_v40  ;;  %v7362_v10 = vsel %vm16530_vm5, 0, %v7360_v17  ;;  %v7373_v52 = vxor.u32 2147483648, %v15097_v26  ;;  %v16537_v28 = vld [vmem:[#allocation37_spill] sm:$0xff]  ;;  %v16541_v17 = vld [vmem:[#allocation50_spill] sm:$0xff] }
 0x8f9   : > { %v7167_v50 = vsel %vm7160_vm3, %v7163_v25, %v7166_v51  ;;  %v7366_v12 = vadd.s32 3, %v7362_v10  ;;  %vm16532_vm9 = vcmp.lt.s32.totalorder %v16531_v0, 0  ;;  %vm7264_vm14 = vcmp.lt.s32.totalorder %v7263_v38, 2  ;;  %v15426_v14 = vpop.eup %9147 }
 0x8fa   : > { %v7464_v60 = vsel %vm16532_vm9, %v7463_v29, %v16527_v6  ;;  %v7168_v33 = vsel %vm7157_vm1, nan, %v7167_v50  ;;  %vm7265_vm0 = vcmp.eq.s32.totalorder %v7263_v38, 0  ;;  %vm7268_vm11 = vcmp.eq.s32.totalorder %v7263_v38, 2  ;;  %v16543_v6 = vld [vmem:[#allocation31_spill] sm:$0xff] }
 0x8fb   : > { %v7905_v63 = vadd.f32 %v7168_v33, %v16533_v53  ;;  %v7267_v21 = vsel %vm7265_vm0, %v16524_v5, %v7266_v27  ;;  %v7270_v48 = vsel %vm7268_vm11, %v7269_v35, %v16523_v32  ;;  %v7367_v42 = vand.u32 3, %v7366_v12  ;;  %v16539_v27 = vld [vmem:[#allocation56_spill] sm:$0xff] }
 0x8fc   : > { %vm7261_vm12 = vweird.f32 %v16517_v15  ;;  %v7271_v13 = vsel %vm7264_vm14, %v7267_v21, %v7270_v48  ;;  %vm7365_vm10 = vweird.f32 %v16525_v43  ;;  %vm16535_vm3 = vnez %v16534_v18  ;;  %v15437_v30 = vpop.eup %9149 }
 0x8fd   : > { %v7466_v44 = vsel %vm16535_vm3, 0, %v7464_v60  ;;  %v7928_v40 = vmul.f32 %v15241_v59, %v7905_v63  ;;  %v7272_v39 = vsel %vm7261_vm12, nan, %v7271_v13  ;;  %vm7369_vm1 = vcmp.eq.s32.totalorder %v7367_v42, 0  ;;  %v16547_v63 = vld [vmem:[#allocation40_spill] sm:$0xff] }
 0x8fe   : > { %v7474_v36 = vxor.u32 2147483648, %v16536_v37  ;;  %v7906_v22 = vadd.f32 %v7272_v39, %v16537_v28  ;;  %v7371_v57 = vsel %vm7369_vm1, %v15097_v26, %v7370_v7  ;;  %vm7372_vm2 = vcmp.eq.s32.totalorder %v7367_v42, 2  ;;  %v16549_v28 = vld [vmem:[#allocation39_spill] sm:$0xff] }
 0x8ff   : > { %v7470_v15 = vadd.s32 3, %v7466_v44  ;;  %vm16538_vm6 = vcmask 261120   ;;  %vm7368_vm5 = vcmp.lt.s32.totalorder %v7367_v42, 2  ;;  %v7374_v20 = vsel %vm7372_vm2, %v7373_v52, %v15152_v8 }
 0x900   : > { %v7960_v34 = vsel %vm16538_vm6, %v7928_v40, 0.0  ;;  %v7567_v24 = vsub.s32 4, %v15094_v41  ;;  %v7929_v3 = vmul.f32 %v15241_v59, %v7906_v22  ;;  %v7375_v45 = vsel %vm7368_vm5, %v7371_v57, %v7374_v20  ;;  %vm16542_vm0 = vmmov %vm16538_vm6  ;;  %v16550_v20 = vld [vmem:[#allocation6_spill] sm:$0xff] }
 0x901   : > { %7961 = vadd.xlane.f32.xlu0 %v7960_v34  ;;  %v7471_v32 = vand.u32 3, %v7470_v15  ;;  %v7477_v5 = vxor.u32 2147483648, %v16539_v27  ;;  %v7376_v35 = vsel %vm7365_vm10, nan, %v7375_v45  ;;  %vm7469_vm9 = vweird.f32 %v16531_v0  ;;  %vm16546_vm2 = vmmov %vm16542_vm0 }
 0x902   : > { %vm16540_vm14 = vcmp.lt.s32.totalorder %v14906_v47, 0  ;;  %v7671_v8 = vsub.s32 4, %v16541_v17  ;;  %v7963_v7 = vsel %vm16542_vm0, %v7929_v3, 0.0  ;;  %v7907_v29 = vadd.f32 %v7376_v35, %v16543_v6  ;;  %v16553_v6 = vld [vmem:[#allocation13_spill] sm:$0xff] }
 0x903   : > { %v7568_v26 = vsel %vm16540_vm14, %v7567_v24, %v15094_v41  ;;  %vm7472_vm11 = vcmp.lt.s32.totalorder %v7471_v32, 2  ;;  %vm7473_vm12 = vcmp.eq.s32.totalorder %v7471_v32, 0  ;;  %7964 = vadd.xlane.f32.xlu1 %v7963_v7  ;;  %vm7476_vm3 = vcmp.eq.s32.totalorder %v7471_v32, 2 }
 0x904   : > { %v7475_v9 = vsel %vm7473_vm12, %v16539_v27, %v7474_v36  ;;  %v7570_v43 = vsel %vm15184_vm15, 0, %v7568_v26  ;;  %vm16544_vm10 = vcmp.lt.s32.totalorder %v14745_v62, 0  ;;  %v7930_v41 = vmul.f32 %v15241_v59, %v7907_v29  ;;  %vm16548_vm12 = vmmov %vm16546_vm2 }
 0x905   : > { %v7672_v25 = vsel %vm16544_vm10, %v7671_v8, %v16541_v17  ;;  %v7478_v51 = vsel %vm7476_vm3, %v7477_v5, %v16536_v37  ;;  %v7574_v38 = vadd.s32 3, %v7570_v43  ;;  %vm16545_vm1 = vnez %v16452_v49 }
 0x906   : > { %v7674_v46 = vsel %vm16545_vm1, 0, %v7672_v25  ;;  %v7479_v10 = vsel %vm7472_vm11, %v7475_v9, %v7478_v51  ;;  %v7578_v50 = vxor.u32 2147483648, %v15310_v56  ;;  %v7581_v12 = vxor.u32 2147483648, %v15295_v54  ;;  %vm16552_vm1 = vmmov %vm16546_vm2 }
 0x907   : > { %v7678_v52 = vadd.s32 3, %v7674_v46  ;;  %v7966_v23 = vsel %vm16546_vm2, %v7930_v41, 0.0  ;;  %v7480_v60 = vsel %vm7469_vm9, nan, %v7479_v10  ;;  %v7575_v33 = vand.u32 3, %v7574_v38  ;;  %v16555_v41 = vld [vmem:[#allocation9_spill] sm:$0xff] }
 0x908   : > { %v7682_v53 = vxor.u32 2147483648, %v15180_v31  ;;  %7967 = vadd.xlane.f32.xlu0 %v7966_v23  ;;  %v7908_v21 = vadd.f32 %v7480_v60, %v16547_v63  ;;  %v7685_v49 = vxor.u32 2147483648, %v15169_v55  ;;  %v7775_v42 = vsub.s32 4, %v15252_v2  ;;  %v8414_v10 = vld [vmem:[#allocation2] ss:$0 sm:$0xff] }
 0x909   : > { %v7679_v48 = vand.u32 3, %v7678_v52  ;;  %vm7573_vm15 = vweird.f32 %v14906_v47  ;;  %vm7576_vm6 = vcmp.lt.s32.totalorder %v7575_v33, 2  ;;  %vm7577_vm5 = vcmp.eq.s32.totalorder %v7575_v33, 0 }
 0x90a   : > { %vm7580_vm14 = vcmp.eq.s32.totalorder %v7575_v33, 2  ;;  %v7931_v13 = vmul.f32 %v15241_v59, %v7908_v21  ;;  %v7579_v0 = vsel %vm7577_vm5, %v15295_v54, %v7578_v50  ;;  %v7776_v40 = vsel %vm7691_vm8, %v7775_v42, %v15252_v2  ;;  %vm16551_vm8 = vmmov %vm16546_vm2 }
 0x90b   : > { %v7582_v18 = vsel %vm7580_vm14, %v7581_v12, %v15310_v56  ;;  %vm7680_vm9 = vcmp.lt.s32.totalorder %v7679_v48, 2  ;;  %vm7681_vm0 = vcmp.eq.s32.totalorder %v7679_v48, 0  ;;  %vm7684_vm11 = vcmp.eq.s32.totalorder %v7679_v48, 2  ;;  %vm16554_vm14 = vmmov %vm16552_vm1 }
 0x90c   : > { %v7583_v44 = vsel %vm7576_vm6, %v7579_v0, %v7582_v18  ;;  %v7969_v39 = vsel %vm16548_vm12, %v7931_v13, 0.0  ;;  %v7683_v37 = vsel %vm7681_vm0, %v15169_v55, %v7682_v53  ;;  %v7686_v36 = vsel %vm7684_vm11, %v7685_v49, %v15180_v31 }
 0x90d   : > { %v7584_v47 = vsel %vm7573_vm15, nan, %v7583_v44  ;;  %7970 = vadd.xlane.f32.xlu1 %v7969_v39  ;;  %vm7677_vm3 = vweird.f32 %v14745_v62  ;;  %v7687_v56 = vsel %vm7680_vm9, %v7683_v37, %v7686_v36  ;;  %v7778_v22 = vsel %vm15333_vm7, 0, %v7776_v40  ;;  %vm16556_vm9 = vmmov %vm16552_vm1 }
 0x90e   : > { %v7909_v54 = vadd.f32 %v7584_v47, %v16549_v28  ;;  %v7688_v57 = vsel %vm7677_vm3, nan, %v7687_v56  ;;  %v7782_v15 = vadd.s32 3, %v7778_v22  ;;  %v7879_v2 = vsub.s32 4, %v15156_v11 }
 0x90f   : > { %v7910_v24 = vadd.f32 %v7688_v57, %v16550_v20  ;;  %v7786_v55 = vxor.u32 2147483648, %v15437_v30  ;;  %v7789_v31 = vxor.u32 2147483648, %v15426_v14  ;;  %v7890_v27 = vxor.u32 2147483648, %v15379_v58 }
 0x910   : > { %v7932_v34 = vmul.f32 %v15241_v59, %v7909_v54  ;;  %v7783_v3 = vand.u32 3, %v7782_v15  ;;  %v7880_v62 = vsel %vm7795_vm4, %v7879_v2, %v15156_v11  ;;  %v7893_v35 = vxor.u32 2147483648, %v15351_v16 }
 0x911   : > { %v7933_v45 = vmul.f32 %v15241_v59, %v7910_v24  ;;  %v7882_v32 = vsel %vm15265_vm13, 0, %v7880_v62  ;;  %vm7781_vm4 = vweird.f32 %v14983_v4  ;;  %vm7885_vm5 = vweird.f32 %v14968_v1 }
 0x912   : > { %v7972_v61 = vsel %vm16551_vm8, %v7932_v34, 0.0  ;;  %vm7785_vm7 = vcmp.eq.s32.totalorder %v7783_v3, 0  ;;  %vm7788_vm10 = vcmp.eq.s32.totalorder %v7783_v3, 2  ;;  %v7886_v5 = vadd.s32 3, %v7882_v32 }
 0x913   : > { %7973 = vadd.xlane.f32.xlu0 %v7972_v61  ;;  %v7975_v26 = vsel %vm16552_vm1, %v7933_v45, 0.0  ;;  %vm7784_vm2 = vcmp.lt.s32.totalorder %v7783_v3, 2  ;;  %v7787_v11 = vsel %vm7785_vm7, %v15426_v14, %v7786_v55  ;;  %v7790_v17 = vsel %vm7788_vm10, %v7789_v31, %v15437_v30 }
 0x914   : > { %7976 = vadd.xlane.f32.xlu1 %v7975_v26  ;;  %v7791_v19 = vsel %vm7784_vm2, %v7787_v11, %v7790_v17  ;;  %v7887_v8 = vand.u32 3, %v7886_v5  ;;  %vm8007_vm0 = vcmask 7168  }
 0x915   : > { %v7792_v7 = vsel %vm7781_vm4, nan, %v7791_v19 }
 0x916   : > { %v7911_v29 = vadd.f32 %v7792_v7, %v16553_v6  ;;  %vm7889_vm13 = vcmp.eq.s32.totalorder %v7887_v8, 0  ;;  %vm7892_vm15 = vcmp.eq.s32.totalorder %v7887_v8, 2  ;;  %vm7888_vm6 = vcmp.lt.s32.totalorder %v7887_v8, 2 }
 0x917   : > { %v7891_v9 = vsel %vm7889_vm13, %v15351_v16, %v7890_v27  ;;  %v7894_v43 = vsel %vm7892_vm15, %v7893_v35, %v15379_v58 }
 0x918   : > { %v7934_v14 = vmul.f32 %v15241_v59, %v7911_v29  ;;  %v7895_v30 = vsel %vm7888_vm6, %v7891_v9, %v7894_v43 }
 0x919   : > { %v7896_v25 = vsel %vm7885_vm5, nan, %v7895_v30 }
 0x91a   : > { %v7978_v4 = vsel %vm16554_vm14, %v7934_v14, 0.0  ;;  %v7912_v51 = vadd.f32 %v7896_v25, %v16555_v41 }
 0x91b   : > { %7979 = vadd.xlane.f32.xlu0 %v7978_v4 }
 0x91c   : > { %v7935_v38 = vmul.f32 %v15241_v59, %v7912_v51 }
 0x91e   : > { %v7981_v46 = vsel %vm16556_vm9, %v7935_v38, 0.0 }
 0x91f   : > { %7982 = vadd.xlane.f32.xlu1 %v7981_v46 }
 0x951   : > { %v7941_v1 = vpop.xlane.xlu0 %7940 }
 0x952   : > { %v7992_v16 = vadd.f32 %v8414_v10, %v7941_v1 }
 0x954   : > { %8009 = vst.msk [vmem:[%s15520_s14 + $0x8] sm:$0xff] %vm8007_vm0, %v7992_v16 }
 0x95c   : > { %v7947_v59 = vpop.xlane.xlu1 %7946 }
 0x95d   : > { %v7994_v58 = vadd.f32 %v8414_v10, %v7947_v59 }
 0x95f   : > { %8011 = vst.msk [vmem:[%s15520_s14 + $0x18] sm:$0xff] %vm8007_vm0, %v7994_v58 }
 0x963   : > { %v7938_v50 = vpop.xlane.xlu0 %7937 }
 0x964   : > { %v7991_v12 = vadd.f32 %v8414_v10, %v7938_v50 }
 0x966   : > { %8008 = vst.msk [vmem:[%s15520_s14] sm:$0xff] %vm8007_vm0, %v7991_v12 }
 0x96d   : > { %v7944_v52 = vpop.xlane.xlu1 %7943 }
 0x96e   : > { %v7993_v23 = vadd.f32 %v8414_v10, %v7944_v52 }
 0x96f   : > { %v7950_v60 = vpop.xlane.xlu0 %7949 }
 0x970   : > { %8010 = vst.msk [vmem:[%s15520_s14 + $0x10] sm:$0xff] %vm8007_vm0, %v7993_v23  ;;  %v7995_v33 = vadd.f32 %v8414_v10, %v7950_v60 }
 0x972   : > { %8012 = vst.msk [vmem:[%s15520_s14 + $0x20] sm:$0xff] %vm8007_vm0, %v7995_v33 }
 0x979   : > { %v7953_v53 = vpop.xlane.xlu1 %7952 }
 0x97a   : > { %v7996_v63 = vadd.f32 %v8414_v10, %v7953_v53 }
 0x97c   : > { %8013 = vst.msk [vmem:[%s15520_s14 + $0x28] sm:$0xff] %vm8007_vm0, %v7996_v63  ;;  %v7956_v21 = vpop.xlane.xlu0 %7955 }
 0x97d   : > { %v7997_v48 = vadd.f32 %v8414_v10, %v7956_v21 }
 0x97f   : > { %8014 = vst.msk [vmem:[%s15520_s14 + $0x30] sm:$0xff] %vm8007_vm0, %v7997_v48 }
 0x980   : > { %v7959_v49 = vpop.xlane.xlu1 %7958 }
 0x981   : > { %v7998_v42 = vadd.f32 %v8414_v10, %v7959_v49 }
 0x983   : > { %8015 = vst.msk [vmem:[%s15520_s14 + $0x38] sm:$0xff] %vm8007_vm0, %v7998_v42 }
 0x98a   : > { %v7962_v13 = vpop.xlane.xlu0 %7961 }
 0x98b   : > { %v7999_v0 = vadd.f32 %v8414_v10, %v7962_v13 }
 0x98c   : > { %v7965_v18 = vpop.xlane.xlu1 %7964 }
 0x98d   : > { %8016 = vst.msk [vmem:[%s15520_s14 + $0x40] sm:$0xff] %vm8007_vm0, %v7999_v0  ;;  %v8000_v44 = vadd.f32 %v8414_v10, %v7965_v18 }
 0x98f   : > { %8017 = vst.msk [vmem:[%s15520_s14 + $0x48] sm:$0xff] %vm8007_vm0, %v8000_v44 }
 0x991   : > { %v7968_v40 = vpop.xlane.xlu0 %7967 }
 0x992   : > { %v8001_v39 = vadd.f32 %v8414_v10, %v7968_v40 }
 0x994   : > { %8018 = vst.msk [vmem:[%s15520_s14 + $0x50] sm:$0xff] %vm8007_vm0, %v8001_v39 }
 0x996   : > { %v7971_v47 = vpop.xlane.xlu1 %7970 }
 0x997   : > { %v8002_v37 = vadd.f32 %v8414_v10, %v7971_v47 }
 0x999   : > { %8019 = vst.msk [vmem:[%s15520_s14 + $0x58] sm:$0xff] %vm8007_vm0, %v8002_v37 }
 0x99c   : > { %v7974_v36 = vpop.xlane.xlu0 %7973 }
 0x99d   : > { %v8003_v28 = vadd.f32 %v8414_v10, %v7974_v36  ;;  %v7977_v54 = vpop.xlane.xlu1 %7976 }
 0x99e   : > { %v8004_v56 = vadd.f32 %v8414_v10, %v7977_v54 }
 0x99f   : > { %8020 = vst.msk [vmem:[%s15520_s14 + $0x60] sm:$0xff] %vm8007_vm0, %v8003_v28 }
 0x9a0   : > { %8021 = vst.msk [vmem:[%s15520_s14 + $0x68] sm:$0xff] %vm8007_vm0, %v8004_v56 }
 0x9a4   : > { %v7980_v22 = vpop.xlane.xlu0 %7979 }
 0x9a5   : > { %v8005_v57 = vadd.f32 %v8414_v10, %v7980_v22 }
 0x9a7   : > { %8022 = vst.msk [vmem:[%s15520_s14 + $0x70] sm:$0xff] %vm8007_vm0, %v8005_v57 }
 0x9a8   : > { %v7983_v15 = vpop.xlane.xlu1 %7982 }
 0x9a9   : > { %v8006_v2 = vadd.f32 %v8414_v10, %v7983_v15 }
 0x9ab   : > { %8023 = vst.msk [vmem:[%s15520_s14 + $0x78] sm:$0xff] %vm8007_vm0, %v8006_v2 }
 0x9ac PF: > { %s23_s19 = sadd.s32 1, %s9180_s19  }
 0x9ad   : > { %p20_p4 = scmp.ge.s32.totalorder %s23_s19, 4  }
 0x9af   :  { %22 = sbr.rel (!%p20_p4) target bundleno = 3 (0x3), region = 94 }

</bundles_post_ra>
